<compile_context>
chip_gen: v5e
topology: v5e:2x2
jax: 0.10.0
libtpu: 0.0.40
codegen_flags: <defaults>
</compile_context>

<pallas_src>
import functools

import jax
import jax.numpy as jnp
from jax.experimental import pallas as pl
from jax.experimental.pallas import tpu as pltpu

D, W, D2 = 8, 256, 4
IN_XYZ, IN_DIR = 63, 27
SKIPS = (4,)
BN_EPS = 1e-5
MAX_TB = 256                      # batch tile (multiple of 8; 256 -> 2-TC friendly)
DIR_OFF = 64                      # column offset of dirs inside the packed input
VMEM_LIMIT = 32 * 1024 * 1024

# ---- layout of the coalesced small-f32-parameter table -----------------------
_PW = 384                          # padded lane width (>= W+1, multiple of 128)
_ROW_XYZ0 = 0                      # 8 rows: xyz-encoder biases        (width W)
_ROW_FS = 8                        # fused feature|sigma bias          (width W+1)
_ROW_DIR = 9                       # dir_encoding bias                 (width W//2)
_ROW_RGB = 10                      # rgb bias                          (width 3)
_ROW_BN0 = 11                      # 4 x [linear bias, gamma, beta]    (width W)
_ROW_EFS = 23                      # fused e_feature|e_sigma bias      (width W+1)
_ROW_E1 = 24                       # edge layer-1 bias                 (width W//2)
_ROW_E2 = 25                       # edge layer-2 bias                 (width 1)
_N_SMALL = 32                      # rows, padded to a multiple of 8


def _mm(a, b):
    # bf16 x bf16 -> f32 accumulation on the MXU
    return jnp.dot(a, b, preferred_element_type=jnp.float32)


def _modern_tpu():
    """True on chips with bf16 VALU + MXU slack (v6e / v7x); False on v5e/older."""
    try:
        kind = jax.devices()[0].device_kind.lower()
    except Exception:
        return True
    return not any(t in kind for t in ("v2", "v3", "v4", "v5"))


# ------------------------------- kernels --------------------------------------
def _nerf_full_kernel(n_rows, has_pad, modern, *refs):
    """Full forward for one batch tile -> packed (TB, 8) output."""
    bf16 = jnp.bfloat16
    xin_ref, sp_ref = refs[0], refs[1]
    out_ref = refs[-1]
    w_it = iter(refs[2:-1])
    nw = lambda: next(w_it)[...]

    tb = xin_ref.shape[0]
    xyz = xin_ref[:, 0:IN_XYZ]                       # (TB, 63) bf16
    dirs = xin_ref[:, DIR_OFF:DIR_OFF + IN_DIR]      # (TB, 27) bf16

    def bias(row, width):
        return sp_ref[row:row + 1, :width]           # (1, width) f32

    def relu_lin(z, b):
        # z: f32 matmul accumulation; returns bf16 activations.
        if modern:
            return jnp.maximum(z.astype(bf16) + b.astype(bf16), 0)
        return jnp.maximum(z + b, 0.0).astype(bf16)

    # ---- sigma (xyz) encoder: D layers, skip connection at SKIPS ----
    h = xyz
    for i in range(D):
        b = bias(_ROW_XYZ0 + i, W)
        if i in SKIPS:
            w_x, w_h = nw(), nw()                    # row-split (63+W, W) weight
            z = _mm(xyz, w_x) + _mm(h, w_h)
        else:
            z = _mm(h, nw())
        h = relu_lin(z, b)

    # fused head: cols [0:W] = feature_linear, col [W] = sigma
    fs = _mm(h, nw()) + bias(_ROW_FS, W + 1)         # (TB, W+1) f32
    feat = fs[:, :W].astype(bf16)
    sigma = fs[:, W:W + 1]                           # (TB, 1) f32, no activation

    # dir_encoding on [feat, dir] (concat expressed as two matmuls) + rgb
    w_df, w_dd = nw(), nw()
    de = relu_lin(_mm(feat, w_df) + _mm(dirs, w_dd), bias(_ROW_DIR, W // 2))
    rgb = _mm(de, nw()) + bias(_ROW_RGB, 3)          # (TB, 3) f32

    # ---- edge-density branch: D2 x (Linear + ReLU + BatchNorm1d) ----
    if has_pad:
        row0 = pl.program_id(0) * tb
        ridx = jax.lax.broadcasted_iota(jnp.int32, (tb, 1), 0) + row0
        valid_f = (ridx < n_rows).astype(jnp.float32)            # (TB, 1)
        valid_b = valid_f.astype(bf16)
        cnt = jnp.maximum(jnp.minimum(n_rows - row0, tb), 1).astype(jnp.float32)
        inv_cnt = 1.0 / cnt
    else:
        valid_f = valid_b = None
        inv_cnt = jnp.float32(1.0 / tb)

    ones_row = jnp.ones((1, tb), bf16) if modern else None       # MXU reduction LHS

    e = xyz
    for i in range(D2):
        w = nw()
        b = bias(_ROW_BN0 + 3 * i, W)
        g = bias(_ROW_BN0 + 3 * i + 1, W)
        bt = bias(_ROW_BN0 + 3 * i + 2, W)
        z = _mm(e, w)                                             # (TB, W) f32
        if modern:
            a = jnp.maximum(z.astype(bf16) + b.astype(bf16), 0)   # bf16 ReLU
            am = a * valid_b if has_pad else a
            s1 = _mm(ones_row, am)                                # (1, W) f32 (MXU)
            s2 = _mm(ones_row, am * am)
        else:
            a = jnp.maximum(z + b, 0.0)                           # f32 ReLU
            am = a * valid_f if has_pad else a
            s1 = jnp.sum(am, axis=0, keepdims=True)
            s2 = jnp.sum(am * a, axis=0, keepdims=True)
        mu = s1 * inv_cnt
        var = jnp.maximum(s2 * inv_cnt - mu * mu, 0.0)            # biased batch var
        scale = g * jax.lax.rsqrt(var + BN_EPS)                   # f32 (1, W)
        shift = bt - mu * scale
        if modern:
            e = a * scale.astype(bf16) + shift.astype(bf16)       # bf16 scale/shift
        else:
            e = (a * scale + shift).astype(bf16)

    # fused head: cols [0:W] = e_feature_linear, col [W] = e_sigma (pre-sigmoid)
    efs = _mm(e, nw()) + bias(_ROW_EFS, W + 1)
    e_feat = efs[:, :W].astype(bf16)
    e_density = jax.nn.sigmoid(efs[:, W:W + 1])

    w_ef, w_ed = nw(), nw()
    eh = relu_lin(_mm(e_feat, w_ef) + _mm(dirs, w_ed), bias(_ROW_E1, W // 2))
    edge_gray = jax.nn.sigmoid(_mm(eh, nw()) + bias(_ROW_E2, 1))

    # single lane-packed output: [rgb(0:3) | sigma(3) | edge_gray(4) | e_density(5) | pad]
    out_ref[:, 0:3] = rgb
    out_ref[:, 3:4] = sigma
    out_ref[:, 4:5] = edge_gray
    out_ref[:, 5:6] = e_density
    out_ref[:, 6:8] = jnp.zeros((tb, 2), jnp.float32)


def _nerf_sigma_kernel(modern, *refs):
    """sigma_only path: xyz encoder + sigma head only."""
    bf16 = jnp.bfloat16
    xyz_ref, sp_ref = refs[0], refs[1]
    sigma_ref = refs[-1]
    w_it = iter(refs[2:-1])
    nw = lambda: next(w_it)[...]

    xyz = xyz_ref[...]
    h = xyz
    for i in range(D):
        b = sp_ref[_ROW_XYZ0 + i:_ROW_XYZ0 + i + 1, :W]
        if i in SKIPS:
            w_x, w_h = nw(), nw()
            z = _mm(xyz, w_x) + _mm(h, w_h)
        else:
            z = _mm(h, nw())
        if modern:
            h = jnp.maximum(z.astype(bf16) + b.astype(bf16), 0)
        else:
            h = jnp.maximum(z + b, 0.0).astype(bf16)

    w_sigma = nw()                                   # (W, 1) sigma column
    b_sigma = sp_ref[_ROW_FS:_ROW_FS + 1, W:W + 1]   # (1, 1)
    sigma_ref[...] = _mm(h, w_sigma) + b_sigma


# ------------------------------ parameters ------------------------------------
def init_params(seed=0):
    """Deterministic synthetic parameters in kernel layout.

    Weights are (in, out) bf16.  All tiny f32 params (biases, BN gamma/beta)
    live in one (32, 384) table addressed by the _ROW_* constants.
    """
    key = jax.random.PRNGKey(seed)
    keys = iter(jax.random.split(key, 64))
    bf = lambda a: a.astype(jnp.bfloat16)

    def lin(fan_in, fan_out):
        bound = float((2.0 ** 0.5) * (3.0 / fan_in) ** 0.5)      # kaiming-uniform-ish
        w = jax.random.uniform(next(keys), (fan_in, fan_out), jnp.float32, -bound, bound)
        bb = 1.0 / float(fan_in ** 0.5)
        b = jax.random.uniform(next(keys), (fan_out,), jnp.float32, -bb, bb)
        return w, b

    small = [jnp.zeros((_PW,), jnp.float32) for _ in range(_N_SMALL)]

    def set_row(r, vec):
        small[r] = jnp.zeros((_PW,), jnp.float32).at[:vec.shape[0]].set(vec)

    # xyz (sigma) encoder
    xyz_w = []
    for i in range(D):
        if i == 0:
            w, b = lin(IN_XYZ, W)
            xyz_w.append(bf(w))
        elif i in SKIPS:
            w, b = lin(IN_XYZ + W, W)                 # input order [xyz, h]
            xyz_w += [bf(w[:IN_XYZ]), bf(w[IN_XYZ:])]
        else:
            w, b = lin(W, W)
            xyz_w.append(bf(w))
        set_row(_ROW_XYZ0 + i, b)

    # fused feature_linear | sigma head
    w_f, b_f = lin(W, W)
    w_s, b_s = lin(W, 1)
    fs_w = bf(jnp.concatenate([w_f, w_s], axis=1))    # (W, W+1)
    set_row(_ROW_FS, jnp.concatenate([b_f, b_s]))

    # dir_encoding on [feat, dir]
    w, b = lin(W + IN_DIR, W // 2)
    dir_w = [bf(w[:W]), bf(w[W:])]
    set_row(_ROW_DIR, b)

    w, b = lin(W // 2, 3)                             # rgb
    rgb_w = bf(w)
    set_row(_ROW_RGB, b)

    # edge branch: D2 x (Linear + ReLU + BatchNorm1d)
    ebn_w = []
    for i in range(D2):
        fin = IN_XYZ if i == 0 else W
        w, b = lin(fin, W)
        ebn_w.append(bf(w))
        set_row(_ROW_BN0 + 3 * i, b)                  # linear bias
        set_row(_ROW_BN0 + 3 * i + 1, jnp.ones((W,), jnp.float32))   # BN gamma
        # BN beta row stays zero

    # fused e_feature_linear | e_sigma head
    w_ef, b_ef = lin(W, W)
    w_es, b_es = lin(W, 1)
    efs_w = bf(jnp.concatenate([w_ef, w_es], axis=1))
    set_row(_ROW_EFS, jnp.concatenate([b_ef, b_es]))

    w, b = lin(W + IN_DIR, W // 2)                    # edge layer 1 on [e_feat, dir]
    edge1_w = [bf(w[:W]), bf(w[W:])]
    set_row(_ROW_E1, b)

    w, b = lin(W // 2, 1)                             # edge layer 2 (pre-sigmoid)
    edge2_w = bf(w)
    set_row(_ROW_E2, b)

    return dict(xyz_w=xyz_w, fs_w=fs_w, dir_w=dir_w, rgb_w=rgb_w,
                ebn_w=ebn_w, efs_w=efs_w, edge1_w=edge1_w, edge2_w=edge2_w,
                small=jnp.stack(small, axis=0))


# ------------------------------- wrappers --------------------------------------
def _tiling(batch):
    bp = -(-batch // 8) * 8                 # sublane-align
    if bp <= MAX_TB:
        return bp, bp                       # single tile (BN exact vs full batch)
    bp = -(-batch // MAX_TB) * MAX_TB
    return MAX_TB, bp


def _pad_rows(a, rows):
    pad = rows - a.shape[0]
    if pad == 0:
        return a
    return jnp.concatenate([a, jnp.zeros((pad, a.shape[1]), a.dtype)], axis=0)


def _resident(arr):
    return pl.BlockSpec(arr.shape, lambda i: (0, 0))   # constant index -> VMEM resident


def _run_full(xyz, dirs, params):
    B = xyz.shape[0]
    TB, Bp = _tiling(B)
    modern = _modern_tpu()
    has_pad = Bp != B

    # pack xyz+dirs into a single lane-aligned (Bp, 128) bf16 input
    xin = jnp.zeros((Bp, 128), jnp.bfloat16)
    xin = xin.at[:B, :IN_XYZ].set(xyz.astype(jnp.bfloat16))
    xin = xin.at[:B, DIR_OFF:DIR_OFF + IN_DIR].set(dirs.astype(jnp.bfloat16))

    wlist = (params["xyz_w"] + [params["fs_w"]] + params["dir_w"] + [params["rgb_w"]]
             + params["ebn_w"] + [params["efs_w"]] + params["edge1_w"]
             + [params["edge2_w"]])
    small = params["small"]

    in_specs = [pl.BlockSpec((TB, 128), lambda i: (i, 0)), _resident(small)]
    in_specs += [_resident(w) for w in wlist]

    packed = pl.pallas_call(
        functools.partial(_nerf_full_kernel, B, has_pad, modern),
        grid=(Bp // TB,),
        in_specs=in_specs,
        out_specs=pl.BlockSpec((TB, 8), lambda i: (i, 0)),
        out_shape=jax.ShapeDtypeStruct((Bp, 8), jnp.float32),
        compiler_params=pltpu.CompilerParams(
            dimension_semantics=("parallel",),
            vmem_limit_bytes=VMEM_LIMIT),
    )(xin, small, *wlist)
    return packed[:B]                       # (B, 8): rgb | sigma | edge | edens | pad


def _run_sigma_only(xyz, params):
    B = xyz.shape[0]
    TB, Bp = _tiling(B)
    modern = _modern_tpu()
    xyz_p = _pad_rows(xyz.astype(jnp.bfloat16), Bp)

    wlist = params["xyz_w"] + [params["fs_w"][:, W:W + 1]]   # sigma column only
    small = params["small"]

    in_specs = [pl.BlockSpec((TB, IN_XYZ), lambda i: (i, 0)), _resident(small)]
    in_specs += [_resident(w) for w in wlist]

    sigma = pl.pallas_call(
        functools.partial(_nerf_sigma_kernel, modern),
        grid=(Bp // TB,),
        in_specs=in_specs,
        out_specs=pl.BlockSpec((TB, 1), lambda i: (i, 0)),
        out_shape=jax.ShapeDtypeStruct((Bp, 1), jnp.float32),
        compiler_params=pltpu.CompilerParams(
            dimension_semantics=("parallel",),
            vmem_limit_bytes=VMEM_LIMIT),
    )(xyz_p, small, *wlist)
    return sigma[:B]


def nerf_forward(x, params, out_typ='all', sigma_only=False):
    x = jnp.asarray(x, jnp.float32)
    if sigma_only:
        return _run_sigma_only(x[:, :IN_XYZ], params)

    xyz = x[:, :IN_XYZ]
    dirs = x[:, IN_XYZ:IN_XYZ + IN_DIR]
    out = _run_full(xyz, dirs, params)      # (B, 8) packed

    if out_typ == 'all':
        return out[:, 0:6]                  # [rgb, sigma, edge_gray, e_density]
    elif out_typ == 'edge':
        return jnp.concatenate([out[:, 4:6], out[:, 3:4]], axis=-1)
    else:
        return out[:, 0:4]                  # [rgb, sigma]


if __name__ == "__main__":
    key = jax.random.PRNGKey(0)
    B = 64
    x = jax.random.normal(key, (B, IN_XYZ + IN_DIR), jnp.float32)
    params = init_params(seed=0)

    out_all = nerf_forward(x, params, out_typ='all')
    jax.block_until_ready(out_all)
    assert out_all.shape == (B, 6)
    assert bool(jnp.all(jnp.isfinite(out_all)))

    out_edge = nerf_forward(x, params, out_typ='edge')
    jax.block_until_ready(out_edge)
    assert out_edge.shape == (B, 3)

    out_default = nerf_forward(x, params, out_typ='rgb_sigma')
    jax.block_until_ready(out_default)
    assert out_default.shape == (B, 4)

    out_sigma = nerf_forward(x[:, :IN_XYZ], params, out_typ='all', sigma_only=True)
    jax.block_until_ready(out_sigma)
    assert out_sigma.shape == (B, 1)

    print("KERNEL_OK")
</pallas_src>

<mosaic_0001>
module attributes {stable_mosaic.version = 11 : i64} {
  func.func @_nerf_full_kernel(%arg0: i32, %arg1: memref<64x128xbf16, #tpu.memory_space<vmem>>, %arg2: memref<32x384xf32, #tpu.memory_space<vmem>>, %arg3: memref<63x256xbf16, #tpu.memory_space<vmem>>, %arg4: memref<256x256xbf16, #tpu.memory_space<vmem>>, %arg5: memref<256x256xbf16, #tpu.memory_space<vmem>>, %arg6: memref<256x256xbf16, #tpu.memory_space<vmem>>, %arg7: memref<63x256xbf16, #tpu.memory_space<vmem>>, %arg8: memref<256x256xbf16, #tpu.memory_space<vmem>>, %arg9: memref<256x256xbf16, #tpu.memory_space<vmem>>, %arg10: memref<256x256xbf16, #tpu.memory_space<vmem>>, %arg11: memref<256x256xbf16, #tpu.memory_space<vmem>>, %arg12: memref<256x257xbf16, #tpu.memory_space<vmem>>, %arg13: memref<256x128xbf16, #tpu.memory_space<vmem>>, %arg14: memref<27x128xbf16, #tpu.memory_space<vmem>>, %arg15: memref<128x3xbf16, #tpu.memory_space<vmem>>, %arg16: memref<63x256xbf16, #tpu.memory_space<vmem>>, %arg17: memref<256x256xbf16, #tpu.memory_space<vmem>>, %arg18: memref<256x256xbf16, #tpu.memory_space<vmem>>, %arg19: memref<256x256xbf16, #tpu.memory_space<vmem>>, %arg20: memref<256x257xbf16, #tpu.memory_space<vmem>>, %arg21: memref<256x128xbf16, #tpu.memory_space<vmem>>, %arg22: memref<27x128xbf16, #tpu.memory_space<vmem>>, %arg23: memref<128x1xbf16, #tpu.memory_space<vmem>>, %arg24: memref<64x8xf32, #tpu.memory_space<vmem>>) attributes {dimension_semantics = [#tpu.dimension_semantics<parallel>], iteration_bounds = array<i64: 1>, scalar_prefetch = 0 : i64, scratch_operands = 0 : i64, tpu.core_type = #tpu.core_type<tc>, window_params = [{transform_indices = @transform_0, window_bounds = array<i64: 64, 128>}, {pipeline_mode = #tpu.pipeline_mode<synchronous>, transform_indices = @transform_1, window_bounds = array<i64: 32, 384>}, {pipeline_mode = #tpu.pipeline_mode<synchronous>, transform_indices = @transform_2, window_bounds = array<i64: 63, 256>}, {pipeline_mode = #tpu.pipeline_mode<synchronous>, transform_indices = @transform_3, window_bounds = array<i64: 256, 256>}, {pipeline_mode = #tpu.pipeline_mode<synchronous>, transform_indices = @transform_4, window_bounds = array<i64: 256, 256>}, {pipeline_mode = #tpu.pipeline_mode<synchronous>, transform_indices = @transform_5, window_bounds = array<i64: 256, 256>}, {pipeline_mode = #tpu.pipeline_mode<synchronous>, transform_indices = @transform_6, window_bounds = array<i64: 63, 256>}, {pipeline_mode = #tpu.pipeline_mode<synchronous>, transform_indices = @transform_7, window_bounds = array<i64: 256, 256>}, {pipeline_mode = #tpu.pipeline_mode<synchronous>, transform_indices = @transform_8, window_bounds = array<i64: 256, 256>}, {pipeline_mode = #tpu.pipeline_mode<synchronous>, transform_indices = @transform_9, window_bounds = array<i64: 256, 256>}, {pipeline_mode = #tpu.pipeline_mode<synchronous>, transform_indices = @transform_10, window_bounds = array<i64: 256, 256>}, {pipeline_mode = #tpu.pipeline_mode<synchronous>, transform_indices = @transform_11, window_bounds = array<i64: 256, 257>}, {pipeline_mode = #tpu.pipeline_mode<synchronous>, transform_indices = @transform_12, window_bounds = array<i64: 256, 128>}, {pipeline_mode = #tpu.pipeline_mode<synchronous>, transform_indices = @transform_13, window_bounds = array<i64: 27, 128>}, {pipeline_mode = #tpu.pipeline_mode<synchronous>, transform_indices = @transform_14, window_bounds = array<i64: 128, 3>}, {pipeline_mode = #tpu.pipeline_mode<synchronous>, transform_indices = @transform_15, window_bounds = array<i64: 63, 256>}, {pipeline_mode = #tpu.pipeline_mode<synchronous>, transform_indices = @transform_16, window_bounds = array<i64: 256, 256>}, {pipeline_mode = #tpu.pipeline_mode<synchronous>, transform_indices = @transform_17, window_bounds = array<i64: 256, 256>}, {pipeline_mode = #tpu.pipeline_mode<synchronous>, transform_indices = @transform_18, window_bounds = array<i64: 256, 256>}, {pipeline_mode = #tpu.pipeline_mode<synchronous>, transform_indices = @transform_19, window_bounds = array<i64: 256, 257>}, {pipeline_mode = #tpu.pipeline_mode<synchronous>, transform_indices = @transform_20, window_bounds = array<i64: 256, 128>}, {pipeline_mode = #tpu.pipeline_mode<synchronous>, transform_indices = @transform_21, window_bounds = array<i64: 27, 128>}, {pipeline_mode = #tpu.pipeline_mode<synchronous>, transform_indices = @transform_22, window_bounds = array<i64: 128, 1>}, {transform_indices = @transform_23, window_bounds = array<i64: 64, 8>}]} {
    %c0 = arith.constant 0 : index
    %c0_0 = arith.constant 0 : index
    %0 = vector.load %arg1[%c0, %c0_0] : memref<64x128xbf16, #tpu.memory_space<vmem>>, vector<64x63xbf16>
    %c0_1 = arith.constant 0 : index
    %c64 = arith.constant 64 : index
    %1 = vector.load %arg1[%c0_1, %c64] : memref<64x128xbf16, #tpu.memory_space<vmem>>, vector<64x27xbf16>
    %c0_2 = arith.constant 0 : index
    %c0_3 = arith.constant 0 : index
    %2 = vector.load %arg2[%c0_2, %c0_3] : memref<32x384xf32, #tpu.memory_space<vmem>>, vector<1x256xf32>
    %c0_4 = arith.constant 0 : index
    %c0_5 = arith.constant 0 : index
    %3 = vector.load %arg3[%c0_4, %c0_5] : memref<63x256xbf16, #tpu.memory_space<vmem>>, vector<63x256xbf16>
    %cst = arith.constant dense<0.000000e+00> : vector<64x256xf32>
    %4 = tpu.matmul %0, %3, %cst {dimension_numbers = #tpu.dot_dimension_numbers<[1], [0], [0], [1], [0, 0, 1, 1], [], []>} : vector<64x63xbf16>, vector<63x256xbf16>, vector<64x256xf32> -> vector<64x256xf32>
    %5 = arith.truncf %4 : vector<64x256xf32> to vector<64x256xbf16>
    %6 = arith.truncf %2 : vector<1x256xf32> to vector<1x256xbf16>
    %7 = vector.broadcast %6 : vector<1x256xbf16> to vector<64x256xbf16>
    %8 = arith.addf %5, %7 : vector<64x256xbf16>
    %cst_6 = arith.constant 0.000000e+00 : bf16
    %9 = vector.broadcast %cst_6 : bf16 to vector<64x256xbf16>
    %10 = arith.maximumf %8, %9 : vector<64x256xbf16>
    %c1 = arith.constant 1 : index
    %c0_7 = arith.constant 0 : index
    %11 = vector.load %arg2[%c1, %c0_7] : memref<32x384xf32, #tpu.memory_space<vmem>>, vector<1x256xf32>
    %c0_8 = arith.constant 0 : index
    %c0_9 = arith.constant 0 : index
    %12 = vector.load %arg4[%c0_8, %c0_9] : memref<256x256xbf16, #tpu.memory_space<vmem>>, vector<256x256xbf16>
    %cst_10 = arith.constant dense<0.000000e+00> : vector<64x256xf32>
    %13 = tpu.matmul %10, %12, %cst_10 {dimension_numbers = #tpu.dot_dimension_numbers<[1], [0], [0], [1], [0, 0, 1, 1], [], []>} : vector<64x256xbf16>, vector<256x256xbf16>, vector<64x256xf32> -> vector<64x256xf32>
    %14 = arith.truncf %13 : vector<64x256xf32> to vector<64x256xbf16>
    %15 = arith.truncf %11 : vector<1x256xf32> to vector<1x256xbf16>
    %16 = vector.broadcast %15 : vector<1x256xbf16> to vector<64x256xbf16>
    %17 = arith.addf %14, %16 : vector<64x256xbf16>
    %cst_11 = arith.constant 0.000000e+00 : bf16
    %18 = vector.broadcast %cst_11 : bf16 to vector<64x256xbf16>
    %19 = arith.maximumf %17, %18 : vector<64x256xbf16>
    %c2 = arith.constant 2 : index
    %c0_12 = arith.constant 0 : index
    %20 = vector.load %arg2[%c2, %c0_12] : memref<32x384xf32, #tpu.memory_space<vmem>>, vector<1x256xf32>
    %c0_13 = arith.constant 0 : index
    %c0_14 = arith.constant 0 : index
    %21 = vector.load %arg5[%c0_13, %c0_14] : memref<256x256xbf16, #tpu.memory_space<vmem>>, vector<256x256xbf16>
    %cst_15 = arith.constant dense<0.000000e+00> : vector<64x256xf32>
    %22 = tpu.matmul %19, %21, %cst_15 {dimension_numbers = #tpu.dot_dimension_numbers<[1], [0], [0], [1], [0, 0, 1, 1], [], []>} : vector<64x256xbf16>, vector<256x256xbf16>, vector<64x256xf32> -> vector<64x256xf32>
    %23 = arith.truncf %22 : vector<64x256xf32> to vector<64x256xbf16>
    %24 = arith.truncf %20 : vector<1x256xf32> to vector<1x256xbf16>
    %25 = vector.broadcast %24 : vector<1x256xbf16> to vector<64x256xbf16>
    %26 = arith.addf %23, %25 : vector<64x256xbf16>
    %cst_16 = arith.constant 0.000000e+00 : bf16
    %27 = vector.broadcast %cst_16 : bf16 to vector<64x256xbf16>
    %28 = arith.maximumf %26, %27 : vector<64x256xbf16>
    %c3 = arith.constant 3 : index
    %c0_17 = arith.constant 0 : index
    %29 = vector.load %arg2[%c3, %c0_17] : memref<32x384xf32, #tpu.memory_space<vmem>>, vector<1x256xf32>
    %c0_18 = arith.constant 0 : index
    %c0_19 = arith.constant 0 : index
    %30 = vector.load %arg6[%c0_18, %c0_19] : memref<256x256xbf16, #tpu.memory_space<vmem>>, vector<256x256xbf16>
    %cst_20 = arith.constant dense<0.000000e+00> : vector<64x256xf32>
    %31 = tpu.matmul %28, %30, %cst_20 {dimension_numbers = #tpu.dot_dimension_numbers<[1], [0], [0], [1], [0, 0, 1, 1], [], []>} : vector<64x256xbf16>, vector<256x256xbf16>, vector<64x256xf32> -> vector<64x256xf32>
    %32 = arith.truncf %31 : vector<64x256xf32> to vector<64x256xbf16>
    %33 = arith.truncf %29 : vector<1x256xf32> to vector<1x256xbf16>
    %34 = vector.broadcast %33 : vector<1x256xbf16> to vector<64x256xbf16>
    %35 = arith.addf %32, %34 : vector<64x256xbf16>
    %cst_21 = arith.constant 0.000000e+00 : bf16
    %36 = vector.broadcast %cst_21 : bf16 to vector<64x256xbf16>
    %37 = arith.maximumf %35, %36 : vector<64x256xbf16>
    %c4 = arith.constant 4 : index
    %c0_22 = arith.constant 0 : index
    %38 = vector.load %arg2[%c4, %c0_22] : memref<32x384xf32, #tpu.memory_space<vmem>>, vector<1x256xf32>
    %c0_23 = arith.constant 0 : index
    %c0_24 = arith.constant 0 : index
    %39 = vector.load %arg7[%c0_23, %c0_24] : memref<63x256xbf16, #tpu.memory_space<vmem>>, vector<63x256xbf16>
    %c0_25 = arith.constant 0 : index
    %c0_26 = arith.constant 0 : index
    %40 = vector.load %arg8[%c0_25, %c0_26] : memref<256x256xbf16, #tpu.memory_space<vmem>>, vector<256x256xbf16>
    %cst_27 = arith.constant dense<0.000000e+00> : vector<64x256xf32>
    %41 = tpu.matmul %0, %39, %cst_27 {dimension_numbers = #tpu.dot_dimension_numbers<[1], [0], [0], [1], [0, 0, 1, 1], [], []>} : vector<64x63xbf16>, vector<63x256xbf16>, vector<64x256xf32> -> vector<64x256xf32>
    %cst_28 = arith.constant dense<0.000000e+00> : vector<64x256xf32>
    %42 = tpu.matmul %37, %40, %cst_28 {dimension_numbers = #tpu.dot_dimension_numbers<[1], [0], [0], [1], [0, 0, 1, 1], [], []>} : vector<64x256xbf16>, vector<256x256xbf16>, vector<64x256xf32> -> vector<64x256xf32>
    %43 = arith.addf %41, %42 : vector<64x256xf32>
    %44 = arith.truncf %43 : vector<64x256xf32> to vector<64x256xbf16>
    %45 = arith.truncf %38 : vector<1x256xf32> to vector<1x256xbf16>
    %46 = vector.broadcast %45 : vector<1x256xbf16> to vector<64x256xbf16>
    %47 = arith.addf %44, %46 : vector<64x256xbf16>
    %cst_29 = arith.constant 0.000000e+00 : bf16
    %48 = vector.broadcast %cst_29 : bf16 to vector<64x256xbf16>
    %49 = arith.maximumf %47, %48 : vector<64x256xbf16>
    %c5 = arith.constant 5 : index
    %c0_30 = arith.constant 0 : index
    %50 = vector.load %arg2[%c5, %c0_30] : memref<32x384xf32, #tpu.memory_space<vmem>>, vector<1x256xf32>
    %c0_31 = arith.constant 0 : index
    %c0_32 = arith.constant 0 : index
    %51 = vector.load %arg9[%c0_31, %c0_32] : memref<256x256xbf16, #tpu.memory_space<vmem>>, vector<256x256xbf16>
    %cst_33 = arith.constant dense<0.000000e+00> : vector<64x256xf32>
    %52 = tpu.matmul %49, %51, %cst_33 {dimension_numbers = #tpu.dot_dimension_numbers<[1], [0], [0], [1], [0, 0, 1, 1], [], []>} : vector<64x256xbf16>, vector<256x256xbf16>, vector<64x256xf32> -> vector<64x256xf32>
    %53 = arith.truncf %52 : vector<64x256xf32> to vector<64x256xbf16>
    %54 = arith.truncf %50 : vector<1x256xf32> to vector<1x256xbf16>
    %55 = vector.broadcast %54 : vector<1x256xbf16> to vector<64x256xbf16>
    %56 = arith.addf %53, %55 : vector<64x256xbf16>
    %cst_34 = arith.constant 0.000000e+00 : bf16
    %57 = vector.broadcast %cst_34 : bf16 to vector<64x256xbf16>
    %58 = arith.maximumf %56, %57 : vector<64x256xbf16>
    %c6 = arith.constant 6 : index
    %c0_35 = arith.constant 0 : index
    %59 = vector.load %arg2[%c6, %c0_35] : memref<32x384xf32, #tpu.memory_space<vmem>>, vector<1x256xf32>
    %c0_36 = arith.constant 0 : index
    %c0_37 = arith.constant 0 : index
    %60 = vector.load %arg10[%c0_36, %c0_37] : memref<256x256xbf16, #tpu.memory_space<vmem>>, vector<256x256xbf16>
    %cst_38 = arith.constant dense<0.000000e+00> : vector<64x256xf32>
    %61 = tpu.matmul %58, %60, %cst_38 {dimension_numbers = #tpu.dot_dimension_numbers<[1], [0], [0], [1], [0, 0, 1, 1], [], []>} : vector<64x256xbf16>, vector<256x256xbf16>, vector<64x256xf32> -> vector<64x256xf32>
    %62 = arith.truncf %61 : vector<64x256xf32> to vector<64x256xbf16>
    %63 = arith.truncf %59 : vector<1x256xf32> to vector<1x256xbf16>
    %64 = vector.broadcast %63 : vector<1x256xbf16> to vector<64x256xbf16>
    %65 = arith.addf %62, %64 : vector<64x256xbf16>
    %cst_39 = arith.constant 0.000000e+00 : bf16
    %66 = vector.broadcast %cst_39 : bf16 to vector<64x256xbf16>
    %67 = arith.maximumf %65, %66 : vector<64x256xbf16>
    %c7 = arith.constant 7 : index
    %c0_40 = arith.constant 0 : index
    %68 = vector.load %arg2[%c7, %c0_40] : memref<32x384xf32, #tpu.memory_space<vmem>>, vector<1x256xf32>
    %c0_41 = arith.constant 0 : index
    %c0_42 = arith.constant 0 : index
    %69 = vector.load %arg11[%c0_41, %c0_42] : memref<256x256xbf16, #tpu.memory_space<vmem>>, vector<256x256xbf16>
    %cst_43 = arith.constant dense<0.000000e+00> : vector<64x256xf32>
    %70 = tpu.matmul %67, %69, %cst_43 {dimension_numbers = #tpu.dot_dimension_numbers<[1], [0], [0], [1], [0, 0, 1, 1], [], []>} : vector<64x256xbf16>, vector<256x256xbf16>, vector<64x256xf32> -> vector<64x256xf32>
    %71 = arith.truncf %70 : vector<64x256xf32> to vector<64x256xbf16>
    %72 = arith.truncf %68 : vector<1x256xf32> to vector<1x256xbf16>
    %73 = vector.broadcast %72 : vector<1x256xbf16> to vector<64x256xbf16>
    %74 = arith.addf %71, %73 : vector<64x256xbf16>
    %cst_44 = arith.constant 0.000000e+00 : bf16
    %75 = vector.broadcast %cst_44 : bf16 to vector<64x256xbf16>
    %76 = arith.maximumf %74, %75 : vector<64x256xbf16>
    %c0_45 = arith.constant 0 : index
    %c0_46 = arith.constant 0 : index
    %77 = vector.load %arg12[%c0_45, %c0_46] : memref<256x257xbf16, #tpu.memory_space<vmem>>, vector<256x257xbf16>
    %cst_47 = arith.constant dense<0.000000e+00> : vector<64x257xf32>
    %78 = tpu.matmul %76, %77, %cst_47 {dimension_numbers = #tpu.dot_dimension_numbers<[1], [0], [0], [1], [0, 0, 1, 1], [], []>} : vector<64x256xbf16>, vector<256x257xbf16>, vector<64x257xf32> -> vector<64x257xf32>
    %c8 = arith.constant 8 : index
    %c0_48 = arith.constant 0 : index
    %79 = vector.load %arg2[%c8, %c0_48] : memref<32x384xf32, #tpu.memory_space<vmem>>, vector<1x257xf32>
    %80 = vector.broadcast %79 : vector<1x257xf32> to vector<64x257xf32>
    %81 = arith.addf %78, %80 : vector<64x257xf32>
    %82 = vector.extract_strided_slice %81 {offsets = [0, 0], sizes = [64, 256], strides = [1, 1]} : vector<64x257xf32> to vector<64x256xf32>
    %83 = arith.truncf %82 : vector<64x256xf32> to vector<64x256xbf16>
    %84 = vector.extract_strided_slice %81 {offsets = [0, 256], sizes = [64, 1], strides = [1, 1]} : vector<64x257xf32> to vector<64x1xf32>
    %c0_49 = arith.constant 0 : index
    %c0_50 = arith.constant 0 : index
    %85 = vector.load %arg13[%c0_49, %c0_50] : memref<256x128xbf16, #tpu.memory_space<vmem>>, vector<256x128xbf16>
    %c0_51 = arith.constant 0 : index
    %c0_52 = arith.constant 0 : index
    %86 = vector.load %arg14[%c0_51, %c0_52] : memref<27x128xbf16, #tpu.memory_space<vmem>>, vector<27x128xbf16>
    %cst_53 = arith.constant dense<0.000000e+00> : vector<64x128xf32>
    %87 = tpu.matmul %83, %85, %cst_53 {dimension_numbers = #tpu.dot_dimension_numbers<[1], [0], [0], [1], [0, 0, 1, 1], [], []>} : vector<64x256xbf16>, vector<256x128xbf16>, vector<64x128xf32> -> vector<64x128xf32>
    %cst_54 = arith.constant dense<0.000000e+00> : vector<64x128xf32>
    %88 = tpu.matmul %1, %86, %cst_54 {dimension_numbers = #tpu.dot_dimension_numbers<[1], [0], [0], [1], [0, 0, 1, 1], [], []>} : vector<64x27xbf16>, vector<27x128xbf16>, vector<64x128xf32> -> vector<64x128xf32>
    %89 = arith.addf %87, %88 : vector<64x128xf32>
    %c9 = arith.constant 9 : index
    %c0_55 = arith.constant 0 : index
    %90 = vector.load %arg2[%c9, %c0_55] : memref<32x384xf32, #tpu.memory_space<vmem>>, vector<1x128xf32>
    %91 = arith.truncf %89 : vector<64x128xf32> to vector<64x128xbf16>
    %92 = arith.truncf %90 : vector<1x128xf32> to vector<1x128xbf16>
    %93 = vector.broadcast %92 : vector<1x128xbf16> to vector<64x128xbf16>
    %94 = arith.addf %91, %93 : vector<64x128xbf16>
    %cst_56 = arith.constant 0.000000e+00 : bf16
    %95 = vector.broadcast %cst_56 : bf16 to vector<64x128xbf16>
    %96 = arith.maximumf %94, %95 : vector<64x128xbf16>
    %c0_57 = arith.constant 0 : index
    %c0_58 = arith.constant 0 : index
    %97 = vector.load %arg15[%c0_57, %c0_58] : memref<128x3xbf16, #tpu.memory_space<vmem>>, vector<128x3xbf16>
    %cst_59 = arith.constant dense<0.000000e+00> : vector<64x3xf32>
    %98 = tpu.matmul %96, %97, %cst_59 {dimension_numbers = #tpu.dot_dimension_numbers<[1], [0], [0], [1], [0, 0, 1, 1], [], []>} : vector<64x128xbf16>, vector<128x3xbf16>, vector<64x3xf32> -> vector<64x3xf32>
    %c10 = arith.constant 10 : index
    %c0_60 = arith.constant 0 : index
    %99 = vector.load %arg2[%c10, %c0_60] : memref<32x384xf32, #tpu.memory_space<vmem>>, vector<1x3xf32>
    %100 = vector.broadcast %99 : vector<1x3xf32> to vector<64x3xf32>
    %101 = arith.addf %98, %100 : vector<64x3xf32>
    %cst_61 = arith.constant 1.000000e+00 : bf16
    %102 = vector.broadcast %cst_61 : bf16 to vector<1x64xbf16>
    %c0_62 = arith.constant 0 : index
    %c0_63 = arith.constant 0 : index
    %103 = vector.load %arg16[%c0_62, %c0_63] : memref<63x256xbf16, #tpu.memory_space<vmem>>, vector<63x256xbf16>
    %c11 = arith.constant 11 : index
    %c0_64 = arith.constant 0 : index
    %104 = vector.load %arg2[%c11, %c0_64] : memref<32x384xf32, #tpu.memory_space<vmem>>, vector<1x256xf32>
    %c12 = arith.constant 12 : index
    %c0_65 = arith.constant 0 : index
    %105 = vector.load %arg2[%c12, %c0_65] : memref<32x384xf32, #tpu.memory_space<vmem>>, vector<1x256xf32>
    %c13 = arith.constant 13 : index
    %c0_66 = arith.constant 0 : index
    %106 = vector.load %arg2[%c13, %c0_66] : memref<32x384xf32, #tpu.memory_space<vmem>>, vector<1x256xf32>
    %cst_67 = arith.constant dense<0.000000e+00> : vector<64x256xf32>
    %107 = tpu.matmul %0, %103, %cst_67 {dimension_numbers = #tpu.dot_dimension_numbers<[1], [0], [0], [1], [0, 0, 1, 1], [], []>} : vector<64x63xbf16>, vector<63x256xbf16>, vector<64x256xf32> -> vector<64x256xf32>
    %108 = arith.truncf %107 : vector<64x256xf32> to vector<64x256xbf16>
    %109 = arith.truncf %104 : vector<1x256xf32> to vector<1x256xbf16>
    %110 = vector.broadcast %109 : vector<1x256xbf16> to vector<64x256xbf16>
    %111 = arith.addf %108, %110 : vector<64x256xbf16>
    %cst_68 = arith.constant 0.000000e+00 : bf16
    %112 = vector.broadcast %cst_68 : bf16 to vector<64x256xbf16>
    %113 = arith.maximumf %111, %112 : vector<64x256xbf16>
    %cst_69 = arith.constant dense<0.000000e+00> : vector<1x256xf32>
    %114 = tpu.matmul %102, %113, %cst_69 {dimension_numbers = #tpu.dot_dimension_numbers<[1], [0], [0], [1], [0, 0, 1, 1], [], []>} : vector<1x64xbf16>, vector<64x256xbf16>, vector<1x256xf32> -> vector<1x256xf32>
    %115 = arith.mulf %113, %113 : vector<64x256xbf16>
    %cst_70 = arith.constant dense<0.000000e+00> : vector<1x256xf32>
    %116 = tpu.matmul %102, %115, %cst_70 {dimension_numbers = #tpu.dot_dimension_numbers<[1], [0], [0], [1], [0, 0, 1, 1], [], []>} : vector<1x64xbf16>, vector<64x256xbf16>, vector<1x256xf32> -> vector<1x256xf32>
    %cst_71 = arith.constant 1.562500e-02 : f32
    %117 = vector.broadcast %cst_71 : f32 to vector<1x256xf32>
    %118 = arith.mulf %114, %117 : vector<1x256xf32>
    %cst_72 = arith.constant 1.562500e-02 : f32
    %119 = vector.broadcast %cst_72 : f32 to vector<1x256xf32>
    %120 = arith.mulf %116, %119 : vector<1x256xf32>
    %121 = arith.mulf %118, %118 : vector<1x256xf32>
    %122 = arith.subf %120, %121 : vector<1x256xf32>
    %cst_73 = arith.constant 0.000000e+00 : f32
    %123 = vector.broadcast %cst_73 : f32 to vector<1x256xf32>
    %124 = arith.maximumf %122, %123 : vector<1x256xf32>
    %cst_74 = arith.constant 9.99999974E-6 : f32
    %125 = vector.broadcast %cst_74 : f32 to vector<1x256xf32>
    %126 = arith.addf %124, %125 : vector<1x256xf32>
    %127 = math.rsqrt %126 : vector<1x256xf32>
    %128 = arith.mulf %105, %127 : vector<1x256xf32>
    %129 = arith.mulf %118, %128 : vector<1x256xf32>
    %130 = arith.subf %106, %129 : vector<1x256xf32>
    %131 = arith.truncf %128 : vector<1x256xf32> to vector<1x256xbf16>
    %132 = vector.broadcast %131 : vector<1x256xbf16> to vector<64x256xbf16>
    %133 = arith.mulf %113, %132 : vector<64x256xbf16>
    %134 = arith.truncf %130 : vector<1x256xf32> to vector<1x256xbf16>
    %135 = vector.broadcast %134 : vector<1x256xbf16> to vector<64x256xbf16>
    %136 = arith.addf %133, %135 : vector<64x256xbf16>
    %c0_75 = arith.constant 0 : index
    %c0_76 = arith.constant 0 : index
    %137 = vector.load %arg17[%c0_75, %c0_76] : memref<256x256xbf16, #tpu.memory_space<vmem>>, vector<256x256xbf16>
    %c14 = arith.constant 14 : index
    %c0_77 = arith.constant 0 : index
    %138 = vector.load %arg2[%c14, %c0_77] : memref<32x384xf32, #tpu.memory_space<vmem>>, vector<1x256xf32>
    %c15 = arith.constant 15 : index
    %c0_78 = arith.constant 0 : index
    %139 = vector.load %arg2[%c15, %c0_78] : memref<32x384xf32, #tpu.memory_space<vmem>>, vector<1x256xf32>
    %c16 = arith.constant 16 : index
    %c0_79 = arith.constant 0 : index
    %140 = vector.load %arg2[%c16, %c0_79] : memref<32x384xf32, #tpu.memory_space<vmem>>, vector<1x256xf32>
    %cst_80 = arith.constant dense<0.000000e+00> : vector<64x256xf32>
    %141 = tpu.matmul %136, %137, %cst_80 {dimension_numbers = #tpu.dot_dimension_numbers<[1], [0], [0], [1], [0, 0, 1, 1], [], []>} : vector<64x256xbf16>, vector<256x256xbf16>, vector<64x256xf32> -> vector<64x256xf32>
    %142 = arith.truncf %141 : vector<64x256xf32> to vector<64x256xbf16>
    %143 = arith.truncf %138 : vector<1x256xf32> to vector<1x256xbf16>
    %144 = vector.broadcast %143 : vector<1x256xbf16> to vector<64x256xbf16>
    %145 = arith.addf %142, %144 : vector<64x256xbf16>
    %cst_81 = arith.constant 0.000000e+00 : bf16
    %146 = vector.broadcast %cst_81 : bf16 to vector<64x256xbf16>
    %147 = arith.maximumf %145, %146 : vector<64x256xbf16>
    %cst_82 = arith.constant dense<0.000000e+00> : vector<1x256xf32>
    %148 = tpu.matmul %102, %147, %cst_82 {dimension_numbers = #tpu.dot_dimension_numbers<[1], [0], [0], [1], [0, 0, 1, 1], [], []>} : vector<1x64xbf16>, vector<64x256xbf16>, vector<1x256xf32> -> vector<1x256xf32>
    %149 = arith.mulf %147, %147 : vector<64x256xbf16>
    %cst_83 = arith.constant dense<0.000000e+00> : vector<1x256xf32>
    %150 = tpu.matmul %102, %149, %cst_83 {dimension_numbers = #tpu.dot_dimension_numbers<[1], [0], [0], [1], [0, 0, 1, 1], [], []>} : vector<1x64xbf16>, vector<64x256xbf16>, vector<1x256xf32> -> vector<1x256xf32>
    %cst_84 = arith.constant 1.562500e-02 : f32
    %151 = vector.broadcast %cst_84 : f32 to vector<1x256xf32>
    %152 = arith.mulf %148, %151 : vector<1x256xf32>
    %cst_85 = arith.constant 1.562500e-02 : f32
    %153 = vector.broadcast %cst_85 : f32 to vector<1x256xf32>
    %154 = arith.mulf %150, %153 : vector<1x256xf32>
    %155 = arith.mulf %152, %152 : vector<1x256xf32>
    %156 = arith.subf %154, %155 : vector<1x256xf32>
    %cst_86 = arith.constant 0.000000e+00 : f32
    %157 = vector.broadcast %cst_86 : f32 to vector<1x256xf32>
    %158 = arith.maximumf %156, %157 : vector<1x256xf32>
    %cst_87 = arith.constant 9.99999974E-6 : f32
    %159 = vector.broadcast %cst_87 : f32 to vector<1x256xf32>
    %160 = arith.addf %158, %159 : vector<1x256xf32>
    %161 = math.rsqrt %160 : vector<1x256xf32>
    %162 = arith.mulf %139, %161 : vector<1x256xf32>
    %163 = arith.mulf %152, %162 : vector<1x256xf32>
    %164 = arith.subf %140, %163 : vector<1x256xf32>
    %165 = arith.truncf %162 : vector<1x256xf32> to vector<1x256xbf16>
    %166 = vector.broadcast %165 : vector<1x256xbf16> to vector<64x256xbf16>
    %167 = arith.mulf %147, %166 : vector<64x256xbf16>
    %168 = arith.truncf %164 : vector<1x256xf32> to vector<1x256xbf16>
    %169 = vector.broadcast %168 : vector<1x256xbf16> to vector<64x256xbf16>
    %170 = arith.addf %167, %169 : vector<64x256xbf16>
    %c0_88 = arith.constant 0 : index
    %c0_89 = arith.constant 0 : index
    %171 = vector.load %arg18[%c0_88, %c0_89] : memref<256x256xbf16, #tpu.memory_space<vmem>>, vector<256x256xbf16>
    %c17 = arith.constant 17 : index
    %c0_90 = arith.constant 0 : index
    %172 = vector.load %arg2[%c17, %c0_90] : memref<32x384xf32, #tpu.memory_space<vmem>>, vector<1x256xf32>
    %c18 = arith.constant 18 : index
    %c0_91 = arith.constant 0 : index
    %173 = vector.load %arg2[%c18, %c0_91] : memref<32x384xf32, #tpu.memory_space<vmem>>, vector<1x256xf32>
    %c19 = arith.constant 19 : index
    %c0_92 = arith.constant 0 : index
    %174 = vector.load %arg2[%c19, %c0_92] : memref<32x384xf32, #tpu.memory_space<vmem>>, vector<1x256xf32>
    %cst_93 = arith.constant dense<0.000000e+00> : vector<64x256xf32>
    %175 = tpu.matmul %170, %171, %cst_93 {dimension_numbers = #tpu.dot_dimension_numbers<[1], [0], [0], [1], [0, 0, 1, 1], [], []>} : vector<64x256xbf16>, vector<256x256xbf16>, vector<64x256xf32> -> vector<64x256xf32>
    %176 = arith.truncf %175 : vector<64x256xf32> to vector<64x256xbf16>
    %177 = arith.truncf %172 : vector<1x256xf32> to vector<1x256xbf16>
    %178 = vector.broadcast %177 : vector<1x256xbf16> to vector<64x256xbf16>
    %179 = arith.addf %176, %178 : vector<64x256xbf16>
    %cst_94 = arith.constant 0.000000e+00 : bf16
    %180 = vector.broadcast %cst_94 : bf16 to vector<64x256xbf16>
    %181 = arith.maximumf %179, %180 : vector<64x256xbf16>
    %cst_95 = arith.constant dense<0.000000e+00> : vector<1x256xf32>
    %182 = tpu.matmul %102, %181, %cst_95 {dimension_numbers = #tpu.dot_dimension_numbers<[1], [0], [0], [1], [0, 0, 1, 1], [], []>} : vector<1x64xbf16>, vector<64x256xbf16>, vector<1x256xf32> -> vector<1x256xf32>
    %183 = arith.mulf %181, %181 : vector<64x256xbf16>
    %cst_96 = arith.constant dense<0.000000e+00> : vector<1x256xf32>
    %184 = tpu.matmul %102, %183, %cst_96 {dimension_numbers = #tpu.dot_dimension_numbers<[1], [0], [0], [1], [0, 0, 1, 1], [], []>} : vector<1x64xbf16>, vector<64x256xbf16>, vector<1x256xf32> -> vector<1x256xf32>
    %cst_97 = arith.constant 1.562500e-02 : f32
    %185 = vector.broadcast %cst_97 : f32 to vector<1x256xf32>
    %186 = arith.mulf %182, %185 : vector<1x256xf32>
    %cst_98 = arith.constant 1.562500e-02 : f32
    %187 = vector.broadcast %cst_98 : f32 to vector<1x256xf32>
    %188 = arith.mulf %184, %187 : vector<1x256xf32>
    %189 = arith.mulf %186, %186 : vector<1x256xf32>
    %190 = arith.subf %188, %189 : vector<1x256xf32>
    %cst_99 = arith.constant 0.000000e+00 : f32
    %191 = vector.broadcast %cst_99 : f32 to vector<1x256xf32>
    %192 = arith.maximumf %190, %191 : vector<1x256xf32>
    %cst_100 = arith.constant 9.99999974E-6 : f32
    %193 = vector.broadcast %cst_100 : f32 to vector<1x256xf32>
    %194 = arith.addf %192, %193 : vector<1x256xf32>
    %195 = math.rsqrt %194 : vector<1x256xf32>
    %196 = arith.mulf %173, %195 : vector<1x256xf32>
    %197 = arith.mulf %186, %196 : vector<1x256xf32>
    %198 = arith.subf %174, %197 : vector<1x256xf32>
    %199 = arith.truncf %196 : vector<1x256xf32> to vector<1x256xbf16>
    %200 = vector.broadcast %199 : vector<1x256xbf16> to vector<64x256xbf16>
    %201 = arith.mulf %181, %200 : vector<64x256xbf16>
    %202 = arith.truncf %198 : vector<1x256xf32> to vector<1x256xbf16>
    %203 = vector.broadcast %202 : vector<1x256xbf16> to vector<64x256xbf16>
    %204 = arith.addf %201, %203 : vector<64x256xbf16>
    %c0_101 = arith.constant 0 : index
    %c0_102 = arith.constant 0 : index
    %205 = vector.load %arg19[%c0_101, %c0_102] : memref<256x256xbf16, #tpu.memory_space<vmem>>, vector<256x256xbf16>
    %c20 = arith.constant 20 : index
    %c0_103 = arith.constant 0 : index
    %206 = vector.load %arg2[%c20, %c0_103] : memref<32x384xf32, #tpu.memory_space<vmem>>, vector<1x256xf32>
    %c21 = arith.constant 21 : index
    %c0_104 = arith.constant 0 : index
    %207 = vector.load %arg2[%c21, %c0_104] : memref<32x384xf32, #tpu.memory_space<vmem>>, vector<1x256xf32>
    %c22 = arith.constant 22 : index
    %c0_105 = arith.constant 0 : index
    %208 = vector.load %arg2[%c22, %c0_105] : memref<32x384xf32, #tpu.memory_space<vmem>>, vector<1x256xf32>
    %cst_106 = arith.constant dense<0.000000e+00> : vector<64x256xf32>
    %209 = tpu.matmul %204, %205, %cst_106 {dimension_numbers = #tpu.dot_dimension_numbers<[1], [0], [0], [1], [0, 0, 1, 1], [], []>} : vector<64x256xbf16>, vector<256x256xbf16>, vector<64x256xf32> -> vector<64x256xf32>
    %210 = arith.truncf %209 : vector<64x256xf32> to vector<64x256xbf16>
    %211 = arith.truncf %206 : vector<1x256xf32> to vector<1x256xbf16>
    %212 = vector.broadcast %211 : vector<1x256xbf16> to vector<64x256xbf16>
    %213 = arith.addf %210, %212 : vector<64x256xbf16>
    %cst_107 = arith.constant 0.000000e+00 : bf16
    %214 = vector.broadcast %cst_107 : bf16 to vector<64x256xbf16>
    %215 = arith.maximumf %213, %214 : vector<64x256xbf16>
    %cst_108 = arith.constant dense<0.000000e+00> : vector<1x256xf32>
    %216 = tpu.matmul %102, %215, %cst_108 {dimension_numbers = #tpu.dot_dimension_numbers<[1], [0], [0], [1], [0, 0, 1, 1], [], []>} : vector<1x64xbf16>, vector<64x256xbf16>, vector<1x256xf32> -> vector<1x256xf32>
    %217 = arith.mulf %215, %215 : vector<64x256xbf16>
    %cst_109 = arith.constant dense<0.000000e+00> : vector<1x256xf32>
    %218 = tpu.matmul %102, %217, %cst_109 {dimension_numbers = #tpu.dot_dimension_numbers<[1], [0], [0], [1], [0, 0, 1, 1], [], []>} : vector<1x64xbf16>, vector<64x256xbf16>, vector<1x256xf32> -> vector<1x256xf32>
    %cst_110 = arith.constant 1.562500e-02 : f32
    %219 = vector.broadcast %cst_110 : f32 to vector<1x256xf32>
    %220 = arith.mulf %216, %219 : vector<1x256xf32>
    %cst_111 = arith.constant 1.562500e-02 : f32
    %221 = vector.broadcast %cst_111 : f32 to vector<1x256xf32>
    %222 = arith.mulf %218, %221 : vector<1x256xf32>
    %223 = arith.mulf %220, %220 : vector<1x256xf32>
    %224 = arith.subf %222, %223 : vector<1x256xf32>
    %cst_112 = arith.constant 0.000000e+00 : f32
    %225 = vector.broadcast %cst_112 : f32 to vector<1x256xf32>
    %226 = arith.maximumf %224, %225 : vector<1x256xf32>
    %cst_113 = arith.constant 9.99999974E-6 : f32
    %227 = vector.broadcast %cst_113 : f32 to vector<1x256xf32>
    %228 = arith.addf %226, %227 : vector<1x256xf32>
    %229 = math.rsqrt %228 : vector<1x256xf32>
    %230 = arith.mulf %207, %229 : vector<1x256xf32>
    %231 = arith.mulf %220, %230 : vector<1x256xf32>
    %232 = arith.subf %208, %231 : vector<1x256xf32>
    %233 = arith.truncf %230 : vector<1x256xf32> to vector<1x256xbf16>
    %234 = vector.broadcast %233 : vector<1x256xbf16> to vector<64x256xbf16>
    %235 = arith.mulf %215, %234 : vector<64x256xbf16>
    %236 = arith.truncf %232 : vector<1x256xf32> to vector<1x256xbf16>
    %237 = vector.broadcast %236 : vector<1x256xbf16> to vector<64x256xbf16>
    %238 = arith.addf %235, %237 : vector<64x256xbf16>
    %c0_114 = arith.constant 0 : index
    %c0_115 = arith.constant 0 : index
    %239 = vector.load %arg20[%c0_114, %c0_115] : memref<256x257xbf16, #tpu.memory_space<vmem>>, vector<256x257xbf16>
    %cst_116 = arith.constant dense<0.000000e+00> : vector<64x257xf32>
    %240 = tpu.matmul %238, %239, %cst_116 {dimension_numbers = #tpu.dot_dimension_numbers<[1], [0], [0], [1], [0, 0, 1, 1], [], []>} : vector<64x256xbf16>, vector<256x257xbf16>, vector<64x257xf32> -> vector<64x257xf32>
    %c23 = arith.constant 23 : index
    %c0_117 = arith.constant 0 : index
    %241 = vector.load %arg2[%c23, %c0_117] : memref<32x384xf32, #tpu.memory_space<vmem>>, vector<1x257xf32>
    %242 = vector.broadcast %241 : vector<1x257xf32> to vector<64x257xf32>
    %243 = arith.addf %240, %242 : vector<64x257xf32>
    %244 = vector.extract_strided_slice %243 {offsets = [0, 0], sizes = [64, 256], strides = [1, 1]} : vector<64x257xf32> to vector<64x256xf32>
    %245 = arith.truncf %244 : vector<64x256xf32> to vector<64x256xbf16>
    %246 = vector.extract_strided_slice %243 {offsets = [0, 256], sizes = [64, 1], strides = [1, 1]} : vector<64x257xf32> to vector<64x1xf32>
    %247 = arith.negf %246 : vector<64x1xf32>
    %248 = math.exp %247 : vector<64x1xf32>
    %cst_118 = arith.constant 1.000000e+00 : f32
    %249 = vector.broadcast %cst_118 : f32 to vector<64x1xf32>
    %250 = arith.addf %249, %248 : vector<64x1xf32>
    %251 = arith.divf %249, %250 : vector<64x1xf32>
    %c0_119 = arith.constant 0 : index
    %c0_120 = arith.constant 0 : index
    %252 = vector.load %arg21[%c0_119, %c0_120] : memref<256x128xbf16, #tpu.memory_space<vmem>>, vector<256x128xbf16>
    %c0_121 = arith.constant 0 : index
    %c0_122 = arith.constant 0 : index
    %253 = vector.load %arg22[%c0_121, %c0_122] : memref<27x128xbf16, #tpu.memory_space<vmem>>, vector<27x128xbf16>
    %cst_123 = arith.constant dense<0.000000e+00> : vector<64x128xf32>
    %254 = tpu.matmul %245, %252, %cst_123 {dimension_numbers = #tpu.dot_dimension_numbers<[1], [0], [0], [1], [0, 0, 1, 1], [], []>} : vector<64x256xbf16>, vector<256x128xbf16>, vector<64x128xf32> -> vector<64x128xf32>
    %cst_124 = arith.constant dense<0.000000e+00> : vector<64x128xf32>
    %255 = tpu.matmul %1, %253, %cst_124 {dimension_numbers = #tpu.dot_dimension_numbers<[1], [0], [0], [1], [0, 0, 1, 1], [], []>} : vector<64x27xbf16>, vector<27x128xbf16>, vector<64x128xf32> -> vector<64x128xf32>
    %256 = arith.addf %254, %255 : vector<64x128xf32>
    %c24 = arith.constant 24 : index
    %c0_125 = arith.constant 0 : index
    %257 = vector.load %arg2[%c24, %c0_125] : memref<32x384xf32, #tpu.memory_space<vmem>>, vector<1x128xf32>
    %258 = arith.truncf %256 : vector<64x128xf32> to vector<64x128xbf16>
    %259 = arith.truncf %257 : vector<1x128xf32> to vector<1x128xbf16>
    %260 = vector.broadcast %259 : vector<1x128xbf16> to vector<64x128xbf16>
    %261 = arith.addf %258, %260 : vector<64x128xbf16>
    %cst_126 = arith.constant 0.000000e+00 : bf16
    %262 = vector.broadcast %cst_126 : bf16 to vector<64x128xbf16>
    %263 = arith.maximumf %261, %262 : vector<64x128xbf16>
    %c0_127 = arith.constant 0 : index
    %c0_128 = arith.constant 0 : index
    %264 = vector.load %arg23[%c0_127, %c0_128] : memref<128x1xbf16, #tpu.memory_space<vmem>>, vector<128x1xbf16>
    %cst_129 = arith.constant dense<0.000000e+00> : vector<64x1xf32>
    %265 = tpu.matmul %263, %264, %cst_129 {dimension_numbers = #tpu.dot_dimension_numbers<[1], [0], [0], [1], [0, 0, 1, 1], [], []>} : vector<64x128xbf16>, vector<128x1xbf16>, vector<64x1xf32> -> vector<64x1xf32>
    %c25 = arith.constant 25 : index
    %c0_130 = arith.constant 0 : index
    %266 = vector.load %arg2[%c25, %c0_130] : memref<32x384xf32, #tpu.memory_space<vmem>>, vector<1x1xf32>
    %267 = vector.broadcast %266 : vector<1x1xf32> to vector<64x1xf32>
    %268 = arith.addf %265, %267 : vector<64x1xf32>
    %269 = arith.negf %268 : vector<64x1xf32>
    %270 = math.exp %269 : vector<64x1xf32>
    %cst_131 = arith.constant 1.000000e+00 : f32
    %271 = vector.broadcast %cst_131 : f32 to vector<64x1xf32>
    %272 = arith.addf %271, %270 : vector<64x1xf32>
    %273 = arith.divf %271, %272 : vector<64x1xf32>
    %c0_132 = arith.constant 0 : index
    %c0_133 = arith.constant 0 : index
    %274 = vector.load %arg24[%c0_132, %c0_133] : memref<64x8xf32, #tpu.memory_space<vmem>>, vector<64x3xf32>
    tpu.vector_store %arg24[%c0_132, %c0_133], %101 {strides = array<i32>} : memref<64x8xf32, #tpu.memory_space<vmem>>, vector<64x3xf32>,
    %c0_134 = arith.constant 0 : index
    %c3_135 = arith.constant 3 : index
    %275 = vector.load %arg24[%c0_134, %c3_135] : memref<64x8xf32, #tpu.memory_space<vmem>>, vector<64x1xf32>
    tpu.vector_store %arg24[%c0_134, %c3_135], %84 {strides = array<i32>} : memref<64x8xf32, #tpu.memory_space<vmem>>, vector<64x1xf32>,
    %c0_136 = arith.constant 0 : index
    %c4_137 = arith.constant 4 : index
    %276 = vector.load %arg24[%c0_136, %c4_137] : memref<64x8xf32, #tpu.memory_space<vmem>>, vector<64x1xf32>
    tpu.vector_store %arg24[%c0_136, %c4_137], %273 {strides = array<i32>} : memref<64x8xf32, #tpu.memory_space<vmem>>, vector<64x1xf32>,
    %c0_138 = arith.constant 0 : index
    %c5_139 = arith.constant 5 : index
    %277 = vector.load %arg24[%c0_138, %c5_139] : memref<64x8xf32, #tpu.memory_space<vmem>>, vector<64x1xf32>
    tpu.vector_store %arg24[%c0_138, %c5_139], %251 {strides = array<i32>} : memref<64x8xf32, #tpu.memory_space<vmem>>, vector<64x1xf32>,
    %cst_140 = arith.constant 0.000000e+00 : f32
    %278 = vector.broadcast %cst_140 : f32 to vector<64x2xf32>
    %c0_141 = arith.constant 0 : index
    %c6_142 = arith.constant 6 : index
    %279 = vector.load %arg24[%c0_141, %c6_142] : memref<64x8xf32, #tpu.memory_space<vmem>>, vector<64x2xf32>
    tpu.vector_store %arg24[%c0_141, %c6_142], %278 {strides = array<i32>} : memref<64x8xf32, #tpu.memory_space<vmem>>, vector<64x2xf32>,
    return
  }
  func.func @transform_0(%arg0: i32) -> (i32, i32) {
    %c0_i32 = arith.constant 0 : i32
    %c0_i32_0 = arith.constant 0 : i32
    return %arg0, %c0_i32 : i32, i32
  }
  func.func @transform_1(%arg0: i32) -> (i32, i32) {
    %c0_i32 = arith.constant 0 : i32
    %c0_i32_0 = arith.constant 0 : i32
    %c0_i32_1 = arith.constant 0 : i32
    return %c0_i32, %c0_i32_0 : i32, i32
  }
  func.func @transform_2(%arg0: i32) -> (i32, i32) {
    %c0_i32 = arith.constant 0 : i32
    %c0_i32_0 = arith.constant 0 : i32
    %c0_i32_1 = arith.constant 0 : i32
    return %c0_i32, %c0_i32_0 : i32, i32
  }
  func.func @transform_3(%arg0: i32) -> (i32, i32) {
    %c0_i32 = arith.constant 0 : i32
    %c0_i32_0 = arith.constant 0 : i32
    %c0_i32_1 = arith.constant 0 : i32
    return %c0_i32, %c0_i32_0 : i32, i32
  }
  func.func @transform_4(%arg0: i32) -> (i32, i32) {
    %c0_i32 = arith.constant 0 : i32
    %c0_i32_0 = arith.constant 0 : i32
    %c0_i32_1 = arith.constant 0 : i32
    return %c0_i32, %c0_i32_0 : i32, i32
  }
  func.func @transform_5(%arg0: i32) -> (i32, i32) {
    %c0_i32 = arith.constant 0 : i32
    %c0_i32_0 = arith.constant 0 : i32
    %c0_i32_1 = arith.constant 0 : i32
    return %c0_i32, %c0_i32_0 : i32, i32
  }
  func.func @transform_6(%arg0: i32) -> (i32, i32) {
    %c0_i32 = arith.constant 0 : i32
    %c0_i32_0 = arith.constant 0 : i32
    %c0_i32_1 = arith.constant 0 : i32
    return %c0_i32, %c0_i32_0 : i32, i32
  }
  func.func @transform_7(%arg0: i32) -> (i32, i32) {
    %c0_i32 = arith.constant 0 : i32
    %c0_i32_0 = arith.constant 0 : i32
    %c0_i32_1 = arith.constant 0 : i32
    return %c0_i32, %c0_i32_0 : i32, i32
  }
  func.func @transform_8(%arg0: i32) -> (i32, i32) {
    %c0_i32 = arith.constant 0 : i32
    %c0_i32_0 = arith.constant 0 : i32
    %c0_i32_1 = arith.constant 0 : i32
    return %c0_i32, %c0_i32_0 : i32, i32
  }
  func.func @transform_9(%arg0: i32) -> (i32, i32) {
    %c0_i32 = arith.constant 0 : i32
    %c0_i32_0 = arith.constant 0 : i32
    %c0_i32_1 = arith.constant 0 : i32
    return %c0_i32, %c0_i32_0 : i32, i32
  }
  func.func @transform_10(%arg0: i32) -> (i32, i32) {
    %c0_i32 = arith.constant 0 : i32
    %c0_i32_0 = arith.constant 0 : i32
    %c0_i32_1 = arith.constant 0 : i32
    return %c0_i32, %c0_i32_0 : i32, i32
  }
  func.func @transform_11(%arg0: i32) -> (i32, i32) {
    %c0_i32 = arith.constant 0 : i32
    %c0_i32_0 = arith.constant 0 : i32
    %c0_i32_1 = arith.constant 0 : i32
    return %c0_i32, %c0_i32_0 : i32, i32
  }
  func.func @transform_12(%arg0: i32) -> (i32, i32) {
    %c0_i32 = arith.constant 0 : i32
    %c0_i32_0 = arith.constant 0 : i32
    %c0_i32_1 = arith.constant 0 : i32
    return %c0_i32, %c0_i32_0 : i32, i32
  }
  func.func @transform_13(%arg0: i32) -> (i32, i32) {
    %c0_i32 = arith.constant 0 : i32
    %c0_i32_0 = arith.constant 0 : i32
    %c0_i32_1 = arith.constant 0 : i32
    return %c0_i32, %c0_i32_0 : i32, i32
  }
  func.func @transform_14(%arg0: i32) -> (i32, i32) {
    %c0_i32 = arith.constant 0 : i32
    %c0_i32_0 = arith.constant 0 : i32
    %c0_i32_1 = arith.constant 0 : i32
    return %c0_i32, %c0_i32_0 : i32, i32
  }
  func.func @transform_15(%arg0: i32) -> (i32, i32) {
    %c0_i32 = arith.constant 0 : i32
    %c0_i32_0 = arith.constant 0 : i32
    %c0_i32_1 = arith.constant 0 : i32
    return %c0_i32, %c0_i32_0 : i32, i32
  }
  func.func @transform_16(%arg0: i32) -> (i32, i32) {
    %c0_i32 = arith.constant 0 : i32
    %c0_i32_0 = arith.constant 0 : i32
    %c0_i32_1 = arith.constant 0 : i32
    return %c0_i32, %c0_i32_0 : i32, i32
  }
  func.func @transform_17(%arg0: i32) -> (i32, i32) {
    %c0_i32 = arith.constant 0 : i32
    %c0_i32_0 = arith.constant 0 : i32
    %c0_i32_1 = arith.constant 0 : i32
    return %c0_i32, %c0_i32_0 : i32, i32
  }
  func.func @transform_18(%arg0: i32) -> (i32, i32) {
    %c0_i32 = arith.constant 0 : i32
    %c0_i32_0 = arith.constant 0 : i32
    %c0_i32_1 = arith.constant 0 : i32
    return %c0_i32, %c0_i32_0 : i32, i32
  }
  func.func @transform_19(%arg0: i32) -> (i32, i32) {
    %c0_i32 = arith.constant 0 : i32
    %c0_i32_0 = arith.constant 0 : i32
    %c0_i32_1 = arith.constant 0 : i32
    return %c0_i32, %c0_i32_0 : i32, i32
  }
  func.func @transform_20(%arg0: i32) -> (i32, i32) {
    %c0_i32 = arith.constant 0 : i32
    %c0_i32_0 = arith.constant 0 : i32
    %c0_i32_1 = arith.constant 0 : i32
    return %c0_i32, %c0_i32_0 : i32, i32
  }
  func.func @transform_21(%arg0: i32) -> (i32, i32) {
    %c0_i32 = arith.constant 0 : i32
    %c0_i32_0 = arith.constant 0 : i32
    %c0_i32_1 = arith.constant 0 : i32
    return %c0_i32, %c0_i32_0 : i32, i32
  }
  func.func @transform_22(%arg0: i32) -> (i32, i32) {
    %c0_i32 = arith.constant 0 : i32
    %c0_i32_0 = arith.constant 0 : i32
    %c0_i32_1 = arith.constant 0 : i32
    return %c0_i32, %c0_i32_0 : i32, i32
  }
  func.func @transform_23(%arg0: i32) -> (i32, i32) {
    %c0_i32 = arith.constant 0 : i32
    %c0_i32_0 = arith.constant 0 : i32
    return %arg0, %c0_i32 : i32, i32
  }
}

</mosaic_0001>

<bundles_post_ra>
// kernel: tpu_custom_call.1
= control target key start
LH: loop header
LB: loop body
LE: loop exit
PB: predicated region body
PF: predicated region fallthrough
CT: control target
= control target key end

     0   :  { %s14556_s0 = inlined_call_operand.hbm [shape: bf16[64,128], index: 0, kind: input, shape index: {}]   ;;  %s14557_s1 = inlined_call_operand.hbm [shape: f32[32,384], index: 1, kind: input, shape index: {}]   ;;  %s14558_s2 = inlined_call_operand.hbm [shape: bf16[63,256], index: 2, kind: input, shape index: {}]   ;;  %s14559_s3 = inlined_call_operand.vmem [shape: bf16[256,256], index: 3, kind: input, shape index: {}]   ;;  %s14560_s4 = inlined_call_operand.vmem [shape: bf16[256,256], index: 4, kind: input, shape index: {}]   ;;  %s14561_s5 = inlined_call_operand.vmem [shape: bf16[256,256], index: 5, kind: input, shape index: {}]   ;;  %s14562_s6 = inlined_call_operand.hbm [shape: bf16[63,256], index: 6, kind: input, shape index: {}]   ;;  %s14563_s7 = inlined_call_operand.vmem [shape: bf16[256,256], index: 7, kind: input, shape index: {}]   ;;  %s14564_s8 = inlined_call_operand.hbm [shape: bf16[256,256], index: 8, kind: input, shape index: {}]   ;;  %s14565_s9 = inlined_call_operand.hbm [shape: bf16[256,256], index: 9, kind: input, shape index: {}]   ;;  %s14566_s10 = inlined_call_operand.hbm [shape: bf16[256,256], index: 10, kind: input, shape index: {}]   ;;  %s14567_s11 = inlined_call_operand.vmem [shape: bf16[256,257], index: 11, kind: input, shape index: {}]   ;;  %s14568_s12 = inlined_call_operand.vmem [shape: bf16[256,128], index: 12, kind: input, shape index: {}]   ;;  %s14569_s13 = inlined_call_operand.hbm [shape: bf16[27,128], index: 13, kind: input, shape index: {}]   ;;  %s14570_s14 = inlined_call_operand.vmem [shape: bf16[128,3], index: 14, kind: input, shape index: {}]   ;;  %s14571_s15 = inlined_call_operand.hbm [shape: bf16[63,256], index: 15, kind: input, shape index: {}]   ;;  %s14572_s16 = inlined_call_operand.hbm [shape: bf16[256,256], index: 16, kind: input, shape index: {}]   ;;  %s14573_s17 = inlined_call_operand.hbm [shape: bf16[256,256], index: 17, kind: input, shape index: {}]   ;;  %s14574_s18 = inlined_call_operand.hbm [shape: bf16[256,256], index: 18, kind: input, shape index: {}]   ;;  %s14575_s19 = inlined_call_operand.vmem [shape: bf16[256,257], index: 19, kind: input, shape index: {}]   ;;  %s14576_s20 = inlined_call_operand.hbm [shape: bf16[256,128], index: 20, kind: input, shape index: {}]   ;;  %s14577_s21 = inlined_call_operand.hbm [shape: bf16[27,128], index: 21, kind: input, shape index: {}]   ;;  %s14578_s22 = inlined_call_operand.vmem [shape: bf16[128,1], index: 22, kind: input, shape index: {}]   ;;  %s14579_s23 = inlined_call_operand.vmem [shape: f32[64,8], index: 23, kind: output, shape index: {}]  }
   0x1   :  { %14585 = sst [smem:[#allocation32_spill]] %s14556_s0 }
   0x2   :  { %14586 = sst [smem:[#allocation33_spill]] %s14557_s1 }
   0x3   :  { %14587 = sst [smem:[#allocation34_spill]] %s14558_s2 }
   0x4   :  { %14588 = sst [smem:[#allocation35_spill]] %s14559_s3 }
   0x5   :  { %14589 = sst [smem:[#allocation36_spill]] %s14560_s4 }
   0x6   :  { %14590 = sst [smem:[#allocation37_spill]] %s14561_s5 }
   0x7   :  { %14591 = sst [smem:[#allocation38_spill]] %s14562_s6 }
   0x8   :  { %14592 = sst [smem:[#allocation39_spill]] %s14563_s7 }
   0x9   :  { %14593 = sst [smem:[#allocation40_spill]] %s14578_s22 }
   0xa   :  { %28 = vsyncpa [#allocation3], 0 }
   0xb   :  { %29 = vsyncpa [#allocation5], 0 }
   0xc   :  { %30 = vsyncpa [#allocation8], 0 }
   0xd   :  { %31 = vsyncpa [#allocation11], 0 }
   0xe   :  { %32 = vsyncpa [#allocation14], 0 }
   0xf   :  { %33 = vsyncpa [#allocation17], 0 }
  0x10   :  { %34 = vsyncpa [#allocation20], 0  ;;  %s14594_s24 = sld [smem:[#allocation33_spill]] }
  0x16   :  { %s53_s25 = sshll.u32 %s14594_s24, 4  ;;  %s54_s25 = int_to_ptr.hbm [resolvable:$true] %s53_s25 }
  0x17   :  { %35 = vsyncpa [#allocation23], 0  ;;  %s11522_s5 = smov [#allocation4]   ;;  %s11523_s26 = smov 384  }
  0x18   :  { %s55_s1 = sshll.u32 %s11522_s5, 4  ;;  %s11524_s2 = smov 24   ;;  %s56_s1 = int_to_ptr.vmem [resolvable:$true] %s55_s1 }
  0x19   :  { %61 = dma.hbm_to_vmem [thread:$0]  %s54_s25, 1536, %s56_s1, [#allocation5], %s11523_s26, %s11523_s26, %s11524_s2  }
  0x1a   :  { %s14595_s7 = sld [smem:[#allocation38_spill]]  ;;  %s11525_s29 = smov [#allocation7]  }
  0x1b   :  { %s87_s3 = sshll.u32 %s11525_s29, 4  ;;  %s113_s4 = sshll.u32 %s14565_s9, 4  ;;  %s88_s3 = int_to_ptr.vmem [resolvable:$true] %s87_s3  ;;  %s114_s4 = int_to_ptr.hbm [resolvable:$true] %s113_s4 }
  0x1c   :  { %s11526_s30 = smov 128   ;;  %s11527_s24 = smov 8  }
  0x1d   :  { %s11528_s25 = smov [#allocation10]   ;;  %s143_s2 = sshll.u32 %s14569_s13, 4  ;;  %s144_s2 = int_to_ptr.hbm [resolvable:$true] %s143_s2 }
  0x1e   :  { %s115_s5 = sshll.u32 %s11528_s25, 4  ;;  %s11529_s9 = smov [#allocation13]   ;;  %s116_s5 = int_to_ptr.vmem [resolvable:$true] %s115_s5 }
  0x1f   :  { %121 = dma.hbm_to_vmem [thread:$0]  %s114_s4, 4096, %s116_s5, [#allocation11], %s11526_s30, %s11526_s30, %s11527_s24  }
  0x20   :  { %s85_s28 = sshll.u32 %s14595_s7, 4  ;;  %s145_s22 = sshll.u32 %s11529_s9, 4  ;;  %s86_s28 = int_to_ptr.hbm [resolvable:$true] %s85_s28  ;;  %s146_s22 = int_to_ptr.vmem [resolvable:$true] %s145_s22 }
  0x21   :  { %93 = dma.hbm_to_vmem [thread:$0]  %s86_s28, 1024, %s88_s3, [#allocation8], %s11526_s30, %s11526_s30, %s11527_s24  }
  0x22   :  { %s171_s7 = sshll.u32 %s14572_s16, 4  ;;  %s11530_s28 = smov 64   ;;  %s172_s7 = int_to_ptr.hbm [resolvable:$true] %s171_s7 }
  0x23   :  { %s11531_s29 = smov 4   ;;  %s197_s0 = sshll.u32 %s14574_s18, 4  ;;  %s198_s0 = int_to_ptr.hbm [resolvable:$true] %s197_s0 }
  0x24   :  { %151 = dma.hbm_to_vmem [thread:$0]  %s144_s2, 256, %s146_s22, [#allocation14], %s11530_s28, %s11530_s28, %s11531_s29  }
  0x25   :  { %s11532_s4 = smov [#allocation16]   ;;  %s11533_s16 = smov [#allocation19]  }
  0x26   :  { %s173_s25 = sshll.u32 %s11532_s4, 4  ;;  %s199_s5 = sshll.u32 %s11533_s16, 4  ;;  %s174_s25 = int_to_ptr.vmem [resolvable:$true] %s173_s25  ;;  %s200_s5 = int_to_ptr.vmem [resolvable:$true] %s199_s5 }
  0x27   :  { %179 = dma.hbm_to_vmem [thread:$0]  %s172_s7, 4096, %s174_s25, [#allocation17], %s11526_s30, %s11526_s30, %s11527_s24  }
  0x28   :  { %s14596_s9 = sld [smem:[#allocation32_spill]]  ;;  %s11534_s13 = smov [#allocation2]  }
  0x29   :  { %205 = dma.hbm_to_vmem [thread:$0]  %s198_s0, 4096, %s200_s5, [#allocation20], %s11526_s30, %s11526_s30, %s11527_s24  }
  0x2a   :  { %s14597_s22 = sld [smem:[#allocation34_spill]]  ;;  %s42_s3 = sshll.u32 %s11534_s13, 4  ;;  %s43_s3 = int_to_ptr.vmem [resolvable:$true] %s42_s3 }
  0x2b   :  { %s11535_s7 = smov [#allocation6]   ;;  %s100_s1 = sshll.u32 %s14564_s8, 4  ;;  %s101_s1 = int_to_ptr.hbm [resolvable:$true] %s100_s1 }
  0x2c   :  { %s68_s4 = sshll.u32 %s11535_s7, 4  ;;  %s126_s26 = sshll.u32 %s14566_s10, 4  ;;  %s69_s4 = int_to_ptr.vmem [resolvable:$true] %s68_s4  ;;  %s127_s26 = int_to_ptr.hbm [resolvable:$true] %s126_s26 }
  0x2d   :  { %s158_s13 = sshll.u32 %s14571_s15, 4  ;;  %s11538_s7 = smov [#allocation15]   ;;  %s159_s13 = int_to_ptr.hbm [resolvable:$true] %s158_s13 }
  0x2e   :  { %s40_s6 = sshll.u32 %s14596_s9, 4  ;;  %s11536_s9 = smov [#allocation9]   ;;  %s41_s6 = int_to_ptr.hbm [resolvable:$true] %s40_s6 }
  0x2f   :  { %48 = dma.hbm_to_vmem [thread:$0]  %s41_s6, 512, %s43_s3, [#allocation3], %s11530_s28, %s11530_s28, %s11531_s29  }
  0x30   :  { %s66_s27 = sshll.u32 %s14597_s22, 4  ;;  %s102_s18 = sshll.u32 %s11536_s9, 4  ;;  %s67_s27 = int_to_ptr.hbm [resolvable:$true] %s66_s27  ;;  %s103_s18 = int_to_ptr.vmem [resolvable:$true] %s102_s18 }
  0x31   :  { %74 = dma.hbm_to_vmem [thread:$0]  %s67_s27, 1024, %s69_s4, [#allocation5], %s11526_s30, %s11526_s30, %s11527_s24  }
  0x32   :  { %108 = dma.hbm_to_vmem [thread:$0]  %s101_s1, 4096, %s103_s18, [#allocation8], %s11526_s30, %s11526_s30, %s11527_s24  }
  0x33   :  { %s11537_s6 = smov [#allocation12]   ;;  %s184_s3 = sshll.u32 %s14573_s17, 4  ;;  %s185_s3 = int_to_ptr.hbm [resolvable:$true] %s184_s3 }
  0x34   :  { %s128_s8 = sshll.u32 %s11537_s6, 4  ;;  %s160_s4 = sshll.u32 %s11538_s7, 4  ;;  %s129_s8 = int_to_ptr.vmem [resolvable:$true] %s128_s8  ;;  %s161_s4 = int_to_ptr.vmem [resolvable:$true] %s160_s4 }
  0x35   :  { %134 = dma.hbm_to_vmem [thread:$0]  %s127_s26, 4096, %s129_s8, [#allocation11], %s11526_s30, %s11526_s30, %s11527_s24  }
  0x36   :  { %166 = dma.hbm_to_vmem [thread:$0]  %s159_s13, 1024, %s161_s4, [#allocation14], %s11526_s30, %s11526_s30, %s11527_s24  }
  0x37   :  { %s11539_s25 = smov [#allocation18]   ;;  %s212_s0 = sshll.u32 %s14576_s20, 4  ;;  %s213_s0 = int_to_ptr.hbm [resolvable:$true] %s212_s0 }
  0x38   :  { %s186_s15 = sshll.u32 %s11539_s25, 4  ;;  %s225_s26 = sshll.u32 %s14577_s21, 4  ;;  %s187_s15 = int_to_ptr.vmem [resolvable:$true] %s186_s15  ;;  %s226_s26 = int_to_ptr.hbm [resolvable:$true] %s225_s26 }
  0x39   :  { %192 = dma.hbm_to_vmem [thread:$0]  %s185_s3, 4096, %s187_s15, [#allocation17], %s11526_s30, %s11526_s30, %s11527_s24  }
  0x3a   :  { %s11540_s9 = smov [#allocation21]   ;;  %s11541_s6 = smov [#allocation22]  }
  0x3b   :  { %s214_s18 = sshll.u32 %s11540_s9, 4  ;;  %s227_s20 = sshll.u32 %s11541_s6, 4  ;;  %s215_s18 = int_to_ptr.vmem [resolvable:$true] %s214_s18  ;;  %s228_s20 = int_to_ptr.vmem [resolvable:$true] %s227_s20 }
  0x3c   :  { %220 = dma.hbm_to_vmem [thread:$0]  %s213_s0, 2048, %s215_s18, [#allocation20], %s11530_s28, %s11530_s28, %s11531_s29  }
  0x3d   :  { %233 = dma.hbm_to_vmem [thread:$0]  %s226_s26, 256, %s228_s20, [#allocation23], %s11530_s28, %s11530_s28, %s11531_s29  }
  0x3e   :  { %11506 = dma.done.wait [#allocation3], 512  }
  0x3f   :  { %11507 = vsyncadd [#allocation3], 4294966784 }
  0x40   :  { %11508 = dma.done.wait [#allocation5], 2560  }
  0x41   :  { %11509 = vsyncadd [#allocation5], 4294964736 }
  0x42   :  { %11510 = dma.done.wait [#allocation8], 5120  }
  0x43   :  { %11511 = vsyncadd [#allocation8], 4294962176 }
  0x44   :  { %11512 = dma.done.wait [#allocation11], 8192  }
  0x45   :  { %11513 = vsyncadd [#allocation11], 4294959104 }
  0x46   :  { %11514 = dma.done.wait [#allocation14], 1280  }
  0x47   :  { %11515 = vsyncadd [#allocation14], 4294966016 }
  0x48   :  { %11516 = dma.done.wait [#allocation17], 8192  }
  0x49   :  { %11517 = vsyncadd [#allocation17], 4294959104 }
  0x4a   :  { %11518 = dma.done.wait [#allocation20], 6144  }
  0x4b   :  { %11519 = vsyncadd [#allocation20], 4294961152 }
  0x4c   :  { %11520 = dma.done.wait [#allocation23], 256  }
  0x4d   :  { %11521 = vsyncadd [#allocation23], 4294967040  ;;  %vm382_vm0 = vcmask 1046528   ;;  %vm383_vm1 = vcmask 1047552   ;;  %v11542_v0 = vmov 65535   ;;  %v11753_v16 = vld [vmem:[#allocation2] sm:$0xff] }
  0x4e   :  { %v384_v1 = vsel %vm382_vm0, 4294967295, %v11542_v0  ;;  %v8547_v3 = vld [vmem:[#allocation6 + $0x30] sm:$0xf]  ;;  %v10564_v4 = vld [vmem:[#allocation6 + $0x34] sm:$0xf0]  ;;  %4149 = vrot.lane.b32.xlu0 %v11753_v16, %s11530_s28  ;;  %s14598_s24 = sld [smem:[#allocation35_spill]] }
  0x4f   :  { %v11749_v2 = vsel %vm383_vm1, %v384_v1, 0  ;;  %v10563_v5 = vld [vmem:[#allocation6 + $0x34] sm:$0xf]  ;;  %v8548_v6 = vor.u32 %v10564_v4, %v8547_v3  ;;  %v8549_v7 = vld [vmem:[#allocation6 + $0x38] sm:$0xf0]  ;;  %v10554_v34 = vld [vmem:[#allocation2 + $0x8] sm:$0xff] }
  0x50   :  { %v8552_v8 = vor.u32 %v10563_v5, %v8549_v7  ;;  %v8539_v9 = vld [vmem:[#allocation6 + $0x20] sm:$0xf]  ;;  %v10562_v10 = vld [vmem:[#allocation6 + $0x24] sm:$0xf0]  ;;  %v10561_v12 = vld [vmem:[#allocation6 + $0x24] sm:$0xf] }
  0x51   :  { %v387_v11 = vand.u32 %v8548_v6, %v11749_v2  ;;  %v8541_v13 = vld [vmem:[#allocation6 + $0x28] sm:$0xf0]  ;;  %v8540_v15 = vor.u32 %v10562_v10, %v8539_v9  ;;  %v8531_v18 = vld [vmem:[#allocation6 + $0x10] sm:$0xf]  ;;  %v10560_v19 = vld [vmem:[#allocation6 + $0x14] sm:$0xf0] }
  0x52   :  { %v390_v14 = vand.u32 %v8552_v8, %v11749_v2  ;;  %v8544_v17 = vor.u32 %v10561_v12, %v8541_v13  ;;  %v10555_v20 = vld [vmem:[#allocation2 + $0x10] sm:$0xff]  ;;  %v8533_v22 = vld [vmem:[#allocation6 + $0x18] sm:$0xf0]  ;;  %v8532_v23 = vor.u32 %v10560_v19, %v8531_v18  ;;  %v8523_v25 = vld [vmem:[#allocation6] sm:$0xf]  ;;  %vm369_vm2 = vcmask 515072  }
  0x53   :  { %396 = vmatpush.bf16.msra.mxu0 %v387_v11  ;;  %11049 = vmatpush.bf16.msra.mxu2 %v387_v11  ;;  %v10559_v21 = vld [vmem:[#allocation6 + $0x14] sm:$0xf]  ;;  %v10558_v26 = vld [vmem:[#allocation6 + $0x4] sm:$0xf0]  ;;  %v10557_v27 = vld [vmem:[#allocation6 + $0x4] sm:$0xf] }
  0x54   :  { %425 = vmatpush.bf16.msra.mxu1 %v390_v14  ;;  %11053 = vmatpush.bf16.msra.mxu3 %v390_v14  ;;  %v8536_v24 = vor.u32 %v10559_v21, %v8533_v22  ;;  %v8525_v28 = vld [vmem:[#allocation6 + $0x8] sm:$0xf0]  ;;  %v8619_v29 = vld [vmem:[%s14598_s24 + $0x70] sm:$0xf]  ;;  %v10580_v30 = vld [vmem:[%s14598_s24 + $0x74] sm:$0xf0]  ;;  %v8524_v33 = vor.u32 %v10558_v26, %v8523_v25 }
  0x55   :  { %4153 = vrot.lane.b32.xlu1 %v10555_v20, %s11530_s28  ;;  %v8683_v31 = vld [vmem:[%s14598_s24 + $0xf0] sm:$0xf]  ;;  %v10596_v32 = vld [vmem:[%s14598_s24 + $0xf4] sm:$0xf0]  ;;  %v8528_v35 = vor.u32 %v10557_v27, %v8525_v28  ;;  %v10579_v37 = vld [vmem:[%s14598_s24 + $0x74] sm:$0xf]  ;;  %v8620_v39 = vor.u32 %v10580_v30, %v8619_v29 }
  0x56   :  { %v10556_v36 = vld [vmem:[#allocation2 + $0x18] sm:$0xff]  ;;  %v8684_v40 = vor.u32 %v10596_v32, %v8683_v31  ;;  %v10595_v41 = vld [vmem:[%s14598_s24 + $0xf4] sm:$0xf]  ;;  %v8611_v43 = vld [vmem:[%s14598_s24 + $0x60] sm:$0xf]  ;;  %4151 = vrot.lane.b32.xlu0 %v10554_v34, %s11530_s28  ;;  %s14599_s7 = sld [smem:[#allocation36_spill]] }
  0x57   :  { %397 = vmatpush.bf16.msra.mxu0 %v8540_v15  ;;  %11050 = vmatpush.bf16.msra.mxu2 %v8540_v15  ;;  %v8621_v38 = vld [vmem:[%s14598_s24 + $0x78] sm:$0xf0]  ;;  %v10578_v44 = vld [vmem:[%s14598_s24 + $0x64] sm:$0xf0]  ;;  %v8675_v45 = vld [vmem:[%s14598_s24 + $0xe0] sm:$0xf] }
  0x58   :  { %426 = vmatpush.bf16.msra.mxu1 %v8544_v17  ;;  %11054 = vmatpush.bf16.msra.mxu3 %v8544_v17  ;;  %v8685_v42 = vld [vmem:[%s14598_s24 + $0xf8] sm:$0xf0]  ;;  %v10594_v46 = vld [vmem:[%s14598_s24 + $0xe4] sm:$0xf0]  ;;  %v8624_v47 = vor.u32 %v10579_v37, %v8621_v38  ;;  %v10577_v49 = vld [vmem:[%s14598_s24 + $0x64] sm:$0xf]  ;;  %v8612_v51 = vor.u32 %v10578_v44, %v8611_v43 }
  0x59   :  { %v8688_v48 = vor.u32 %v10595_v41, %v8685_v42  ;;  %v8613_v50 = vld [vmem:[%s14598_s24 + $0x68] sm:$0xf0]  ;;  %v8676_v52 = vor.u32 %v10594_v46, %v8675_v45  ;;  %v10593_v53 = vld [vmem:[%s14598_s24 + $0xe4] sm:$0xf]  ;;  %v8603_v55 = vld [vmem:[%s14598_s24 + $0x50] sm:$0xf] }
  0x5a   :  { %v8677_v54 = vld [vmem:[%s14598_s24 + $0xe8] sm:$0xf0]  ;;  %v10576_v56 = vld [vmem:[%s14598_s24 + $0x54] sm:$0xf0]  ;;  %v8667_v57 = vld [vmem:[%s14598_s24 + $0xd0] sm:$0xf]  ;;  %v8616_v59 = vor.u32 %v10577_v49, %v8613_v50 }
  0x5b   :  { %398 = vmatpush.bf16.msra.mxu0 %v8532_v23  ;;  %11051 = vmatpush.bf16.msra.mxu2 %v8532_v23  ;;  %v10592_v58 = vld [vmem:[%s14598_s24 + $0xd4] sm:$0xf0]  ;;  %v8680_v60 = vor.u32 %v10593_v53, %v8677_v54  ;;  %v10575_v61 = vld [vmem:[%s14598_s24 + $0x54] sm:$0xf]  ;;  %v8604_v62 = vor.u32 %v10576_v56, %v8603_v55  ;;  %v8605_v1 = vld [vmem:[%s14598_s24 + $0x58] sm:$0xf0] }
  0x5c   :  { %427 = vmatpush.bf16.msra.mxu1 %v8536_v24  ;;  %11055 = vmatpush.bf16.msra.mxu3 %v8536_v24  ;;  %v8668_v63 = vor.u32 %v10592_v58, %v8667_v57  ;;  %v10591_v3 = vld [vmem:[%s14598_s24 + $0xd4] sm:$0xf]  ;;  %v8669_v4 = vld [vmem:[%s14598_s24 + $0xd8] sm:$0xf0]  ;;  %v8608_v5 = vor.u32 %v10575_v61, %v8605_v1  ;;  %v8595_v7 = vld [vmem:[%s14598_s24 + $0x40] sm:$0xf] }
  0x5d   :  { %4155 = vrot.lane.b32.xlu1 %v10556_v36, %s11530_s28  ;;  %v8672_v6 = vor.u32 %v10591_v3, %v8669_v4  ;;  %v10574_v8 = vld [vmem:[%s14598_s24 + $0x44] sm:$0xf0]  ;;  %v8659_v9 = vld [vmem:[%s14598_s24 + $0xc0] sm:$0xf]  ;;  %v10573_v12 = vld [vmem:[%s14598_s24 + $0x44] sm:$0xf] }
  0x5e   :  { %v8596_v10 = vor.u32 %v10574_v8, %v8595_v7  ;;  %v10590_v11 = vld [vmem:[%s14598_s24 + $0xc4] sm:$0xf0]  ;;  %v8597_v13 = vld [vmem:[%s14598_s24 + $0x48] sm:$0xf0]  ;;  %v8587_v19 = vld [vmem:[%s14598_s24 + $0x30] sm:$0xf] }
  0x5f   :  { %399 = vmatpush.bf16.msra.mxu0 %v8524_v33  ;;  %11052 = vmatpush.bf16.msra.mxu2 %v8524_v33  ;;  %v8660_v14 = vor.u32 %v10590_v11, %v8659_v9  ;;  %v8600_v15 = vor.u32 %v10573_v12, %v8597_v13  ;;  %v8661_v17 = vld [vmem:[%s14598_s24 + $0xc8] sm:$0xf0]  ;;  %v8651_v22 = vld [vmem:[%s14598_s24 + $0xb0] sm:$0xf]  ;;  %v10588_v23 = vld [vmem:[%s14598_s24 + $0xb4] sm:$0xf0] }
  0x60   :  { %428 = vmatpush.bf16.msra.mxu1 %v8528_v35  ;;  %11056 = vmatpush.bf16.msra.mxu3 %v8528_v35  ;;  %v10571_v24 = vld [vmem:[%s14598_s24 + $0x34] sm:$0xf]  ;;  %v8652_v25 = vor.u32 %v10588_v23, %v8651_v22  ;;  %v8589_v26 = vld [vmem:[%s14598_s24 + $0x38] sm:$0xf0]  ;;  %v8579_v31 = vld [vmem:[%s14598_s24 + $0x20] sm:$0xf] }
  0x61   :  { %v10587_v27 = vld [vmem:[%s14598_s24 + $0xb4] sm:$0xf]  ;;  %v8653_v28 = vld [vmem:[%s14598_s24 + $0xb8] sm:$0xf0]  ;;  %v8592_v29 = vor.u32 %v10571_v24, %v8589_v26  ;;  %v10570_v32 = vld [vmem:[%s14598_s24 + $0x24] sm:$0xf0] }
  0x62   :  { %8553 = vmatmul.msk.bf16.vlgmr.msra.gmra.mxu0 %vm369_vm2, %v11753_v16  ;;  %8555 = vmatmul.msk.bf16.vlgmr.msra.gmra.mxu2 %vm369_vm2, %v10555_v20  ;;  %v8656_v30 = vor.u32 %v10587_v27, %v8653_v28  ;;  %v8643_v33 = vld [vmem:[%s14598_s24 + $0xa0] sm:$0xf]  ;;  %v10586_v35 = vld [vmem:[%s14598_s24 + $0xa4] sm:$0xf0]  ;;  %v8581_v37 = vld [vmem:[%s14598_s24 + $0x28] sm:$0xf0] }
  0x63   :  { %753 = vmatpush.bf16.msrb.mxu2 %v8620_v39  ;;  %8557 = vmatmul.msk.bf16.vlgmr.msra.gmra.mxu1 %vm369_vm2, %v11753_v16  ;;  %v10589_v16 = vld [vmem:[%s14598_s24 + $0xc4] sm:$0xf]  ;;  %v8644_v38 = vor.u32 %v10586_v35, %v8643_v33  ;;  %v8645_v41 = vld [vmem:[%s14598_s24 + $0xa8] sm:$0xf0]  ;;  %v8571_v43 = vld [vmem:[%s14598_s24 + $0x10] sm:$0xf] }
  0x64   :  { %782 = vmatpush.bf16.msrb.mxu3 %v8684_v40  ;;  %811 = vmatpush.bf16.msrb.mxu0 %v8624_v47  ;;  %v8664_v18 = vor.u32 %v10589_v16, %v8661_v17  ;;  %v10585_v40 = vld [vmem:[%s14598_s24 + $0xa4] sm:$0xf]  ;;  %v10568_v44 = vld [vmem:[%s14598_s24 + $0x14] sm:$0xf0]  ;;  %v8635_v45 = vld [vmem:[%s14598_s24 + $0x90] sm:$0xf] }
  0x65   :  { %8559 = vmatmul.msk.bf16.vlgmr.msra.gmra.mxu3 %vm369_vm2, %v10555_v20  ;;  %840 = vmatpush.bf16.msrb.mxu1 %v8688_v48  ;;  %v10572_v20 = vld [vmem:[%s14598_s24 + $0x34] sm:$0xf0]  ;;  %v8648_v42 = vor.u32 %v10585_v40, %v8645_v41  ;;  %v8572_v46 = vor.u32 %v10568_v44, %v8571_v43  ;;  %v10567_v48 = vld [vmem:[%s14598_s24 + $0x14] sm:$0xf]  ;;  %v8573_v49 = vld [vmem:[%s14598_s24 + $0x18] sm:$0xf0] }
  0x66   :  { %v8588_v21 = vor.u32 %v10572_v20, %v8587_v19  ;;  %v10584_v47 = vld [vmem:[%s14598_s24 + $0x94] sm:$0xf0]  ;;  %v8637_v53 = vld [vmem:[%s14598_s24 + $0x98] sm:$0xf0]  ;;  %v8563_v56 = vld [vmem:[%s14598_s24] sm:$0xf] }
  0x67   :  { %754 = vmatpush.bf16.msrb.mxu2 %v8612_v51  ;;  %v8636_v50 = vor.u32 %v10584_v47, %v8635_v45  ;;  %v8576_v51 = vor.u32 %v10567_v48, %v8573_v49  ;;  %v302_v54 = vld [vmem:[#allocation4] ss:$8 sm:$0x3]  ;;  %v10565_v61 = vld [vmem:[%s14598_s24 + $0x4] sm:$0xf]  ;;  %s14600_s5 = sld [smem:[#allocation37_spill]] }
  0x68   :  { %783 = vmatpush.bf16.msrb.mxu3 %v8676_v52  ;;  %812 = vmatpush.bf16.msrb.mxu0 %v8616_v59  ;;  %v10583_v52 = vld [vmem:[%s14598_s24 + $0x94] sm:$0xf]  ;;  %v10566_v57 = vld [vmem:[%s14598_s24 + $0x4] sm:$0xf0]  ;;  %v8627_v58 = vld [vmem:[%s14598_s24 + $0x80] sm:$0xf] }
  0x69   :  { %841 = vmatpush.bf16.msrb.mxu1 %v8680_v60  ;;  %v8640_v55 = vor.u32 %v10583_v52, %v8637_v53  ;;  %v8564_v59 = vor.u32 %v10566_v57, %v8563_v56  ;;  %v10582_v60 = vld [vmem:[%s14598_s24 + $0x84] sm:$0xf0]  ;;  %v460_v1 = vperm.slane %v302_v54, 1  ;;  %s14601_s8 = sld [smem:[#allocation39_spill]]  ;;  %vm4181_vm3 = vcmask 1044480  }
  0x6a   :  { %v8628_v3 = vor.u32 %v10582_v60, %v8627_v58  ;;  %vm4182_vm4 = vcmask 1045504   ;;  %vm4168_vm5 = vcmask 220160   ;;  %vm4785_vm6 = vcmask 523264   ;;  %s14608_s6 = sld [smem:[#allocation40_spill]] }
  0x6b   :  { %755 = vmatpush.bf16.msrb.mxu2 %v8604_v62  ;;  %v8565_v62 = vld [vmem:[%s14598_s24 + $0x8] sm:$0xf0]  ;;  %vm8352_vm7 = vcmask 23552   ;;  %vm8393_vm8 = vcmask 31768   ;;  %vm4916_vm14 = vcmask 1040384  }
  0x6c   :  { %784 = vmatpush.bf16.msrb.mxu3 %v8668_v63  ;;  %813 = vmatpush.bf16.msrb.mxu0 %v8608_v5  ;;  %v459_v63 = vperm.slane %v302_v54, 0  ;;  %v8568_v4 = vor.u32 %v10565_v61, %v8565_v62  ;;  %v10581_v5 = vld [vmem:[%s14598_s24 + $0x84] sm:$0xf] }
  0x6d   :  { %842 = vmatpush.bf16.msrb.mxu1 %v8672_v6  ;;  %v8629_v6 = vld [vmem:[%s14598_s24 + $0x88] sm:$0xf0] }
  0x6e   :  { %v8632_v7 = vor.u32 %v10581_v5, %v8629_v6  ;;  %v463_v8 = vpack.c.bf16 %v460_v1, %v459_v63  ;;  %v8747_v6 = vld [vmem:[%s14599_s7 + $0x70] sm:$0xf] }
  0x6f   :  { %756 = vmatpush.bf16.msrb.mxu2 %v8596_v10 }
  0x70   :  { %785 = vmatpush.bf16.msrb.mxu3 %v8660_v14  ;;  %814 = vmatpush.bf16.msrb.mxu0 %v8600_v15  ;;  %v465_v9 = vunpack.c.l.b16 %v463_v8  ;;  %v466_v10 = vunpack.c.h.b16 %v463_v8  ;;  %v8811_v8 = vld [vmem:[%s14599_s7 + $0xf0] sm:$0xf] }
  0x71   :  { %843 = vmatpush.bf16.msrb.mxu1 %v8664_v18 }
  0x72   :  { %8554 = vmatmul.msk.bf16.gmra.mxu0 %vm369_vm2, %v10554_v34  ;;  %8556 = vmatmul.msk.bf16.gmra.mxu2 %vm369_vm2, %v10556_v36  ;;  %v467_v11 = vpack.c.b16 %v465_v9, %v465_v9  ;;  %v468_v12 = vpack.c.b16 %v466_v10, %v466_v10 }
  0x73   :  { %8558 = vmatmul.msk.bf16.gmra.mxu1 %vm369_vm2, %v10554_v34  ;;  %757 = vmatpush.bf16.msrb.mxu2 %v8588_v21  ;;  %v8580_v34 = vor.u32 %v10570_v32, %v8579_v31 }
  0x74   :  { %786 = vmatpush.bf16.msrb.mxu3 %v8652_v25  ;;  %815 = vmatpush.bf16.msrb.mxu0 %v8592_v29  ;;  %v470_v14 = vpack.i.b16 %v467_v11, %v467_v11  ;;  %v474_v15 = vpack.i.b16 %v468_v12, %v468_v12 }
  0x75   :  { %8560 = vmatmul.msk.bf16.gmra.mxu3 %vm369_vm2, %v10556_v36  ;;  %844 = vmatpush.bf16.msrb.mxu1 %v8656_v30  ;;  %v10569_v36 = vld [vmem:[%s14598_s24 + $0x24] sm:$0xf] }
  0x76   :  { %v8584_v39 = vor.u32 %v10569_v36, %v8581_v37  ;;  %v472_v18 = vperm.slane %v470_v14, 0  ;;  %v476_v19 = vperm.slane %v474_v15, 0  ;;  %v10611_v14 = vld [vmem:[%s14599_s7 + $0x74] sm:$0xf] }
  0x77   :  { %758 = vmatpush.bf16.msrb.mxu2 %v8580_v34 }
  0x78   :  { %787 = vmatpush.bf16.msrb.mxu3 %v8644_v38  ;;  %816 = vmatpush.bf16.msrb.mxu0 %v8584_v39  ;;  %v11962_v22 = vunpack.c.l.bf16 %v472_v18  ;;  %v11964_v23 = vunpack.c.l.bf16 %v476_v19  ;;  %v8813_v18 = vld [vmem:[%s14599_s7 + $0xf8] sm:$0xf0] }
  0x79   :  { %845 = vmatpush.bf16.msrb.mxu1 %v8648_v42 }
  0x7b   :  { %759 = vmatpush.bf16.msrb.mxu2 %v8572_v46 }
  0x7c   :  { %788 = vmatpush.bf16.msrb.mxu3 %v8636_v50  ;;  %817 = vmatpush.bf16.msrb.mxu0 %v8576_v51 }
  0x7d   :  { %846 = vmatpush.bf16.msrb.mxu1 %v8640_v55 }
  0x7f   :  { %760 = vmatpush.bf16.msrb.mxu2 %v8564_v59 }
  0x80   :  { %789 = vmatpush.bf16.msrb.mxu3 %v8628_v3  ;;  %818 = vmatpush.bf16.msrb.mxu0 %v8568_v4 }
  0x81   :  { %847 = vmatpush.bf16.msrb.mxu1 %v8632_v7  ;;  %v10612_v7 = vld [vmem:[%s14599_s7 + $0x74] sm:$0xf0] }
  0x82   :  { %v8748_v12 = vor.u32 %v10612_v7, %v8747_v6 }
  0x84   :  { %1172 = vmatpush.bf16.msra.mxu2 %v8748_v12  ;;  %v10606_v12 = vld [vmem:[%s14599_s7 + $0x44] sm:$0xf0] }
  0xdf   :  { %v401_v13 = vpop.f32.mrf.mxu0 }
  0xe0   :  { %v430_v16 = vpop.f32.mrf.mxu1 }
  0xe1   :  { %v450_v17 = vpack.c.bf16 %v430_v16, %v401_v13  ;;  %v10628_v13 = vld [vmem:[%s14599_s7 + $0xf4] sm:$0xf0]  ;;  %v8749_v16 = vld [vmem:[%s14599_s7 + $0x78] sm:$0xf0] }
  0xe2   :  { %v8812_v15 = vor.u32 %v10628_v13, %v8811_v8  ;;  %v8752_v19 = vor.u32 %v10611_v14, %v8749_v16  ;;  %v10623_v8 = vld [vmem:[%s14599_s7 + $0xd4] sm:$0xf]  ;;  %v8787_v13 = vld [vmem:[%s14599_s7 + $0xc0] sm:$0xf]  ;;  %v10605_v16 = vld [vmem:[%s14599_s7 + $0x44] sm:$0xf] }
  0xe3   :  { %v477_v20 = vunpack.c.l.bf16 %v450_v17  ;;  %v478_v21 = vunpack.c.h.bf16 %v450_v17  ;;  %v10627_v17 = vld [vmem:[%s14599_s7 + $0xf4] sm:$0xf] }
  0xe4   :  { %1201 = vmatpush.bf16.msra.mxu3 %v8812_v15  ;;  %1230 = vmatpush.bf16.msra.mxu0 %v8752_v19  ;;  %v10622_v15 = vld [vmem:[%s14599_s7 + $0xc4] sm:$0xf0] }
  0xe5   :  { %v495_v27 = vadd.f32 %v11962_v22, %v477_v20  ;;  %v496_v28 = vadd.f32 %v11964_v23, %v478_v21  ;;  %v411_v38 = vpop.f32.mrf.mxu2  ;;  %v8816_v20 = vor.u32 %v10627_v17, %v8813_v18  ;;  %v8725_v17 = vld [vmem:[%s14599_s7 + $0x48] sm:$0xf0]  ;;  %v8788_v18 = vor.u32 %v10622_v15, %v8787_v13 }
  0xe6   :  { %v8728_v19 = vor.u32 %v10605_v16, %v8725_v17 }
  0xe7   :  { %v403_v24 = vpop.f32.mrf.mxu0  ;;  %v535_v33 = vmax.f32 %v495_v27, 0.0  ;;  %v536_v34 = vmax.f32 %v496_v28, 0.0  ;;  %1259 = vmatpush.bf16.msra.mxu1 %v8816_v20  ;;  %v10621_v20 = vld [vmem:[%s14599_s7 + $0xc4] sm:$0xf] }
  0xe8   :  { %v432_v25 = vpop.f32.mrf.mxu1  ;;  %v440_v40 = vpop.f32.mrf.mxu3 }
  0xe9   :  { %v451_v26 = vpack.c.bf16 %v432_v25, %v403_v24  ;;  %v454_v61 = vpack.c.bf16 %v440_v40, %v411_v38 }
  0xeb   :  { %v479_v29 = vunpack.c.l.bf16 %v451_v26  ;;  %v480_v30 = vunpack.c.h.bf16 %v451_v26  ;;  %v485_v3 = vunpack.c.l.bf16 %v454_v61  ;;  %v486_v9 = vunpack.c.h.bf16 %v454_v61  ;;  %v8731_v61 = vld [vmem:[%s14599_s7 + $0x50] sm:$0xf] }
  0xed   :  { %v497_v31 = vadd.f32 %v11962_v22, %v479_v29  ;;  %v498_v32 = vadd.f32 %v11964_v23, %v480_v30  ;;  %v413_v49 = vpop.f32.mrf.mxu2  ;;  %v503_v21 = vadd.f32 %v11962_v22, %v485_v3  ;;  %v504_v25 = vadd.f32 %v11964_v23, %v486_v9  ;;  %v10624_v3 = vld [vmem:[%s14599_s7 + $0xd4] sm:$0xf0]  ;;  %v8797_v9 = vld [vmem:[%s14599_s7 + $0xd8] sm:$0xf0] }
  0xef   :  { %v406_v35 = vpop.f32.mrf.mxu0  ;;  %v537_v36 = vmax.f32 %v497_v31, 0.0  ;;  %v538_v37 = vmax.f32 %v498_v32, 0.0  ;;  %v543_v27 = vmax.f32 %v503_v21, 0.0  ;;  %v544_v29 = vmax.f32 %v504_v25, 0.0  ;;  %v8789_v21 = vld [vmem:[%s14599_s7 + $0xc8] sm:$0xf0] }
  0xf0   :  { %v435_v39 = vpop.f32.mrf.mxu1  ;;  %v442_v50 = vpop.f32.mrf.mxu3  ;;  %v8715_v25 = vld [vmem:[%s14599_s7 + $0x30] sm:$0xf] }
  0xf1   :  { %v551_v41 = vpack.c.bf16 %v537_v36, %v535_v33  ;;  %v552_v42 = vpack.c.bf16 %v538_v37, %v536_v34  ;;  %v452_v43 = vpack.c.bf16 %v435_v39, %v406_v35  ;;  %v455_v62 = vpack.c.bf16 %v442_v50, %v413_v49 }
  0xf3   :  { %761 = vmatmul.bf16.vlgmr.msrb.gmra.mxu2 %v551_v41  ;;  %790 = vmatmul.bf16.vlgmr.msrb.gmra.mxu3 %v552_v42  ;;  %v481_v44 = vunpack.c.l.bf16 %v452_v43  ;;  %v482_v45 = vunpack.c.h.bf16 %v452_v43  ;;  %v487_v10 = vunpack.c.l.bf16 %v455_v62  ;;  %v488_v11 = vunpack.c.h.bf16 %v455_v62  ;;  %v10608_v62 = vld [vmem:[%s14599_s7 + $0x54] sm:$0xf0] }
  0xf4   :  { %819 = vmatmul.bf16.vlgmr.msrb.gmra.mxu0 %v551_v41  ;;  %848 = vmatmul.bf16.vlgmr.msrb.gmra.mxu1 %v552_v42 }
  0xf5   :  { %v499_v53 = vadd.f32 %v11962_v22, %v481_v44  ;;  %v500_v54 = vadd.f32 %v11964_v23, %v482_v45  ;;  %v416_v4 = vpop.f32.mrf.mxu2  ;;  %v505_v24 = vadd.f32 %v11962_v22, %v487_v10  ;;  %v506_v26 = vadd.f32 %v11964_v23, %v488_v11  ;;  %v8723_v11 = vld [vmem:[%s14599_s7 + $0x40] sm:$0xf] }
  0xf6   :  { %v8800_v10 = vor.u32 %v10623_v8, %v8797_v9  ;;  %v8724_v14 = vor.u32 %v10606_v12, %v8723_v11  ;;  %v10613_v9 = vld [vmem:[%s14599_s7 + $0x84] sm:$0xf] }
  0xf7   :  { %v408_v46 = vpop.f32.mrf.mxu0  ;;  %v539_v57 = vmax.f32 %v499_v53, 0.0  ;;  %v540_v59 = vmax.f32 %v500_v54, 0.0  ;;  %v545_v28 = vmax.f32 %v505_v24, 0.0  ;;  %v546_v30 = vmax.f32 %v506_v26, 0.0  ;;  %v10626_v53 = vld [vmem:[%s14599_s7 + $0xe4] sm:$0xf0] }
  0xf8   :  { %v437_v47 = vpop.f32.mrf.mxu1  ;;  %v445_v5 = vpop.f32.mrf.mxu3  ;;  %v10609_v54 = vld [vmem:[%s14599_s7 + $0x64] sm:$0xf]  ;;  %v8792_v24 = vor.u32 %v10621_v20, %v8789_v21  ;;  %v10604_v26 = vld [vmem:[%s14599_s7 + $0x34] sm:$0xf0] }
  0xf9   :  { %v453_v48 = vpack.c.bf16 %v437_v47, %v408_v46  ;;  %v456_v33 = vpack.c.bf16 %v445_v5, %v416_v4  ;;  %v555_v35 = vpack.c.bf16 %v545_v28, %v543_v27  ;;  %v556_v36 = vpack.c.bf16 %v546_v30, %v544_v29  ;;  %v10607_v4 = vld [vmem:[%s14599_s7 + $0x54] sm:$0xf]  ;;  %v8733_v5 = vld [vmem:[%s14599_s7 + $0x58] sm:$0xf0]  ;;  %v8779_v27 = vld [vmem:[%s14599_s7 + $0xb0] sm:$0xf] }
  0xfa   :  { %v8736_v7 = vor.u32 %v10607_v4, %v8733_v5  ;;  %v8716_v28 = vor.u32 %v10604_v26, %v8715_v25  ;;  %v10620_v29 = vld [vmem:[%s14599_s7 + $0xb4] sm:$0xf0]  ;;  %v10603_v30 = vld [vmem:[%s14599_s7 + $0x34] sm:$0xf]  ;;  %v10614_v4 = vld [vmem:[%s14599_s7 + $0x84] sm:$0xf0] }
  0xfb   :  { %v483_v51 = vunpack.c.l.bf16 %v453_v48  ;;  %v484_v52 = vunpack.c.h.bf16 %v453_v48  ;;  %v489_v37 = vunpack.c.l.bf16 %v456_v33  ;;  %v490_v38 = vunpack.c.h.bf16 %v456_v33  ;;  %v10597_v5 = vld [vmem:[%s14599_s7 + $0x4] sm:$0xf] }
  0xfd   :  { %v501_v55 = vadd.f32 %v11962_v22, %v483_v51  ;;  %v502_v56 = vadd.f32 %v11964_v23, %v484_v52  ;;  %v418_v31 = vpop.f32.mrf.mxu2  ;;  %v507_v41 = vadd.f32 %v11962_v22, %v489_v37  ;;  %v508_v43 = vadd.f32 %v11964_v23, %v490_v38  ;;  %v8739_v51 = vld [vmem:[%s14599_s7 + $0x60] sm:$0xf]  ;;  %v10602_v38 = vld [vmem:[%s14599_s7 + $0x24] sm:$0xf0] }
  0xfe   :  { %v8707_v37 = vld [vmem:[%s14599_s7 + $0x20] sm:$0xf] }
  0xff   :  { %v541_v58 = vmax.f32 %v501_v55, 0.0  ;;  %v542_v60 = vmax.f32 %v502_v56, 0.0  ;;  %v547_v45 = vmax.f32 %v507_v41, 0.0  ;;  %v548_v47 = vmax.f32 %v508_v43, 0.0  ;;  %v8741_v55 = vld [vmem:[%s14599_s7 + $0x68] sm:$0xf0] }
 0x100   :  { %v447_v32 = vpop.f32.mrf.mxu3  ;;  %v10618_v41 = vld [vmem:[%s14599_s7 + $0xa4] sm:$0xf0] }
 0x101   :  { %v553_v63 = vpack.c.bf16 %v541_v58, %v539_v57  ;;  %v554_v1 = vpack.c.bf16 %v542_v60, %v540_v59  ;;  %v457_v34 = vpack.c.bf16 %v447_v32, %v418_v31  ;;  %v8744_v57 = vor.u32 %v10609_v54, %v8741_v55  ;;  %v10625_v58 = vld [vmem:[%s14599_s7 + $0xe4] sm:$0xf]  ;;  %v8805_v59 = vld [vmem:[%s14599_s7 + $0xe8] sm:$0xf0]  ;;  %v8717_v31 = vld [vmem:[%s14599_s7 + $0x38] sm:$0xf0] }
 0x102   :  { %v8808_v60 = vor.u32 %v10625_v58, %v8805_v59  ;;  %v8780_v32 = vor.u32 %v10620_v29, %v8779_v27  ;;  %v8720_v33 = vor.u32 %v10603_v30, %v8717_v31  ;;  %v8701_v54 = vld [vmem:[%s14599_s7 + $0x18] sm:$0xf0] }
 0x103   :  { %766 = vmatmul.bf16.gmra.mxu2 %v553_v63  ;;  %795 = vmatmul.bf16.gmra.mxu3 %v554_v1  ;;  %v491_v39 = vunpack.c.l.bf16 %v457_v34  ;;  %v492_v40 = vunpack.c.h.bf16 %v457_v34  ;;  %v10619_v34 = vld [vmem:[%s14599_s7 + $0xb4] sm:$0xf]  ;;  %v8765_v58 = vld [vmem:[%s14599_s7 + $0x98] sm:$0xf0] }
 0x104   :  { %824 = vmatmul.bf16.gmra.mxu0 %v553_v63  ;;  %853 = vmatmul.bf16.gmra.mxu1 %v554_v1  ;;  %v8795_v63 = vld [vmem:[%s14599_s7 + $0xd0] sm:$0xf]  ;;  %v8732_v1 = vor.u32 %v10608_v62, %v8731_v61  ;;  %v8691_v62 = vld [vmem:[%s14599_s7] sm:$0xf] }
 0x105   :  { %v509_v42 = vadd.f32 %v11962_v22, %v491_v39  ;;  %v510_v44 = vadd.f32 %v11964_v23, %v492_v40  ;;  %v10610_v22 = vld [vmem:[%s14599_s7 + $0x64] sm:$0xf0]  ;;  %v8803_v23 = vld [vmem:[%s14599_s7 + $0xe0] sm:$0xf]  ;;  %1231 = vmatpush.bf16.msra.mxu0 %v8744_v57  ;;  %1260 = vmatpush.bf16.msra.mxu1 %v8808_v60  ;;  %v8796_v6 = vor.u32 %v10624_v3, %v8795_v63  ;;  %v10615_v57 = vld [vmem:[%s14599_s7 + $0x94] sm:$0xf] }
 0x106   :  { %v8740_v52 = vor.u32 %v10610_v22, %v8739_v51  ;;  %v8804_v56 = vor.u32 %v10626_v53, %v8803_v23  ;;  %v8708_v39 = vor.u32 %v10602_v38, %v8707_v37  ;;  %v8771_v40 = vld [vmem:[%s14599_s7 + $0xa0] sm:$0xf]  ;;  %v10600_v51 = vld [vmem:[%s14599_s7 + $0x14] sm:$0xf0]  ;;  %v8763_v22 = vld [vmem:[%s14599_s7 + $0x90] sm:$0xf]  ;;  %v8768_v61 = vor.u32 %v10615_v57, %v8765_v58 }
 0x107   :  { %v549_v46 = vmax.f32 %v509_v42, 0.0  ;;  %v550_v48 = vmax.f32 %v510_v44, 0.0  ;;  %v10601_v42 = vld [vmem:[%s14599_s7 + $0x24] sm:$0xf]  ;;  %v8772_v43 = vor.u32 %v10618_v41, %v8771_v40  ;;  %v8709_v44 = vld [vmem:[%s14599_s7 + $0x28] sm:$0xf0] }
 0x108   :  { %1173 = vmatpush.bf16.msra.mxu2 %v8740_v52  ;;  %1202 = vmatpush.bf16.msra.mxu3 %v8804_v56  ;;  %v10616_v52 = vld [vmem:[%s14599_s7 + $0x94] sm:$0xf0]  ;;  %v10599_v53 = vld [vmem:[%s14599_s7 + $0x14] sm:$0xf]  ;;  %v10598_v63 = vld [vmem:[%s14599_s7 + $0x4] sm:$0xf0] }
 0x109   :  { %v557_v49 = vpack.c.bf16 %v549_v46, %v547_v45  ;;  %v558_v50 = vpack.c.bf16 %v550_v48, %v548_v47  ;;  %1232 = vmatpush.bf16.msra.mxu0 %v8736_v7  ;;  %1261 = vmatpush.bf16.msra.mxu1 %v8800_v10  ;;  %v10617_v45 = vld [vmem:[%s14599_s7 + $0xa4] sm:$0xf]  ;;  %v8773_v46 = vld [vmem:[%s14599_s7 + $0xa8] sm:$0xf0]  ;;  %v8712_v48 = vor.u32 %v10601_v42, %v8709_v44 }
 0x10a   :  { %v560_v47 = vld [vmem:[#allocation4 + $0x1] ss:$8 sm:$0x3]  ;;  %v8764_v55 = vor.u32 %v10616_v52, %v8763_v22  ;;  %v8704_v56 = vor.u32 %v10599_v53, %v8701_v54  ;;  %v8692_v3 = vor.u32 %v10598_v63, %v8691_v62  ;;  %v8757_v10 = vld [vmem:[%s14599_s7 + $0x88] sm:$0xf0] }
 0x10b   :  { %v878_v59 = vperm.slane %v560_v47, 0  ;;  %v879_v60 = vperm.slane %v560_v47, 1  ;;  %v8760_v11 = vor.u32 %v10613_v9, %v8757_v10 }
 0x10c   :  { %1174 = vmatpush.bf16.msra.mxu2 %v8732_v1  ;;  %1203 = vmatpush.bf16.msra.mxu3 %v8796_v6  ;;  %v8755_v1 = vld [vmem:[%s14599_s7 + $0x80] sm:$0xf]  ;;  %v8693_v6 = vld [vmem:[%s14599_s7 + $0x8] sm:$0xf0] }
 0x10d   :  { %1233 = vmatpush.bf16.msra.mxu0 %v8728_v19  ;;  %1262 = vmatpush.bf16.msra.mxu1 %v8792_v24  ;;  %v8756_v7 = vor.u32 %v10614_v4, %v8755_v1  ;;  %v8696_v8 = vor.u32 %v10597_v5, %v8693_v6  ;;  %v882_v12 = vpack.c.bf16 %v879_v60, %v878_v59 }
 0x10f   :  { %v884_v13 = vunpack.c.l.b16 %v882_v12 }
 0x110   :  { %1175 = vmatpush.bf16.msra.mxu2 %v8724_v14  ;;  %1204 = vmatpush.bf16.msra.mxu3 %v8788_v18  ;;  %v885_v14 = vunpack.c.h.b16 %v882_v12 }
 0x111   :  { %1234 = vmatpush.bf16.msra.mxu0 %v8720_v33  ;;  %v886_v17 = vpack.c.b16 %v884_v13, %v884_v13 }
 0x112   :  { %v887_v18 = vpack.c.b16 %v885_v14, %v885_v14 }
 0x113   :  { %771 = vmatmul.bf16.gmra.mxu2 %v555_v35  ;;  %800 = vmatmul.bf16.gmra.mxu3 %v556_v36  ;;  %v889_v21 = vpack.i.b16 %v886_v17, %v886_v17 }
 0x114   :  { %829 = vmatmul.bf16.gmra.mxu0 %v555_v35  ;;  %858 = vmatmul.bf16.gmra.mxu1 %v556_v36  ;;  %v8781_v35 = vld [vmem:[%s14599_s7 + $0xb8] sm:$0xf0]  ;;  %v893_v25 = vpack.i.b16 %v887_v18, %v887_v18 }
 0x115   :  { %1176 = vmatpush.bf16.msra.mxu2 %v8716_v28  ;;  %v8784_v36 = vor.u32 %v10619_v34, %v8781_v35  ;;  %1205 = vmatpush.bf16.msra.mxu3 %v8780_v32  ;;  %v891_v30 = vperm.slane %v889_v21, 0 }
 0x116   :  { %1235 = vmatpush.bf16.msra.mxu0 %v8712_v48  ;;  %v895_v31 = vperm.slane %v893_v25, 0 }
 0x117   :  { %1263 = vmatpush.bf16.msra.mxu1 %v8784_v36  ;;  %v12174_v33 = vunpack.c.l.bf16 %v891_v30  ;;  %v8939_v30 = vld [vmem:[%s14600_s5 + $0xf0] sm:$0xf] }
 0x118   :  { %v12176_v37 = vunpack.c.l.bf16 %v895_v31 }
 0x119   :  { %1177 = vmatpush.bf16.msra.mxu2 %v8708_v39  ;;  %1206 = vmatpush.bf16.msra.mxu3 %v8772_v43 }
 0x11a   :  { %1236 = vmatpush.bf16.msra.mxu0 %v8704_v56 }
 0x11d   :  { %1207 = vmatpush.bf16.msra.mxu3 %v8764_v55 }
 0x11e   :  { %1237 = vmatpush.bf16.msra.mxu0 %v8696_v8 }
 0x121   :  { %1208 = vmatpush.bf16.msra.mxu3 %v8756_v7 }
 0x123   :  { %776 = vmatmul.bf16.gmra.mxu2 %v557_v49  ;;  %805 = vmatmul.bf16.gmra.mxu3 %v558_v50 }
 0x124   :  { %834 = vmatmul.bf16.gmra.mxu0 %v557_v49  ;;  %863 = vmatmul.bf16.gmra.mxu1 %v558_v50  ;;  %v8776_v49 = vor.u32 %v10617_v45, %v8773_v46  ;;  %v8699_v50 = vld [vmem:[%s14599_s7 + $0x10] sm:$0xf] }
 0x125   :  { %v8700_v23 = vor.u32 %v10600_v51, %v8699_v50 }
 0x126   :  { %1264 = vmatpush.bf16.msra.mxu1 %v8776_v49 }
 0x127   :  { %1178 = vmatpush.bf16.msra.mxu2 %v8700_v23 }
 0x12a   :  { %1265 = vmatpush.bf16.msra.mxu1 %v8768_v61 }
 0x12b   :  { %1179 = vmatpush.bf16.msra.mxu2 %v8692_v3 }
 0x12e   :  { %1266 = vmatpush.bf16.msra.mxu1 %v8760_v11 }
 0x171   :  { %v820_v15 = vpop.f32.mrf.mxu0  ;;  %v849_v16 = vpop.f32.mrf.mxu1 }
 0x172   :  { %v850_v26 = vadd.f32 %v849_v16, %v820_v15 }
 0x176   :  { %v762_v19 = vpop.f32.mrf.mxu2  ;;  %v791_v20 = vpop.f32.mrf.mxu3 }
 0x177   :  { %v792_v24 = vadd.f32 %v791_v20, %v762_v19 }
 0x179   :  { %v822_v27 = vpop.f32.mrf.mxu0  ;;  %v851_v28 = vpop.f32.mrf.mxu1  ;;  %v869_v29 = vpack.c.bf16 %v850_v26, %v792_v24 }
 0x17a   :  { %v852_v38 = vadd.f32 %v851_v28, %v822_v27  ;;  %v8875_v28 = vld [vmem:[%s14600_s5 + $0x70] sm:$0xf] }
 0x17b   :  { %v896_v32 = vunpack.c.l.bf16 %v869_v29  ;;  %v897_v36 = vunpack.c.h.bf16 %v869_v29  ;;  %v10644_v29 = vld [vmem:[%s14600_s5 + $0x74] sm:$0xf0] }
 0x17c   :  { %v8876_v31 = vor.u32 %v10644_v29, %v8875_v28  ;;  %v10658_v29 = vld [vmem:[%s14600_s5 + $0xe4] sm:$0xf0] }
 0x17d   :  { %v914_v43 = vadd.f32 %v12174_v33, %v896_v32  ;;  %v915_v44 = vadd.f32 %v12176_v37, %v897_v36  ;;  %v10660_v32 = vld [vmem:[%s14600_s5 + $0xf4] sm:$0xf0] }
 0x17e   :  { %v764_v34 = vpop.f32.mrf.mxu2  ;;  %v793_v35 = vpop.f32.mrf.mxu3  ;;  %1591 = vmatpush.bf16.msrb.mxu2 %v8876_v31  ;;  %v8869_v31 = vld [vmem:[%s14600_s5 + $0x68] sm:$0xf0] }
 0x17f   :  { %v794_v39 = vadd.f32 %v793_v35, %v764_v34  ;;  %v954_v49 = vmax.f32 %v914_v43, 0.0  ;;  %v955_v22 = vmax.f32 %v915_v44, 0.0  ;;  %v10643_v34 = vld [vmem:[%s14600_s5 + $0x74] sm:$0xf]  ;;  %v8877_v35 = vld [vmem:[%s14600_s5 + $0x78] sm:$0xf0] }
 0x180   :  { %v8941_v43 = vld [vmem:[%s14600_s5 + $0xf8] sm:$0xf0] }
 0x181   :  { %v870_v40 = vpack.c.bf16 %v852_v38, %v794_v39  ;;  %v825_v41 = vpop.f32.mrf.mxu0  ;;  %v854_v42 = vpop.f32.mrf.mxu1 }
 0x182   :  { %v855_v54 = vadd.f32 %v854_v42, %v825_v41  ;;  %v8880_v41 = vor.u32 %v10643_v34, %v8877_v35  ;;  %v10659_v42 = vld [vmem:[%s14600_s5 + $0xf4] sm:$0xf]  ;;  %v10657_v35 = vld [vmem:[%s14600_s5 + $0xe4] sm:$0xf] }
 0x183   :  { %v898_v45 = vunpack.c.l.bf16 %v870_v40  ;;  %v899_v46 = vunpack.c.h.bf16 %v870_v40  ;;  %v8940_v40 = vor.u32 %v10660_v32, %v8939_v30  ;;  %v10641_v30 = vld [vmem:[%s14600_s5 + $0x64] sm:$0xf] }
 0x184   :  { %1649 = vmatpush.bf16.msrb.mxu0 %v8880_v41  ;;  %v8872_v34 = vor.u32 %v10641_v30, %v8869_v31  ;;  %v8923_v41 = vld [vmem:[%s14600_s5 + $0xd0] sm:$0xf]  ;;  %v8829_v30 = vld [vmem:[%s14600_s5 + $0x18] sm:$0xf0] }
 0x185   :  { %v916_v47 = vadd.f32 %v12174_v33, %v898_v45  ;;  %v917_v48 = vadd.f32 %v12176_v37, %v899_v46  ;;  %1620 = vmatpush.bf16.msrb.mxu3 %v8940_v40  ;;  %v10640_v40 = vld [vmem:[%s14600_s5 + $0x54] sm:$0xf0] }
 0x186   :  { %v767_v50 = vpop.f32.mrf.mxu2  ;;  %v796_v51 = vpop.f32.mrf.mxu3 }
 0x187   :  { %v956_v23 = vmax.f32 %v916_v47, 0.0  ;;  %v957_v52 = vmax.f32 %v917_v48, 0.0  ;;  %v797_v53 = vadd.f32 %v796_v51, %v767_v50  ;;  %v8944_v47 = vor.u32 %v10659_v42, %v8941_v43  ;;  %v10656_v43 = vld [vmem:[%s14600_s5 + $0xd4] sm:$0xf0] }
 0x188   :  { %1650 = vmatpush.bf16.msrb.mxu0 %v8872_v34  ;;  %v10647_v34 = vld [vmem:[%s14600_s5 + $0x94] sm:$0xf] }
 0x189   :  { %v827_v55 = vpop.f32.mrf.mxu0  ;;  %v856_v56 = vpop.f32.mrf.mxu1  ;;  %v970_v57 = vpack.c.bf16 %v956_v23, %v954_v49  ;;  %v971_v58 = vpack.c.bf16 %v957_v52, %v955_v22  ;;  %v871_v59 = vpack.c.bf16 %v855_v54, %v797_v53  ;;  %1678 = vmatpush.bf16.msrb.mxu1 %v8944_v47 }
 0x18a   :  { %v857_v1 = vadd.f32 %v856_v56, %v827_v55 }
 0x18b   :  { %1180 = vmatmul.bf16.vlgmr.msra.gmra.mxu2 %v970_v57  ;;  %1209 = vmatmul.bf16.vlgmr.msra.gmra.mxu3 %v971_v58  ;;  %v900_v60 = vunpack.c.l.bf16 %v871_v59  ;;  %v901_v63 = vunpack.c.h.bf16 %v871_v59 }
 0x18c   :  { %1238 = vmatmul.bf16.vlgmr.msra.gmra.mxu0 %v970_v57  ;;  %1267 = vmatmul.bf16.vlgmr.msra.gmra.mxu1 %v971_v58 }
 0x18d   :  { %v918_v7 = vadd.f32 %v12174_v33, %v900_v60  ;;  %v919_v10 = vadd.f32 %v12176_v37, %v901_v63 }
 0x18e   :  { %v769_v61 = vpop.f32.mrf.mxu2  ;;  %v798_v62 = vpop.f32.mrf.mxu3 }
 0x18f   :  { %v799_v3 = vadd.f32 %v798_v62, %v769_v61  ;;  %v958_v15 = vmax.f32 %v918_v7, 0.0  ;;  %v959_v18 = vmax.f32 %v919_v10, 0.0 }
 0x191   :  { %v872_v4 = vpack.c.bf16 %v857_v1, %v799_v3  ;;  %v830_v5 = vpop.f32.mrf.mxu0  ;;  %v859_v6 = vpop.f32.mrf.mxu1 }
 0x192   :  { %v860_v20 = vadd.f32 %v859_v6, %v830_v5 }
 0x193   :  { %v902_v8 = vunpack.c.l.bf16 %v872_v4  ;;  %v903_v9 = vunpack.c.h.bf16 %v872_v4 }
 0x195   :  { %v920_v11 = vadd.f32 %v12174_v33, %v902_v8  ;;  %v921_v12 = vadd.f32 %v12176_v37, %v903_v9 }
 0x196   :  { %v772_v13 = vpop.f32.mrf.mxu2  ;;  %v801_v14 = vpop.f32.mrf.mxu3 }
 0x197   :  { %v802_v16 = vadd.f32 %v801_v14, %v772_v13  ;;  %v960_v17 = vmax.f32 %v920_v11, 0.0  ;;  %v961_v19 = vmax.f32 %v921_v12, 0.0 }
 0x199   :  { %v832_v21 = vpop.f32.mrf.mxu0  ;;  %v861_v24 = vpop.f32.mrf.mxu1  ;;  %v972_v25 = vpack.c.bf16 %v960_v17, %v958_v15  ;;  %v973_v26 = vpack.c.bf16 %v961_v19, %v959_v18  ;;  %v873_v27 = vpack.c.bf16 %v860_v20, %v802_v16 }
 0x19a   :  { %v862_v45 = vadd.f32 %v861_v24, %v832_v21 }
 0x19b   :  { %1185 = vmatmul.bf16.gmra.mxu2 %v972_v25  ;;  %1214 = vmatmul.bf16.gmra.mxu3 %v973_v26  ;;  %v904_v36 = vunpack.c.l.bf16 %v873_v27  ;;  %v905_v44 = vunpack.c.h.bf16 %v873_v27  ;;  %v8867_v27 = vld [vmem:[%s14600_s5 + $0x60] sm:$0xf] }
 0x19c   :  { %1243 = vmatmul.bf16.gmra.mxu0 %v972_v25  ;;  %1272 = vmatmul.bf16.gmra.mxu1 %v973_v26 }
 0x19d   :  { %v922_v51 = vadd.f32 %v12174_v33, %v904_v36  ;;  %v923_v52 = vadd.f32 %v12176_v37, %v905_v44  ;;  %v8933_v36 = vld [vmem:[%s14600_s5 + $0xe8] sm:$0xf0]  ;;  %v10639_v44 = vld [vmem:[%s14600_s5 + $0x54] sm:$0xf] }
 0x19e   :  { %v774_v38 = vpop.f32.mrf.mxu2  ;;  %v803_v39 = vpop.f32.mrf.mxu3 }
 0x19f   :  { %v804_v46 = vadd.f32 %v803_v39, %v774_v38  ;;  %v962_v57 = vmax.f32 %v922_v51, 0.0  ;;  %v963_v60 = vmax.f32 %v923_v52, 0.0  ;;  %v8936_v38 = vor.u32 %v10657_v35, %v8933_v36  ;;  %v8859_v39 = vld [vmem:[%s14600_s5 + $0x50] sm:$0xf]  ;;  %v8851_v51 = vld [vmem:[%s14600_s5 + $0x40] sm:$0xf] }
 0x1a0   :  { %v8860_v42 = vor.u32 %v10640_v40, %v8859_v39  ;;  %v8893_v35 = vld [vmem:[%s14600_s5 + $0x98] sm:$0xf0]  ;;  %v8819_v40 = vld [vmem:[%s14600_s5] sm:$0xf] }
 0x1a1   :  { %v874_v48 = vpack.c.bf16 %v862_v45, %v804_v46  ;;  %v835_v49 = vpop.f32.mrf.mxu0  ;;  %v864_v50 = vpop.f32.mrf.mxu1  ;;  %1679 = vmatpush.bf16.msrb.mxu1 %v8936_v38  ;;  %v8861_v45 = vld [vmem:[%s14600_s5 + $0x58] sm:$0xf0]  ;;  %v8924_v46 = vor.u32 %v10656_v43, %v8923_v41  ;;  %v8896_v39 = vor.u32 %v10647_v34, %v8893_v35  ;;  %v10630_v41 = vld [vmem:[%s14600_s5 + $0x4] sm:$0xf0] }
 0x1a2   :  { %v865_v62 = vadd.f32 %v864_v50, %v835_v49  ;;  %v8864_v47 = vor.u32 %v10639_v44, %v8861_v45  ;;  %v8925_v49 = vld [vmem:[%s14600_s5 + $0xd8] sm:$0xf0]  ;;  %v8820_v43 = vor.u32 %v10630_v41, %v8819_v40  ;;  %v10646_v44 = vld [vmem:[%s14600_s5 + $0x84] sm:$0xf0]  ;;  %v10629_v45 = vld [vmem:[%s14600_s5 + $0x4] sm:$0xf] }
 0x1a3   :  { %v906_v22 = vunpack.c.l.bf16 %v874_v48  ;;  %v907_v23 = vunpack.c.h.bf16 %v874_v48  ;;  %v10655_v48 = vld [vmem:[%s14600_s5 + $0xd4] sm:$0xf] }
 0x1a4   :  { %v8928_v50 = vor.u32 %v10655_v48, %v8925_v49  ;;  %1651 = vmatpush.bf16.msrb.mxu0 %v8864_v47  ;;  %v10645_v49 = vld [vmem:[%s14600_s5 + $0x84] sm:$0xf] }
 0x1a5   :  { %v924_v53 = vadd.f32 %v12174_v33, %v906_v22  ;;  %v925_v54 = vadd.f32 %v12176_v37, %v907_v23  ;;  %v10638_v22 = vld [vmem:[%s14600_s5 + $0x44] sm:$0xf0]  ;;  %v8915_v23 = vld [vmem:[%s14600_s5 + $0xc0] sm:$0xf] }
 0x1a6   :  { %v777_v55 = vpop.f32.mrf.mxu2  ;;  %v806_v56 = vpop.f32.mrf.mxu3  ;;  %1680 = vmatpush.bf16.msrb.mxu1 %v8928_v50  ;;  %v8852_v52 = vor.u32 %v10638_v22, %v8851_v51  ;;  %v8885_v50 = vld [vmem:[%s14600_s5 + $0x88] sm:$0xf0] }
 0x1a7   :  { %v807_v58 = vadd.f32 %v806_v56, %v777_v55  ;;  %v964_v59 = vmax.f32 %v924_v53, 0.0  ;;  %v965_v61 = vmax.f32 %v925_v54, 0.0  ;;  %v10654_v53 = vld [vmem:[%s14600_s5 + $0xc4] sm:$0xf0]  ;;  %v10637_v54 = vld [vmem:[%s14600_s5 + $0x44] sm:$0xf]  ;;  %v8888_v51 = vor.u32 %v10645_v49, %v8885_v50 }
 0x1a8   :  { %v8853_v55 = vld [vmem:[%s14600_s5 + $0x48] sm:$0xf0]  ;;  %v8916_v56 = vor.u32 %v10654_v53, %v8915_v23 }
 0x1a9   :  { %v974_v63 = vpack.c.bf16 %v964_v59, %v962_v57  ;;  %v975_v1 = vpack.c.bf16 %v965_v61, %v963_v60  ;;  %v875_v3 = vpack.c.bf16 %v865_v62, %v807_v58  ;;  %v837_v4 = vpop.f32.mrf.mxu0  ;;  %v866_v5 = vpop.f32.mrf.mxu1  ;;  %v8856_v57 = vor.u32 %v10637_v54, %v8853_v55  ;;  %v10653_v58 = vld [vmem:[%s14600_s5 + $0xc4] sm:$0xf]  ;;  %v8917_v59 = vld [vmem:[%s14600_s5 + $0xc8] sm:$0xf0]  ;;  %v8843_v61 = vld [vmem:[%s14600_s5 + $0x30] sm:$0xf] }
 0x1aa   :  { %v867_v10 = vadd.f32 %v866_v5, %v837_v4  ;;  %v8920_v60 = vor.u32 %v10653_v58, %v8917_v59  ;;  %v10636_v62 = vld [vmem:[%s14600_s5 + $0x34] sm:$0xf0]  ;;  %v10635_v4 = vld [vmem:[%s14600_s5 + $0x34] sm:$0xf]  ;;  %v8845_v5 = vld [vmem:[%s14600_s5 + $0x38] sm:$0xf0] }
 0x1ab   :  { %1190 = vmatmul.bf16.gmra.mxu2 %v974_v63  ;;  %1219 = vmatmul.bf16.gmra.mxu3 %v975_v1  ;;  %v908_v8 = vunpack.c.l.bf16 %v875_v3  ;;  %v909_v9 = vunpack.c.h.bf16 %v875_v3  ;;  %v10652_v3 = vld [vmem:[%s14600_s5 + $0xb4] sm:$0xf0] }
 0x1ac   :  { %1248 = vmatmul.bf16.gmra.mxu0 %v974_v63  ;;  %1277 = vmatmul.bf16.gmra.mxu1 %v975_v1  ;;  %v8907_v63 = vld [vmem:[%s14600_s5 + $0xb0] sm:$0xf]  ;;  %v8844_v1 = vor.u32 %v10636_v62, %v8843_v61 }
 0x1ad   :  { %v926_v15 = vadd.f32 %v12174_v33, %v908_v8  ;;  %v927_v16 = vadd.f32 %v12176_v37, %v909_v9  ;;  %1652 = vmatpush.bf16.msrb.mxu0 %v8856_v57  ;;  %1681 = vmatpush.bf16.msrb.mxu1 %v8920_v60  ;;  %v10651_v8 = vld [vmem:[%s14600_s5 + $0xb4] sm:$0xf]  ;;  %v8909_v9 = vld [vmem:[%s14600_s5 + $0xb8] sm:$0xf0] }
 0x1ae   :  { %v779_v6 = vpop.f32.mrf.mxu2  ;;  %v808_v7 = vpop.f32.mrf.mxu3 }
 0x1af   :  { %v809_v11 = vadd.f32 %v808_v7, %v779_v6  ;;  %v966_v19 = vmax.f32 %v926_v15, 0.0  ;;  %v967_v21 = vmax.f32 %v927_v16, 0.0  ;;  %v8908_v6 = vor.u32 %v10652_v3, %v8907_v63  ;;  %v10650_v15 = vld [vmem:[%s14600_s5 + $0xa4] sm:$0xf0]  ;;  %v10633_v16 = vld [vmem:[%s14600_s5 + $0x24] sm:$0xf] }
 0x1b0   :  { %v8848_v7 = vor.u32 %v10635_v4, %v8845_v5 }
 0x1b1   :  { %v876_v12 = vpack.c.bf16 %v867_v10, %v809_v11  ;;  %v8912_v10 = vor.u32 %v10651_v8, %v8909_v9  ;;  %v8835_v11 = vld [vmem:[%s14600_s5 + $0x20] sm:$0xf] }
 0x1b2   :  { %1653 = vmatpush.bf16.msrb.mxu0 %v8848_v7 }
 0x1b3   :  { %v910_v13 = vunpack.c.l.bf16 %v876_v12  ;;  %v911_v14 = vunpack.c.h.bf16 %v876_v12  ;;  %v10634_v12 = vld [vmem:[%s14600_s5 + $0x24] sm:$0xf0]  ;;  %1682 = vmatpush.bf16.msrb.mxu1 %v8912_v10 }
 0x1b5   :  { %v928_v17 = vadd.f32 %v12174_v33, %v910_v13  ;;  %v929_v18 = vadd.f32 %v12176_v37, %v911_v14  ;;  %v10642_v33 = vld [vmem:[%s14600_s5 + $0x64] sm:$0xf0]  ;;  %v8931_v37 = vld [vmem:[%s14600_s5 + $0xe0] sm:$0xf]  ;;  %v8836_v13 = vor.u32 %v10634_v12, %v8835_v11 }
 0x1b6   :  { %v8868_v28 = vor.u32 %v10642_v33, %v8867_v27  ;;  %v8932_v32 = vor.u32 %v10658_v29, %v8931_v37  ;;  %v8899_v14 = vld [vmem:[%s14600_s5 + $0xa0] sm:$0xf]  ;;  %v10632_v27 = vld [vmem:[%s14600_s5 + $0x14] sm:$0xf0]  ;;  %v8891_v33 = vld [vmem:[%s14600_s5 + $0x90] sm:$0xf] }
 0x1b7   :  { %v968_v20 = vmax.f32 %v928_v17, 0.0  ;;  %v969_v24 = vmax.f32 %v929_v18, 0.0  ;;  %v8900_v17 = vor.u32 %v10650_v15, %v8899_v14  ;;  %v8837_v18 = vld [vmem:[%s14600_s5 + $0x28] sm:$0xf0]  ;;  %v10631_v29 = vld [vmem:[%s14600_s5 + $0x14] sm:$0xf] }
 0x1b8   :  { %1592 = vmatpush.bf16.msrb.mxu2 %v8868_v28  ;;  %1621 = vmatpush.bf16.msrb.mxu3 %v8932_v32  ;;  %v10648_v28 = vld [vmem:[%s14600_s5 + $0x94] sm:$0xf0]  ;;  %v8832_v32 = vor.u32 %v10631_v29, %v8829_v30 }
 0x1b9   :  { %v976_v25 = vpack.c.bf16 %v968_v20, %v966_v19  ;;  %v977_v26 = vpack.c.bf16 %v969_v24, %v967_v21  ;;  %v10649_v19 = vld [vmem:[%s14600_s5 + $0xa4] sm:$0xf]  ;;  %v8901_v20 = vld [vmem:[%s14600_s5 + $0xa8] sm:$0xf0]  ;;  %v8840_v24 = vor.u32 %v10633_v16, %v8837_v18  ;;  %v8892_v31 = vor.u32 %v10648_v28, %v8891_v33 }
 0x1ba   :  { %v979_v21 = vld [vmem:[#allocation4 + $0x2] ss:$8 sm:$0x3] }
 0x1bb   :  { %1195 = vmatmul.bf16.gmra.mxu2 %v976_v25  ;;  %1224 = vmatmul.bf16.gmra.mxu3 %v977_v26  ;;  %v1297_v36 = vperm.slane %v979_v21, 0  ;;  %v1298_v38 = vperm.slane %v979_v21, 1 }
 0x1bc   :  { %1253 = vmatmul.bf16.gmra.mxu0 %v976_v25  ;;  %1282 = vmatmul.bf16.gmra.mxu1 %v977_v26  ;;  %v8904_v25 = vor.u32 %v10649_v19, %v8901_v20  ;;  %v8827_v26 = vld [vmem:[%s14600_s5 + $0x10] sm:$0xf] }
 0x1bd   :  { %1593 = vmatpush.bf16.msrb.mxu2 %v8860_v42  ;;  %1622 = vmatpush.bf16.msrb.mxu3 %v8924_v46  ;;  %v8828_v37 = vor.u32 %v10632_v27, %v8827_v26  ;;  %v8883_v42 = vld [vmem:[%s14600_s5 + $0x80] sm:$0xf]  ;;  %v8821_v46 = vld [vmem:[%s14600_s5 + $0x8] sm:$0xf0]  ;;  %v1301_v22 = vpack.c.bf16 %v1298_v38, %v1297_v36 }
 0x1be   :  { %1654 = vmatpush.bf16.msrb.mxu0 %v8840_v24  ;;  %1683 = vmatpush.bf16.msrb.mxu1 %v8904_v25  ;;  %v8884_v47 = vor.u32 %v10646_v44, %v8883_v42  ;;  %v8824_v48 = vor.u32 %v10629_v45, %v8821_v46 }
 0x1bf   :  { %v1303_v23 = vunpack.c.l.b16 %v1301_v22 }
 0x1c1   :  { %1594 = vmatpush.bf16.msrb.mxu2 %v8852_v52  ;;  %1623 = vmatpush.bf16.msrb.mxu3 %v8916_v56  ;;  %v1304_v52 = vunpack.c.h.b16 %v1301_v22  ;;  %v1305_v55 = vpack.c.b16 %v1303_v23, %v1303_v23 }
 0x1c2   :  { %1655 = vmatpush.bf16.msrb.mxu0 %v8832_v32  ;;  %1684 = vmatpush.bf16.msrb.mxu1 %v8896_v39 }
 0x1c3   :  { %v1306_v56 = vpack.c.b16 %v1304_v52, %v1304_v52  ;;  %v1308_v59 = vpack.i.b16 %v1305_v55, %v1305_v55 }
 0x1c5   :  { %1595 = vmatpush.bf16.msrb.mxu2 %v8844_v1  ;;  %1624 = vmatpush.bf16.msrb.mxu3 %v8908_v6  ;;  %v1312_v61 = vpack.i.b16 %v1306_v56, %v1306_v56  ;;  %v1310_v4 = vperm.slane %v1308_v59, 0 }
 0x1c6   :  { %1656 = vmatpush.bf16.msrb.mxu0 %v8824_v48  ;;  %1685 = vmatpush.bf16.msrb.mxu1 %v8888_v51 }
 0x1c7   :  { %v1314_v5 = vperm.slane %v1312_v61, 0  ;;  %v12386_v7 = vunpack.c.l.bf16 %v1310_v4  ;;  %v9067_v4 = vld [vmem:[%s14601_s8 + $0xf0] sm:$0xf] }
 0x1c9   :  { %1596 = vmatpush.bf16.msrb.mxu2 %v8836_v13  ;;  %1625 = vmatpush.bf16.msrb.mxu3 %v8900_v17  ;;  %v12388_v11 = vunpack.c.l.bf16 %v1314_v5 }
 0x1cd   :  { %1597 = vmatpush.bf16.msrb.mxu2 %v8828_v37  ;;  %1626 = vmatpush.bf16.msrb.mxu3 %v8892_v31 }
 0x1d1   :  { %1598 = vmatpush.bf16.msrb.mxu2 %v8820_v43  ;;  %1627 = vmatpush.bf16.msrb.mxu3 %v8884_v47 }
 0x209   :  { %v1239_v53 = vpop.f32.mrf.mxu0  ;;  %v1268_v54 = vpop.f32.mrf.mxu1 }
 0x20a   :  { %v1269_v62 = vadd.f32 %v1268_v54, %v1239_v53 }
 0x20e   :  { %v1181_v57 = vpop.f32.mrf.mxu2  ;;  %v1210_v58 = vpop.f32.mrf.mxu3 }
 0x20f   :  { %v1211_v60 = vadd.f32 %v1210_v58, %v1181_v57 }
 0x211   :  { %v1241_v63 = vpop.f32.mrf.mxu0  ;;  %v1270_v1 = vpop.f32.mrf.mxu1  ;;  %v1288_v3 = vpack.c.bf16 %v1269_v62, %v1211_v60 }
 0x212   :  { %v1271_v12 = vadd.f32 %v1270_v1, %v1241_v63  ;;  %v9003_v1 = vld [vmem:[%s14601_s8 + $0x70] sm:$0xf] }
 0x213   :  { %v1315_v6 = vunpack.c.l.bf16 %v1288_v3  ;;  %v1316_v10 = vunpack.c.h.bf16 %v1288_v3  ;;  %v10684_v3 = vld [vmem:[%s14601_s8 + $0x74] sm:$0xf0] }
 0x214   :  { %v9004_v5 = vor.u32 %v10684_v3, %v9003_v1  ;;  %v10698_v3 = vld [vmem:[%s14601_s8 + $0xe4] sm:$0xf0] }
 0x215   :  { %v1333_v17 = vadd.f32 %v12386_v7, %v1315_v6  ;;  %v1334_v18 = vadd.f32 %v12388_v11, %v1316_v10  ;;  %v10700_v6 = vld [vmem:[%s14601_s8 + $0xf4] sm:$0xf0] }
 0x216   :  { %v1183_v8 = vpop.f32.mrf.mxu2  ;;  %v1212_v9 = vpop.f32.mrf.mxu3  ;;  %2018 = vmatpush.bf16.msra.mxu2 %v9004_v5  ;;  %v8997_v5 = vld [vmem:[%s14601_s8 + $0x68] sm:$0xf0] }
 0x217   :  { %v1213_v13 = vadd.f32 %v1212_v9, %v1183_v8  ;;  %v1373_v25 = vmax.f32 %v1333_v17, 0.0  ;;  %v1374_v33 = vmax.f32 %v1334_v18, 0.0  ;;  %v10683_v8 = vld [vmem:[%s14601_s8 + $0x74] sm:$0xf]  ;;  %v9005_v9 = vld [vmem:[%s14601_s8 + $0x78] sm:$0xf0] }
 0x218   :  { %v9069_v17 = vld [vmem:[%s14601_s8 + $0xf8] sm:$0xf0] }
 0x219   :  { %v1289_v14 = vpack.c.bf16 %v1271_v12, %v1213_v13  ;;  %v1244_v15 = vpop.f32.mrf.mxu0  ;;  %v1273_v16 = vpop.f32.mrf.mxu1 }
 0x21a   :  { %v1274_v30 = vadd.f32 %v1273_v16, %v1244_v15  ;;  %v9008_v15 = vor.u32 %v10683_v8, %v9005_v9  ;;  %v10699_v16 = vld [vmem:[%s14601_s8 + $0xf4] sm:$0xf]  ;;  %v10697_v9 = vld [vmem:[%s14601_s8 + $0xe4] sm:$0xf] }
 0x21b   :  { %v1317_v19 = vunpack.c.l.bf16 %v1289_v14  ;;  %v1318_v20 = vunpack.c.h.bf16 %v1289_v14  ;;  %v9068_v14 = vor.u32 %v10700_v6, %v9067_v4  ;;  %v10681_v4 = vld [vmem:[%s14601_s8 + $0x64] sm:$0xf] }
 0x21c   :  { %2076 = vmatpush.bf16.msra.mxu0 %v9008_v15  ;;  %v9000_v8 = vor.u32 %v10681_v4, %v8997_v5  ;;  %v9051_v15 = vld [vmem:[%s14601_s8 + $0xd0] sm:$0xf]  ;;  %v8957_v4 = vld [vmem:[%s14601_s8 + $0x18] sm:$0xf0] }
 0x21d   :  { %v1335_v21 = vadd.f32 %v12386_v7, %v1317_v19  ;;  %v1336_v24 = vadd.f32 %v12388_v11, %v1318_v20  ;;  %2047 = vmatpush.bf16.msra.mxu3 %v9068_v14  ;;  %v10680_v14 = vld [vmem:[%s14601_s8 + $0x54] sm:$0xf0] }
 0x21e   :  { %v1186_v26 = vpop.f32.mrf.mxu2  ;;  %v1215_v27 = vpop.f32.mrf.mxu3 }
 0x21f   :  { %v1375_v37 = vmax.f32 %v1335_v21, 0.0  ;;  %v1376_v28 = vmax.f32 %v1336_v24, 0.0  ;;  %v1216_v29 = vadd.f32 %v1215_v27, %v1186_v26  ;;  %v9072_v21 = vor.u32 %v10699_v16, %v9069_v17  ;;  %v10696_v17 = vld [vmem:[%s14601_s8 + $0xd4] sm:$0xf0] }
 0x220   :  { %2077 = vmatpush.bf16.msra.mxu0 %v9000_v8  ;;  %v10687_v8 = vld [vmem:[%s14601_s8 + $0x94] sm:$0xf] }
 0x221   :  { %v1246_v31 = vpop.f32.mrf.mxu0  ;;  %v1275_v32 = vpop.f32.mrf.mxu1  ;;  %v1389_v34 = vpack.c.bf16 %v1375_v37, %v1373_v25  ;;  %v1390_v35 = vpack.c.bf16 %v1376_v28, %v1374_v33  ;;  %v1290_v36 = vpack.c.bf16 %v1274_v30, %v1216_v29  ;;  %2105 = vmatpush.bf16.msra.mxu1 %v9072_v21 }
 0x222   :  { %v1276_v42 = vadd.f32 %v1275_v32, %v1246_v31 }
 0x223   :  { %1599 = vmatmul.bf16.vlgmr.msrb.gmra.mxu2 %v1389_v34  ;;  %1628 = vmatmul.bf16.vlgmr.msrb.gmra.mxu3 %v1390_v35  ;;  %v1319_v38 = vunpack.c.l.bf16 %v1290_v36  ;;  %v1320_v41 = vunpack.c.h.bf16 %v1290_v36 }
 0x224   :  { %1657 = vmatmul.bf16.vlgmr.msrb.gmra.mxu0 %v1389_v34  ;;  %1686 = vmatmul.bf16.vlgmr.msrb.gmra.mxu1 %v1390_v35 }
 0x225   :  { %v1337_v47 = vadd.f32 %v12386_v7, %v1319_v38  ;;  %v1338_v50 = vadd.f32 %v12388_v11, %v1320_v41 }
 0x226   :  { %v1188_v39 = vpop.f32.mrf.mxu2  ;;  %v1217_v40 = vpop.f32.mrf.mxu3 }
 0x227   :  { %v1218_v43 = vadd.f32 %v1217_v40, %v1188_v39  ;;  %v1377_v53 = vmax.f32 %v1337_v47, 0.0  ;;  %v1378_v56 = vmax.f32 %v1338_v50, 0.0 }
 0x229   :  { %v1291_v44 = vpack.c.bf16 %v1276_v42, %v1218_v43  ;;  %v1249_v45 = vpop.f32.mrf.mxu0  ;;  %v1278_v46 = vpop.f32.mrf.mxu1 }
 0x22a   :  { %v1279_v58 = vadd.f32 %v1278_v46, %v1249_v45 }
 0x22b   :  { %v1321_v48 = vunpack.c.l.bf16 %v1291_v44  ;;  %v1322_v49 = vunpack.c.h.bf16 %v1291_v44 }
 0x22d   :  { %v1339_v51 = vadd.f32 %v12386_v7, %v1321_v48  ;;  %v1340_v22 = vadd.f32 %v12388_v11, %v1322_v49 }
 0x22e   :  { %v1191_v23 = vpop.f32.mrf.mxu2  ;;  %v1220_v52 = vpop.f32.mrf.mxu3 }
 0x22f   :  { %v1221_v54 = vadd.f32 %v1220_v52, %v1191_v23  ;;  %v1379_v55 = vmax.f32 %v1339_v51, 0.0  ;;  %v1380_v57 = vmax.f32 %v1340_v22, 0.0 }
 0x231   :  { %v1251_v59 = vpop.f32.mrf.mxu0  ;;  %v1280_v60 = vpop.f32.mrf.mxu1  ;;  %v1391_v61 = vpack.c.bf16 %v1379_v55, %v1377_v53  ;;  %v1392_v62 = vpack.c.bf16 %v1380_v57, %v1378_v56  ;;  %v1292_v63 = vpack.c.bf16 %v1279_v58, %v1221_v54 }
 0x232   :  { %v1281_v19 = vadd.f32 %v1280_v60, %v1251_v59 }
 0x233   :  { %1604 = vmatmul.bf16.gmra.mxu2 %v1391_v61  ;;  %1633 = vmatmul.bf16.gmra.mxu3 %v1392_v62  ;;  %v1323_v10 = vunpack.c.l.bf16 %v1292_v63  ;;  %v1324_v18 = vunpack.c.h.bf16 %v1292_v63  ;;  %v8995_v63 = vld [vmem:[%s14601_s8 + $0x60] sm:$0xf] }
 0x234   :  { %1662 = vmatmul.bf16.gmra.mxu0 %v1391_v61  ;;  %1691 = vmatmul.bf16.gmra.mxu1 %v1392_v62 }
 0x235   :  { %v1341_v27 = vadd.f32 %v12386_v7, %v1323_v10  ;;  %v1342_v28 = vadd.f32 %v12388_v11, %v1324_v18  ;;  %v9061_v10 = vld [vmem:[%s14601_s8 + $0xe8] sm:$0xf0]  ;;  %v10679_v18 = vld [vmem:[%s14601_s8 + $0x54] sm:$0xf] }
 0x236   :  { %v1193_v12 = vpop.f32.mrf.mxu2  ;;  %v1222_v13 = vpop.f32.mrf.mxu3 }
 0x237   :  { %v1223_v20 = vadd.f32 %v1222_v13, %v1193_v12  ;;  %v1381_v34 = vmax.f32 %v1341_v27, 0.0  ;;  %v1382_v38 = vmax.f32 %v1342_v28, 0.0  ;;  %v9064_v12 = vor.u32 %v10697_v9, %v9061_v10  ;;  %v8987_v13 = vld [vmem:[%s14601_s8 + $0x50] sm:$0xf]  ;;  %v8979_v27 = vld [vmem:[%s14601_s8 + $0x40] sm:$0xf] }
 0x238   :  { %v8988_v16 = vor.u32 %v10680_v14, %v8987_v13  ;;  %v9021_v9 = vld [vmem:[%s14601_s8 + $0x98] sm:$0xf0]  ;;  %v8947_v14 = vld [vmem:[%s14601_s8] sm:$0xf] }
 0x239   :  { %v1293_v24 = vpack.c.bf16 %v1281_v19, %v1223_v20  ;;  %v1254_v25 = vpop.f32.mrf.mxu0  ;;  %v1283_v26 = vpop.f32.mrf.mxu1  ;;  %2106 = vmatpush.bf16.msra.mxu1 %v9064_v12  ;;  %v8989_v19 = vld [vmem:[%s14601_s8 + $0x58] sm:$0xf0]  ;;  %v9052_v20 = vor.u32 %v10696_v17, %v9051_v15  ;;  %v9024_v13 = vor.u32 %v10687_v8, %v9021_v9  ;;  %v10670_v15 = vld [vmem:[%s14601_s8 + $0x4] sm:$0xf0] }
 0x23a   :  { %v1284_v40 = vadd.f32 %v1283_v26, %v1254_v25  ;;  %v8992_v21 = vor.u32 %v10679_v18, %v8989_v19  ;;  %v9053_v25 = vld [vmem:[%s14601_s8 + $0xd8] sm:$0xf0]  ;;  %v8948_v17 = vor.u32 %v10670_v15, %v8947_v14  ;;  %v10686_v18 = vld [vmem:[%s14601_s8 + $0x84] sm:$0xf0]  ;;  %v10669_v19 = vld [vmem:[%s14601_s8 + $0x4] sm:$0xf] }
 0x23b   :  { %v1325_v33 = vunpack.c.l.bf16 %v1293_v24  ;;  %v1326_v37 = vunpack.c.h.bf16 %v1293_v24  ;;  %v10695_v24 = vld [vmem:[%s14601_s8 + $0xd4] sm:$0xf] }
 0x23c   :  { %v9056_v26 = vor.u32 %v10695_v24, %v9053_v25  ;;  %2078 = vmatpush.bf16.msra.mxu0 %v8992_v21  ;;  %v10685_v25 = vld [vmem:[%s14601_s8 + $0x84] sm:$0xf] }
 0x23d   :  { %v1343_v29 = vadd.f32 %v12386_v7, %v1325_v33  ;;  %v1344_v30 = vadd.f32 %v12388_v11, %v1326_v37  ;;  %v10678_v33 = vld [vmem:[%s14601_s8 + $0x44] sm:$0xf0]  ;;  %v9043_v37 = vld [vmem:[%s14601_s8 + $0xc0] sm:$0xf] }
 0x23e   :  { %v1196_v31 = vpop.f32.mrf.mxu2  ;;  %v1225_v32 = vpop.f32.mrf.mxu3  ;;  %2107 = vmatpush.bf16.msra.mxu1 %v9056_v26  ;;  %v8980_v28 = vor.u32 %v10678_v33, %v8979_v27  ;;  %v9013_v26 = vld [vmem:[%s14601_s8 + $0x88] sm:$0xf0] }
 0x23f   :  { %v1226_v35 = vadd.f32 %v1225_v32, %v1196_v31  ;;  %v1383_v36 = vmax.f32 %v1343_v29, 0.0  ;;  %v1384_v39 = vmax.f32 %v1344_v30, 0.0  ;;  %v10694_v29 = vld [vmem:[%s14601_s8 + $0xc4] sm:$0xf0]  ;;  %v10677_v30 = vld [vmem:[%s14601_s8 + $0x44] sm:$0xf]  ;;  %v9016_v27 = vor.u32 %v10685_v25, %v9013_v26 }
 0x240   :  { %v8981_v31 = vld [vmem:[%s14601_s8 + $0x48] sm:$0xf0]  ;;  %v9044_v32 = vor.u32 %v10694_v29, %v9043_v37 }
 0x241   :  { %v1393_v41 = vpack.c.bf16 %v1383_v36, %v1381_v34  ;;  %v1394_v42 = vpack.c.bf16 %v1384_v39, %v1382_v38  ;;  %v1294_v43 = vpack.c.bf16 %v1284_v40, %v1226_v35  ;;  %v1256_v44 = vpop.f32.mrf.mxu0  ;;  %v1285_v45 = vpop.f32.mrf.mxu1  ;;  %v8984_v34 = vor.u32 %v10677_v30, %v8981_v31  ;;  %v10693_v35 = vld [vmem:[%s14601_s8 + $0xc4] sm:$0xf]  ;;  %v9045_v36 = vld [vmem:[%s14601_s8 + $0xc8] sm:$0xf0]  ;;  %v8971_v39 = vld [vmem:[%s14601_s8 + $0x30] sm:$0xf] }
 0x242   :  { %v1286_v50 = vadd.f32 %v1285_v45, %v1256_v44  ;;  %v9048_v38 = vor.u32 %v10693_v35, %v9045_v36  ;;  %v10676_v40 = vld [vmem:[%s14601_s8 + $0x34] sm:$0xf0]  ;;  %v10675_v44 = vld [vmem:[%s14601_s8 + $0x34] sm:$0xf]  ;;  %v8973_v45 = vld [vmem:[%s14601_s8 + $0x38] sm:$0xf0] }
 0x243   :  { %1609 = vmatmul.bf16.gmra.mxu2 %v1393_v41  ;;  %1638 = vmatmul.bf16.gmra.mxu3 %v1394_v42  ;;  %v1327_v48 = vunpack.c.l.bf16 %v1294_v43  ;;  %v1328_v49 = vunpack.c.h.bf16 %v1294_v43  ;;  %v10692_v43 = vld [vmem:[%s14601_s8 + $0xb4] sm:$0xf0] }
 0x244   :  { %1667 = vmatmul.bf16.gmra.mxu0 %v1393_v41  ;;  %1696 = vmatmul.bf16.gmra.mxu1 %v1394_v42  ;;  %v9035_v41 = vld [vmem:[%s14601_s8 + $0xb0] sm:$0xf]  ;;  %v8972_v42 = vor.u32 %v10676_v40, %v8971_v39 }
 0x245   :  { %v1345_v53 = vadd.f32 %v12386_v7, %v1327_v48  ;;  %v1346_v54 = vadd.f32 %v12388_v11, %v1328_v49  ;;  %2079 = vmatpush.bf16.msra.mxu0 %v8984_v34  ;;  %2108 = vmatpush.bf16.msra.mxu1 %v9048_v38  ;;  %v10691_v48 = vld [vmem:[%s14601_s8 + $0xb4] sm:$0xf]  ;;  %v9037_v49 = vld [vmem:[%s14601_s8 + $0xb8] sm:$0xf0] }
 0x246   :  { %v1198_v46 = vpop.f32.mrf.mxu2  ;;  %v1227_v47 = vpop.f32.mrf.mxu3 }
 0x247   :  { %v1228_v51 = vadd.f32 %v1227_v47, %v1198_v46  ;;  %v1385_v57 = vmax.f32 %v1345_v53, 0.0  ;;  %v1386_v59 = vmax.f32 %v1346_v54, 0.0  ;;  %v9036_v46 = vor.u32 %v10692_v43, %v9035_v41  ;;  %v10690_v53 = vld [vmem:[%s14601_s8 + $0xa4] sm:$0xf0]  ;;  %v10673_v54 = vld [vmem:[%s14601_s8 + $0x24] sm:$0xf] }
 0x248   :  { %v8976_v47 = vor.u32 %v10675_v44, %v8973_v45 }
 0x249   :  { %v1295_v22 = vpack.c.bf16 %v1286_v50, %v1228_v51  ;;  %v9040_v50 = vor.u32 %v10691_v48, %v9037_v49  ;;  %v8963_v51 = vld [vmem:[%s14601_s8 + $0x20] sm:$0xf] }
 0x24a   :  { %2080 = vmatpush.bf16.msra.mxu0 %v8976_v47 }
 0x24b   :  { %v1329_v23 = vunpack.c.l.bf16 %v1295_v22  ;;  %v1330_v52 = vunpack.c.h.bf16 %v1295_v22  ;;  %v10674_v22 = vld [vmem:[%s14601_s8 + $0x24] sm:$0xf0]  ;;  %2109 = vmatpush.bf16.msra.mxu1 %v9040_v50 }
 0x24d   :  { %v1347_v55 = vadd.f32 %v12386_v7, %v1329_v23  ;;  %v1348_v56 = vadd.f32 %v12388_v11, %v1330_v52  ;;  %v10682_v7 = vld [vmem:[%s14601_s8 + $0x64] sm:$0xf0]  ;;  %v9059_v11 = vld [vmem:[%s14601_s8 + $0xe0] sm:$0xf]  ;;  %v8964_v23 = vor.u32 %v10674_v22, %v8963_v51 }
 0x24e   :  { %v8996_v1 = vor.u32 %v10682_v7, %v8995_v63  ;;  %v9060_v6 = vor.u32 %v10698_v3, %v9059_v11  ;;  %v9027_v52 = vld [vmem:[%s14601_s8 + $0xa0] sm:$0xf]  ;;  %v10672_v63 = vld [vmem:[%s14601_s8 + $0x14] sm:$0xf0]  ;;  %v9019_v7 = vld [vmem:[%s14601_s8 + $0x90] sm:$0xf] }
 0x24f   :  { %v1387_v58 = vmax.f32 %v1347_v55, 0.0  ;;  %v1388_v60 = vmax.f32 %v1348_v56, 0.0  ;;  %v9028_v55 = vor.u32 %v10690_v53, %v9027_v52  ;;  %v8965_v56 = vld [vmem:[%s14601_s8 + $0x28] sm:$0xf0]  ;;  %v10671_v3 = vld [vmem:[%s14601_s8 + $0x14] sm:$0xf] }
 0x250   :  { %2019 = vmatpush.bf16.msra.mxu2 %v8996_v1  ;;  %2048 = vmatpush.bf16.msra.mxu3 %v9060_v6  ;;  %v10688_v1 = vld [vmem:[%s14601_s8 + $0x94] sm:$0xf0]  ;;  %v8960_v6 = vor.u32 %v10671_v3, %v8957_v4 }
 0x251   :  { %v1395_v61 = vpack.c.bf16 %v1387_v58, %v1385_v57  ;;  %v1396_v62 = vpack.c.bf16 %v1388_v60, %v1386_v59  ;;  %v10689_v57 = vld [vmem:[%s14601_s8 + $0xa4] sm:$0xf]  ;;  %v9029_v58 = vld [vmem:[%s14601_s8 + $0xa8] sm:$0xf0]  ;;  %v8968_v60 = vor.u32 %v10673_v54, %v8965_v56  ;;  %v9020_v5 = vor.u32 %v10688_v1, %v9019_v7 }
 0x252   :  { %v1398_v59 = vld [vmem:[#allocation4 + $0x3] ss:$8 sm:$0x3] }
 0x253   :  { %1614 = vmatmul.bf16.gmra.mxu2 %v1395_v61  ;;  %1643 = vmatmul.bf16.gmra.mxu3 %v1396_v62  ;;  %v1716_v10 = vperm.slane %v1398_v59, 0  ;;  %v1717_v12 = vperm.slane %v1398_v59, 1 }
 0x254   :  { %1672 = vmatmul.bf16.gmra.mxu0 %v1395_v61  ;;  %1701 = vmatmul.bf16.gmra.mxu1 %v1396_v62  ;;  %v9032_v61 = vor.u32 %v10689_v57, %v9029_v58  ;;  %v8955_v62 = vld [vmem:[%s14601_s8 + $0x10] sm:$0xf] }
 0x255   :  { %2020 = vmatpush.bf16.msra.mxu2 %v8988_v16  ;;  %2049 = vmatpush.bf16.msra.mxu3 %v9052_v20  ;;  %v8956_v11 = vor.u32 %v10672_v63, %v8955_v62  ;;  %v9011_v16 = vld [vmem:[%s14601_s8 + $0x80] sm:$0xf]  ;;  %v8949_v20 = vld [vmem:[%s14601_s8 + $0x8] sm:$0xf0]  ;;  %v1720_v33 = vpack.c.bf16 %v1717_v12, %v1716_v10 }
 0x256   :  { %2081 = vmatpush.bf16.msra.mxu0 %v8968_v60  ;;  %2110 = vmatpush.bf16.msra.mxu1 %v9032_v61  ;;  %v9012_v21 = vor.u32 %v10686_v18, %v9011_v16  ;;  %v8952_v24 = vor.u32 %v10669_v19, %v8949_v20 }
 0x257   :  { %v1722_v37 = vunpack.c.l.b16 %v1720_v33 }
 0x259   :  { %2021 = vmatpush.bf16.msra.mxu2 %v8980_v28  ;;  %2050 = vmatpush.bf16.msra.mxu3 %v9044_v32  ;;  %v1723_v28 = vunpack.c.h.b16 %v1720_v33  ;;  %v1724_v31 = vpack.c.b16 %v1722_v37, %v1722_v37 }
 0x25a   :  { %2082 = vmatpush.bf16.msra.mxu0 %v8960_v6  ;;  %2111 = vmatpush.bf16.msra.mxu1 %v9024_v13 }
 0x25b   :  { %v1725_v32 = vpack.c.b16 %v1723_v28, %v1723_v28  ;;  %v1727_v36 = vpack.i.b16 %v1724_v31, %v1724_v31 }
 0x25d   :  { %2022 = vmatpush.bf16.msra.mxu2 %v8972_v42  ;;  %2051 = vmatpush.bf16.msra.mxu3 %v9036_v46  ;;  %v1731_v39 = vpack.i.b16 %v1725_v32, %v1725_v32  ;;  %v1729_v44 = vperm.slane %v1727_v36, 0  ;;  %v9099_v36 = vld [vmem:[#allocation7 + $0x30] sm:$0xf] }
 0x25e   :  { %2083 = vmatpush.bf16.msra.mxu0 %v8952_v24  ;;  %2112 = vmatpush.bf16.msra.mxu1 %v9016_v27 }
 0x25f   :  { %v1733_v45 = vperm.slane %v1731_v39, 0  ;;  %v12598_v47 = vunpack.c.l.bf16 %v1729_v44  ;;  %v10667_v39 = vld [vmem:[#allocation7 + $0x34] sm:$0xf] }
 0x261   :  { %2023 = vmatpush.bf16.msra.mxu2 %v8964_v23  ;;  %2052 = vmatpush.bf16.msra.mxu3 %v9028_v55  ;;  %v12600_v51 = vunpack.c.l.bf16 %v1733_v45  ;;  %v9101_v45 = vld [vmem:[#allocation7 + $0x38] sm:$0xf0] }
 0x265   :  { %2024 = vmatpush.bf16.msra.mxu2 %v8956_v11  ;;  %2053 = vmatpush.bf16.msra.mxu3 %v9020_v5 }
 0x269   :  { %2025 = vmatpush.bf16.msra.mxu2 %v8948_v17  ;;  %2054 = vmatpush.bf16.msra.mxu3 %v9012_v21 }
 0x2a1   :  { %v1658_v29 = vpop.f32.mrf.mxu0  ;;  %v1687_v30 = vpop.f32.mrf.mxu1 }
 0x2a2   :  { %v1688_v40 = vadd.f32 %v1687_v30, %v1658_v29 }
 0x2a6   :  { %v1600_v34 = vpop.f32.mrf.mxu2  ;;  %v1629_v35 = vpop.f32.mrf.mxu3 }
 0x2a7   :  { %v1630_v38 = vadd.f32 %v1629_v35, %v1600_v34 }
 0x2a9   :  { %v1660_v41 = vpop.f32.mrf.mxu0  ;;  %v1689_v42 = vpop.f32.mrf.mxu1  ;;  %v1707_v43 = vpack.c.bf16 %v1688_v40, %v1630_v38  ;;  %v10668_v38 = vld [vmem:[#allocation7 + $0x34] sm:$0xf0] }
 0x2aa   :  { %v1690_v22 = vadd.f32 %v1689_v42, %v1660_v41  ;;  %v9100_v44 = vor.u32 %v10668_v38, %v9099_v36 }
 0x2ab   :  { %v1734_v46 = vunpack.c.l.bf16 %v1707_v43  ;;  %v1735_v50 = vunpack.c.h.bf16 %v1707_v43 }
 0x2ad   :  { %v1752_v55 = vadd.f32 %v12598_v47, %v1734_v46  ;;  %v1753_v56 = vadd.f32 %v12600_v51, %v1735_v50 }
 0x2ae   :  { %v1602_v48 = vpop.f32.mrf.mxu2  ;;  %v1631_v49 = vpop.f32.mrf.mxu3 }
 0x2af   :  { %v1632_v23 = vadd.f32 %v1631_v49, %v1602_v48  ;;  %v1792_v61 = vmax.f32 %v1752_v55, 0.0  ;;  %v1793_v7 = vmax.f32 %v1753_v56, 0.0  ;;  %v9104_v48 = vor.u32 %v10667_v39, %v9101_v45 }
 0x2b0   :  { %v2173_v49 = vand.u32 %v9100_v44, %v11749_v2 }
 0x2b1   :  { %v1708_v52 = vpack.c.bf16 %v1690_v22, %v1632_v23  ;;  %v1663_v53 = vpop.f32.mrf.mxu0  ;;  %v1692_v54 = vpop.f32.mrf.mxu1  ;;  %v2176_v50 = vand.u32 %v9104_v48, %v11749_v2  ;;  %v9091_v22 = vld [vmem:[#allocation7 + $0x20] sm:$0xf]  ;;  %v10666_v23 = vld [vmem:[#allocation7 + $0x24] sm:$0xf0] }
 0x2b2   :  { %v1693_v4 = vadd.f32 %v1692_v54, %v1663_v53  ;;  %2182 = vmatpush.bf16.msrb.mxu2 %v2173_v49  ;;  %v9092_v53 = vor.u32 %v10666_v23, %v9091_v22  ;;  %v9093_v54 = vld [vmem:[#allocation7 + $0x28] sm:$0xf0] }
 0x2b3   :  { %v1736_v57 = vunpack.c.l.bf16 %v1708_v52  ;;  %v1737_v58 = vunpack.c.h.bf16 %v1708_v52  ;;  %v10665_v52 = vld [vmem:[#allocation7 + $0x24] sm:$0xf]  ;;  %2211 = vmatpush.bf16.msrb.mxu3 %v2176_v50 }
 0x2b5   :  { %v1754_v59 = vadd.f32 %v12598_v47, %v1736_v57  ;;  %v1755_v60 = vadd.f32 %v12600_v51, %v1737_v58  ;;  %v9096_v58 = vor.u32 %v10665_v52, %v9093_v54 }
 0x2b6   :  { %v1605_v62 = vpop.f32.mrf.mxu2  ;;  %v1634_v63 = vpop.f32.mrf.mxu3  ;;  %2183 = vmatpush.bf16.msrb.mxu2 %v9092_v53 }
 0x2b7   :  { %v1794_v11 = vmax.f32 %v1754_v59, 0.0  ;;  %v1795_v1 = vmax.f32 %v1755_v60, 0.0  ;;  %v1635_v3 = vadd.f32 %v1634_v63, %v1605_v62  ;;  %v9083_v59 = vld [vmem:[#allocation7 + $0x10] sm:$0xf]  ;;  %v10664_v60 = vld [vmem:[#allocation7 + $0x14] sm:$0xf0]  ;;  %2212 = vmatpush.bf16.msrb.mxu3 %v9096_v58 }
 0x2b9   :  { %v1808_v5 = vpack.c.bf16 %v1794_v11, %v1792_v61  ;;  %v1809_v6 = vpack.c.bf16 %v1795_v1, %v1793_v7  ;;  %v1665_v8 = vpop.f32.mrf.mxu0  ;;  %v1694_v9 = vpop.f32.mrf.mxu1  ;;  %v1709_v10 = vpack.c.bf16 %v1693_v4, %v1635_v3  ;;  %v10663_v7 = vld [vmem:[#allocation7 + $0x14] sm:$0xf]  ;;  %v9085_v11 = vld [vmem:[#allocation7 + $0x18] sm:$0xf0]  ;;  %v9084_v3 = vor.u32 %v10664_v60, %v9083_v59 }
 0x2ba   :  { %v1695_v16 = vadd.f32 %v1694_v9, %v1665_v8  ;;  %v9088_v8 = vor.u32 %v10663_v7, %v9085_v11  ;;  %v9075_v9 = vld [vmem:[#allocation7] sm:$0xf]  ;;  %v9171_v11 = vld [vmem:[#allocation9 + $0x70] sm:$0xf] }
 0x2bb   :  { %2026 = vmatmul.bf16.vlgmr.msra.gmra.mxu2 %v1808_v5  ;;  %2055 = vmatmul.bf16.vlgmr.msra.gmra.mxu3 %v1809_v6  ;;  %v1738_v12 = vunpack.c.l.bf16 %v1709_v10  ;;  %v1739_v15 = vunpack.c.h.bf16 %v1709_v10  ;;  %v10662_v10 = vld [vmem:[#allocation7 + $0x4] sm:$0xf0] }
 0x2bc   :  { %2084 = vmatmul.bf16.vlgmr.msra.gmra.mxu0 %v1808_v5  ;;  %2113 = vmatmul.bf16.vlgmr.msra.gmra.mxu1 %v1809_v6 }
 0x2bd   :  { %v1756_v21 = vadd.f32 %v12598_v47, %v1738_v12  ;;  %v1757_v26 = vadd.f32 %v12600_v51, %v1739_v15  ;;  %v10661_v15 = vld [vmem:[#allocation7 + $0x4] sm:$0xf]  ;;  %2184 = vmatpush.bf16.msrb.mxu2 %v9084_v3  ;;  %2213 = vmatpush.bf16.msrb.mxu3 %v9088_v8  ;;  %v9235_v3 = vld [vmem:[#allocation9 + $0xf0] sm:$0xf]  ;;  %v9173_v8 = vld [vmem:[#allocation9 + $0x78] sm:$0xf0] }
 0x2be   :  { %v1607_v13 = vpop.f32.mrf.mxu2  ;;  %v1636_v14 = vpop.f32.mrf.mxu3 }
 0x2bf   :  { %v1637_v17 = vadd.f32 %v1636_v14, %v1607_v13  ;;  %v1796_v29 = vmax.f32 %v1756_v21, 0.0  ;;  %v1797_v32 = vmax.f32 %v1757_v26, 0.0 }
 0x2c1   :  { %v1710_v18 = vpack.c.bf16 %v1695_v16, %v1637_v17  ;;  %v1668_v19 = vpop.f32.mrf.mxu0  ;;  %v1697_v20 = vpop.f32.mrf.mxu1  ;;  %v9077_v16 = vld [vmem:[#allocation7 + $0x8] sm:$0xf0] }
 0x2c2   :  { %v1698_v35 = vadd.f32 %v1697_v20, %v1668_v19  ;;  %v9076_v19 = vor.u32 %v10662_v10, %v9075_v9 }
 0x2c3   :  { %v1740_v24 = vunpack.c.l.bf16 %v1710_v18  ;;  %v1741_v25 = vunpack.c.h.bf16 %v1710_v18 }
 0x2c4   :  { %2185 = vmatpush.bf16.msrb.mxu2 %v9076_v19  ;;  %v9227_v19 = vld [vmem:[#allocation9 + $0xe0] sm:$0xf] }
 0x2c5   :  { %v1758_v27 = vadd.f32 %v12598_v47, %v1740_v24  ;;  %v1759_v33 = vadd.f32 %v12600_v51, %v1741_v25  ;;  %v9080_v25 = vor.u32 %v10661_v15, %v9077_v16 }
 0x2c6   :  { %v1610_v37 = vpop.f32.mrf.mxu2  ;;  %v1639_v28 = vpop.f32.mrf.mxu3 }
 0x2c7   :  { %v1640_v30 = vadd.f32 %v1639_v28, %v1610_v37  ;;  %v1798_v31 = vmax.f32 %v1758_v27, 0.0  ;;  %v1799_v34 = vmax.f32 %v1759_v33, 0.0  ;;  %2214 = vmatpush.bf16.msrb.mxu3 %v9080_v25  ;;  %v9165_v25 = vld [vmem:[#allocation9 + $0x68] sm:$0xf0] }
 0x2c9   :  { %v1670_v40 = vpop.f32.mrf.mxu0  ;;  %v1699_v41 = vpop.f32.mrf.mxu1  ;;  %v1810_v42 = vpack.c.bf16 %v1798_v31, %v1796_v29  ;;  %v1811_v43 = vpack.c.bf16 %v1799_v34, %v1797_v32  ;;  %v1711_v46 = vpack.c.bf16 %v1698_v35, %v1640_v30 }
 0x2ca   :  { %v1700_v62 = vadd.f32 %v1699_v41, %v1670_v40 }
 0x2cb   :  { %2031 = vmatmul.bf16.gmra.mxu2 %v1810_v42  ;;  %2060 = vmatmul.bf16.gmra.mxu3 %v1811_v43  ;;  %v1742_v55 = vunpack.c.l.bf16 %v1711_v46  ;;  %v1743_v61 = vunpack.c.h.bf16 %v1711_v46 }
 0x2cc   :  { %2089 = vmatmul.bf16.gmra.mxu0 %v1810_v42  ;;  %2118 = vmatmul.bf16.gmra.mxu1 %v1811_v43 }
 0x2cd   :  { %v1760_v6 = vadd.f32 %v12598_v47, %v1742_v55  ;;  %v1761_v14 = vadd.f32 %v12600_v51, %v1743_v61  ;;  %v11162_v55 = vld [vmem:[#allocation2] sm:$0xff] }
 0x2ce   :  { %v1612_v56 = vpop.f32.mrf.mxu2  ;;  %v1641_v57 = vpop.f32.mrf.mxu3 }
 0x2cf   :  { %v1642_v63 = vadd.f32 %v1641_v57, %v1612_v56  ;;  %v1800_v24 = vmax.f32 %v1760_v6, 0.0  ;;  %v1801_v33 = vmax.f32 %v1761_v14, 0.0  ;;  %v11163_v56 = vld [vmem:[#allocation2 + $0x8] sm:$0xff]  ;;  %v10715_v6 = vld [vmem:[#allocation9 + $0x74] sm:$0xf] }
 0x2d0   :  { %v9176_v10 = vor.u32 %v10715_v6, %v9173_v8  ;;  %v9205_v6 = vld [vmem:[#allocation9 + $0xb8] sm:$0xf0] }
 0x2d1   :  { %v1712_v1 = vpack.c.bf16 %v1700_v62, %v1642_v63  ;;  %v1673_v4 = vpop.f32.mrf.mxu0  ;;  %v1702_v5 = vpop.f32.mrf.mxu1 }
 0x2d2   :  { %v1703_v28 = vadd.f32 %v1702_v5, %v1673_v4  ;;  %v10732_v5 = vld [vmem:[#allocation9 + $0xf4] sm:$0xf0]  ;;  %2597 = vmatpush.bf16.msra.mxu2 %v9176_v10 }
 0x2d3   :  { %v1744_v12 = vunpack.c.l.bf16 %v1712_v1  ;;  %v1745_v13 = vunpack.c.h.bf16 %v1712_v1  ;;  %v10716_v1 = vld [vmem:[#allocation9 + $0x74] sm:$0xf0]  ;;  %v9236_v9 = vor.u32 %v10732_v5, %v9235_v3  ;;  %v10723_v5 = vld [vmem:[#allocation9 + $0xb4] sm:$0xf] }
 0x2d4   :  { %v9172_v4 = vor.u32 %v10716_v1, %v9171_v11  ;;  %v10707_v11 = vld [vmem:[#allocation9 + $0x34] sm:$0xf]  ;;  %v9141_v1 = vld [vmem:[#allocation9 + $0x38] sm:$0xf0]  ;;  %v9208_v8 = vor.u32 %v10723_v5, %v9205_v6 }
 0x2d5   :  { %v1762_v17 = vadd.f32 %v12598_v47, %v1744_v12  ;;  %v1763_v18 = vadd.f32 %v12600_v51, %v1745_v13  ;;  %v10731_v12 = vld [vmem:[#allocation9 + $0xf4] sm:$0xf]  ;;  %v9237_v13 = vld [vmem:[#allocation9 + $0xf8] sm:$0xf0]  ;;  %2568 = vmatpush.bf16.msrb.mxu1 %v9236_v9 }
 0x2d6   :  { %v1615_v20 = vpop.f32.mrf.mxu2  ;;  %v1644_v21 = vpop.f32.mrf.mxu3  ;;  %2539 = vmatpush.bf16.msrb.mxu0 %v9172_v4  ;;  %v9240_v14 = vor.u32 %v10731_v12, %v9237_v13  ;;  %v9144_v4 = vor.u32 %v10707_v11, %v9141_v1  ;;  %v9131_v12 = vld [vmem:[#allocation9 + $0x20] sm:$0xf]  ;;  %v10706_v13 = vld [vmem:[#allocation9 + $0x24] sm:$0xf0] }
 0x2d7   :  { %v1645_v26 = vadd.f32 %v1644_v21, %v1615_v20  ;;  %v1802_v27 = vmax.f32 %v1762_v17, 0.0  ;;  %v1803_v37 = vmax.f32 %v1763_v18, 0.0  ;;  %v9163_v17 = vld [vmem:[#allocation9 + $0x60] sm:$0xf]  ;;  %v10714_v18 = vld [vmem:[#allocation9 + $0x64] sm:$0xf0] }
 0x2d8   :  { %2626 = vmatpush.bf16.msra.mxu3 %v9240_v14  ;;  %v9164_v20 = vor.u32 %v10714_v18, %v9163_v17  ;;  %v10730_v21 = vld [vmem:[#allocation9 + $0xe4] sm:$0xf0]  ;;  %v9132_v14 = vor.u32 %v10706_v13, %v9131_v12  ;;  %v9195_v17 = vld [vmem:[#allocation9 + $0xa0] sm:$0xf] }
 0x2d9   :  { %v1812_v29 = vpack.c.bf16 %v1802_v27, %v1800_v24  ;;  %v1813_v30 = vpack.c.bf16 %v1803_v37, %v1801_v33  ;;  %v1713_v31 = vpack.c.bf16 %v1703_v28, %v1645_v26  ;;  %v1675_v32 = vpop.f32.mrf.mxu0  ;;  %v1704_v34 = vpop.f32.mrf.mxu1  ;;  %v10713_v24 = vld [vmem:[#allocation9 + $0x64] sm:$0xf]  ;;  %v9228_v26 = vor.u32 %v10730_v21, %v9227_v19  ;;  %v9229_v37 = vld [vmem:[#allocation9 + $0xe8] sm:$0xf0]  ;;  %v9155_v28 = vld [vmem:[#allocation9 + $0x50] sm:$0xf] }
 0x2da   :  { %v1705_v40 = vadd.f32 %v1704_v34, %v1675_v32  ;;  %v9168_v27 = vor.u32 %v10713_v24, %v9165_v25  ;;  %v10729_v33 = vld [vmem:[#allocation9 + $0xe4] sm:$0xf]  ;;  %2540 = vmatpush.bf16.msrb.mxu0 %v9164_v20  ;;  %v10728_v32 = vld [vmem:[#allocation9 + $0xd4] sm:$0xf0]  ;;  %v10722_v18 = vld [vmem:[#allocation9 + $0xa4] sm:$0xf0] }
 0x2db   :  { %2036 = vmatmul.bf16.gmra.mxu2 %v1812_v29  ;;  %2065 = vmatmul.bf16.gmra.mxu3 %v1813_v30  ;;  %v1746_v38 = vunpack.c.l.bf16 %v1713_v31  ;;  %v1747_v39 = vunpack.c.h.bf16 %v1713_v31  ;;  %v9219_v31 = vld [vmem:[#allocation9 + $0xd0] sm:$0xf]  ;;  %v10705_v19 = vld [vmem:[#allocation9 + $0x24] sm:$0xf]  ;;  %v9196_v20 = vor.u32 %v10722_v18, %v9195_v17  ;;  %v9133_v21 = vld [vmem:[#allocation9 + $0x28] sm:$0xf0] }
 0x2dc   :  { %2094 = vmatmul.bf16.gmra.mxu0 %v1812_v29  ;;  %2123 = vmatmul.bf16.gmra.mxu1 %v1813_v30  ;;  %v9232_v29 = vor.u32 %v10729_v33, %v9229_v37  ;;  %v10712_v30 = vld [vmem:[#allocation9 + $0x54] sm:$0xf0]  ;;  %v10721_v24 = vld [vmem:[#allocation9 + $0xa4] sm:$0xf]  ;;  %v9197_v25 = vld [vmem:[#allocation9 + $0xa8] sm:$0xf0] }
 0x2dd   :  { %v1764_v45 = vadd.f32 %v12598_v47, %v1746_v38  ;;  %v1765_v46 = vadd.f32 %v12600_v51, %v1747_v39  ;;  %2569 = vmatpush.bf16.msrb.mxu1 %v9228_v26  ;;  %2598 = vmatpush.bf16.msra.mxu2 %v9168_v27  ;;  %v9156_v34 = vor.u32 %v10712_v30, %v9155_v28  ;;  %v9157_v38 = vld [vmem:[#allocation9 + $0x58] sm:$0xf0]  ;;  %v10727_v39 = vld [vmem:[#allocation9 + $0xd4] sm:$0xf]  ;;  %v9123_v37 = vld [vmem:[#allocation9 + $0x10] sm:$0xf] }
 0x2de   :  { %v1617_v35 = vpop.f32.mrf.mxu2  ;;  %v1646_v36 = vpop.f32.mrf.mxu3  ;;  %2627 = vmatpush.bf16.msra.mxu3 %v9232_v29  ;;  %v1817_v26 = vld [vmem:[#allocation4 + $0x4] ss:$8 sm:$0x3]  ;;  %v9136_v27 = vor.u32 %v10705_v19, %v9133_v21  ;;  %v9200_v33 = vor.u32 %v10721_v24, %v9197_v25  ;;  %v10704_v28 = vld [vmem:[#allocation9 + $0x14] sm:$0xf0] }
 0x2df   :  { %v1647_v41 = vadd.f32 %v1646_v36, %v1617_v35  ;;  %v1804_v50 = vmax.f32 %v1764_v45, 0.0  ;;  %v1805_v23 = vmax.f32 %v1765_v46, 0.0  ;;  %v9220_v35 = vor.u32 %v10728_v32, %v9219_v31  ;;  %v10711_v36 = vld [vmem:[#allocation9 + $0x54] sm:$0xf]  ;;  %2541 = vmatpush.bf16.msrb.mxu0 %v9156_v34  ;;  %v9147_v45 = vld [vmem:[#allocation9 + $0x40] sm:$0xf] }
 0x2e0   :  { %v10710_v46 = vld [vmem:[#allocation9 + $0x44] sm:$0xf0]  ;;  %v9187_v29 = vld [vmem:[#allocation9 + $0x90] sm:$0xf]  ;;  %v9124_v32 = vor.u32 %v10704_v28, %v9123_v37  ;;  %v10720_v34 = vld [vmem:[#allocation9 + $0x94] sm:$0xf0] }
 0x2e1   :  { %v1714_v42 = vpack.c.bf16 %v1705_v40, %v1647_v41  ;;  %v9160_v40 = vor.u32 %v10711_v36, %v9157_v38  ;;  %v9221_v41 = vld [vmem:[#allocation9 + $0xd8] sm:$0xf0]  ;;  %2570 = vmatpush.bf16.msrb.mxu1 %v9220_v35  ;;  %v10703_v35 = vld [vmem:[#allocation9 + $0x14] sm:$0xf]  ;;  %v9188_v38 = vor.u32 %v10720_v34, %v9187_v29 }
 0x2e2   :  { %v9125_v36 = vld [vmem:[#allocation9 + $0x18] sm:$0xf0] }
 0x2e3   :  { %v1748_v43 = vunpack.c.l.bf16 %v1714_v42  ;;  %v1749_v44 = vunpack.c.h.bf16 %v1714_v42  ;;  %v9224_v42 = vor.u32 %v10727_v39, %v9221_v41  ;;  %2599 = vmatpush.bf16.msra.mxu2 %v9160_v40  ;;  %v9128_v39 = vor.u32 %v10703_v35, %v9125_v36  ;;  %v10719_v40 = vld [vmem:[#allocation9 + $0x94] sm:$0xf]  ;;  %v9189_v41 = vld [vmem:[#allocation9 + $0x98] sm:$0xf0] }
 0x2e5   :  { %v1766_v48 = vadd.f32 %v12598_v47, %v1748_v43  ;;  %v1767_v49 = vadd.f32 %v12600_v51, %v1749_v44  ;;  %v11164_v47 = vld [vmem:[#allocation2 + $0x10] sm:$0xff]  ;;  %v11165_v51 = vld [vmem:[#allocation2 + $0x18] sm:$0xff]  ;;  %2628 = vmatpush.bf16.msra.mxu3 %v9224_v42  ;;  %v2245_v42 = vperm.slane %v1817_v26, 0 }
 0x2e7   :  { %v1806_v22 = vmax.f32 %v1766_v48, 0.0  ;;  %v1807_v52 = vmax.f32 %v1767_v49, 0.0  ;;  %v9211_v48 = vld [vmem:[#allocation9 + $0xc0] sm:$0xf] }
 0x2e9   :  { %v1814_v53 = vpack.c.bf16 %v1806_v22, %v1804_v50  ;;  %v1815_v54 = vpack.c.bf16 %v1807_v52, %v1805_v23  ;;  %v9148_v50 = vor.u32 %v10710_v46, %v9147_v45  ;;  %v10726_v22 = vld [vmem:[#allocation9 + $0xc4] sm:$0xf0]  ;;  %v10709_v23 = vld [vmem:[#allocation9 + $0x44] sm:$0xf]  ;;  %v9149_v52 = vld [vmem:[#allocation9 + $0x48] sm:$0xf0] }
 0x2eb   :  { %2041 = vmatmul.bf16.gmra.mxu2 %v1814_v53  ;;  %2070 = vmatmul.bf16.gmra.mxu3 %v1815_v54 }
 0x2ec   :  { %2099 = vmatmul.bf16.gmra.mxu0 %v1814_v53  ;;  %2128 = vmatmul.bf16.gmra.mxu1 %v1815_v54  ;;  %v9212_v53 = vor.u32 %v10726_v22, %v9211_v48  ;;  %v9152_v54 = vor.u32 %v10709_v23, %v9149_v52  ;;  %v9115_v48 = vld [vmem:[#allocation9] sm:$0xf] }
 0x2ed   :  { %2542 = vmatpush.bf16.msrb.mxu0 %v9148_v50  ;;  %v10702_v50 = vld [vmem:[#allocation9 + $0x4] sm:$0xf0]  ;;  %v9179_v22 = vld [vmem:[#allocation9 + $0x80] sm:$0xf] }
 0x2ee   :  { %2571 = vmatpush.bf16.msrb.mxu1 %v9212_v53  ;;  %2600 = vmatpush.bf16.msra.mxu2 %v9152_v54  ;;  %v9116_v52 = vor.u32 %v10702_v50, %v9115_v48  ;;  %v10718_v53 = vld [vmem:[#allocation9 + $0x84] sm:$0xf0]  ;;  %v10701_v54 = vld [vmem:[#allocation9 + $0x4] sm:$0xf] }
 0x2f2   :  { %2601 = vmatpush.bf16.msra.mxu2 %v9144_v4 }
 0x2f6   :  { %2602 = vmatpush.bf16.msra.mxu2 %v9136_v27 }
 0x2fa   :  { %2603 = vmatpush.bf16.msra.mxu2 %v9128_v39 }
 0x2fb   :  { %9105 = vmatmul.msk.bf16.vlgmr.msrb.gmra.mxu2 %vm369_vm2, %v11162_v55  ;;  %9109 = vmatmul.msk.bf16.vlgmr.msrb.gmra.mxu3 %vm369_vm2, %v11162_v55  ;;  %v10725_v55 = vld [vmem:[#allocation9 + $0xc4] sm:$0xf] }
 0x30b   :  { %9106 = vmatmul.msk.bf16.gmra.mxu2 %vm369_vm2, %v11163_v56  ;;  %9110 = vmatmul.msk.bf16.gmra.mxu3 %vm369_vm2, %v11163_v56  ;;  %v9213_v56 = vld [vmem:[#allocation9 + $0xc8] sm:$0xf0] }
 0x31b   :  { %9107 = vmatmul.msk.bf16.gmra.mxu2 %vm369_vm2, %v11164_v47  ;;  %9111 = vmatmul.msk.bf16.gmra.mxu3 %vm369_vm2, %v11164_v47  ;;  %v9216_v47 = vor.u32 %v10725_v55, %v9213_v56  ;;  %v9117_v55 = vld [vmem:[#allocation9 + $0x8] sm:$0xf0]  ;;  %v9180_v56 = vor.u32 %v10718_v53, %v9179_v22 }
 0x31d   :  { %2629 = vmatpush.bf16.msra.mxu3 %v9216_v47  ;;  %v9120_v47 = vor.u32 %v10701_v54, %v9117_v55 }
 0x31f   :  { %2604 = vmatpush.bf16.msra.mxu2 %v9120_v47 }
 0x321   :  { %2630 = vmatpush.bf16.msra.mxu3 %v9208_v8 }
 0x325   :  { %2631 = vmatpush.bf16.msra.mxu3 %v9200_v33 }
 0x32b   :  { %9108 = vmatmul.msk.bf16.gmra.mxu2 %vm369_vm2, %v11165_v51  ;;  %9112 = vmatmul.msk.bf16.gmra.mxu3 %vm369_vm2, %v11165_v51  ;;  %v9139_v51 = vld [vmem:[#allocation9 + $0x30] sm:$0xf] }
 0x339   :  { %v2085_v30 = vpop.f32.mrf.mxu0  ;;  %v2114_v31 = vpop.f32.mrf.mxu1 }
 0x33a   :  { %v2115_v12 = vadd.f32 %v2114_v31, %v2085_v30 }
 0x33e   :  { %v2027_v57 = vpop.f32.mrf.mxu2  ;;  %v2056_v58 = vpop.f32.mrf.mxu3 }
 0x33f   :  { %v12628_v59 = vadd.f32 %v2056_v58, %v2027_v57  ;;  %v10708_v57 = vld [vmem:[#allocation9 + $0x34] sm:$0xf0]  ;;  %v9203_v58 = vld [vmem:[#allocation9 + $0xb0] sm:$0xf] }
 0x341   :  { %v2116_v11 = vpop.f32.mrf.mxu1 }
 0x346   :  { %v12630_v60 = vpop.f32.mrf.mxu2  ;;  %v12632_v61 = vpop.f32.mrf.mxu3 }
 0x347   :  { %v2059_v37 = vadd.f32 %v12632_v61, %v12630_v60 }
 0x34e   :  { %v2032_v62 = vpop.f32.mrf.mxu2  ;;  %v2061_v63 = vpop.f32.mrf.mxu3 }
 0x34f   :  { %v12634_v7 = vadd.f32 %v2061_v63, %v2032_v62  ;;  %v9140_v62 = vor.u32 %v10708_v57, %v9139_v51  ;;  %v10724_v63 = vld [vmem:[#allocation9 + $0xb4] sm:$0xf0]  ;;  %v10717_v51 = vld [vmem:[#allocation9 + $0x84] sm:$0xf]  ;;  %v9181_v57 = vld [vmem:[#allocation9 + $0x88] sm:$0xf0] }
 0x350   :  { %v9204_v3 = vor.u32 %v10724_v63, %v9203_v58  ;;  %v9184_v58 = vor.u32 %v10717_v51, %v9181_v57  ;;  %v2087_v63 = vpop.f32.mrf.mxu0 }
 0x351   :  { %2543 = vmatpush.bf16.msrb.mxu0 %v9140_v62  ;;  %v2117_v33 = vadd.f32 %v2116_v11, %v2087_v63 }
 0x352   :  { %2572 = vmatpush.bf16.msrb.mxu1 %v9204_v3 }
 0x355   :  { %2544 = vmatpush.bf16.msrb.mxu0 %v9132_v14 }
 0x356   :  { %v12636_v15 = vpop.f32.mrf.mxu2  ;;  %v12638_v16 = vpop.f32.mrf.mxu3  ;;  %2573 = vmatpush.bf16.msrb.mxu1 %v9196_v20 }
 0x357   :  { %v2119_v20 = vpop.f32.mrf.mxu1 }
 0x358   :  { %v2090_v19 = vpop.f32.mrf.mxu0 }
 0x359   :  { %2545 = vmatpush.bf16.msrb.mxu0 %v9124_v32  ;;  %v2120_v60 = vadd.f32 %v2119_v20, %v2090_v19 }
 0x35a   :  { %2574 = vmatpush.bf16.msrb.mxu1 %v9188_v38 }
 0x35d   :  { %2546 = vmatpush.bf16.msrb.mxu0 %v9116_v52 }
 0x35e   :  { %v2037_v43 = vpop.f32.mrf.mxu2  ;;  %v2066_v44 = vpop.f32.mrf.mxu3  ;;  %2575 = vmatpush.bf16.msrb.mxu1 %v9180_v56 }
 0x35f   :  { %v12640_v49 = vadd.f32 %v2066_v44, %v2037_v43  ;;  %v2246_v43 = vperm.slane %v1817_v26, 1  ;;  %v9192_v44 = vor.u32 %v10719_v40, %v9189_v41 }
 0x360   :  { %v2092_v38 = vpop.f32.mrf.mxu0 }
 0x361   :  { %2632 = vmatpush.bf16.msra.mxu3 %v9192_v44  ;;  %v2249_v62 = vpack.c.bf16 %v2246_v43, %v2245_v42 }
 0x363   :  { %v2251_v4 = vunpack.c.l.b16 %v2249_v62  ;;  %v2252_v5 = vunpack.c.h.b16 %v2249_v62  ;;  %v2064_v62 = vadd.f32 %v12638_v16, %v12636_v15 }
 0x365   :  { %2633 = vmatpush.bf16.msra.mxu3 %v9184_v58  ;;  %v2253_v6 = vpack.c.b16 %v2251_v4, %v2251_v4  ;;  %v2254_v8 = vpack.c.b16 %v2252_v5, %v2252_v5 }
 0x366   :  { %v12642_v9 = vpop.f32.mrf.mxu2  ;;  %v12644_v10 = vpop.f32.mrf.mxu3 }
 0x367   :  { %v2256_v17 = vpack.i.b16 %v2253_v6, %v2253_v6  ;;  %v2260_v18 = vpack.i.b16 %v2254_v8, %v2254_v8 }
 0x368   :  { %v2095_v51 = vpop.f32.mrf.mxu0 }
 0x369   :  { %v2258_v26 = vperm.slane %v2256_v17, 0  ;;  %v2262_v27 = vperm.slane %v2260_v18, 0 }
 0x36b   :  { %v12655_v32 = vunpack.c.l.bf16 %v2258_v26  ;;  %v12657_v30 = vunpack.c.l.bf16 %v2262_v27 }
 0x36e   :  { %v2042_v45 = vpop.f32.mrf.mxu2  ;;  %v2071_v46 = vpop.f32.mrf.mxu3 }
 0x36f   :  { %v12646_v23 = vadd.f32 %v2071_v46, %v2042_v45 }
 0x370   :  { %v2097_v19 = vpop.f32.mrf.mxu0 }
 0x376   :  { %v12648_v1 = vpop.f32.mrf.mxu2  ;;  %v12650_v3 = vpop.f32.mrf.mxu3 }
 0x37e   :  { %v2187_v13 = vpop.f32.mrf.mxu2  ;;  %v2216_v14 = vpop.f32.mrf.mxu3 }
 0x37f   :  { %v2188_v21 = vadd.f32 %v2187_v13, %v12628_v59  ;;  %v2217_v24 = vadd.f32 %v2216_v14, %v2115_v12  ;;  %v2121_v59 = vpop.f32.mrf.mxu1 }
 0x380   :  { %v2122_v58 = vadd.f32 %v2121_v59, %v2092_v38  ;;  %v9363_v38 = vld [vmem:[#allocation10 + $0xf0] sm:$0xf] }
 0x381   :  { %v2236_v25 = vpack.c.bf16 %v2217_v24, %v2188_v21 }
 0x383   :  { %v2263_v28 = vunpack.c.l.bf16 %v2236_v25  ;;  %v2264_v29 = vunpack.c.h.bf16 %v2236_v25 }
 0x385   :  { %v2281_v40 = vadd.f32 %v12655_v32, %v2263_v28  ;;  %v2282_v41 = vadd.f32 %v12657_v30, %v2264_v29 }
 0x386   :  { %v2189_v31 = vpop.f32.mrf.mxu2  ;;  %v2218_v34 = vpop.f32.mrf.mxu3 }
 0x387   :  { %v2190_v35 = vadd.f32 %v2189_v31, %v2059_v37  ;;  %v2219_v36 = vadd.f32 %v2218_v34, %v2117_v33  ;;  %v2321_v45 = vmax.f32 %v2281_v40, 0.0  ;;  %v2322_v46 = vmax.f32 %v2282_v41, 0.0  ;;  %v2124_v57 = vpop.f32.mrf.mxu1  ;;  %v10764_v41 = vld [vmem:[#allocation10 + $0xf4] sm:$0xf0] }
 0x388   :  { %v2125_v18 = vadd.f32 %v2124_v57, %v2095_v51 }
 0x389   :  { %v2237_v39 = vpack.c.bf16 %v2219_v36, %v2190_v35  ;;  %v9299_v35 = vld [vmem:[#allocation10 + $0x70] sm:$0xf]  ;;  %v10748_v36 = vld [vmem:[#allocation10 + $0x74] sm:$0xf0] }
 0x38a   :  { %v9300_v40 = vor.u32 %v10748_v36, %v9299_v35 }
 0x38b   :  { %v2265_v42 = vunpack.c.l.bf16 %v2237_v39  ;;  %v2266_v43 = vunpack.c.h.bf16 %v2237_v39  ;;  %v2069_v39 = vadd.f32 %v12644_v10, %v12642_v9 }
 0x38c   :  { %2958 = vmatpush.bf16.msra.mxu0 %v9300_v40  ;;  %v10746_v40 = vld [vmem:[#allocation10 + $0x64] sm:$0xf0] }
 0x38d   :  { %v2283_v61 = vadd.f32 %v12655_v32, %v2265_v42  ;;  %v2284_v44 = vadd.f32 %v12657_v30, %v2266_v43  ;;  %v9301_v42 = vld [vmem:[#allocation10 + $0x78] sm:$0xf0] }
 0x38e   :  { %v2192_v48 = vpop.f32.mrf.mxu2  ;;  %v2221_v50 = vpop.f32.mrf.mxu3 }
 0x38f   :  { %v2323_v22 = vmax.f32 %v2283_v61, 0.0  ;;  %v2324_v52 = vmax.f32 %v2284_v44, 0.0  ;;  %v2193_v53 = vadd.f32 %v2192_v48, %v12634_v7  ;;  %v2222_v54 = vadd.f32 %v2221_v50, %v2120_v60  ;;  %v2126_v20 = vpop.f32.mrf.mxu1  ;;  %v10763_v48 = vld [vmem:[#allocation10 + $0xf4] sm:$0xf]  ;;  %v9365_v50 = vld [vmem:[#allocation10 + $0xf8] sm:$0xf0] }
 0x390   :  { %v2127_v59 = vadd.f32 %v2126_v20, %v2097_v19  ;;  %v9368_v9 = vor.u32 %v10763_v48, %v9365_v50  ;;  %v10744_v48 = vld [vmem:[#allocation10 + $0x54] sm:$0xf0]  ;;  %v9347_v50 = vld [vmem:[#allocation10 + $0xd0] sm:$0xf] }
 0x391   :  { %v2337_v55 = vpack.c.bf16 %v2323_v22, %v2321_v45  ;;  %v2338_v56 = vpack.c.bf16 %v2324_v52, %v2322_v46  ;;  %v2238_v47 = vpack.c.bf16 %v2222_v54, %v2193_v53  ;;  %v9364_v45 = vor.u32 %v10764_v41, %v9363_v38  ;;  %v2100_v53 = vpop.f32.mrf.mxu0  ;;  %v9355_v41 = vld [vmem:[#allocation10 + $0xe0] sm:$0xf] }
 0x392   :  { %3045 = vmatpush.bf16.msrb.mxu3 %v9368_v9 }
 0x393   :  { %2547 = vmatmul.bf16.vlgmr.msrb.gmra.mxu0 %v2337_v55  ;;  %2576 = vmatmul.bf16.vlgmr.msrb.gmra.mxu1 %v2338_v56  ;;  %v2267_v63 = vunpack.c.l.bf16 %v2238_v47  ;;  %v2268_v11 = vunpack.c.h.bf16 %v2238_v47 }
 0x394   :  { %2605 = vmatmul.bf16.vlgmr.msra.gmra.mxu2 %v2337_v55  ;;  %2634 = vmatmul.bf16.vlgmr.msra.gmra.mxu3 %v2338_v56 }
 0x395   :  { %v2285_v12 = vadd.f32 %v12655_v32, %v2267_v63  ;;  %v2286_v13 = vadd.f32 %v12657_v30, %v2268_v11  ;;  %2987 = vmatpush.bf16.msra.mxu1 %v9364_v45 }
 0x396   :  { %v2194_v4 = vpop.f32.mrf.mxu2  ;;  %v2223_v5 = vpop.f32.mrf.mxu3 }
 0x397   :  { %v2195_v6 = vadd.f32 %v2194_v4, %v2064_v62  ;;  %v2224_v7 = vadd.f32 %v2223_v5, %v2122_v58  ;;  %v2325_v25 = vmax.f32 %v2285_v12, 0.0  ;;  %v2326_v26 = vmax.f32 %v2286_v13, 0.0  ;;  %v2129_v54 = vpop.f32.mrf.mxu1 }
 0x398   :  { %v2130_v57 = vadd.f32 %v2129_v54, %v2100_v53  ;;  %v10743_v53 = vld [vmem:[#allocation10 + $0x54] sm:$0xf]  ;;  %v9285_v54 = vld [vmem:[#allocation10 + $0x58] sm:$0xf0] }
 0x399   :  { %v2239_v8 = vpack.c.bf16 %v2224_v7, %v2195_v6 }
 0x39b   :  { %v2269_v14 = vunpack.c.l.bf16 %v2239_v8  ;;  %v2270_v17 = vunpack.c.h.bf16 %v2239_v8 }
 0x39d   :  { %v2287_v21 = vadd.f32 %v12655_v32, %v2269_v14  ;;  %v2288_v15 = vadd.f32 %v12657_v30, %v2270_v17  ;;  %v2102_v17 = vpop.f32.mrf.mxu0 }
 0x39e   :  { %v2197_v16 = vpop.f32.mrf.mxu2  ;;  %v2226_v24 = vpop.f32.mrf.mxu3 }
 0x39f   :  { %v2198_v27 = vadd.f32 %v2197_v16, %v12640_v49  ;;  %v2227_v33 = vadd.f32 %v2226_v24, %v2125_v18  ;;  %v2327_v37 = vmax.f32 %v2287_v21, 0.0  ;;  %v2328_v28 = vmax.f32 %v2288_v15, 0.0  ;;  %v10747_v49 = vld [vmem:[#allocation10 + $0x74] sm:$0xf]  ;;  %v2131_v18 = vpop.f32.mrf.mxu1 }
 0x3a0   :  { %v9304_v46 = vor.u32 %v10747_v49, %v9301_v42  ;;  %v2132_v20 = vadd.f32 %v2131_v18, %v2102_v17  ;;  %v2074_v21 = vadd.f32 %v12650_v3, %v12648_v1  ;;  %v10762_v42 = vld [vmem:[#allocation10 + $0xe4] sm:$0xf0]  ;;  %v9331_v17 = vld [vmem:[#allocation10 + $0xb0] sm:$0xf] }
 0x3a1   :  { %v2339_v29 = vpack.c.bf16 %v2327_v37, %v2325_v25  ;;  %v2340_v31 = vpack.c.bf16 %v2328_v28, %v2326_v26  ;;  %v2240_v34 = vpack.c.bf16 %v2227_v33, %v2198_v27 }
 0x3a2   :  { %3016 = vmatpush.bf16.msrb.mxu2 %v9304_v46  ;;  %v9283_v46 = vld [vmem:[#allocation10 + $0x50] sm:$0xf] }
 0x3a3   :  { %2552 = vmatmul.bf16.gmra.mxu0 %v2339_v29  ;;  %2581 = vmatmul.bf16.gmra.mxu1 %v2340_v31  ;;  %v2271_v43 = vunpack.c.l.bf16 %v2240_v34  ;;  %v2272_v60 = vunpack.c.h.bf16 %v2240_v34 }
 0x3a4   :  { %2610 = vmatmul.bf16.gmra.mxu2 %v2339_v29  ;;  %2639 = vmatmul.bf16.gmra.mxu3 %v2340_v31 }
 0x3a5   :  { %v2289_v55 = vadd.f32 %v12655_v32, %v2271_v43  ;;  %v2290_v56 = vadd.f32 %v12657_v30, %v2272_v60  ;;  %v10745_v43 = vld [vmem:[#allocation10 + $0x64] sm:$0xf]  ;;  %v9293_v60 = vld [vmem:[#allocation10 + $0x68] sm:$0xf0] }
 0x3a6   :  { %v2199_v61 = vpop.f32.mrf.mxu2  ;;  %v2228_v44 = vpop.f32.mrf.mxu3 }
 0x3a7   :  { %v2200_v22 = vadd.f32 %v2199_v61, %v2069_v39  ;;  %v2229_v52 = vadd.f32 %v2228_v44, %v2127_v59  ;;  %v2329_v4 = vmax.f32 %v2289_v55, 0.0  ;;  %v2330_v5 = vmax.f32 %v2290_v56, 0.0  ;;  %v9291_v39 = vld [vmem:[#allocation10 + $0x60] sm:$0xf]  ;;  %v9357_v44 = vld [vmem:[#allocation10 + $0xe8] sm:$0xf0] }
 0x3a8   :  { %v9292_v49 = vor.u32 %v10746_v40, %v9291_v39  ;;  %v9296_v61 = vor.u32 %v10745_v43, %v9293_v60  ;;  %v10759_v55 = vld [vmem:[#allocation10 + $0xd4] sm:$0xf]  ;;  %v9349_v56 = vld [vmem:[#allocation10 + $0xd8] sm:$0xf0]  ;;  %v10736_v39 = vld [vmem:[#allocation10 + $0x14] sm:$0xf0] }
 0x3a9   :  { %v2241_v10 = vpack.c.bf16 %v2229_v52, %v2200_v22  ;;  %v9284_v22 = vor.u32 %v10744_v48, %v9283_v46  ;;  %v10760_v52 = vld [vmem:[#allocation10 + $0xd4] sm:$0xf0]  ;;  %v9315_v40 = vld [vmem:[#allocation10 + $0x90] sm:$0xf]  ;;  %v9253_v43 = vld [vmem:[#allocation10 + $0x18] sm:$0xf0] }
 0x3aa   :  { %2959 = vmatpush.bf16.msra.mxu0 %v9292_v49  ;;  %3017 = vmatpush.bf16.msrb.mxu2 %v9296_v61  ;;  %v9348_v9 = vor.u32 %v10760_v52, %v9347_v50  ;;  %v10752_v49 = vld [vmem:[#allocation10 + $0x94] sm:$0xf0]  ;;  %v10751_v61 = vld [vmem:[#allocation10 + $0x94] sm:$0xf]  ;;  %v9243_v48 = vld [vmem:[#allocation10] sm:$0xf] }
 0x3ab   :  { %v2273_v47 = vunpack.c.l.bf16 %v2241_v10  ;;  %v2274_v51 = vunpack.c.h.bf16 %v2241_v10  ;;  %v9288_v10 = vor.u32 %v10743_v53, %v9285_v54  ;;  %v9316_v60 = vor.u32 %v10752_v49, %v9315_v40  ;;  %v10734_v50 = vld [vmem:[#allocation10 + $0x4] sm:$0xf0]  ;;  %v10733_v54 = vld [vmem:[#allocation10 + $0x4] sm:$0xf] }
 0x3ac   :  { %v9244_v52 = vor.u32 %v10734_v50, %v9243_v48  ;;  %v10750_v53 = vld [vmem:[#allocation10 + $0x84] sm:$0xf0] }
 0x3ad   :  { %v2291_v58 = vadd.f32 %v12655_v32, %v2273_v47  ;;  %v2292_v62 = vadd.f32 %v12657_v30, %v2274_v51  ;;  %v9352_v47 = vor.u32 %v10759_v55, %v9349_v56  ;;  %v9275_v51 = vld [vmem:[#allocation10 + $0x40] sm:$0xf]  ;;  %v10749_v56 = vld [vmem:[#allocation10 + $0x84] sm:$0xf] }
 0x3ae   :  { %v2202_v63 = vpop.f32.mrf.mxu2  ;;  %v2231_v11 = vpop.f32.mrf.mxu3  ;;  %2960 = vmatpush.bf16.msra.mxu0 %v9284_v22  ;;  %3018 = vmatpush.bf16.msrb.mxu2 %v9288_v10  ;;  %v9307_v22 = vld [vmem:[#allocation10 + $0x80] sm:$0xf] }
 0x3af   :  { %v2203_v6 = vadd.f32 %v2202_v63, %v12646_v23  ;;  %v2232_v7 = vadd.f32 %v2231_v11, %v2130_v57  ;;  %v2331_v8 = vmax.f32 %v2291_v58, 0.0  ;;  %v2332_v12 = vmax.f32 %v2292_v62, 0.0  ;;  %v10742_v57 = vld [vmem:[#allocation10 + $0x44] sm:$0xf0]  ;;  %v9339_v58 = vld [vmem:[#allocation10 + $0xc0] sm:$0xf] }
 0x3b0   :  { %v9276_v62 = vor.u32 %v10742_v57, %v9275_v51  ;;  %v10758_v63 = vld [vmem:[#allocation10 + $0xc4] sm:$0xf0]  ;;  %v10741_v11 = vld [vmem:[#allocation10 + $0x44] sm:$0xf]  ;;  %v9308_v10 = vor.u32 %v10750_v53, %v9307_v22 }
 0x3b1   :  { %v2341_v13 = vpack.c.bf16 %v2331_v8, %v2329_v4  ;;  %v2342_v14 = vpack.c.bf16 %v2332_v12, %v2330_v5  ;;  %v2242_v19 = vpack.c.bf16 %v2232_v7, %v2203_v6  ;;  %v9277_v4 = vld [vmem:[#allocation10 + $0x48] sm:$0xf0]  ;;  %v9340_v5 = vor.u32 %v10758_v63, %v9339_v58  ;;  %v10757_v7 = vld [vmem:[#allocation10 + $0xc4] sm:$0xf] }
 0x3b2   :  { %v9280_v6 = vor.u32 %v10741_v11, %v9277_v4  ;;  %v9341_v8 = vld [vmem:[#allocation10 + $0xc8] sm:$0xf0]  ;;  %2961 = vmatpush.bf16.msra.mxu0 %v9276_v62 }
 0x3b3   :  { %2557 = vmatmul.bf16.gmra.mxu0 %v2341_v13  ;;  %2586 = vmatmul.bf16.gmra.mxu1 %v2342_v14  ;;  %v2275_v24 = vunpack.c.l.bf16 %v2242_v19  ;;  %v2276_v23 = vunpack.c.h.bf16 %v2242_v19  ;;  %v9344_v12 = vor.u32 %v10757_v7, %v9341_v8  ;;  %v10756_v19 = vld [vmem:[#allocation10 + $0xb4] sm:$0xf0] }
 0x3b4   :  { %2615 = vmatmul.bf16.gmra.mxu2 %v2341_v13  ;;  %2644 = vmatmul.bf16.gmra.mxu3 %v2342_v14  ;;  %v9267_v13 = vld [vmem:[#allocation10 + $0x30] sm:$0xf]  ;;  %v10740_v14 = vld [vmem:[#allocation10 + $0x34] sm:$0xf0] }
 0x3b5   :  { %v2293_v28 = vadd.f32 %v12655_v32, %v2275_v24  ;;  %v2294_v29 = vadd.f32 %v12657_v30, %v2276_v23  ;;  %3019 = vmatpush.bf16.msrb.mxu2 %v9280_v6  ;;  %v9268_v18 = vor.u32 %v10740_v14, %v9267_v13  ;;  %v10755_v24 = vld [vmem:[#allocation10 + $0xb4] sm:$0xf]  ;;  %v9333_v23 = vld [vmem:[#allocation10 + $0xb8] sm:$0xf0] }
 0x3b6   :  { %v2204_v15 = vpop.f32.mrf.mxu2  ;;  %v2233_v16 = vpop.f32.mrf.mxu3 }
 0x3b7   :  { %v2205_v25 = vadd.f32 %v2204_v15, %v2074_v21  ;;  %v2234_v26 = vadd.f32 %v2233_v16, %v2132_v20  ;;  %v2333_v35 = vmax.f32 %v2293_v28, 0.0  ;;  %v2334_v1 = vmax.f32 %v2294_v29, 0.0  ;;  %v10739_v20 = vld [vmem:[#allocation10 + $0x34] sm:$0xf]  ;;  %v9269_v21 = vld [vmem:[#allocation10 + $0x38] sm:$0xf0]  ;;  %2962 = vmatpush.bf16.msra.mxu0 %v9268_v18 }
 0x3b8   :  { %v9332_v15 = vor.u32 %v10756_v19, %v9331_v17  ;;  %v9272_v16 = vor.u32 %v10739_v20, %v9269_v21  ;;  %v10754_v28 = vld [vmem:[#allocation10 + $0xa4] sm:$0xf0]  ;;  %v10737_v29 = vld [vmem:[#allocation10 + $0x24] sm:$0xf] }
 0x3b9   :  { %v2243_v27 = vpack.c.bf16 %v2234_v26, %v2205_v25  ;;  %v9336_v25 = vor.u32 %v10755_v24, %v9333_v23  ;;  %v9259_v26 = vld [vmem:[#allocation10 + $0x20] sm:$0xf] }
 0x3ba   :  { %3020 = vmatpush.bf16.msrb.mxu2 %v9272_v16 }
 0x3bb   :  { %v2277_v33 = vunpack.c.l.bf16 %v2243_v27  ;;  %v2278_v37 = vunpack.c.h.bf16 %v2243_v27  ;;  %v10738_v27 = vld [vmem:[#allocation10 + $0x24] sm:$0xf0] }
 0x3bd   :  { %v2295_v31 = vadd.f32 %v12655_v32, %v2277_v33  ;;  %v2296_v34 = vadd.f32 %v12657_v30, %v2278_v37  ;;  %v9356_v32 = vor.u32 %v10762_v42, %v9355_v41  ;;  %v10761_v30 = vld [vmem:[#allocation10 + $0xe4] sm:$0xf]  ;;  %v9323_v33 = vld [vmem:[#allocation10 + $0xa0] sm:$0xf]  ;;  %v9260_v37 = vor.u32 %v10738_v27, %v9259_v26  ;;  %v10735_v42 = vld [vmem:[#allocation10 + $0x14] sm:$0xf] }
 0x3be   :  { %v9360_v45 = vor.u32 %v10761_v30, %v9357_v44  ;;  %v9317_v30 = vld [vmem:[#allocation10 + $0x98] sm:$0xf0] }
 0x3bf   :  { %v2335_v36 = vmax.f32 %v2295_v31, 0.0  ;;  %v2336_v3 = vmax.f32 %v2296_v34, 0.0  ;;  %2988 = vmatpush.bf16.msra.mxu1 %v9356_v32  ;;  %v9324_v31 = vor.u32 %v10754_v28, %v9323_v33  ;;  %v9261_v34 = vld [vmem:[#allocation10 + $0x28] sm:$0xf0]  ;;  %2963 = vmatpush.bf16.msra.mxu0 %v9260_v37  ;;  %v9256_v32 = vor.u32 %v10735_v42, %v9253_v43 }
 0x3c0   :  { %3046 = vmatpush.bf16.msrb.mxu3 %v9360_v45  ;;  %v9320_v46 = vor.u32 %v10751_v61, %v9317_v30 }
 0x3c1   :  { %v2343_v38 = vpack.c.bf16 %v2335_v36, %v2333_v35  ;;  %v2344_v59 = vpack.c.bf16 %v2336_v3, %v2334_v1  ;;  %v10753_v35 = vld [vmem:[#allocation10 + $0xa4] sm:$0xf]  ;;  %v9325_v36 = vld [vmem:[#allocation10 + $0xa8] sm:$0xf0]  ;;  %v9264_v3 = vor.u32 %v10737_v29, %v9261_v34 }
 0x3c2   :  { %v2346_v1 = vld [vmem:[#allocation4 + $0x5] ss:$8 sm:$0x3] }
 0x3c3   :  { %2562 = vmatmul.bf16.gmra.mxu0 %v2343_v38  ;;  %2591 = vmatmul.bf16.gmra.mxu1 %v2344_v59  ;;  %v2664_v44 = vperm.slane %v2346_v1, 0  ;;  %v2665_v45 = vperm.slane %v2346_v1, 1 }
 0x3c4   :  { %2620 = vmatmul.bf16.gmra.mxu2 %v2343_v38  ;;  %2649 = vmatmul.bf16.gmra.mxu3 %v2344_v59  ;;  %v9328_v38 = vor.u32 %v10753_v35, %v9325_v36  ;;  %v9251_v59 = vld [vmem:[#allocation10 + $0x10] sm:$0xf] }
 0x3c5   :  { %2989 = vmatpush.bf16.msra.mxu1 %v9348_v9  ;;  %3047 = vmatpush.bf16.msrb.mxu3 %v9352_v47  ;;  %v9252_v41 = vor.u32 %v10736_v39, %v9251_v59  ;;  %v9245_v9 = vld [vmem:[#allocation10 + $0x8] sm:$0xf0]  ;;  %v2668_v57 = vpack.c.bf16 %v2665_v45, %v2664_v44 }
 0x3c6   :  { %3021 = vmatpush.bf16.msrb.mxu2 %v9264_v3  ;;  %v9248_v55 = vor.u32 %v10733_v54, %v9245_v9  ;;  %v9309_v47 = vld [vmem:[#allocation10 + $0x88] sm:$0xf0] }
 0x3c7   :  { %2964 = vmatpush.bf16.msra.mxu0 %v9252_v41  ;;  %v9312_v51 = vor.u32 %v10749_v56, %v9309_v47  ;;  %v2670_v58 = vunpack.c.l.b16 %v2668_v57  ;;  %v2671_v11 = vunpack.c.h.b16 %v2668_v57 }
 0x3c9   :  { %2990 = vmatpush.bf16.msra.mxu1 %v9340_v5  ;;  %3048 = vmatpush.bf16.msrb.mxu3 %v9344_v12  ;;  %v2672_v4 = vpack.c.b16 %v2670_v58, %v2670_v58  ;;  %v2673_v5 = vpack.c.b16 %v2671_v11, %v2671_v11 }
 0x3ca   :  { %3022 = vmatpush.bf16.msrb.mxu2 %v9256_v32 }
 0x3cb   :  { %2965 = vmatpush.bf16.msra.mxu0 %v9244_v52  ;;  %v2675_v8 = vpack.i.b16 %v2672_v4, %v2672_v4  ;;  %v2679_v13 = vpack.i.b16 %v2673_v5, %v2673_v5 }
 0x3cd   :  { %2991 = vmatpush.bf16.msra.mxu1 %v9332_v15  ;;  %3049 = vmatpush.bf16.msrb.mxu3 %v9336_v25  ;;  %v2677_v20 = vperm.slane %v2675_v8, 0  ;;  %v2681_v21 = vperm.slane %v2679_v13, 0 }
 0x3ce   :  { %3023 = vmatpush.bf16.msrb.mxu2 %v9248_v55 }
 0x3cf   :  { %v12684_v16 = vunpack.c.l.bf16 %v2677_v20  ;;  %v12686_v26 = vunpack.c.l.bf16 %v2681_v21  ;;  %v9491_v20 = vld [vmem:[#allocation12 + $0xf0] sm:$0xf] }
 0x3d1   :  { %2992 = vmatpush.bf16.msra.mxu1 %v9324_v31  ;;  %3050 = vmatpush.bf16.msrb.mxu3 %v9328_v38 }
 0x3d5   :  { %2993 = vmatpush.bf16.msra.mxu1 %v9316_v60  ;;  %3051 = vmatpush.bf16.msrb.mxu3 %v9320_v46 }
 0x3d9   :  { %2994 = vmatpush.bf16.msra.mxu1 %v9308_v10  ;;  %3052 = vmatpush.bf16.msrb.mxu3 %v9312_v51 }
 0x410   :  { %v2548_v62 = vpop.f32.mrf.mxu0  ;;  %v2577_v63 = vpop.f32.mrf.mxu1 }
 0x411   :  { %v2578_v18 = vadd.f32 %v2577_v63, %v2548_v62 }
 0x417   :  { %v2606_v6 = vpop.f32.mrf.mxu2  ;;  %v2635_v7 = vpop.f32.mrf.mxu3 }
 0x418   :  { %v2636_v12 = vadd.f32 %v2635_v7, %v2606_v6  ;;  %v2550_v14 = vpop.f32.mrf.mxu0  ;;  %v2579_v17 = vpop.f32.mrf.mxu1 }
 0x419   :  { %v2580_v27 = vadd.f32 %v2579_v17, %v2550_v14 }
 0x41a   :  { %v2655_v19 = vpack.c.bf16 %v2636_v12, %v2578_v18  ;;  %v9427_v18 = vld [vmem:[#allocation12 + $0x70] sm:$0xf] }
 0x41c   :  { %v2682_v15 = vunpack.c.l.bf16 %v2655_v19  ;;  %v2683_v25 = vunpack.c.h.bf16 %v2655_v19  ;;  %v10780_v19 = vld [vmem:[#allocation12 + $0x74] sm:$0xf0] }
 0x41d   :  { %v9428_v21 = vor.u32 %v10780_v19, %v9427_v18  ;;  %v10778_v18 = vld [vmem:[#allocation12 + $0x64] sm:$0xf0]  ;;  %v9483_v19 = vld [vmem:[#allocation12 + $0xe0] sm:$0xf] }
 0x41e   :  { %v2700_v31 = vadd.f32 %v12684_v16, %v2682_v15  ;;  %v2701_v34 = vadd.f32 %v12686_v26, %v2683_v25  ;;  %v10796_v15 = vld [vmem:[#allocation12 + $0xf4] sm:$0xf0] }
 0x41f   :  { %v2608_v24 = vpop.f32.mrf.mxu2  ;;  %v2637_v23 = vpop.f32.mrf.mxu3  ;;  %3377 = vmatpush.bf16.msrb.mxu0 %v9428_v21  ;;  %v10794_v21 = vld [vmem:[#allocation12 + $0xe4] sm:$0xf0] }
 0x420   :  { %v2638_v33 = vadd.f32 %v2637_v23, %v2608_v24  ;;  %v2553_v37 = vpop.f32.mrf.mxu0  ;;  %v2582_v28 = vpop.f32.mrf.mxu1  ;;  %v2740_v38 = vmax.f32 %v2700_v31, 0.0  ;;  %v2741_v40 = vmax.f32 %v2701_v34, 0.0  ;;  %v10779_v24 = vld [vmem:[#allocation12 + $0x74] sm:$0xf]  ;;  %v9429_v23 = vld [vmem:[#allocation12 + $0x78] sm:$0xf0] }
 0x421   :  { %v2583_v32 = vadd.f32 %v2582_v28, %v2553_v37  ;;  %v9492_v37 = vor.u32 %v10796_v15, %v9491_v20  ;;  %v9432_v28 = vor.u32 %v10779_v24, %v9429_v23  ;;  %v9493_v31 = vld [vmem:[#allocation12 + $0xf8] sm:$0xf0]  ;;  %v10777_v15 = vld [vmem:[#allocation12 + $0x64] sm:$0xf]  ;;  %v9421_v24 = vld [vmem:[#allocation12 + $0x68] sm:$0xf0] }
 0x422   :  { %v2656_v29 = vpack.c.bf16 %v2638_v33, %v2580_v27  ;;  %v9424_v23 = vor.u32 %v10777_v15, %v9421_v24  ;;  %v9381_v15 = vld [vmem:[#allocation12 + $0x18] sm:$0xf0] }
 0x423   :  { %3406 = vmatpush.bf16.msrb.mxu1 %v9492_v37  ;;  %3435 = vmatpush.bf16.msra.mxu2 %v9432_v28  ;;  %v10776_v37 = vld [vmem:[#allocation12 + $0x54] sm:$0xf0]  ;;  %v9475_v28 = vld [vmem:[#allocation12 + $0xd0] sm:$0xf] }
 0x424   :  { %v2684_v35 = vunpack.c.l.bf16 %v2656_v29  ;;  %v2685_v36 = vunpack.c.h.bf16 %v2656_v29  ;;  %v10795_v29 = vld [vmem:[#allocation12 + $0xf4] sm:$0xf] }
 0x426   :  { %v2702_v1 = vadd.f32 %v12684_v16, %v2684_v35  ;;  %v2703_v3 = vadd.f32 %v12686_v26, %v2685_v36 }
 0x427   :  { %v2611_v59 = vpop.f32.mrf.mxu2  ;;  %v2640_v39 = vpop.f32.mrf.mxu3  ;;  %3436 = vmatpush.bf16.msra.mxu2 %v9424_v23  ;;  %v10783_v23 = vld [vmem:[#allocation12 + $0x94] sm:$0xf] }
 0x428   :  { %v2742_v41 = vmax.f32 %v2702_v1, 0.0  ;;  %v2743_v49 = vmax.f32 %v2703_v3, 0.0  ;;  %v2641_v42 = vadd.f32 %v2640_v39, %v2611_v59  ;;  %v2555_v43 = vpop.f32.mrf.mxu0  ;;  %v2584_v60 = vpop.f32.mrf.mxu1  ;;  %v9496_v1 = vor.u32 %v10795_v29, %v9493_v31  ;;  %v10792_v31 = vld [vmem:[#allocation12 + $0xd4] sm:$0xf0] }
 0x429   :  { %v2585_v22 = vadd.f32 %v2584_v60, %v2555_v43 }
 0x42a   :  { %v2756_v61 = vpack.c.bf16 %v2742_v41, %v2740_v38  ;;  %v2757_v30 = vpack.c.bf16 %v2743_v49, %v2741_v40  ;;  %v2657_v44 = vpack.c.bf16 %v2641_v42, %v2583_v32  ;;  %3464 = vmatpush.bf16.msra.mxu3 %v9496_v1 }
 0x42c   :  { %2966 = vmatmul.bf16.vlgmr.msra.gmra.mxu0 %v2756_v61  ;;  %2995 = vmatmul.bf16.vlgmr.msra.gmra.mxu1 %v2757_v30  ;;  %v2686_v45 = vunpack.c.l.bf16 %v2657_v44  ;;  %v2687_v50 = vunpack.c.h.bf16 %v2657_v44 }
 0x42d   :  { %3024 = vmatmul.bf16.vlgmr.msrb.gmra.mxu2 %v2756_v61  ;;  %3053 = vmatmul.bf16.vlgmr.msrb.gmra.mxu3 %v2757_v30 }
 0x42e   :  { %v2704_v10 = vadd.f32 %v12684_v16, %v2686_v45  ;;  %v2705_v47 = vadd.f32 %v12686_v26, %v2687_v50 }
 0x42f   :  { %v2613_v46 = vpop.f32.mrf.mxu2  ;;  %v2642_v48 = vpop.f32.mrf.mxu3 }
 0x430   :  { %v2643_v52 = vadd.f32 %v2642_v48, %v2613_v46  ;;  %v2558_v53 = vpop.f32.mrf.mxu0  ;;  %v2587_v54 = vpop.f32.mrf.mxu1  ;;  %v2744_v63 = vmax.f32 %v2704_v10, 0.0  ;;  %v2745_v5 = vmax.f32 %v2705_v47, 0.0 }
 0x431   :  { %v2588_v7 = vadd.f32 %v2587_v54, %v2558_v53 }
 0x432   :  { %v2658_v9 = vpack.c.bf16 %v2643_v52, %v2585_v22 }
 0x434   :  { %v2688_v55 = vunpack.c.l.bf16 %v2658_v9  ;;  %v2689_v56 = vunpack.c.h.bf16 %v2658_v9 }
 0x436   :  { %v2706_v51 = vadd.f32 %v12684_v16, %v2688_v55  ;;  %v2707_v57 = vadd.f32 %v12686_v26, %v2689_v56 }
 0x437   :  { %v2616_v58 = vpop.f32.mrf.mxu2  ;;  %v2645_v62 = vpop.f32.mrf.mxu3 }
 0x438   :  { %v2646_v11 = vadd.f32 %v2645_v62, %v2616_v58  ;;  %v2746_v4 = vmax.f32 %v2706_v51, 0.0  ;;  %v2747_v6 = vmax.f32 %v2707_v57, 0.0  ;;  %v2560_v8 = vpop.f32.mrf.mxu0  ;;  %v2589_v12 = vpop.f32.mrf.mxu1 }
 0x439   :  { %v2590_v35 = vadd.f32 %v2589_v12, %v2560_v8 }
 0x43a   :  { %v2758_v13 = vpack.c.bf16 %v2746_v4, %v2744_v63  ;;  %v2759_v14 = vpack.c.bf16 %v2747_v6, %v2745_v5  ;;  %v2659_v17 = vpack.c.bf16 %v2646_v11, %v2588_v7 }
 0x43c   :  { %2971 = vmatmul.bf16.gmra.mxu0 %v2758_v13  ;;  %3000 = vmatmul.bf16.gmra.mxu1 %v2759_v14  ;;  %v2690_v25 = vunpack.c.l.bf16 %v2659_v17  ;;  %v2691_v34 = vunpack.c.h.bf16 %v2659_v17  ;;  %v9419_v17 = vld [vmem:[#allocation12 + $0x60] sm:$0xf] }
 0x43d   :  { %3029 = vmatmul.bf16.gmra.mxu2 %v2758_v13  ;;  %3058 = vmatmul.bf16.gmra.mxu3 %v2759_v14  ;;  %v9420_v20 = vor.u32 %v10778_v18, %v9419_v17  ;;  %v10768_v17 = vld [vmem:[#allocation12 + $0x14] sm:$0xf0]  ;;  %v9443_v18 = vld [vmem:[#allocation12 + $0x90] sm:$0xf] }
 0x43e   :  { %v2708_v39 = vadd.f32 %v12684_v16, %v2690_v25  ;;  %v2709_v49 = vadd.f32 %v12686_v26, %v2691_v34  ;;  %v9485_v25 = vld [vmem:[#allocation12 + $0xe8] sm:$0xf0]  ;;  %v10775_v34 = vld [vmem:[#allocation12 + $0x54] sm:$0xf] }
 0x43f   :  { %v2618_v27 = vpop.f32.mrf.mxu2  ;;  %v2647_v33 = vpop.f32.mrf.mxu3  ;;  %3378 = vmatpush.bf16.msrb.mxu0 %v9420_v20  ;;  %v10784_v20 = vld [vmem:[#allocation12 + $0x94] sm:$0xf0] }
 0x440   :  { %v2648_v36 = vadd.f32 %v2647_v33, %v2618_v27  ;;  %v2563_v38 = vpop.f32.mrf.mxu0  ;;  %v2592_v59 = vpop.f32.mrf.mxu1  ;;  %v2748_v61 = vmax.f32 %v2708_v39, 0.0  ;;  %v2749_v45 = vmax.f32 %v2709_v49, 0.0  ;;  %v9411_v33 = vld [vmem:[#allocation12 + $0x50] sm:$0xf]  ;;  %v9403_v39 = vld [vmem:[#allocation12 + $0x40] sm:$0xf]  ;;  %v9444_v24 = vor.u32 %v10784_v20, %v9443_v18 }
 0x441   :  { %v2593_v48 = vadd.f32 %v2592_v59, %v2563_v38  ;;  %v9412_v29 = vor.u32 %v10776_v37, %v9411_v33  ;;  %v9477_v38 = vld [vmem:[#allocation12 + $0xd8] sm:$0xf0]  ;;  %v9371_v37 = vld [vmem:[#allocation12] sm:$0xf] }
 0x442   :  { %v2660_v3 = vpack.c.bf16 %v2648_v36, %v2590_v35  ;;  %v9413_v35 = vld [vmem:[#allocation12 + $0x58] sm:$0xf0]  ;;  %v9476_v36 = vor.u32 %v10792_v31, %v9475_v28  ;;  %v10766_v28 = vld [vmem:[#allocation12 + $0x4] sm:$0xf0] }
 0x443   :  { %v9416_v1 = vor.u32 %v10775_v34, %v9413_v35  ;;  %3379 = vmatpush.bf16.msrb.mxu0 %v9412_v29  ;;  %v9435_v29 = vld [vmem:[#allocation12 + $0x80] sm:$0xf]  ;;  %v9372_v31 = vor.u32 %v10766_v28, %v9371_v37  ;;  %v10782_v34 = vld [vmem:[#allocation12 + $0x84] sm:$0xf0]  ;;  %v10765_v35 = vld [vmem:[#allocation12 + $0x4] sm:$0xf] }
 0x444   :  { %v2692_v40 = vunpack.c.l.bf16 %v2660_v3  ;;  %v2693_v41 = vunpack.c.h.bf16 %v2660_v3  ;;  %v10791_v3 = vld [vmem:[#allocation12 + $0xd4] sm:$0xf] }
 0x445   :  { %v9480_v59 = vor.u32 %v10791_v3, %v9477_v38  ;;  %3437 = vmatpush.bf16.msra.mxu2 %v9416_v1  ;;  %v9436_v1 = vor.u32 %v10782_v34, %v9435_v29  ;;  %v10781_v38 = vld [vmem:[#allocation12 + $0x84] sm:$0xf] }
 0x446   :  { %v2710_v42 = vadd.f32 %v12684_v16, %v2692_v40  ;;  %v2711_v43 = vadd.f32 %v12686_v26, %v2693_v41  ;;  %v10774_v40 = vld [vmem:[#allocation12 + $0x44] sm:$0xf0]  ;;  %v9467_v41 = vld [vmem:[#allocation12 + $0xc0] sm:$0xf] }
 0x447   :  { %v2621_v60 = vpop.f32.mrf.mxu2  ;;  %v2650_v32 = vpop.f32.mrf.mxu3  ;;  %v9404_v49 = vor.u32 %v10774_v40, %v9403_v39 }
 0x448   :  { %v2651_v30 = vadd.f32 %v2650_v32, %v2621_v60  ;;  %v2750_v44 = vmax.f32 %v2710_v42, 0.0  ;;  %v2751_v46 = vmax.f32 %v2711_v43, 0.0  ;;  %v2565_v53 = vpop.f32.mrf.mxu0  ;;  %v2594_v54 = vpop.f32.mrf.mxu1  ;;  %v10790_v42 = vld [vmem:[#allocation12 + $0xc4] sm:$0xf0]  ;;  %v10773_v43 = vld [vmem:[#allocation12 + $0x44] sm:$0xf] }
 0x449   :  { %v2595_v47 = vadd.f32 %v2594_v54, %v2565_v53  ;;  %v9405_v60 = vld [vmem:[#allocation12 + $0x48] sm:$0xf0]  ;;  %v9468_v32 = vor.u32 %v10790_v42, %v9467_v41  ;;  %3380 = vmatpush.bf16.msrb.mxu0 %v9404_v49  ;;  %v10771_v53 = vld [vmem:[#allocation12 + $0x34] sm:$0xf]  ;;  %v9397_v54 = vld [vmem:[#allocation12 + $0x38] sm:$0xf0] }
 0x44a   :  { %v2760_v50 = vpack.c.bf16 %v2750_v44, %v2748_v61  ;;  %v2761_v22 = vpack.c.bf16 %v2751_v46, %v2749_v45  ;;  %v2661_v52 = vpack.c.bf16 %v2651_v30, %v2593_v48  ;;  %v9408_v61 = vor.u32 %v10773_v43, %v9405_v60  ;;  %v10789_v30 = vld [vmem:[#allocation12 + $0xc4] sm:$0xf]  ;;  %v9469_v44 = vld [vmem:[#allocation12 + $0xc8] sm:$0xf0]  ;;  %v9395_v46 = vld [vmem:[#allocation12 + $0x30] sm:$0xf] }
 0x44b   :  { %v9472_v45 = vor.u32 %v10789_v30, %v9469_v44  ;;  %v10772_v48 = vld [vmem:[#allocation12 + $0x34] sm:$0xf0] }
 0x44c   :  { %2976 = vmatmul.bf16.gmra.mxu0 %v2760_v50  ;;  %3005 = vmatmul.bf16.gmra.mxu1 %v2761_v22  ;;  %v2694_v55 = vunpack.c.l.bf16 %v2661_v52  ;;  %v2695_v56 = vunpack.c.h.bf16 %v2661_v52  ;;  %v10788_v52 = vld [vmem:[#allocation12 + $0xb4] sm:$0xf0] }
 0x44d   :  { %3034 = vmatmul.bf16.gmra.mxu2 %v2760_v50  ;;  %3063 = vmatmul.bf16.gmra.mxu3 %v2761_v22  ;;  %v9459_v50 = vld [vmem:[#allocation12 + $0xb0] sm:$0xf]  ;;  %v9396_v22 = vor.u32 %v10772_v48, %v9395_v46 }
 0x44e   :  { %v2712_v63 = vadd.f32 %v12684_v16, %v2694_v55  ;;  %v2713_v11 = vadd.f32 %v12686_v26, %v2695_v56  ;;  %3438 = vmatpush.bf16.msra.mxu2 %v9408_v61  ;;  %v10787_v55 = vld [vmem:[#allocation12 + $0xb4] sm:$0xf]  ;;  %v9461_v56 = vld [vmem:[#allocation12 + $0xb8] sm:$0xf0] }
 0x44f   :  { %v2623_v9 = vpop.f32.mrf.mxu2  ;;  %v2652_v10 = vpop.f32.mrf.mxu3  ;;  %3381 = vmatpush.bf16.msrb.mxu0 %v9396_v22 }
 0x450   :  { %v2653_v51 = vadd.f32 %v2652_v10, %v2623_v9  ;;  %v2752_v6 = vmax.f32 %v2712_v63, 0.0  ;;  %v2753_v8 = vmax.f32 %v2713_v11, 0.0  ;;  %v9460_v9 = vor.u32 %v10788_v52, %v9459_v50  ;;  %v10786_v63 = vld [vmem:[#allocation12 + $0xa4] sm:$0xf0]  ;;  %v10769_v11 = vld [vmem:[#allocation12 + $0x24] sm:$0xf] }
 0x451   :  { %v9400_v10 = vor.u32 %v10771_v53, %v9397_v54 }
 0x452   :  { %v2662_v57 = vpack.c.bf16 %v2653_v51, %v2595_v47  ;;  %v9464_v47 = vor.u32 %v10787_v55, %v9461_v56  ;;  %v9387_v51 = vld [vmem:[#allocation12 + $0x20] sm:$0xf] }
 0x453   :  { %3439 = vmatpush.bf16.msra.mxu2 %v9400_v10 }
 0x454   :  { %v2696_v58 = vunpack.c.l.bf16 %v2662_v57  ;;  %v2697_v62 = vunpack.c.h.bf16 %v2662_v57  ;;  %v10770_v57 = vld [vmem:[#allocation12 + $0x24] sm:$0xf0] }
 0x456   :  { %v2714_v4 = vadd.f32 %v12684_v16, %v2696_v58  ;;  %v2715_v5 = vadd.f32 %v12686_v26, %v2697_v62  ;;  %v9484_v16 = vor.u32 %v10794_v21, %v9483_v19  ;;  %v10793_v26 = vld [vmem:[#allocation12 + $0xe4] sm:$0xf]  ;;  %v9451_v58 = vld [vmem:[#allocation12 + $0xa0] sm:$0xf]  ;;  %v9388_v62 = vor.u32 %v10770_v57, %v9387_v51  ;;  %v10767_v21 = vld [vmem:[#allocation12 + $0x14] sm:$0xf] }
 0x457   :  { %v9488_v27 = vor.u32 %v10793_v26, %v9485_v25  ;;  %v9445_v26 = vld [vmem:[#allocation12 + $0x98] sm:$0xf0] }
 0x458   :  { %v2754_v7 = vmax.f32 %v2714_v4, 0.0  ;;  %v2755_v12 = vmax.f32 %v2715_v5, 0.0  ;;  %3407 = vmatpush.bf16.msrb.mxu1 %v9484_v16  ;;  %v9452_v4 = vor.u32 %v10786_v63, %v9451_v58  ;;  %v9389_v5 = vld [vmem:[#allocation12 + $0x28] sm:$0xf0]  ;;  %3382 = vmatpush.bf16.msrb.mxu0 %v9388_v62  ;;  %v9384_v16 = vor.u32 %v10767_v21, %v9381_v15 }
 0x459   :  { %3465 = vmatpush.bf16.msra.mxu3 %v9488_v27  ;;  %v9448_v33 = vor.u32 %v10783_v23, %v9445_v26 }
 0x45a   :  { %v2762_v13 = vpack.c.bf16 %v2754_v7, %v2752_v6  ;;  %v2763_v14 = vpack.c.bf16 %v2755_v12, %v2753_v8  ;;  %v10785_v6 = vld [vmem:[#allocation12 + $0xa4] sm:$0xf]  ;;  %v9453_v7 = vld [vmem:[#allocation12 + $0xa8] sm:$0xf0]  ;;  %v9392_v12 = vor.u32 %v10769_v11, %v9389_v5 }
 0x45b   :  { %v2765_v8 = vld [vmem:[#allocation4 + $0x6] ss:$8 sm:$0x3] }
 0x45c   :  { %2981 = vmatmul.bf16.gmra.mxu0 %v2762_v13  ;;  %3010 = vmatmul.bf16.gmra.mxu1 %v2763_v14  ;;  %v3083_v25 = vperm.slane %v2765_v8, 0  ;;  %v3084_v27 = vperm.slane %v2765_v8, 1 }
 0x45d   :  { %3039 = vmatmul.bf16.gmra.mxu2 %v2762_v13  ;;  %3068 = vmatmul.bf16.gmra.mxu3 %v2763_v14  ;;  %v9456_v13 = vor.u32 %v10785_v6, %v9453_v7  ;;  %v9379_v14 = vld [vmem:[#allocation12 + $0x10] sm:$0xf] }
 0x45e   :  { %3408 = vmatpush.bf16.msrb.mxu1 %v9476_v36  ;;  %3466 = vmatpush.bf16.msra.mxu3 %v9480_v59  ;;  %v9380_v19 = vor.u32 %v10768_v17, %v9379_v14  ;;  %v9373_v36 = vld [vmem:[#allocation12 + $0x8] sm:$0xf0]  ;;  %v3087_v40 = vpack.c.bf16 %v3084_v27, %v3083_v25 }
 0x45f   :  { %3440 = vmatpush.bf16.msra.mxu2 %v9392_v12  ;;  %v9376_v3 = vor.u32 %v10765_v35, %v9373_v36  ;;  %v9437_v59 = vld [vmem:[#allocation12 + $0x88] sm:$0xf0] }
 0x460   :  { %3383 = vmatpush.bf16.msrb.mxu0 %v9380_v19  ;;  %v9440_v39 = vor.u32 %v10781_v38, %v9437_v59  ;;  %v3089_v41 = vunpack.c.l.b16 %v3087_v40  ;;  %v3090_v43 = vunpack.c.h.b16 %v3087_v40 }
 0x462   :  { %3409 = vmatpush.bf16.msrb.mxu1 %v9468_v32  ;;  %3467 = vmatpush.bf16.msra.mxu3 %v9472_v45  ;;  %v3091_v60 = vpack.c.b16 %v3089_v41, %v3089_v41  ;;  %v3092_v32 = vpack.c.b16 %v3090_v43, %v3090_v43 }
 0x463   :  { %3441 = vmatpush.bf16.msra.mxu2 %v9384_v16 }
 0x464   :  { %3384 = vmatpush.bf16.msrb.mxu0 %v9372_v31  ;;  %v3094_v44 = vpack.i.b16 %v3091_v60, %v3091_v60  ;;  %v3098_v46 = vpack.i.b16 %v3092_v32, %v3092_v32 }
 0x466   :  { %3410 = vmatpush.bf16.msrb.mxu1 %v9460_v9  ;;  %3468 = vmatpush.bf16.msra.mxu3 %v9464_v47  ;;  %v3096_v53 = vperm.slane %v3094_v44, 0  ;;  %v3100_v54 = vperm.slane %v3098_v46, 0 }
 0x467   :  { %3442 = vmatpush.bf16.msra.mxu2 %v9376_v3 }
 0x468   :  { %v12704_v10 = vunpack.c.l.bf16 %v3096_v53  ;;  %v12706_v51 = vunpack.c.l.bf16 %v3100_v54  ;;  %v9679_v53 = vld [vmem:[%s14567_s11 + $0x168] sm:$0xf] }
 0x46a   :  { %3411 = vmatpush.bf16.msrb.mxu1 %v9452_v4  ;;  %3469 = vmatpush.bf16.msra.mxu3 %v9456_v13 }
 0x46e   :  { %3412 = vmatpush.bf16.msrb.mxu1 %v9444_v24  ;;  %3470 = vmatpush.bf16.msra.mxu3 %v9448_v33 }
 0x472   :  { %3413 = vmatpush.bf16.msrb.mxu1 %v9436_v1  ;;  %3471 = vmatpush.bf16.msra.mxu3 %v9440_v39 }
 0x4a9   :  { %v2967_v49 = vpop.f32.mrf.mxu0  ;;  %v2996_v42 = vpop.f32.mrf.mxu1 }
 0x4aa   :  { %v2997_v22 = vadd.f32 %v2996_v42, %v2967_v49 }
 0x4b0   :  { %v3025_v61 = vpop.f32.mrf.mxu2  ;;  %v3054_v30 = vpop.f32.mrf.mxu3 }
 0x4b1   :  { %v3055_v45 = vadd.f32 %v3054_v30, %v3025_v61  ;;  %v2969_v48 = vpop.f32.mrf.mxu0  ;;  %v2998_v50 = vpop.f32.mrf.mxu1 }
 0x4b2   :  { %v2999_v57 = vadd.f32 %v2998_v50, %v2969_v48 }
 0x4b3   :  { %v3074_v52 = vpack.c.bf16 %v3055_v45, %v2997_v22  ;;  %v9583_v22 = vld [vmem:[%s14567_s11 + $0xa8] sm:$0xf] }
 0x4b5   :  { %v3101_v9 = vunpack.c.l.bf16 %v3074_v52  ;;  %v3102_v47 = vunpack.c.h.bf16 %v3074_v52  ;;  %v10819_v52 = vld [vmem:[%s14567_s11 + $0xb0] sm:$0xf0] }
 0x4b6   :  { %v9584_v54 = vor.u32 %v10819_v52, %v9583_v22  ;;  %v10840_v52 = vld [vmem:[%s14567_s11 + $0x158] sm:$0xf0] }
 0x4b7   :  { %v3119_v4 = vadd.f32 %v12704_v10, %v3101_v9  ;;  %v3120_v5 = vadd.f32 %v12706_v51, %v3102_v47  ;;  %v10843_v9 = vld [vmem:[%s14567_s11 + $0x170] sm:$0xf0] }
 0x4b8   :  { %v3027_v55 = vpop.f32.mrf.mxu2  ;;  %v3056_v56 = vpop.f32.mrf.mxu3  ;;  %3931 = vmatpush.bf16.msra.mxu0 %v9584_v54  ;;  %v9573_v54 = vld [vmem:[%s14567_s11 + $0x9c] sm:$0xf0] }
 0x4b9   :  { %v3057_v58 = vadd.f32 %v3056_v56, %v3027_v55  ;;  %v2972_v62 = vpop.f32.mrf.mxu0  ;;  %v3001_v63 = vpop.f32.mrf.mxu1  ;;  %v3159_v13 = vmax.f32 %v3119_v4, 0.0  ;;  %v3160_v18 = vmax.f32 %v3120_v5, 0.0  ;;  %v10818_v55 = vld [vmem:[%s14567_s11 + $0xac] sm:$0xf]  ;;  %v9585_v56 = vld [vmem:[%s14567_s11 + $0xb4] sm:$0xf0] }
 0x4ba   :  { %v3002_v16 = vadd.f32 %v3001_v63, %v2972_v62  ;;  %v9680_v62 = vor.u32 %v10843_v9, %v9679_v53  ;;  %v9588_v63 = vor.u32 %v10818_v55, %v9585_v56  ;;  %v9681_v4 = vld [vmem:[%s14567_s11 + $0x174] sm:$0xf0]  ;;  %v10815_v53 = vld [vmem:[%s14567_s11 + $0x94] sm:$0xf] }
 0x4bb   :  { %v3075_v11 = vpack.c.bf16 %v3057_v58, %v2999_v57  ;;  %v9576_v55 = vor.u32 %v10815_v53, %v9573_v54  ;;  %v10839_v56 = vld [vmem:[%s14567_s11 + $0x154] sm:$0xf]  ;;  %v9513_v53 = vld [vmem:[%s14567_s11 + $0x24] sm:$0xf0] }
 0x4bc   :  { %3960 = vmatpush.bf16.msra.mxu1 %v9680_v62  ;;  %3989 = vmatpush.bf16.msrb.mxu2 %v9588_v63  ;;  %v10813_v62 = vld [vmem:[%s14567_s11 + $0x80] sm:$0xf0]  ;;  %v9655_v63 = vld [vmem:[%s14567_s11 + $0x138] sm:$0xf] }
 0x4bd   :  { %v3103_v6 = vunpack.c.l.bf16 %v3075_v11  ;;  %v3104_v7 = vunpack.c.h.bf16 %v3075_v11  ;;  %v10842_v11 = vld [vmem:[%s14567_s11 + $0x16c] sm:$0xf] }
 0x4bf   :  { %v3121_v8 = vadd.f32 %v12704_v10, %v3103_v6  ;;  %v3122_v12 = vadd.f32 %v12706_v51, %v3104_v7 }
 0x4c0   :  { %v3030_v14 = vpop.f32.mrf.mxu2  ;;  %v3059_v17 = vpop.f32.mrf.mxu3  ;;  %3990 = vmatpush.bf16.msrb.mxu2 %v9576_v55  ;;  %v10824_v55 = vld [vmem:[%s14567_s11 + $0xdc] sm:$0xf] }
 0x4c1   :  { %v3161_v19 = vmax.f32 %v3121_v8, 0.0  ;;  %v3162_v20 = vmax.f32 %v3122_v12, 0.0  ;;  %v3060_v21 = vadd.f32 %v3059_v17, %v3030_v14  ;;  %v2974_v15 = vpop.f32.mrf.mxu0  ;;  %v3003_v24 = vpop.f32.mrf.mxu1  ;;  %v9684_v8 = vor.u32 %v10842_v11, %v9681_v4  ;;  %v10837_v4 = vld [vmem:[%s14567_s11 + $0x140] sm:$0xf0] }
 0x4c2   :  { %v3004_v29 = vadd.f32 %v3003_v24, %v2974_v15 }
 0x4c3   :  { %v3175_v23 = vpack.c.bf16 %v3161_v19, %v3159_v13  ;;  %v3176_v26 = vpack.c.bf16 %v3162_v20, %v3160_v18  ;;  %v3076_v25 = vpack.c.bf16 %v3060_v21, %v3002_v16  ;;  %4018 = vmatpush.bf16.msrb.mxu3 %v9684_v8 }
 0x4c5   :  { %3385 = vmatmul.bf16.vlgmr.msrb.gmra.mxu0 %v3175_v23  ;;  %3414 = vmatmul.bf16.vlgmr.msrb.gmra.mxu1 %v3176_v26  ;;  %v3105_v27 = vunpack.c.l.bf16 %v3076_v25  ;;  %v3106_v28 = vunpack.c.h.bf16 %v3076_v25 }
 0x4c6   :  { %3443 = vmatmul.bf16.vlgmr.msra.gmra.mxu2 %v3175_v23  ;;  %3472 = vmatmul.bf16.vlgmr.msra.gmra.mxu3 %v3176_v26 }
 0x4c7   :  { %v3123_v1 = vadd.f32 %v12704_v10, %v3105_v27  ;;  %v3124_v59 = vadd.f32 %v12706_v51, %v3106_v28 }
 0x4c8   :  { %v3032_v33 = vpop.f32.mrf.mxu2  ;;  %v3061_v37 = vpop.f32.mrf.mxu3 }
 0x4c9   :  { %v3062_v31 = vadd.f32 %v3061_v37, %v3032_v33  ;;  %v2977_v34 = vpop.f32.mrf.mxu0  ;;  %v3006_v35 = vpop.f32.mrf.mxu1  ;;  %v3163_v42 = vmax.f32 %v3123_v1, 0.0  ;;  %v3164_v32 = vmax.f32 %v3124_v59, 0.0 }
 0x4ca   :  { %v3007_v30 = vadd.f32 %v3006_v35, %v2977_v34 }
 0x4cb   :  { %v3077_v36 = vpack.c.bf16 %v3062_v31, %v3004_v29 }
 0x4cd   :  { %v3107_v3 = vunpack.c.l.bf16 %v3077_v36  ;;  %v3108_v38 = vunpack.c.h.bf16 %v3077_v36 }
 0x4cf   :  { %v3125_v39 = vadd.f32 %v12704_v10, %v3107_v3  ;;  %v3126_v40 = vadd.f32 %v12706_v51, %v3108_v38 }
 0x4d0   :  { %v3035_v41 = vpop.f32.mrf.mxu2  ;;  %v3064_v49 = vpop.f32.mrf.mxu3 }
 0x4d1   :  { %v3065_v43 = vadd.f32 %v3064_v49, %v3035_v41  ;;  %v3165_v60 = vmax.f32 %v3125_v39, 0.0  ;;  %v3166_v61 = vmax.f32 %v3126_v40, 0.0  ;;  %v2979_v44 = vpop.f32.mrf.mxu0  ;;  %v3008_v45 = vpop.f32.mrf.mxu1 }
 0x4d2   :  { %v3009_v6 = vadd.f32 %v3008_v45, %v2979_v44 }
 0x4d3   :  { %v3177_v46 = vpack.c.bf16 %v3165_v60, %v3163_v42  ;;  %v3178_v48 = vpack.c.bf16 %v3166_v61, %v3164_v32  ;;  %v3078_v50 = vpack.c.bf16 %v3065_v43, %v3007_v30 }
 0x4d5   :  { %3390 = vmatmul.bf16.gmra.mxu0 %v3177_v46  ;;  %3419 = vmatmul.bf16.gmra.mxu1 %v3178_v48  ;;  %v3109_v47 = vunpack.c.l.bf16 %v3078_v50  ;;  %v3110_v5 = vunpack.c.h.bf16 %v3078_v50  ;;  %v9571_v50 = vld [vmem:[%s14567_s11 + $0x90] sm:$0xf] }
 0x4d6   :  { %3448 = vmatmul.bf16.gmra.mxu2 %v3177_v46  ;;  %3477 = vmatmul.bf16.gmra.mxu3 %v3178_v48 }
 0x4d7   :  { %v3127_v17 = vadd.f32 %v12704_v10, %v3109_v47  ;;  %v3128_v20 = vadd.f32 %v12706_v51, %v3110_v5  ;;  %v9669_v47 = vld [vmem:[%s14567_s11 + $0x15c] sm:$0xf0]  ;;  %v10812_v5 = vld [vmem:[%s14567_s11 + $0x7c] sm:$0xf] }
 0x4d8   :  { %v3037_v57 = vpop.f32.mrf.mxu2  ;;  %v3066_v58 = vpop.f32.mrf.mxu3 }
 0x4d9   :  { %v3067_v7 = vadd.f32 %v3066_v58, %v3037_v57  ;;  %v2982_v13 = vpop.f32.mrf.mxu0  ;;  %v3011_v14 = vpop.f32.mrf.mxu1  ;;  %v3167_v23 = vmax.f32 %v3127_v17, 0.0  ;;  %v3168_v27 = vmax.f32 %v3128_v20, 0.0  ;;  %v9672_v57 = vor.u32 %v10839_v56, %v9669_v47  ;;  %v9559_v58 = vld [vmem:[%s14567_s11 + $0x78] sm:$0xf]  ;;  %v9547_v17 = vld [vmem:[%s14567_s11 + $0x60] sm:$0xf] }
 0x4da   :  { %v3012_v37 = vadd.f32 %v3011_v14, %v2982_v13  ;;  %v9560_v11 = vor.u32 %v10813_v62, %v9559_v58  ;;  %v9657_v13 = vld [vmem:[%s14567_s11 + $0x144] sm:$0xf0]  ;;  %v9499_v62 = vld [vmem:[%s14567_s11] sm:$0xf] }
 0x4db   :  { %v3079_v12 = vpack.c.bf16 %v3067_v7, %v3009_v6  ;;  %v9561_v6 = vld [vmem:[%s14567_s11 + $0x84] sm:$0xf0]  ;;  %4019 = vmatpush.bf16.msrb.mxu3 %v9672_v57  ;;  %v9656_v7 = vor.u32 %v10837_v4, %v9655_v63  ;;  %v10798_v63 = vld [vmem:[%s14567_s11 + $0x8] sm:$0xf0] }
 0x4dc   :  { %v9564_v8 = vor.u32 %v10812_v5, %v9561_v6  ;;  %v9609_v56 = vld [vmem:[%s14567_s11 + $0xe4] sm:$0xf0]  ;;  %v9500_v4 = vor.u32 %v10798_v63, %v9499_v62  ;;  %v10822_v5 = vld [vmem:[%s14567_s11 + $0xc8] sm:$0xf0]  ;;  %v10797_v6 = vld [vmem:[%s14567_s11 + $0x4] sm:$0xf] }
 0x4dd   :  { %v3111_v18 = vunpack.c.l.bf16 %v3079_v12  ;;  %v3112_v19 = vunpack.c.h.bf16 %v3079_v12  ;;  %v10836_v12 = vld [vmem:[%s14567_s11 + $0x13c] sm:$0xf]  ;;  %v9612_v58 = vor.u32 %v10824_v55, %v9609_v56  ;;  %v9687_v62 = vld [vmem:[%s14567_s11 + $0x170] sm:$0xf] }
 0x4de   :  { %v9660_v14 = vor.u32 %v10836_v12, %v9657_v13  ;;  %3991 = vmatpush.bf16.msrb.mxu2 %v9564_v8  ;;  %v10821_v13 = vld [vmem:[%s14567_s11 + $0xc4] sm:$0xf] }
 0x4df   :  { %v3129_v21 = vadd.f32 %v12704_v10, %v3111_v18  ;;  %v3130_v15 = vadd.f32 %v12706_v51, %v3112_v19  ;;  %v10810_v18 = vld [vmem:[%s14567_s11 + $0x68] sm:$0xf0]  ;;  %v9643_v19 = vld [vmem:[%s14567_s11 + $0x120] sm:$0xf] }
 0x4e0   :  { %v3040_v24 = vpop.f32.mrf.mxu2  ;;  %v3069_v16 = vpop.f32.mrf.mxu3  ;;  %4020 = vmatpush.bf16.msrb.mxu3 %v9660_v14  ;;  %v9548_v20 = vor.u32 %v10810_v18, %v9547_v17  ;;  %v9597_v14 = vld [vmem:[%s14567_s11 + $0xcc] sm:$0xf0] }
 0x4e1   :  { %v3070_v26 = vadd.f32 %v3069_v16, %v3040_v24  ;;  %v3169_v25 = vmax.f32 %v3129_v21, 0.0  ;;  %v3170_v33 = vmax.f32 %v3130_v15, 0.0  ;;  %v2984_v34 = vpop.f32.mrf.mxu0  ;;  %v3013_v35 = vpop.f32.mrf.mxu1  ;;  %v10834_v21 = vld [vmem:[%s14567_s11 + $0x128] sm:$0xf0]  ;;  %v10809_v15 = vld [vmem:[%s14567_s11 + $0x64] sm:$0xf]  ;;  %v9600_v17 = vor.u32 %v10821_v13, %v9597_v14 }
 0x4e2   :  { %v3014_v59 = vadd.f32 %v3013_v35, %v2984_v34  ;;  %v9549_v24 = vld [vmem:[%s14567_s11 + $0x6c] sm:$0xf0]  ;;  %v9644_v16 = vor.u32 %v10834_v21, %v9643_v19  ;;  %v10806_v34 = vld [vmem:[%s14567_s11 + $0x4c] sm:$0xf]  ;;  %v9537_v35 = vld [vmem:[%s14567_s11 + $0x54] sm:$0xf0] }
 0x4e3   :  { %v3179_v28 = vpack.c.bf16 %v3169_v25, %v3167_v23  ;;  %v3180_v29 = vpack.c.bf16 %v3170_v33, %v3168_v27  ;;  %v3080_v31 = vpack.c.bf16 %v3070_v26, %v3012_v37  ;;  %v9552_v23 = vor.u32 %v10809_v15, %v9549_v24  ;;  %v10833_v26 = vld [vmem:[%s14567_s11 + $0x124] sm:$0xf]  ;;  %v9645_v25 = vld [vmem:[%s14567_s11 + $0x12c] sm:$0xf0]  ;;  %v9535_v33 = vld [vmem:[%s14567_s11 + $0x48] sm:$0xf] }
 0x4e4   :  { %v9648_v27 = vor.u32 %v10833_v26, %v9645_v25  ;;  %v10807_v37 = vld [vmem:[%s14567_s11 + $0x50] sm:$0xf0]  ;;  %v9675_v13 = vld [vmem:[%s14567_s11 + $0x158] sm:$0xf] }
 0x4e5   :  { %3395 = vmatmul.bf16.gmra.mxu0 %v3179_v28  ;;  %3424 = vmatmul.bf16.gmra.mxu1 %v3180_v29  ;;  %v3113_v3 = vunpack.c.l.bf16 %v3080_v31  ;;  %v3114_v38 = vunpack.c.h.bf16 %v3080_v31  ;;  %v10831_v31 = vld [vmem:[%s14567_s11 + $0x110] sm:$0xf0] }
 0x4e6   :  { %3453 = vmatmul.bf16.gmra.mxu2 %v3179_v28  ;;  %3482 = vmatmul.bf16.gmra.mxu3 %v3180_v29  ;;  %v9631_v28 = vld [vmem:[%s14567_s11 + $0x108] sm:$0xf]  ;;  %v9536_v29 = vor.u32 %v10807_v37, %v9535_v33 }
 0x4e7   :  { %v3131_v42 = vadd.f32 %v12704_v10, %v3113_v3  ;;  %v3132_v43 = vadd.f32 %v12706_v51, %v3114_v38  ;;  %3992 = vmatpush.bf16.msrb.mxu2 %v9552_v23  ;;  %4021 = vmatpush.bf16.msrb.mxu3 %v9648_v27  ;;  %v10830_v3 = vld [vmem:[%s14567_s11 + $0x10c] sm:$0xf]  ;;  %v9633_v38 = vld [vmem:[%s14567_s11 + $0x114] sm:$0xf0] }
 0x4e8   :  { %v3042_v36 = vpop.f32.mrf.mxu2  ;;  %v3071_v1 = vpop.f32.mrf.mxu3 }
 0x4e9   :  { %v3072_v39 = vadd.f32 %v3071_v1, %v3042_v36  ;;  %v3171_v61 = vmax.f32 %v3131_v42, 0.0  ;;  %v3172_v44 = vmax.f32 %v3132_v43, 0.0  ;;  %v9632_v36 = vor.u32 %v10831_v31, %v9631_v28  ;;  %v10828_v42 = vld [vmem:[%s14567_s11 + $0xf8] sm:$0xf0]  ;;  %v10803_v43 = vld [vmem:[%s14567_s11 + $0x34] sm:$0xf] }
 0x4ea   :  { %v9540_v1 = vor.u32 %v10806_v34, %v9537_v35 }
 0x4eb   :  { %v3081_v40 = vpack.c.bf16 %v3072_v39, %v3014_v59  ;;  %v9636_v59 = vor.u32 %v10830_v3, %v9633_v38  ;;  %v9523_v39 = vld [vmem:[%s14567_s11 + $0x30] sm:$0xf] }
 0x4ec   :  { %3993 = vmatpush.bf16.msrb.mxu2 %v9540_v1 }
 0x4ed   :  { %v3115_v41 = vunpack.c.l.bf16 %v3081_v40  ;;  %v3116_v49 = vunpack.c.h.bf16 %v3081_v40  ;;  %v10804_v40 = vld [vmem:[%s14567_s11 + $0x38] sm:$0xf0]  ;;  %4022 = vmatpush.bf16.msrb.mxu3 %v9636_v59 }
 0x4ef   :  { %v3133_v60 = vadd.f32 %v12704_v10, %v3115_v41  ;;  %v3134_v32 = vadd.f32 %v12706_v51, %v3116_v49  ;;  %v10816_v10 = vld [vmem:[%s14567_s11 + $0x98] sm:$0xf0]  ;;  %v9667_v51 = vld [vmem:[%s14567_s11 + $0x150] sm:$0xf]  ;;  %v9524_v49 = vor.u32 %v10804_v40, %v9523_v39 }
 0x4f0   :  { %v9572_v22 = vor.u32 %v10816_v10, %v9571_v50  ;;  %v9668_v9 = vor.u32 %v10840_v52, %v9667_v51  ;;  %v9619_v41 = vld [vmem:[%s14567_s11 + $0xf0] sm:$0xf]  ;;  %v10801_v50 = vld [vmem:[%s14567_s11 + $0x20] sm:$0xf0]  ;;  %v9607_v10 = vld [vmem:[%s14567_s11 + $0xd8] sm:$0xf] }
 0x4f1   :  { %v3173_v30 = vmax.f32 %v3133_v60, 0.0  ;;  %v3174_v45 = vmax.f32 %v3134_v32, 0.0  ;;  %v9620_v60 = vor.u32 %v10828_v42, %v9619_v41  ;;  %v9525_v32 = vld [vmem:[%s14567_s11 + $0x3c] sm:$0xf0]  ;;  %v10800_v52 = vld [vmem:[%s14567_s11 + $0x1c] sm:$0xf] }
 0x4f2   :  { %3932 = vmatpush.bf16.msra.mxu0 %v9572_v22  ;;  %3961 = vmatpush.bf16.msra.mxu1 %v9668_v9  ;;  %v10825_v22 = vld [vmem:[%s14567_s11 + $0xe0] sm:$0xf0]  ;;  %v9516_v9 = vor.u32 %v10800_v52, %v9513_v53 }
 0x4f3   :  { %v3181_v46 = vpack.c.bf16 %v3173_v30, %v3171_v61  ;;  %v3182_v48 = vpack.c.bf16 %v3174_v45, %v3172_v44  ;;  %v10827_v61 = vld [vmem:[%s14567_s11 + $0xf4] sm:$0xf]  ;;  %v9621_v30 = vld [vmem:[%s14567_s11 + $0xfc] sm:$0xf0]  ;;  %v9528_v45 = vor.u32 %v10803_v43, %v9525_v32  ;;  %v9608_v54 = vor.u32 %v10825_v22, %v9607_v10 }
 0x4f4   :  { %v3184_v44 = vld [vmem:[#allocation4 + $0x7] ss:$8 sm:$0x3] }
 0x4f5   :  { %3400 = vmatmul.bf16.gmra.mxu0 %v3181_v46  ;;  %3429 = vmatmul.bf16.gmra.mxu1 %v3182_v48  ;;  %v3502_v47 = vperm.slane %v3184_v44, 0  ;;  %v3503_v57 = vperm.slane %v3184_v44, 1 }
 0x4f6   :  { %3458 = vmatmul.bf16.gmra.mxu2 %v3181_v46  ;;  %3487 = vmatmul.bf16.gmra.mxu3 %v3182_v48  ;;  %v9624_v46 = vor.u32 %v10827_v61, %v9621_v30  ;;  %v9511_v48 = vld [vmem:[%s14567_s11 + $0x18] sm:$0xf] }
 0x4f7   :  { %3933 = vmatpush.bf16.msra.mxu0 %v9560_v11  ;;  %3962 = vmatpush.bf16.msra.mxu1 %v9656_v7  ;;  %v9512_v51 = vor.u32 %v10801_v50, %v9511_v48  ;;  %v9595_v11 = vld [vmem:[%s14567_s11 + $0xc0] sm:$0xf]  ;;  %v9501_v7 = vld [vmem:[%s14567_s11 + $0xc] sm:$0xf0]  ;;  %v3506_v18 = vpack.c.bf16 %v3503_v57, %v3502_v47 }
 0x4f8   :  { %3994 = vmatpush.bf16.msrb.mxu2 %v9528_v45  ;;  %4023 = vmatpush.bf16.msrb.mxu3 %v9624_v46  ;;  %v9596_v8 = vor.u32 %v10822_v5, %v9595_v11  ;;  %v9504_v12 = vor.u32 %v10797_v6, %v9501_v7  ;;  %v9591_v57 = vld [vmem:[%s14567_s11 + $0xb0] sm:$0xf]  ;;  %v10844_v11 = vld [vmem:[%s14567_s11 + $0x178] sm:$0xf0] }
 0x4f9   :  { %v3508_v19 = vunpack.c.l.b16 %v3506_v18  ;;  %v3509_v15 = vunpack.c.h.b16 %v3506_v18 }
 0x4fb   :  { %3934 = vmatpush.bf16.msra.mxu0 %v9548_v20  ;;  %3963 = vmatpush.bf16.msra.mxu1 %v9644_v16  ;;  %v3510_v24 = vpack.c.b16 %v3508_v19, %v3508_v19  ;;  %v3511_v16 = vpack.c.b16 %v3509_v15, %v3509_v15  ;;  %v10841_v15 = vld [vmem:[%s14567_s11 + $0x160] sm:$0xf0] }
 0x4fc   :  { %3995 = vmatpush.bf16.msrb.mxu2 %v9516_v9  ;;  %4024 = vmatpush.bf16.msrb.mxu3 %v9612_v58  ;;  %v10820_v58 = vld [vmem:[%s14567_s11 + $0xb8] sm:$0xf0] }
 0x4fd   :  { %v3513_v25 = vpack.i.b16 %v3510_v24, %v3510_v24  ;;  %v3517_v33 = vpack.i.b16 %v3511_v16, %v3511_v16  ;;  %v9592_v63 = vor.u32 %v10820_v58, %v9591_v57  ;;  %v9676_v24 = vor.u32 %v10841_v15, %v9675_v13  ;;  %v9531_v57 = vld [vmem:[%s14567_s11 + $0x38] sm:$0xf]  ;;  %v10805_v58 = vld [vmem:[%s14567_s11 + $0x40] sm:$0xf0] }
 0x4ff   :  { %3935 = vmatpush.bf16.msra.mxu0 %v9536_v29  ;;  %3964 = vmatpush.bf16.msra.mxu1 %v9632_v36  ;;  %v3515_v34 = vperm.slane %v3513_v25, 0  ;;  %v3519_v35 = vperm.slane %v3517_v33, 0  ;;  %v10814_v25 = vld [vmem:[%s14567_s11 + $0x88] sm:$0xf0] }
 0x500   :  { %3996 = vmatpush.bf16.msrb.mxu2 %v9504_v12  ;;  %4025 = vmatpush.bf16.msrb.mxu3 %v9600_v17  ;;  %v10817_v12 = vld [vmem:[%s14567_s11 + $0xa0] sm:$0xf0] }
 0x501   :  { %v12916_v1 = vunpack.c.l.bf16 %v3515_v34  ;;  %v12918_v39 = vunpack.c.l.bf16 %v3519_v35  ;;  %v9555_v34 = vld [vmem:[%s14567_s11 + $0x68] sm:$0xf]  ;;  %v10811_v35 = vld [vmem:[%s14567_s11 + $0x70] sm:$0xf0] }
 0x503   :  { %3936 = vmatpush.bf16.msra.mxu0 %v9524_v49  ;;  %3965 = vmatpush.bf16.msra.mxu1 %v9620_v60 }
 0x507   :  { %3937 = vmatpush.bf16.msra.mxu0 %v9512_v51  ;;  %3966 = vmatpush.bf16.msra.mxu1 %v9608_v54 }
 0x50b   :  { %3938 = vmatpush.bf16.msra.mxu0 %v9500_v4  ;;  %3967 = vmatpush.bf16.msra.mxu1 %v9596_v8  ;;  %v9688_v4 = vor.u32 %v10844_v11, %v9687_v62  ;;  %v9579_v8 = vld [vmem:[%s14567_s11 + $0x98] sm:$0xf]  ;;  %v10829_v11 = vld [vmem:[%s14567_s11 + $0x100] sm:$0xf0] }
 0x50c   :  { %v9627_v62 = vld [vmem:[%s14567_s11 + $0xf8] sm:$0xf] }
 0x50f   :  { %4047 = vmatpush.bf16.msrb.mxu0 %v9592_v63  ;;  %4076 = vmatpush.bf16.msrb.mxu1 %v9688_v4  ;;  %v9532_v63 = vor.u32 %v10805_v58, %v9531_v57 }
 0x513   :  { %4077 = vmatpush.bf16.msrb.mxu1 %v9676_v24 }
 0x542   :  { %v3386_v20 = vpop.f32.mrf.mxu0  ;;  %v3415_v21 = vpop.f32.mrf.mxu1 }
 0x543   :  { %v3416_v29 = vadd.f32 %v3415_v21, %v3386_v20  ;;  %v9580_v21 = vor.u32 %v10817_v12, %v9579_v8  ;;  %v9519_v8 = vld [vmem:[%s14567_s11 + $0x20] sm:$0xf]  ;;  %v10802_v12 = vld [vmem:[%s14567_s11 + $0x28] sm:$0xf0] }
 0x545   :  { %4048 = vmatpush.bf16.msrb.mxu0 %v9580_v21  ;;  %v9520_v21 = vor.u32 %v10802_v12, %v9519_v8  ;;  %v10860_v8 = vld [vmem:[%s14568_s12 + $0x78] sm:$0xff]  ;;  %v9695_v12 = vld [vmem:[#allocation13 + $0x8] sm:$0xf] }
 0x549   :  { %v3444_v23 = vpop.f32.mrf.mxu2  ;;  %v3473_v26 = vpop.f32.mrf.mxu3 }
 0x54a   :  { %v3474_v27 = vadd.f32 %v3473_v26, %v3444_v23  ;;  %v3388_v37 = vpop.f32.mrf.mxu0  ;;  %v3417_v28 = vpop.f32.mrf.mxu1  ;;  %v9567_v26 = vld [vmem:[%s14567_s11 + $0x80] sm:$0xf] }
 0x54b   :  { %v3418_v40 = vadd.f32 %v3417_v28, %v3388_v37 }
 0x54c   :  { %v3493_v31 = vpack.c.bf16 %v3474_v27, %v3416_v29  ;;  %v9663_v27 = vld [vmem:[%s14567_s11 + $0x140] sm:$0xf]  ;;  %v9568_v29 = vor.u32 %v10814_v25, %v9567_v26  ;;  %v9507_v26 = vld [vmem:[%s14567_s11 + $0x8] sm:$0xf]  ;;  %v10799_v25 = vld [vmem:[%s14567_s11 + $0x10] sm:$0xf0] }
 0x54e   :  { %v3520_v36 = vunpack.c.l.bf16 %v3493_v31  ;;  %v3521_v59 = vunpack.c.h.bf16 %v3493_v31  ;;  %v10838_v31 = vld [vmem:[%s14567_s11 + $0x148] sm:$0xf0]  ;;  %4049 = vmatpush.bf16.msrb.mxu0 %v9568_v29  ;;  %v10823_v29 = vld [vmem:[%s14567_s11 + $0xd0] sm:$0xf0] }
 0x550   :  { %v3538_v60 = vadd.f32 %v12916_v1, %v3520_v36  ;;  %v3539_v32 = vadd.f32 %v12918_v39, %v3521_v59  ;;  %v9664_v36 = vor.u32 %v10838_v31, %v9663_v27 }
 0x551   :  { %v3446_v3 = vpop.f32.mrf.mxu2  ;;  %v3475_v38 = vpop.f32.mrf.mxu3 }
 0x552   :  { %v3476_v41 = vadd.f32 %v3475_v38, %v3446_v3  ;;  %v3391_v49 = vpop.f32.mrf.mxu0  ;;  %v3420_v42 = vpop.f32.mrf.mxu1  ;;  %v3578_v46 = vmax.f32 %v3538_v60, 0.0  ;;  %v3579_v10 = vmax.f32 %v3539_v32, 0.0  ;;  %v9651_v3 = vld [vmem:[%s14567_s11 + $0x128] sm:$0xf]  ;;  %v10835_v38 = vld [vmem:[%s14567_s11 + $0x130] sm:$0xf0]  ;;  %4078 = vmatpush.bf16.msrb.mxu1 %v9664_v36 }
 0x553   :  { %v3421_v9 = vadd.f32 %v3420_v42, %v3391_v49  ;;  %v9652_v60 = vor.u32 %v10835_v38, %v9651_v3 }
 0x554   :  { %v3494_v43 = vpack.c.bf16 %v3476_v41, %v3418_v40  ;;  %v9556_v41 = vor.u32 %v10811_v35, %v9555_v34  ;;  %v9508_v35 = vor.u32 %v10799_v25, %v9507_v26  ;;  %v10855_v26 = vld [vmem:[%s14568_s12 + $0x50] sm:$0xff]  ;;  %v10845_v25 = vld [vmem:[%s14568_s12] sm:$0xff] }
 0x556   :  { %v3522_v61 = vunpack.c.l.bf16 %v3494_v43  ;;  %v3523_v30 = vunpack.c.h.bf16 %v3494_v43  ;;  %4050 = vmatpush.bf16.msrb.mxu0 %v9556_v41  ;;  %4079 = vmatpush.bf16.msrb.mxu1 %v9652_v60 }
 0x558   :  { %v3540_v44 = vadd.f32 %v12916_v1, %v3522_v61  ;;  %v3541_v45 = vadd.f32 %v12918_v39, %v3523_v30 }
 0x559   :  { %v3449_v48 = vpop.f32.mrf.mxu2  ;;  %v3478_v50 = vpop.f32.mrf.mxu3 }
 0x55a   :  { %v3580_v51 = vmax.f32 %v3540_v44, 0.0  ;;  %v3581_v22 = vmax.f32 %v3541_v45, 0.0  ;;  %v3479_v52 = vadd.f32 %v3478_v50, %v3449_v48  ;;  %v3393_v53 = vpop.f32.mrf.mxu0  ;;  %v3422_v54 = vpop.f32.mrf.mxu1 }
 0x55b   :  { %v3423_v17 = vadd.f32 %v3422_v54, %v3393_v53  ;;  %v9639_v53 = vld [vmem:[%s14567_s11 + $0x110] sm:$0xf] }
 0x55c   :  { %v12924_v55 = vpack.c.bf16 %v3580_v51, %v3578_v46  ;;  %v12926_v56 = vpack.c.bf16 %v3581_v22, %v3579_v10  ;;  %v3495_v47 = vpack.c.bf16 %v3479_v52, %v3421_v9  ;;  %v9543_v22 = vld [vmem:[%s14567_s11 + $0x50] sm:$0xf]  ;;  %v10808_v52 = vld [vmem:[%s14567_s11 + $0x58] sm:$0xf0] }
 0x55d   :  { %v9544_v54 = vor.u32 %v10808_v52, %v9543_v22  ;;  %v10832_v9 = vld [vmem:[%s14567_s11 + $0x118] sm:$0xf0] }
 0x55e   :  { %3939 = vmatmul.bf16.vlgmr.msra.gmra.mxu0 %v12924_v55  ;;  %3968 = vmatmul.bf16.vlgmr.msra.gmra.mxu1 %v12926_v56  ;;  %v3524_v5 = vunpack.c.l.bf16 %v3495_v47  ;;  %v3525_v14 = vunpack.c.h.bf16 %v3495_v47  ;;  %v9640_v47 = vor.u32 %v10832_v9, %v9639_v53 }
 0x55f   :  { %3997 = vmatmul.bf16.vlgmr.msrb.gmra.mxu2 %v12924_v55  ;;  %4026 = vmatmul.bf16.vlgmr.msrb.gmra.mxu3 %v12926_v56 }
 0x560   :  { %v3542_v23 = vadd.f32 %v12916_v1, %v3524_v5  ;;  %v3543_v28 = vadd.f32 %v12918_v39, %v3525_v14  ;;  %4051 = vmatpush.bf16.msrb.mxu0 %v9544_v54  ;;  %4080 = vmatpush.bf16.msrb.mxu1 %v9640_v47 }
 0x561   :  { %v3451_v6 = vpop.f32.mrf.mxu2  ;;  %v3480_v7 = vpop.f32.mrf.mxu3 }
 0x562   :  { %v3481_v18 = vadd.f32 %v3480_v7, %v3451_v6  ;;  %v3396_v19 = vpop.f32.mrf.mxu0  ;;  %v3425_v20 = vpop.f32.mrf.mxu1  ;;  %v3582_v43 = vmax.f32 %v3542_v23, 0.0  ;;  %v3583_v30 = vmax.f32 %v3543_v28, 0.0  ;;  %v9628_v7 = vor.u32 %v10829_v11, %v9627_v62  ;;  %v9603_v28 = vld [vmem:[%s14567_s11 + $0xc8] sm:$0xf] }
 0x563   :  { %v3426_v45 = vadd.f32 %v3425_v20, %v3396_v19  ;;  %v10826_v19 = vld [vmem:[%s14567_s11 + $0xe8] sm:$0xf0] }
 0x564   :  { %v3496_v16 = vpack.c.bf16 %v3481_v18, %v3423_v17  ;;  %v9615_v18 = vld [vmem:[%s14567_s11 + $0xe0] sm:$0xf]  ;;  %4052 = vmatpush.bf16.msrb.mxu0 %v9532_v63  ;;  %4081 = vmatpush.bf16.msrb.mxu1 %v9628_v7 }
 0x565   :  { %v9616_v23 = vor.u32 %v10826_v19, %v9615_v18 }
 0x566   :  { %v3526_v33 = vunpack.c.l.bf16 %v3496_v16  ;;  %v3527_v37 = vunpack.c.h.bf16 %v3496_v16 }
 0x568   :  { %v3544_v59 = vadd.f32 %v12916_v1, %v3526_v33  ;;  %v3545_v40 = vadd.f32 %v12918_v39, %v3527_v37  ;;  %4053 = vmatpush.bf16.msrb.mxu0 %v9520_v21  ;;  %4082 = vmatpush.bf16.msrb.mxu1 %v9616_v23  ;;  %v10857_v21 = vld [vmem:[%s14568_s12 + $0x60] sm:$0xff]  ;;  %v10846_v23 = vld [vmem:[%s14568_s12 + $0x8] sm:$0xff] }
 0x569   :  { %v3454_v49 = vpop.f32.mrf.mxu2  ;;  %v3483_v42 = vpop.f32.mrf.mxu3 }
 0x56a   :  { %v3484_v32 = vadd.f32 %v3483_v42, %v3454_v49  ;;  %v3584_v61 = vmax.f32 %v3544_v59, 0.0  ;;  %v3585_v44 = vmax.f32 %v3545_v40, 0.0  ;;  %v3398_v46 = vpop.f32.mrf.mxu0  ;;  %v3427_v48 = vpop.f32.mrf.mxu1  ;;  %v9604_v59 = vor.u32 %v10823_v29, %v9603_v28  ;;  %v13122_v28 = vld [vmem:[#allocation4 + $0x18] ss:$8 sm:$0x7] }
 0x56b   :  { %v3428_v14 = vadd.f32 %v3427_v48, %v3398_v46 }
 0x56c   :  { %v12984_v50 = vpack.c.bf16 %v3584_v61, %v3582_v43  ;;  %v12986_v10 = vpack.c.bf16 %v3585_v44, %v3583_v30  ;;  %v3497_v51 = vpack.c.bf16 %v3484_v32, %v3426_v45  ;;  %4054 = vmatpush.bf16.msrb.mxu0 %v9508_v35  ;;  %4083 = vmatpush.bf16.msrb.mxu1 %v9604_v59  ;;  %v13127_v35 = vpop.permute.xlu1 %4153 }
 0x56e   :  { %3944 = vmatmul.bf16.gmra.mxu0 %v12984_v50  ;;  %3973 = vmatmul.bf16.gmra.mxu1 %v12986_v10  ;;  %v3528_v4 = vunpack.c.l.bf16 %v3497_v51  ;;  %v3529_v13 = vunpack.c.h.bf16 %v3497_v51 }
 0x56f   :  { %4002 = vmatmul.bf16.gmra.mxu2 %v12984_v50  ;;  %4031 = vmatmul.bf16.gmra.mxu3 %v12986_v10 }
 0x570   :  { %v3546_v16 = vadd.f32 %v12916_v1, %v3528_v4  ;;  %v3547_v37 = vadd.f32 %v12918_v39, %v3529_v13  ;;  %4342 = vmatpush.bf16.msra.mxu0 %v10860_v8  ;;  %v10862_v13 = vld [vmem:[#allocation13 + $0x8] sm:$0x30]  ;;  %v10877_v8 = vld [vmem:[#allocation15 + $0x34] sm:$0xf] }
 0x571   :  { %v3456_v5 = vpop.f32.mrf.mxu2  ;;  %v3485_v6 = vpop.f32.mrf.mxu3 }
 0x572   :  { %v3486_v17 = vadd.f32 %v3485_v6, %v3456_v5  ;;  %v3401_v15 = vpop.f32.mrf.mxu0  ;;  %v3430_v24 = vpop.f32.mrf.mxu1  ;;  %v3586_v38 = vmax.f32 %v3546_v16, 0.0  ;;  %v3587_v49 = vmax.f32 %v3547_v37, 0.0  ;;  %v10856_v16 = vld [vmem:[%s14568_s12 + $0x58] sm:$0xff] }
 0x573   :  { %v3431_v43 = vadd.f32 %v3430_v24, %v3401_v15  ;;  %v10861_v15 = vld [vmem:[#allocation13] sm:$0xff]  ;;  %v13096_v24 = vpop.permute.xlu0 %4149 }
 0x574   :  { %v3498_v20 = vpack.c.bf16 %v3486_v17, %v3428_v14  ;;  %v9696_v14 = vor.u32 %v10862_v13, %v9695_v12  ;;  %v4183_v17 = vsel %vm4181_vm3, 4294967295, %v11542_v0  ;;  %v10847_v0 = vld [vmem:[%s14568_s12 + $0x10] sm:$0xff]  ;;  %v9807_v12 = vld [vmem:[#allocation15 + $0x10] sm:$0xf]  ;;  %v10874_v13 = vld [vmem:[#allocation15 + $0x14] sm:$0xf0] }
 0x575   :  { %v13082_v18 = vsel %vm4182_vm4, %v4183_v17, 0 }
 0x576   :  { %v3530_v27 = vunpack.c.l.bf16 %v3498_v20  ;;  %v3531_v33 = vunpack.c.h.bf16 %v3498_v20  ;;  %v4186_v19 = vand.u32 %v9696_v14, %v13082_v18  ;;  %v10848_v20 = vld [vmem:[%s14568_s12 + $0x18] sm:$0xff] }
 0x578   :  { %v3548_v31 = vadd.f32 %v12916_v1, %v3530_v27  ;;  %v3549_v34 = vadd.f32 %v12918_v39, %v3531_v33  ;;  %4194 = vmatpush.bf16.msra.mxu2 %v4186_v19  ;;  %v10854_v27 = vld [vmem:[%s14568_s12 + $0x48] sm:$0xff]  ;;  %v10853_v33 = vld [vmem:[%s14568_s12 + $0x40] sm:$0xff]  ;;  %v9808_v19 = vor.u32 %v10874_v13, %v9807_v12 }
 0x579   :  { %v3459_v36 = vpop.f32.mrf.mxu2  ;;  %v3488_v3 = vpop.f32.mrf.mxu3 }
 0x57a   :  { %v3489_v40 = vadd.f32 %v3488_v3, %v3459_v36  ;;  %v3588_v41 = vmax.f32 %v3548_v31, 0.0  ;;  %v3589_v42 = vmax.f32 %v3549_v34, 0.0  ;;  %v3403_v30 = vpop.f32.mrf.mxu0  ;;  %v3432_v44 = vpop.f32.mrf.mxu1  ;;  %v13125_v34 = vperm.slane %v13122_v28, 0 }
 0x57b   :  { %v3433_v22 = vadd.f32 %v3432_v44, %v3403_v30  ;;  %v13118_v37 = vpop.permute.xlu0 %4151 }
 0x57c   :  { %v13044_v60 = vpack.c.bf16 %v3588_v41, %v3586_v38  ;;  %v13046_v32 = vpack.c.bf16 %v3589_v42, %v3587_v49  ;;  %v3499_v61 = vpack.c.bf16 %v3489_v40, %v3431_v43  ;;  %4195 = vmatpush.bf16.msra.mxu2 %v10861_v15  ;;  %v13134_v49 = vperm.slane %v13122_v28, 1 }
 0x57e   :  { %3949 = vmatmul.bf16.gmra.mxu0 %v13044_v60  ;;  %3978 = vmatmul.bf16.gmra.mxu1 %v13046_v32  ;;  %v3532_v48 = vunpack.c.l.bf16 %v3499_v61  ;;  %v3533_v51 = vunpack.c.h.bf16 %v3499_v61 }
 0x57f   :  { %4007 = vmatmul.bf16.gmra.mxu2 %v13044_v60  ;;  %4036 = vmatmul.bf16.gmra.mxu3 %v13046_v32 }
 0x580   :  { %v3550_v47 = vadd.f32 %v12916_v1, %v3532_v48  ;;  %v3551_v57 = vadd.f32 %v12918_v39, %v3533_v51 }
 0x581   :  { %v3461_v45 = vpop.f32.mrf.mxu2  ;;  %v3490_v46 = vpop.f32.mrf.mxu3 }
 0x582   :  { %v3491_v52 = vadd.f32 %v3490_v46, %v3461_v45  ;;  %v3590_v63 = vmax.f32 %v3550_v47, 0.0  ;;  %v3591_v4 = vmax.f32 %v3551_v57, 0.0 }
 0x584   :  { %v3500_v53 = vpack.c.bf16 %v3491_v52, %v3433_v22  ;;  %v9823_v52 = vld [vmem:[#allocation15 + $0x30] sm:$0xf] }
 0x586   :  { %v3534_v54 = vunpack.c.l.bf16 %v3500_v53  ;;  %v3535_v9 = vunpack.c.h.bf16 %v3500_v53  ;;  %v10878_v53 = vld [vmem:[#allocation15 + $0x34] sm:$0xf0] }
 0x588   :  { %v3552_v58 = vadd.f32 %v12916_v1, %v3534_v54  ;;  %v3553_v62 = vadd.f32 %v12918_v39, %v3535_v9  ;;  %v10852_v1 = vld [vmem:[%s14568_s12 + $0x38] sm:$0xff]  ;;  %v10851_v39 = vld [vmem:[%s14568_s12 + $0x30] sm:$0xff]  ;;  %v9824_v54 = vor.u32 %v10878_v53, %v9823_v52  ;;  %v13138_v9 = vpop.permute.xlu1 %4155 }
 0x589   :  { %4313 = vmatpush.bf16.msra.mxu3 %v10852_v1 }
 0x58a   :  { %v3592_v11 = vmax.f32 %v3552_v58, 0.0  ;;  %v3593_v5 = vmax.f32 %v3553_v62, 0.0  ;;  %v4573_v62 = vand.u32 %v9824_v54, %v11749_v2 }
 0x58c   :  { %v3600_v6 = vpack.c.bf16 %v3592_v11, %v3590_v63  ;;  %v3601_v7 = vpack.c.bf16 %v3593_v5, %v3591_v4  ;;  %4582 = vmatpush.bf16.msrb.mxu2 %v4573_v62  ;;  %v9815_v5 = vld [vmem:[#allocation15 + $0x20] sm:$0xf] }
 0x58d   :  { %4314 = vmatpush.bf16.msra.mxu3 %v10851_v39 }
 0x58e   :  { %3954 = vmatmul.bf16.gmra.mxu0 %v3600_v6  ;;  %3983 = vmatmul.bf16.gmra.mxu1 %v3601_v7 }
 0x58f   :  { %4012 = vmatmul.bf16.gmra.mxu2 %v3600_v6  ;;  %4041 = vmatmul.bf16.gmra.mxu3 %v3601_v7 }
 0x59e   :  { %4055 = vmatmul.bf16.vlgmr.msrb.gmra.mxu0 %v12924_v55  ;;  %4084 = vmatmul.bf16.vlgmr.msrb.gmra.mxu1 %v12926_v56  ;;  %v10850_v55 = vld [vmem:[%s14568_s12 + $0x28] sm:$0xff]  ;;  %v10859_v56 = vld [vmem:[%s14568_s12 + $0x70] sm:$0xff] }
 0x59f   :  { %4315 = vmatpush.bf16.msra.mxu3 %v10850_v55  ;;  %4343 = vmatpush.bf16.msra.mxu0 %v10859_v56  ;;  %v9825_v55 = vld [vmem:[#allocation15 + $0x38] sm:$0xf0] }
 0x5a0   :  { %9697 = vmatmul.msk.bf16.vlgmr.msra.gmra.mxu2 %vm4168_vm5, %v13096_v24 }
 0x5ae   :  { %4060 = vmatmul.bf16.gmra.mxu0 %v12984_v50  ;;  %4089 = vmatmul.bf16.gmra.mxu1 %v12986_v10  ;;  %v10849_v50 = vld [vmem:[%s14568_s12 + $0x20] sm:$0xff]  ;;  %v10858_v10 = vld [vmem:[%s14568_s12 + $0x68] sm:$0xff]  ;;  %s11543_s12 = smov 3  }
 0x5af   :  { %4316 = vmatpush.bf16.msra.mxu3 %v10849_v50  ;;  %4344 = vmatpush.bf16.msra.mxu0 %v10858_v10  ;;  %v9828_v50 = vor.u32 %v10877_v8, %v9825_v55 }
 0x5b0   :  { %9698 = vmatmul.msk.bf16.gmra.mxu2 %vm4168_vm5, %v13118_v37 }
 0x5b3   :  { %4317 = vmatpush.bf16.msra.mxu3 %v10848_v20  ;;  %4345 = vmatpush.bf16.msra.mxu0 %v10857_v21  ;;  %v4576_v20 = vand.u32 %v9828_v50, %v11749_v2  ;;  %v9809_v2 = vld [vmem:[#allocation15 + $0x18] sm:$0xf0] }
 0x5b7   :  { %4318 = vmatpush.bf16.msra.mxu3 %v10847_v0  ;;  %4346 = vmatpush.bf16.msra.mxu0 %v10856_v16 }
 0x5bb   :  { %4319 = vmatpush.bf16.msra.mxu3 %v10846_v23  ;;  %4347 = vmatpush.bf16.msra.mxu0 %v10855_v26  ;;  %v9799_v26 = vld [vmem:[#allocation15] sm:$0xf] }
 0x5be   :  { %4065 = vmatmul.bf16.gmra.mxu0 %v13044_v60  ;;  %4094 = vmatmul.bf16.gmra.mxu1 %v13046_v32 }
 0x5bf   :  { %4320 = vmatpush.bf16.msra.mxu3 %v10845_v25  ;;  %4348 = vmatpush.bf16.msra.mxu0 %v10854_v27  ;;  %v10872_v25 = vld [vmem:[#allocation15 + $0x4] sm:$0xf0]  ;;  %v10875_v27 = vld [vmem:[#allocation15 + $0x24] sm:$0xf] }
 0x5c0   :  { %9699 = vmatmul.msk.bf16.gmra.mxu2 %vm4168_vm5, %v13127_v35 }
 0x5c3   :  { %4349 = vmatpush.bf16.msra.mxu0 %v10853_v33  ;;  %4611 = vmatpush.bf16.msrb.mxu3 %v4576_v20  ;;  %v9800_v33 = vor.u32 %v10872_v25, %v9799_v26 }
 0x5ce   :  { %4070 = vmatmul.bf16.gmra.mxu0 %v3600_v6  ;;  %4099 = vmatmul.bf16.gmra.mxu1 %v3601_v7  ;;  %v10876_v6 = vld [vmem:[#allocation15 + $0x24] sm:$0xf0] }
 0x5cf   :  { %v9816_v39 = vor.u32 %v10876_v6, %v9815_v5 }
 0x5d0   :  { %9700 = vmatmul.msk.bf16.gmra.mxu2 %vm4168_vm5, %v13138_v9 }
 0x5d1   :  { %4583 = vmatpush.bf16.msrb.mxu2 %v9816_v39 }
 0x5d5   :  { %4584 = vmatpush.bf16.msrb.mxu2 %v9808_v19 }
 0x5d9   :  { %4585 = vmatpush.bf16.msrb.mxu2 %v9800_v33 }
 0x5db   :  { %v3940_v29 = vpop.f32.mrf.mxu0  ;;  %v3969_v31 = vpop.f32.mrf.mxu1 }
 0x5dc   :  { %v3941_v36 = vadd.f32 %v3940_v29, %v13125_v34  ;;  %v9817_v29 = vld [vmem:[#allocation15 + $0x28] sm:$0xf0] }
 0x5de   :  { %v3970_v42 = vadd.f32 %v3969_v31, %v3941_v36  ;;  %v9820_v36 = vor.u32 %v10875_v27, %v9817_v29 }
 0x5e0   :  { %4612 = vmatpush.bf16.msrb.mxu3 %v9820_v36  ;;  %v11169_v36 = vld [vmem:[#allocation2 + $0x18] sm:$0xff] }
 0x5e2   :  { %v3998_v3 = vpop.f32.mrf.mxu2  ;;  %v4027_v38 = vpop.f32.mrf.mxu3 }
 0x5e3   :  { %v3942_v59 = vpop.f32.mrf.mxu0  ;;  %v3971_v40 = vpop.f32.mrf.mxu1  ;;  %v3999_v32 = vadd.f32 %v3998_v3, %v13134_v49  ;;  %v10873_v3 = vld [vmem:[#allocation15 + $0x14] sm:$0xf] }
 0x5e4   :  { %v3943_v41 = vadd.f32 %v3942_v59, %v13125_v34 }
 0x5e5   :  { %v4028_v48 = vadd.f32 %v4027_v38, %v3999_v32 }
 0x5e6   :  { %v3972_v43 = vadd.f32 %v3971_v40, %v3943_v41  ;;  %v9812_v41 = vor.u32 %v10873_v3, %v9809_v2 }
 0x5e8   :  { %v4105_v60 = vpack.c.bf16 %v3972_v43, %v3970_v42  ;;  %4613 = vmatpush.bf16.msrb.mxu3 %v9812_v41 }
 0x5ea   :  { %v4000_v61 = vpop.f32.mrf.mxu2  ;;  %v4029_v30 = vpop.f32.mrf.mxu3  ;;  %4321 = vmatmul.bf16.vlgmr.msra.gmra.mxu3 %v4105_v60  ;;  %v11166_v60 = vld [vmem:[#allocation2] sm:$0xff] }
 0x5eb   :  { %v4001_v44 = vadd.f32 %v4000_v61, %v13134_v49  ;;  %v3945_v45 = vpop.f32.mrf.mxu0  ;;  %v3974_v46 = vpop.f32.mrf.mxu1  ;;  %9829 = vmatmul.msk.bf16.vlgmr.msrb.gmra.mxu2 %vm369_vm2, %v11166_v60  ;;  %v10871_v61 = vld [vmem:[#allocation15 + $0x4] sm:$0xf] }
 0x5ec   :  { %v3946_v47 = vadd.f32 %v3945_v45, %v13125_v34 }
 0x5ed   :  { %v4030_v51 = vadd.f32 %v4029_v30, %v4001_v44  ;;  %v9801_v30 = vld [vmem:[#allocation15 + $0x8] sm:$0xf0] }
 0x5ee   :  { %v3975_v7 = vadd.f32 %v3974_v46, %v3946_v47  ;;  %v9804_v46 = vor.u32 %v10871_v61, %v9801_v30 }
 0x5ef   :  { %v4106_v22 = vpack.c.bf16 %v4030_v51, %v4028_v48 }
 0x5f0   :  { %4614 = vmatpush.bf16.msrb.mxu3 %v9804_v46 }
 0x5f1   :  { %4350 = vmatmul.bf16.vlgmr.msra.gmra.mxu0 %v4106_v22 }
 0x5f2   :  { %v4003_v57 = vpop.f32.mrf.mxu2  ;;  %v4032_v58 = vpop.f32.mrf.mxu3 }
 0x5f3   :  { %v3947_v63 = vpop.f32.mrf.mxu0  ;;  %v3976_v11 = vpop.f32.mrf.mxu1  ;;  %v4004_v10 = vadd.f32 %v4003_v57, %v13134_v49 }
 0x5f4   :  { %v3948_v4 = vadd.f32 %v3947_v63, %v13125_v34 }
 0x5f5   :  { %v4033_v16 = vadd.f32 %v4032_v58, %v4004_v10 }
 0x5f6   :  { %v3977_v1 = vadd.f32 %v3976_v11, %v3948_v4 }
 0x5f8   :  { %v4107_v56 = vpack.c.bf16 %v3977_v1, %v3975_v7  ;;  %v11167_v7 = vld [vmem:[#allocation2 + $0x8] sm:$0xff] }
 0x5fa   :  { %v4005_v14 = vpop.f32.mrf.mxu2  ;;  %v4034_v17 = vpop.f32.mrf.mxu3  ;;  %4326 = vmatmul.bf16.gmra.mxu3 %v4107_v56  ;;  %v13157_v56 = vperm.slane %v13122_v28, 2 }
 0x5fb   :  { %v4006_v21 = vadd.f32 %v4005_v14, %v13134_v49  ;;  %v3950_v15 = vpop.f32.mrf.mxu0  ;;  %v3979_v0 = vpop.f32.mrf.mxu1  ;;  %9830 = vmatmul.msk.bf16.gmra.mxu2 %vm369_vm2, %v11167_v7 }
 0x5fc   :  { %v3951_v38 = vadd.f32 %v3950_v15, %v13125_v34 }
 0x5fd   :  { %v4035_v23 = vadd.f32 %v4034_v17, %v4006_v21 }
 0x5fe   :  { %v3980_v44 = vadd.f32 %v3979_v0, %v3951_v38  ;;  %v10870_v38 = vld [vmem:[%s14570_s14 + $0x38] sm:$0xff] }
 0x5ff   :  { %v4108_v31 = vpack.c.bf16 %v4035_v23, %v4033_v16  ;;  %v11168_v16 = vld [vmem:[#allocation2 + $0x10] sm:$0xff]  ;;  %4491 = vmatpush.bf16.msra.mxu1 %v10870_v38 }
 0x601   :  { %4355 = vmatmul.bf16.gmra.mxu0 %v4108_v31 }
 0x602   :  { %v4008_v59 = vpop.f32.mrf.mxu2  ;;  %v4037_v40 = vpop.f32.mrf.mxu3 }
 0x603   :  { %v3952_v42 = vpop.f32.mrf.mxu0  ;;  %v3981_v43 = vpop.f32.mrf.mxu1  ;;  %v4009_v51 = vadd.f32 %v4008_v59, %v13134_v49 }
 0x604   :  { %v3953_v32 = vadd.f32 %v3952_v42, %v13125_v34  ;;  %v10869_v42 = vld [vmem:[%s14570_s14 + $0x30] sm:$0xff] }
 0x605   :  { %v4038_v57 = vadd.f32 %v4037_v40, %v4009_v51  ;;  %4492 = vmatpush.bf16.msra.mxu1 %v10869_v42 }
 0x606   :  { %v3982_v45 = vadd.f32 %v3981_v43, %v3953_v32 }
 0x608   :  { %v4109_v48 = vpack.c.bf16 %v3982_v45, %v3980_v44 }
 0x60a   :  { %v4010_v22 = vpop.f32.mrf.mxu2  ;;  %v4039_v52 = vpop.f32.mrf.mxu3  ;;  %4331 = vmatmul.bf16.gmra.mxu3 %v4109_v48  ;;  %v10868_v48 = vld [vmem:[%s14570_s14 + $0x28] sm:$0xff] }
 0x60b   :  { %v4011_v53 = vadd.f32 %v4010_v22, %v13134_v49  ;;  %v3955_v54 = vpop.f32.mrf.mxu0  ;;  %v3984_v47 = vpop.f32.mrf.mxu1  ;;  %9831 = vmatmul.msk.bf16.gmra.mxu2 %vm369_vm2, %v11168_v16  ;;  %4493 = vmatpush.bf16.msra.mxu1 %v10868_v48 }
 0x60c   :  { %v3956_v63 = vadd.f32 %v3955_v54, %v13125_v34 }
 0x60d   :  { %v4040_v58 = vadd.f32 %v4039_v52, %v4011_v53  ;;  %v10867_v52 = vld [vmem:[%s14570_s14 + $0x20] sm:$0xff] }
 0x60e   :  { %v3985_v39 = vadd.f32 %v3984_v47, %v3956_v63  ;;  %v10866_v47 = vld [vmem:[%s14570_s14 + $0x18] sm:$0xff] }
 0x60f   :  { %v4110_v62 = vpack.c.bf16 %v4040_v58, %v4038_v57  ;;  %4494 = vmatpush.bf16.msra.mxu1 %v10867_v52 }
 0x611   :  { %4360 = vmatmul.bf16.gmra.mxu0 %v4110_v62  ;;  %v10865_v62 = vld [vmem:[%s14570_s14 + $0x10] sm:$0xff] }
 0x612   :  { %v4013_v11 = vpop.f32.mrf.mxu2  ;;  %v4042_v4 = vpop.f32.mrf.mxu3 }
 0x613   :  { %v3957_v5 = vpop.f32.mrf.mxu0  ;;  %v3986_v6 = vpop.f32.mrf.mxu1  ;;  %v4014_v50 = vadd.f32 %v4013_v11, %v13134_v49  ;;  %4495 = vmatpush.bf16.msra.mxu1 %v10866_v47  ;;  %v10864_v11 = vld [vmem:[%s14570_s14 + $0x8] sm:$0xff] }
 0x614   :  { %v3958_v1 = vadd.f32 %v3957_v5, %v13125_v34 }
 0x615   :  { %v4043_v20 = vadd.f32 %v4042_v4, %v4014_v50  ;;  %v10863_v4 = vld [vmem:[%s14570_s14] sm:$0xff] }
 0x616   :  { %v3987_v8 = vadd.f32 %v3986_v6, %v3958_v1 }
 0x617   :  { %4496 = vmatpush.bf16.msra.mxu1 %v10865_v62 }
 0x618   :  { %v4111_v55 = vpack.c.bf16 %v3987_v8, %v3985_v39 }
 0x61a   :  { %v4015_v10 = vpop.f32.mrf.mxu2  ;;  %4336 = vmatmul.bf16.gmra.mxu3 %v4111_v55  ;;  %v4044_v17 = vpop.f32.mrf.mxu3  ;;  %v4371_v55 = vld [vmem:[#allocation4 + $0x19] ss:$0 sm:$0xff] }
 0x61b   :  { %v4016_v12 = vadd.f32 %v4015_v10, %v13134_v49  ;;  %v4056_v13 = vpop.f32.mrf.mxu0  ;;  %v4085_v14 = vpop.f32.mrf.mxu1  ;;  %9832 = vmatmul.msk.bf16.gmra.mxu2 %vm369_vm2, %v11169_v36  ;;  %4497 = vmatpush.bf16.msra.mxu1 %v10864_v11  ;;  %v4380_v50 = vpack.c.bf16 %v4371_v55, %v4371_v55 }
 0x61c   :  { %v4057_v19 = vadd.f32 %v4056_v13, %v13157_v56 }
 0x61d   :  { %v4045_v21 = vadd.f32 %v4044_v17, %v4016_v12 }
 0x61e   :  { %v4086_v34 = vadd.f32 %v4085_v14, %v4057_v19  ;;  %v13207_v19 = vunpack.c.l.bf16 %v4380_v50 }
 0x61f   :  { %v4112_v15 = vpack.c.bf16 %v4045_v21, %v4043_v20  ;;  %4498 = vmatpush.bf16.msra.mxu1 %v10863_v4 }
 0x620   :  { %8369 = vrot.lane.b32.xlu2 %v4086_v34, %s11543_s12 }
 0x621   :  { %4365 = vmatmul.bf16.gmra.mxu0 %v4112_v15 }
 0x623   :  { %v4058_v28 = vpop.f32.mrf.mxu0  ;;  %v4087_v0 = vpop.f32.mrf.mxu1 }
 0x624   :  { %v4059_v49 = vadd.f32 %v4058_v28, %v13157_v56  ;;  %v4197_v22 = vpop.f32.mrf.mxu2 }
 0x626   :  { %v4088_v23 = vadd.f32 %v4087_v0, %v4059_v49 }
 0x628   :  { %8371 = vrot.lane.b32.xlu2 %v4088_v23, %s11543_s12 }
 0x62a   :  { %9833 = vmatmul.msk.bf16.vlgmr.msrb.gmra.mxu3 %vm369_vm2, %v11166_v60 }
 0x62b   :  { %v4061_v26 = vpop.f32.mrf.mxu0  ;;  %v4090_v25 = vpop.f32.mrf.mxu1 }
 0x62c   :  { %v4062_v27 = vadd.f32 %v4061_v26, %v13157_v56  ;;  %v4199_v63 = vpop.f32.mrf.mxu2 }
 0x62e   :  { %v4091_v33 = vadd.f32 %v4090_v25, %v4062_v27 }
 0x630   :  { %8373 = vrot.lane.b32.xlu0 %v4091_v33, %s11543_s12 }
 0x633   :  { %v4063_v29 = vpop.f32.mrf.mxu0  ;;  %v4092_v31 = vpop.f32.mrf.mxu1 }
 0x634   :  { %v4064_v3 = vadd.f32 %v4063_v29, %v13157_v56  ;;  %v4202_v5 = vpop.f32.mrf.mxu2 }
 0x636   :  { %v4093_v2 = vadd.f32 %v4092_v31, %v4064_v3 }
 0x638   :  { %8375 = vrot.lane.b32.xlu1 %v4093_v2, %s11543_s12 }
 0x63a   :  { %9834 = vmatmul.msk.bf16.gmra.mxu3 %vm369_vm2, %v11167_v7 }
 0x63b   :  { %v4066_v59 = vpop.f32.mrf.mxu0  ;;  %v4095_v40 = vpop.f32.mrf.mxu1 }
 0x63c   :  { %v4067_v41 = vadd.f32 %v4066_v59, %v13157_v56  ;;  %v4204_v7 = vpop.f32.mrf.mxu2 }
 0x63e   :  { %v4096_v43 = vadd.f32 %v4095_v40, %v4067_v41 }
 0x640   :  { %8377 = vrot.lane.b32.xlu2 %v4096_v43, %s11543_s12 }
 0x643   :  { %v4068_v60 = vpop.f32.mrf.mxu0  ;;  %v4097_v32 = vpop.f32.mrf.mxu1 }
 0x644   :  { %v4069_v61 = vadd.f32 %v4068_v60, %v13157_v56  ;;  %v4207_v14 = vpop.f32.mrf.mxu2 }
 0x646   :  { %v4098_v30 = vadd.f32 %v4097_v32, %v4069_v61 }
 0x648   :  { %8379 = vrot.lane.b32.xlu0 %v4098_v30, %s11543_s12 }
 0x64a   :  { %9835 = vmatmul.msk.bf16.gmra.mxu3 %vm369_vm2, %v11168_v16 }
 0x64b   :  { %v4071_v44 = vpop.f32.mrf.mxu0  ;;  %v4100_v45 = vpop.f32.mrf.mxu1 }
 0x64c   :  { %v4072_v46 = vadd.f32 %v4071_v44, %v13157_v56  ;;  %v4209_v27 = vpop.f32.mrf.mxu2 }
 0x64e   :  { %v4101_v51 = vadd.f32 %v4100_v45, %v4072_v46 }
 0x650   :  { %8381 = vrot.lane.b32.xlu1 %v4101_v51, %s11543_s12 }
 0x653   :  { %v4073_v53 = vpop.f32.mrf.mxu0  ;;  %v4102_v57 = vpop.f32.mrf.mxu1 }
 0x654   :  { %v4074_v54 = vadd.f32 %v4073_v53, %v13157_v56  ;;  %v4212_v40 = vpop.f32.mrf.mxu2 }
 0x656   :  { %v4103_v58 = vadd.f32 %v4102_v57, %v4074_v54 }
 0x658   :  { %8383 = vrot.lane.b32.xlu2 %v4103_v58, %s11543_s12 }
 0x65a   :  { %9836 = vmatmul.msk.bf16.gmra.mxu3 %vm369_vm2, %v11169_v36 }
 0x66d   :  { %v4322_v6 = vpop.f32.mrf.mxu3 }
 0x66e   :  { %v4323_v1 = vadd.f32 %v4322_v6, %v4197_v22  ;;  %v4351_v39 = vpop.f32.mrf.mxu0  ;;  %v4214_v22 = vpop.f32.mrf.mxu2 }
 0x670   :  { %v4352_v8 = vadd.f32 %v4351_v39, %v4323_v1 }
 0x672   :  { %v4372_v56 = vpack.c.bf16 %v4352_v8, %v4352_v8 }
 0x674   :  { %v4381_v17 = vunpack.c.l.bf16 %v4372_v56 }
 0x675   :  { %v4324_v10 = vpop.f32.mrf.mxu3 }
 0x676   :  { %v4325_v12 = vadd.f32 %v4324_v10, %v4199_v63  ;;  %v4353_v13 = vpop.f32.mrf.mxu0  ;;  %v4390_v34 = vadd.f32 %v13207_v19, %v4381_v17  ;;  %v4587_v6 = vpop.f32.mrf.mxu2 }
 0x678   :  { %v4354_v20 = vadd.f32 %v4353_v13, %v4325_v12  ;;  %v4414_v23 = vmax.f32 %v4390_v34, 0.0 }
 0x67a   :  { %v4373_v21 = vpack.c.bf16 %v4354_v20, %v4354_v20 }
 0x67c   :  { %v4382_v15 = vunpack.c.l.bf16 %v4373_v21 }
 0x67d   :  { %v4327_v28 = vpop.f32.mrf.mxu3 }
 0x67e   :  { %v4391_v0 = vadd.f32 %v13207_v19, %v4382_v15  ;;  %v4328_v16 = vadd.f32 %v4327_v28, %v4202_v5  ;;  %v4356_v49 = vpop.f32.mrf.mxu0 }
 0x680   :  { %v4415_v26 = vmax.f32 %v4391_v0, 0.0  ;;  %v4357_v25 = vadd.f32 %v4356_v49, %v4328_v16 }
 0x682   :  { %v4422_v33 = vpack.c.bf16 %v4415_v26, %v4414_v23  ;;  %v4374_v29 = vpack.c.bf16 %v4357_v25, %v4357_v25 }
 0x684   :  { %4499 = vmatmul.bf16.vlgmr.msra.gmra.mxu1 %v4422_v33  ;;  %v4383_v2 = vunpack.c.l.bf16 %v4374_v29  ;;  %v4529_v29 = vld [vmem:[#allocation4 + $0x1b] ss:$8 sm:$0x3] }
 0x685   :  { %v4329_v31 = vpop.f32.mrf.mxu3 }
 0x686   :  { %v4330_v36 = vadd.f32 %v4329_v31, %v4204_v7  ;;  %v4358_v3 = vpop.f32.mrf.mxu0  ;;  %v4392_v41 = vadd.f32 %v13207_v19, %v4383_v2 }
 0x688   :  { %v4359_v38 = vadd.f32 %v4358_v3, %v4330_v36  ;;  %v4416_v30 = vmax.f32 %v4392_v41, 0.0  ;;  %v4645_v36 = vperm.slane %v4529_v29, 0  ;;  %v4646_v3 = vperm.slane %v4529_v29, 1 }
 0x68a   :  { %v4375_v59 = vpack.c.bf16 %v4359_v38, %v4359_v38  ;;  %v4649_v38 = vpack.c.bf16 %v4646_v3, %v4645_v36 }
 0x68c   :  { %v4384_v42 = vunpack.c.l.bf16 %v4375_v59 }
 0x68d   :  { %v4332_v43 = vpop.f32.mrf.mxu3 }
 0x68e   :  { %v4393_v60 = vadd.f32 %v13207_v19, %v4384_v42  ;;  %v4333_v32 = vadd.f32 %v4332_v43, %v4207_v14  ;;  %v4361_v61 = vpop.f32.mrf.mxu0  ;;  %v4589_v14 = vpop.f32.mrf.mxu2 }
 0x690   :  { %v4417_v44 = vmax.f32 %v4393_v60, 0.0  ;;  %v4362_v45 = vadd.f32 %v4361_v61, %v4333_v32 }
 0x692   :  { %v4423_v46 = vpack.c.bf16 %v4417_v44, %v4416_v30  ;;  %v4376_v48 = vpack.c.bf16 %v4362_v45, %v4362_v45 }
 0x694   :  { %4504 = vmatmul.bf16.gmra.mxu1 %v4423_v46  ;;  %v4385_v54 = vunpack.c.l.bf16 %v4376_v48 }
 0x695   :  { %v4334_v51 = vpop.f32.mrf.mxu3 }
 0x696   :  { %v4335_v52 = vadd.f32 %v4334_v51, %v4209_v27  ;;  %v4363_v53 = vpop.f32.mrf.mxu0  ;;  %v4394_v58 = vadd.f32 %v13207_v19, %v4385_v54  ;;  %v4592_v23 = vpop.f32.mrf.mxu2 }
 0x698   :  { %v4364_v47 = vadd.f32 %v4363_v53, %v4335_v52  ;;  %v4418_v7 = vmax.f32 %v4394_v58, 0.0 }
 0x69a   :  { %v4377_v57 = vpack.c.bf16 %v4364_v47, %v4364_v47 }
 0x69c   :  { %v4386_v62 = vunpack.c.l.bf16 %v4377_v57 }
 0x69d   :  { %v4337_v63 = vpop.f32.mrf.mxu3 }
 0x69e   :  { %v4395_v11 = vadd.f32 %v13207_v19, %v4386_v62  ;;  %v4338_v4 = vadd.f32 %v4337_v63, %v4212_v40  ;;  %v4366_v5 = vpop.f32.mrf.mxu0  ;;  %v4594_v25 = vpop.f32.mrf.mxu2  ;;  %v4651_v40 = vunpack.c.l.b16 %v4649_v38 }
 0x6a0   :  { %v4419_v1 = vmax.f32 %v4395_v11, 0.0  ;;  %v4367_v39 = vadd.f32 %v4366_v5, %v4338_v4  ;;  %v4653_v42 = vpack.c.b16 %v4651_v40, %v4651_v40 }
 0x6a2   :  { %v4424_v8 = vpack.c.bf16 %v4419_v1, %v4418_v7  ;;  %v4378_v55 = vpack.c.bf16 %v4367_v39, %v4367_v39  ;;  %v4656_v60 = vpack.i.b16 %v4653_v42, %v4653_v42 }
 0x6a4   :  { %4509 = vmatmul.bf16.gmra.mxu1 %v4424_v8  ;;  %v4387_v12 = vunpack.c.l.bf16 %v4378_v55  ;;  %v4658_v44 = vperm.slane %v4656_v60, 0 }
 0x6a5   :  { %v4339_v56 = vpop.f32.mrf.mxu3 }
 0x6a6   :  { %v4340_v50 = vadd.f32 %v4339_v56, %v4214_v22  ;;  %v4368_v10 = vpop.f32.mrf.mxu0  ;;  %v4396_v20 = vadd.f32 %v13207_v19, %v4387_v12  ;;  %v4597_v31 = vpop.f32.mrf.mxu2  ;;  %v4679_v54 = vunpack.c.l.bf16 %v4658_v44 }
 0x6a8   :  { %v4369_v13 = vadd.f32 %v4368_v10, %v4340_v50  ;;  %v4420_v0 = vmax.f32 %v4396_v20, 0.0 }
 0x6aa   :  { %v4379_v17 = vpack.c.bf16 %v4369_v13, %v4369_v13 }
 0x6ac   :  { %v4388_v21 = vunpack.c.l.bf16 %v4379_v17 }
 0x6ad   :  { %v4616_v34 = vpop.f32.mrf.mxu3 }
 0x6ae   :  { %v4397_v15 = vadd.f32 %v13207_v19, %v4388_v21  ;;  %v13217_v28 = vpack.c.bf16 %v4616_v34, %v4587_v6  ;;  %v4599_v59 = vpop.f32.mrf.mxu2  ;;  %v4652_v19 = vunpack.c.h.b16 %v4649_v38 }
 0x6b0   :  { %v4421_v16 = vmax.f32 %v4397_v15, 0.0  ;;  %v4654_v43 = vpack.c.b16 %v4652_v19, %v4652_v19  ;;  %v4663_v6 = vunpack.c.l.bf16 %v13217_v28  ;;  %v4664_v56 = vunpack.c.h.bf16 %v13217_v28 }
 0x6b2   :  { %v4425_v49 = vpack.c.bf16 %v4421_v16, %v4420_v0  ;;  %v4660_v32 = vpack.i.b16 %v4654_v43, %v4654_v43  ;;  %v4681_v43 = vadd.f32 %v4679_v54, %v4663_v6 }
 0x6b4   :  { %4514 = vmatmul.bf16.gmra.mxu1 %v4425_v49  ;;  %v4662_v45 = vperm.slane %v4660_v32, 0 }
 0x6b5   :  { %v4618_v26 = vpop.f32.mrf.mxu3 }
 0x6b6   :  { %v4602_v61 = vpop.f32.mrf.mxu2  ;;  %v4680_v47 = vunpack.c.l.bf16 %v4662_v45  ;;  %v4637_v7 = vpack.c.bf16 %v4618_v26, %v4589_v14 }
 0x6b8   :  { %v4665_v49 = vunpack.c.l.bf16 %v4637_v7 }
 0x6ba   :  { %v4683_v40 = vadd.f32 %v4679_v54, %v4665_v49 }
 0x6bd   :  { %v4621_v27 = vpop.f32.mrf.mxu3 }
 0x6be   :  { %v4638_v62 = vpack.c.bf16 %v4621_v27, %v4592_v23  ;;  %v4604_v8 = vpop.f32.mrf.mxu2  ;;  %v4666_v23 = vunpack.c.h.bf16 %v4637_v7 }
 0x6c0   :  { %v4667_v13 = vunpack.c.l.bf16 %v4638_v62  ;;  %v4668_v17 = vunpack.c.h.bf16 %v4638_v62  ;;  %v4684_v19 = vadd.f32 %v4680_v47, %v4666_v23 }
 0x6c2   :  { %v4685_v28 = vadd.f32 %v4679_v54, %v4667_v13 }
 0x6c5   :  { %v4623_v33 = vpop.f32.mrf.mxu3 }
 0x6c6   :  { %v4639_v53 = vpack.c.bf16 %v4623_v33, %v4594_v25 }
 0x6c8   :  { %v4669_v1 = vunpack.c.l.bf16 %v4639_v53  ;;  %v4670_v39 = vunpack.c.h.bf16 %v4639_v53  ;;  %v4724_v53 = vmax.f32 %v4684_v19, 0.0 }
 0x6ca   :  { %v4687_v14 = vadd.f32 %v4679_v54, %v4669_v1  ;;  %v4688_v26 = vadd.f32 %v4680_v47, %v4670_v39 }
 0x6cc   :  { %v4728_v42 = vmax.f32 %v4688_v26, 0.0 }
 0x6cd   :  { %v4626_v2 = vpop.f32.mrf.mxu3 }
 0x6ce   :  { %v4640_v51 = vpack.c.bf16 %v4626_v2, %v4597_v31  ;;  %v4686_v31 = vadd.f32 %v4680_v47, %v4668_v17 }
 0x6d0   :  { %v4671_v63 = vunpack.c.l.bf16 %v4640_v51  ;;  %v4672_v11 = vunpack.c.h.bf16 %v4640_v51  ;;  %v4726_v44 = vmax.f32 %v4686_v31, 0.0 }
 0x6d2   :  { %v4689_v20 = vadd.f32 %v4679_v54, %v4671_v63  ;;  %v4690_v21 = vadd.f32 %v4680_v47, %v4672_v11 }
 0x6d4   :  { %v4729_v36 = vmax.f32 %v4689_v20, 0.0  ;;  %v4730_v3 = vmax.f32 %v4690_v21, 0.0 }
 0x6d5   :  { %v4628_v41 = vpop.f32.mrf.mxu3 }
 0x6d6   :  { %v4641_v46 = vpack.c.bf16 %v4628_v41, %v4599_v59  ;;  %v4727_v41 = vmax.f32 %v4687_v14, 0.0  ;;  %v4741_v45 = vpack.c.bf16 %v4730_v3, %v4729_v36 }
 0x6d8   :  { %v4673_v57 = vunpack.c.l.bf16 %v4641_v46  ;;  %v4674_v58 = vunpack.c.h.bf16 %v4641_v46  ;;  %v4762_v6 = vunpack.c.h.b16 %v4741_v45 }
 0x6da   :  { %v4691_v50 = vadd.f32 %v4679_v54, %v4673_v57  ;;  %v4692_v10 = vadd.f32 %v4680_v47, %v4674_v58  ;;  %v4740_v57 = vpack.c.bf16 %v4728_v42, %v4727_v41 }
 0x6dc   :  { %v4731_v25 = vmax.f32 %v4691_v50, 0.0  ;;  %v4732_v27 = vmax.f32 %v4692_v10, 0.0  ;;  %v13245_v3 = vunpack.c.l.bf16 %v4740_v57 }
 0x6dd   :  { %v4631_v30 = vpop.f32.mrf.mxu3 }
 0x6de   :  { %v4642_v48 = vpack.c.bf16 %v4631_v30, %v4602_v61  ;;  %v4742_v60 = vpack.c.bf16 %v4732_v27, %v4731_v25  ;;  %v4682_v61 = vadd.f32 %v4680_v47, %v4664_v56  ;;  %v4725_v30 = vmax.f32 %v4685_v28, 0.0 }
 0x6df   :  { %v13243_v28 = vunpack.c.h.bf16 %v4741_v45 }
 0x6e0   :  { %v4675_v22 = vunpack.c.l.bf16 %v4642_v48  ;;  %v4676_v52 = vunpack.c.h.bf16 %v4642_v48  ;;  %v4763_v63 = vunpack.c.l.b16 %v4742_v60  ;;  %v4764_v11 = vunpack.c.h.b16 %v4742_v60 }
 0x6e1   :  { %v13233_v23 = vunpack.c.l.bf16 %v4742_v60  ;;  %v13235_v14 = vunpack.c.h.bf16 %v4742_v60 }
 0x6e2   :  { %v4693_v4 = vadd.f32 %v4679_v54, %v4675_v22  ;;  %v4694_v5 = vadd.f32 %v4680_v47, %v4676_v52  ;;  %v4723_v52 = vmax.f32 %v4683_v40, 0.0  ;;  %v4774_v39 = vpack.c.b16 %v4764_v11, %v4762_v6 }
 0x6e3   :  { %v4841_v19 = vmul.f32 %v13233_v23, %v13233_v23  ;;  %v4842_v41 = vmul.f32 %v13235_v14, %v13235_v14 }
 0x6e4   :  { %v4733_v34 = vmax.f32 %v4693_v4, 0.0  ;;  %v4734_v15 = vmax.f32 %v4694_v5, 0.0  ;;  %v4721_v4 = vmax.f32 %v4681_v43, 0.0  ;;  %v4722_v5 = vmax.f32 %v4682_v61, 0.0 }
 0x6e5   :  { %v4633_v55 = vpop.f32.mrf.mxu3  ;;  %v4738_v7 = vpack.c.bf16 %v4724_v53, %v4723_v52 }
 0x6e6   :  { %v4643_v12 = vpack.c.bf16 %v4633_v55, %v4604_v8  ;;  %v4743_v2 = vpack.c.bf16 %v4734_v15, %v4733_v34  ;;  %v4759_v8 = vunpack.c.l.b16 %v4740_v57  ;;  %v4760_v55 = vunpack.c.h.b16 %v4740_v57 }
 0x6e7   :  { %v4737_v10 = vpack.c.bf16 %v4722_v5, %v4721_v4  ;;  %v4755_v15 = vunpack.c.l.b16 %v4738_v7  ;;  %v13274_v53 = vunpack.c.h.bf16 %v4738_v7 }
 0x6e8   :  { %v4677_v0 = vunpack.c.l.bf16 %v4643_v12  ;;  %v4678_v16 = vunpack.c.h.bf16 %v4643_v12  ;;  %v4765_v46 = vunpack.c.l.b16 %v4743_v2  ;;  %v4766_v51 = vunpack.c.h.b16 %v4743_v2 }
 0x6e9   :  { %v13225_v17 = vunpack.c.l.bf16 %v4743_v2  ;;  %v13227_v20 = vunpack.c.h.bf16 %v4743_v2  ;;  %v4753_v26 = vunpack.c.l.b16 %v4737_v10  ;;  %v4754_v25 = vunpack.c.h.b16 %v4737_v10 }
 0x6ea   :  { %v4695_v33 = vadd.f32 %v4679_v54, %v4677_v0  ;;  %v4696_v29 = vadd.f32 %v4680_v47, %v4678_v16  ;;  %v4739_v54 = vpack.c.bf16 %v4726_v44, %v4725_v30  ;;  %v4761_v47 = vunpack.c.l.b16 %v4741_v45  ;;  %v8370_v30 = vpop.permute.xlu2 %8369 }
 0x6eb   :  { %v4756_v0 = vunpack.c.h.b16 %v4738_v7  ;;  %v4843_v27 = vmul.f32 %v13225_v17, %v13225_v17  ;;  %v4769_v31 = vpack.c.b16 %v4755_v15, %v4753_v26  ;;  %v13247_v2 = vunpack.c.h.bf16 %v4740_v57  ;;  %v8376_v15 = vpop.permute.xlu1 %8375 }
 0x6ec   :  { %v4735_v38 = vmax.f32 %v4695_v33, 0.0  ;;  %v4736_v59 = vmax.f32 %v4696_v29, 0.0  ;;  %v4773_v1 = vpack.c.b16 %v4763_v63, %v4761_v47  ;;  %v4757_v12 = vunpack.c.l.b16 %v4739_v54 }
 0x6ed   :  { %v4758_v13 = vunpack.c.h.b16 %v4739_v54  ;;  %v4844_v33 = vmul.f32 %v13227_v20, %v13227_v20  ;;  %v13241_v29 = vunpack.c.l.bf16 %v4741_v45  ;;  %v4770_v36 = vpack.c.b16 %v4756_v0, %v4754_v25 }
 0x6ee   :  { %v4744_v32 = vpack.c.bf16 %v4736_v59, %v4735_v38  ;;  %v4771_v21 = vpack.c.b16 %v4759_v8, %v4757_v12  ;;  %v13249_v38 = vld [vmem:[#allocation4 + $0x1a] ss:$0 sm:$0xff]  ;;  %v13255_v42 = vunpack.c.l.bf16 %v4739_v54  ;;  %v13261_v61 = vunpack.c.h.bf16 %v4739_v54 }
 0x6ef   :  { %v4772_v34 = vpack.c.b16 %v4760_v55, %v4758_v13  ;;  %v4839_v60 = vmul.f32 %v13241_v29, %v13241_v29  ;;  %v4837_v45 = vmul.f32 %v13245_v3, %v13245_v3  ;;  %v4838_v52 = vmul.f32 %v13247_v2, %v13247_v2  ;;  %v8374_v13 = vpop.permute.xlu0 %8373 }
 0x6f0   :  { %v4767_v48 = vunpack.c.l.b16 %v4744_v32  ;;  %v4768_v22 = vunpack.c.h.b16 %v4744_v32  ;;  %v13221_v56 = vunpack.c.l.bf16 %v4744_v32  ;;  %v13223_v50 = vunpack.c.h.bf16 %v4744_v32 }
 0x6f1   :  { %v4840_v32 = vmul.f32 %v13243_v28, %v13243_v28  ;;  %v4835_v57 = vmul.f32 %v13255_v42, %v13255_v42  ;;  %v13286_v63 = vunpack.c.h.bf16 %v4737_v10  ;;  %v4834_v54 = vmul.f32 %v13274_v53, %v13274_v53 }
 0x6f2   :  { %v4775_v58 = vpack.c.b16 %v4767_v48, %v4765_v46  ;;  %v4776_v62 = vpack.c.b16 %v4768_v22, %v4766_v51  ;;  %v4845_v16 = vmul.f32 %v13221_v56, %v13221_v56  ;;  %v4846_v49 = vmul.f32 %v13223_v50, %v13223_v50  ;;  %v8372_v55 = vpop.permute.xlu2 %8371 }
 0x6f3   :  { %v13266_v46 = vunpack.c.l.bf16 %v4738_v7  ;;  %v11544_v48 = vmov 1065369472   ;;  %v4851_v51 = vpack.c.bf16 %v4841_v19, %v4839_v60  ;;  %v4852_v22 = vpack.c.bf16 %v4842_v41, %v4840_v32 }
 0x6f4   :  { %4793 = vmatpush.bf16.msrb.mxu0 %v4775_v58  ;;  %4806 = vmatpush.bf16.msrb.mxu1 %v4776_v62  ;;  %v4853_v59 = vpack.c.bf16 %v4845_v16, %v4843_v27  ;;  %v4854_v40 = vpack.c.bf16 %v4846_v49, %v4844_v33  ;;  %v4836_v58 = vmul.f32 %v13261_v61, %v13261_v61  ;;  %v13284_v62 = vunpack.c.l.bf16 %v4737_v10 }
 0x6f5   :  { %v4849_v11 = vpack.c.bf16 %v4837_v45, %v4835_v57  ;;  %v4833_v5 = vmul.f32 %v13266_v46, %v13266_v46  ;;  %v4832_v7 = vmul.f32 %v13286_v63, %v13286_v63  ;;  %v9963_v45 = vld [vmem:[#allocation16 + $0xf0] sm:$0xf]  ;;  %v10893_v57 = vld [vmem:[#allocation16 + $0x74] sm:$0xf] }
 0x6f6   :  { %v4850_v4 = vpack.c.bf16 %v4838_v52, %v4836_v58  ;;  %v4831_v6 = vmul.f32 %v13284_v62, %v13284_v62  ;;  %v10910_v52 = vld [vmem:[#allocation16 + $0xf4] sm:$0xf0] }
 0x6f7   :  { %v4848_v8 = vpack.c.bf16 %v4834_v54, %v4832_v7  ;;  %v8380_v27 = vpop.permute.xlu0 %8379  ;;  %v9964_v58 = vor.u32 %v10910_v52, %v9963_v45  ;;  %v10892_v7 = vld [vmem:[#allocation16 + $0x64] sm:$0xf0]  ;;  %v9949_v52 = vld [vmem:[#allocation16 + $0xd8] sm:$0xf0] }
 0x6f8   :  { %4794 = vmatpush.bf16.msrb.mxu0 %v4773_v1  ;;  %4807 = vmatpush.bf16.msrb.mxu1 %v4774_v39  ;;  %v4847_v39 = vpack.c.bf16 %v4833_v5, %v4831_v6  ;;  %v9965_v5 = vld [vmem:[#allocation16 + $0xf8] sm:$0xf0]  ;;  %v9891_v6 = vld [vmem:[#allocation16 + $0x60] sm:$0xf] }
 0x6f9   :  { %5261 = vmatpush.bf16.msra.mxu3 %v9964_v58 }
 0x6fa   :  { %v8378_v49 = vpop.permute.xlu2 %8377 }
 0x6fc   :  { %4795 = vmatpush.bf16.msrb.mxu0 %v4771_v21  ;;  %4808 = vmatpush.bf16.msrb.mxu1 %v4772_v34 }
 0x700   :  { %4796 = vmatpush.bf16.msrb.mxu0 %v4769_v31  ;;  %4809 = vmatpush.bf16.msrb.mxu1 %v4770_v36  ;;  %v8382_v36 = vpop.permute.xlu1 %8381 }
 0x701   :  { %v4500_v43 = vpop.f32.mrf.mxu1 }
 0x702   :  { %v4501_v44 = vadd.f32 %v4500_v43, %v13249_v38  ;;  %v8384_v19 = vpop.permute.xlu2 %8383 }
 0x703   :  { %9837 = vmatmul.msk.bf16.vlgmr.msrb.gmra.mxu0 %vm4785_vm6, %v11544_v48  ;;  %9838 = vmatmul.msk.bf16.vlgmr.msrb.gmra.mxu1 %vm4785_vm6, %v11544_v48 }
 0x704   :  { %4859 = vmatpush.bf16.msra.mxu0 %v4853_v59  ;;  %4872 = vmatpush.bf16.msra.mxu1 %v4854_v40  ;;  %8353 = vst.msk [vmem:[%s14579_s23] sm:$0xff] %vm8352_vm7, %v4501_v44  ;;  %v10894_v44 = vld [vmem:[#allocation16 + $0x74] sm:$0xf0] }
 0x705   :  { %8394 = vst.msk [vmem:[%s14579_s23] sm:$0xff] %vm8393_vm8, %v8370_v30  ;;  %v9899_v30 = vld [vmem:[#allocation16 + $0x70] sm:$0xf] }
 0x708   :  { %4860 = vmatpush.bf16.msra.mxu0 %v4851_v51  ;;  %4873 = vmatpush.bf16.msra.mxu1 %v4852_v22  ;;  %v9900_v22 = vor.u32 %v10894_v44, %v9899_v30 }
 0x709   :  { %v4502_v47 = vpop.f32.mrf.mxu1 }
 0x70a   :  { %v4503_v1 = vadd.f32 %v4502_v47, %v13249_v38  ;;  %5232 = vmatpush.bf16.msra.mxu2 %v9900_v22  ;;  %v10905_v22 = vld [vmem:[#allocation16 + $0xd4] sm:$0xf] }
 0x70c   :  { %4861 = vmatpush.bf16.msra.mxu0 %v4849_v11  ;;  %4874 = vmatpush.bf16.msra.mxu1 %v4850_v4  ;;  %8354 = vst.msk [vmem:[%s14579_s23 + $0x8] sm:$0xff] %vm8352_vm7, %v4503_v1  ;;  %v9901_v11 = vld [vmem:[#allocation16 + $0x78] sm:$0xf0]  ;;  %v10909_v4 = vld [vmem:[#allocation16 + $0xf4] sm:$0xf] }
 0x70d   :  { %8395 = vst.msk [vmem:[%s14579_s23 + $0x8] sm:$0xff] %vm8393_vm8, %v8372_v55  ;;  %v9904_v54 = vor.u32 %v10893_v57, %v9901_v11  ;;  %v9968_v47 = vor.u32 %v10909_v4, %v9965_v5  ;;  %v9955_v1 = vld [vmem:[#allocation16 + $0xe0] sm:$0xf]  ;;  %v9952_v57 = vor.u32 %v10905_v22, %v9949_v52  ;;  %v9861_v22 = vld [vmem:[#allocation16 + $0x28] sm:$0xf0] }
 0x70e   :  { %v9875_v4 = vld [vmem:[#allocation16 + $0x40] sm:$0xf] }
 0x710   :  { %4862 = vmatpush.bf16.msra.mxu0 %v4847_v39  ;;  %4875 = vmatpush.bf16.msra.mxu1 %v4848_v8 }
 0x711   :  { %v4505_v10 = vpop.f32.mrf.mxu1 }
 0x712   :  { %v4506_v12 = vadd.f32 %v4505_v10, %v13249_v38 }
 0x713   :  { %9839 = vmatmul.msk.bf16.vlgmr.msra.gmra.mxu0 %vm4785_vm6, %v11544_v48  ;;  %9840 = vmatmul.msk.bf16.vlgmr.msra.gmra.mxu1 %vm4785_vm6, %v11544_v48 }
 0x714   :  { %8355 = vst.msk [vmem:[%s14579_s23 + $0x10] sm:$0xff] %vm8352_vm7, %v4506_v12  ;;  %5290 = vmatpush.bf16.msrb.mxu0 %v9904_v54  ;;  %5319 = vmatpush.bf16.msrb.mxu1 %v9968_v47  ;;  %v9892_v12 = vor.u32 %v10892_v7, %v9891_v6  ;;  %v10888_v47 = vld [vmem:[#allocation16 + $0x44] sm:$0xf0]  ;;  %v9939_v6 = vld [vmem:[#allocation16 + $0xc0] sm:$0xf] }
 0x715   :  { %8396 = vst.msk [vmem:[%s14579_s23 + $0x10] sm:$0xff] %vm8393_vm8, %v8374_v13  ;;  %v10908_v13 = vld [vmem:[#allocation16 + $0xe4] sm:$0xf0] }
 0x716   :  { %5233 = vmatpush.bf16.msra.mxu2 %v9892_v12  ;;  %v10904_v7 = vld [vmem:[#allocation16 + $0xc4] sm:$0xf0] }
 0x719   :  { %v4507_v21 = vpop.f32.mrf.mxu1 }
 0x71a   :  { %v4508_v34 = vadd.f32 %v4507_v21, %v13249_v38  ;;  %v10891_v21 = vld [vmem:[#allocation16 + $0x64] sm:$0xf] }
 0x71c   :  { %8356 = vst.msk [vmem:[%s14579_s23 + $0x18] sm:$0xff] %vm8352_vm7, %v4508_v34  ;;  %v9893_v34 = vld [vmem:[#allocation16 + $0x68] sm:$0xf0] }
 0x71d   :  { %8397 = vst.msk [vmem:[%s14579_s23 + $0x18] sm:$0xff] %vm8393_vm8, %v8376_v15 }
 0x721   :  { %v4510_v0 = vpop.f32.mrf.mxu1 }
 0x722   :  { %v4511_v16 = vadd.f32 %v4510_v0, %v13249_v38 }
 0x724   :  { %8357 = vst.msk [vmem:[%s14579_s23 + $0x20] sm:$0xff] %vm8352_vm7, %v4511_v16  ;;  %v9956_v16 = vor.u32 %v10908_v13, %v9955_v1  ;;  %v9876_v1 = vor.u32 %v10888_v47, %v9875_v4  ;;  %v9941_v13 = vld [vmem:[#allocation16 + $0xc8] sm:$0xf0] }
 0x725   :  { %8398 = vst.msk [vmem:[%s14579_s23 + $0x20] sm:$0xff] %vm8393_vm8, %v8378_v49  ;;  %v9896_v49 = vor.u32 %v10891_v21, %v9893_v34  ;;  %v9867_v34 = vld [vmem:[#allocation16 + $0x30] sm:$0xf] }
 0x726   :  { %5262 = vmatpush.bf16.msra.mxu3 %v9956_v16 }
 0x727   :  { %5291 = vmatpush.bf16.msrb.mxu0 %v9896_v49  ;;  %v10902_v49 = vld [vmem:[#allocation16 + $0xb4] sm:$0xf0] }
 0x729   :  { %v4512_v26 = vpop.f32.mrf.mxu1 }
 0x72a   :  { %v4513_v25 = vadd.f32 %v4512_v26, %v13249_v38  ;;  %v10907_v26 = vld [vmem:[#allocation16 + $0xe4] sm:$0xf] }
 0x72c   :  { %8358 = vst.msk [vmem:[%s14579_s23 + $0x28] sm:$0xff] %vm8352_vm7, %v4513_v25  ;;  %v9957_v25 = vld [vmem:[#allocation16 + $0xe8] sm:$0xf0] }
 0x72d   :  { %8399 = vst.msk [vmem:[%s14579_s23 + $0x28] sm:$0xff] %vm8393_vm8, %v8380_v27  ;;  %v9960_v27 = vor.u32 %v10907_v26, %v9957_v25  ;;  %v10885_v26 = vld [vmem:[#allocation16 + $0x34] sm:$0xf]  ;;  %v9869_v25 = vld [vmem:[#allocation16 + $0x38] sm:$0xf0] }
 0x72f   :  { %5320 = vmatpush.bf16.msrb.mxu1 %v9960_v27 }
 0x731   :  { %v4515_v33 = vpop.f32.mrf.mxu1 }
 0x732   :  { %v4516_v31 = vadd.f32 %v4515_v33, %v13249_v38 }
 0x733   :  { %5321 = vmatpush.bf16.msrb.mxu1 %v9952_v57 }
 0x734   :  { %8359 = vst.msk [vmem:[%s14579_s23 + $0x30] sm:$0xff] %vm8352_vm7, %v4516_v31 }
 0x735   :  { %8400 = vst.msk [vmem:[%s14579_s23 + $0x30] sm:$0xff] %vm8393_vm8, %v8382_v36  ;;  %v9883_v36 = vld [vmem:[#allocation16 + $0x50] sm:$0xf] }
 0x739   :  { %v4517_v59 = vpop.f32.mrf.mxu1 }
 0x73a   :  { %v4518_v40 = vadd.f32 %v4517_v59, %v13249_v38  ;;  %v10890_v59 = vld [vmem:[#allocation16 + $0x54] sm:$0xf0] }
 0x73c   :  { %8360 = vst.msk [vmem:[%s14579_s23 + $0x38] sm:$0xff] %vm8352_vm7, %v4518_v40  ;;  %v9947_v40 = vld [vmem:[#allocation16 + $0xd0] sm:$0xf] }
 0x73d   :  { %8401 = vst.msk [vmem:[%s14579_s23 + $0x38] sm:$0xff] %vm8393_vm8, %v8384_v19  ;;  %v9884_v19 = vor.u32 %v10890_v59, %v9883_v36  ;;  %v9933_v36 = vld [vmem:[#allocation16 + $0xb8] sm:$0xf0] }
 0x73f   :  { %5234 = vmatpush.bf16.msra.mxu2 %v9884_v19  ;;  %v9859_v19 = vld [vmem:[#allocation16 + $0x20] sm:$0xf] }
 0x743   :  { %5235 = vmatpush.bf16.msra.mxu2 %v9876_v1  ;;  %v9851_v1 = vld [vmem:[#allocation16 + $0x10] sm:$0xf] }
 0x780   :  { %v4798_v41 = vpop.f32.mrf.mxu0  ;;  %v4811_v43 = vpop.f32.mrf.mxu1 }
 0x781   :  { %v13367_v51 = vmul.f32 0.015625, %v4798_v41  ;;  %v13369_v38 = vmul.f32 0.015625, %v4811_v43  ;;  %v10906_v41 = vld [vmem:[#allocation16 + $0xd4] sm:$0xf0]  ;;  %v10889_v43 = vld [vmem:[#allocation16 + $0x54] sm:$0xf] }
 0x782   :  { %v9948_v44 = vor.u32 %v10906_v41, %v9947_v40  ;;  %v10884_v41 = vld [vmem:[#allocation16 + $0x24] sm:$0xf0] }
 0x783   :  { %v4885_v39 = vmul.f32 %v13367_v51, %v13367_v51  ;;  %v4886_v8 = vmul.f32 %v13369_v38, %v13369_v38 }
 0x784   :  { %5263 = vmatpush.bf16.msra.mxu3 %v9948_v44  ;;  %v10900_v44 = vld [vmem:[#allocation16 + $0xa4] sm:$0xf0] }
 0x788   :  { %v4800_v60 = vpop.f32.mrf.mxu0  ;;  %v4813_v32 = vpop.f32.mrf.mxu1 }
 0x789   :  { %v9885_v60 = vld [vmem:[#allocation16 + $0x58] sm:$0xf0] }
 0x78a   :  { %v9888_v45 = vor.u32 %v10889_v43, %v9885_v60  ;;  %v9923_v43 = vld [vmem:[#allocation16 + $0xa0] sm:$0xf] }
 0x78b   :  { %v9924_v57 = vor.u32 %v10900_v44, %v9923_v43  ;;  %v9845_v43 = vld [vmem:[#allocation16 + $0x8] sm:$0xf0] }
 0x78c   :  { %5292 = vmatpush.bf16.msrb.mxu0 %v9888_v45  ;;  %v10883_v45 = vld [vmem:[#allocation16 + $0x24] sm:$0xf] }
 0x78d   :  { %v9864_v4 = vor.u32 %v10883_v45, %v9861_v22  ;;  %v10895_v22 = vld [vmem:[#allocation16 + $0x84] sm:$0xf] }
 0x790   :  { %v4864_v55 = vpop.f32.mrf.mxu0  ;;  %v4877_v10 = vpop.f32.mrf.mxu1 }
 0x791   :  { %v4883_v15 = vmul.f32 0.015625, %v4864_v55  ;;  %v4884_v0 = vmul.f32 0.015625, %v4877_v10  ;;  %v10903_v55 = vld [vmem:[#allocation16 + $0xc4] sm:$0xf]  ;;  %v9940_v10 = vor.u32 %v10904_v7, %v9939_v6 }
 0x792   :  { %v9944_v21 = vor.u32 %v10903_v55, %v9941_v13  ;;  %v10881_v13 = vld [vmem:[#allocation16 + $0x14] sm:$0xf] }
 0x793   :  { %v4887_v33 = vsub.f32 %v4883_v15, %v4885_v39  ;;  %v4888_v31 = vsub.f32 %v4884_v0, %v4886_v8  ;;  %v10887_v39 = vld [vmem:[#allocation16 + $0x44] sm:$0xf]  ;;  %v9877_v8 = vld [vmem:[#allocation16 + $0x48] sm:$0xf0]  ;;  %v10886_v15 = vld [vmem:[#allocation16 + $0x34] sm:$0xf0]  ;;  %5264 = vmatpush.bf16.msra.mxu3 %v9940_v10 }
 0x794   :  { %v9880_v12 = vor.u32 %v10887_v39, %v9877_v8  ;;  %v9931_v0 = vld [vmem:[#allocation16 + $0xb0] sm:$0xf]  ;;  %v9868_v16 = vor.u32 %v10886_v15, %v9867_v34  ;;  %5322 = vmatpush.bf16.msrb.mxu1 %v9944_v21  ;;  %v10882_v39 = vld [vmem:[#allocation16 + $0x14] sm:$0xf0]  ;;  %v9853_v15 = vld [vmem:[#allocation16 + $0x18] sm:$0xf0] }
 0x795   :  { %v4889_v32 = vmax.f32 %v4887_v33, 0.0  ;;  %v4890_v30 = vmax.f32 %v4888_v31, 0.0  ;;  %v9932_v27 = vor.u32 %v10902_v49, %v9931_v0  ;;  %v9872_v33 = vor.u32 %v10885_v26, %v9869_v25  ;;  %v10901_v31 = vld [vmem:[#allocation16 + $0xb4] sm:$0xf]  ;;  %v9915_v8 = vld [vmem:[#allocation16 + $0x90] sm:$0xf] }
 0x796   :  { %5293 = vmatpush.bf16.msrb.mxu0 %v9880_v12  ;;  %v9936_v59 = vor.u32 %v10901_v31, %v9933_v36  ;;  %5236 = vmatpush.bf16.msra.mxu2 %v9868_v16  ;;  %v9852_v10 = vor.u32 %v10882_v39, %v9851_v1  ;;  %v10898_v12 = vld [vmem:[#allocation16 + $0x94] sm:$0xf0]  ;;  %v10897_v0 = vld [vmem:[#allocation16 + $0x94] sm:$0xf]  ;;  %v9856_v49 = vor.u32 %v10881_v13, %v9853_v15  ;;  %v9917_v26 = vld [vmem:[#allocation16 + $0x98] sm:$0xf0] }
 0x797   :  { %v13375_v58 = vadd.f32 1e-05, %v4889_v32  ;;  %v13377_v11 = vadd.f32 1e-05, %v4890_v30  ;;  %5265 = vmatpush.bf16.msra.mxu3 %v9932_v27  ;;  %v9860_v30 = vor.u32 %v10884_v41, %v9859_v19  ;;  %v9916_v34 = vor.u32 %v10898_v12, %v9915_v8  ;;  %v9843_v25 = vld [vmem:[#allocation16] sm:$0xf] }
 0x798   :  { %v4866_v5 = vpop.f32.mrf.mxu0  ;;  %v4879_v54 = vpop.f32.mrf.mxu1  ;;  %5323 = vmatpush.bf16.msrb.mxu1 %v9936_v59  ;;  %v10880_v31 = vld [vmem:[#allocation16 + $0x4] sm:$0xf0]  ;;  %v9907_v36 = vld [vmem:[#allocation16 + $0x80] sm:$0xf]  ;;  %v10879_v41 = vld [vmem:[#allocation16 + $0x4] sm:$0xf] }
 0x799   :  { %11082 = vrsqrt.f32 %v13375_v58  ;;  %v10899_v5 = vld [vmem:[#allocation16 + $0xa4] sm:$0xf]  ;;  %v9925_v54 = vld [vmem:[#allocation16 + $0xa8] sm:$0xf0]  ;;  %vm4909_vm11 = vweird.f32 %v13377_v11  ;;  %v9844_v59 = vor.u32 %v10880_v31, %v9843_v25  ;;  %v10896_v19 = vld [vmem:[#allocation16 + $0x84] sm:$0xf0]  ;;  %v9848_v45 = vor.u32 %v10879_v41, %v9845_v43 }
 0x79a   :  { %11084 = vrsqrt.f32 %v13377_v11  ;;  %5294 = vmatpush.bf16.msrb.mxu0 %v9872_v33  ;;  %v9928_v6 = vor.u32 %v10899_v5, %v9925_v54  ;;  %5237 = vmatpush.bf16.msra.mxu2 %v9860_v30  ;;  %v9920_v33 = vor.u32 %v10897_v0, %v9917_v26  ;;  %v9908_v44 = vor.u32 %v10896_v19, %v9907_v36  ;;  %v4533_v39 = vld [vmem:[#allocation4 + $0x1d] ss:$8 sm:$0x3] }
 0x79b   :  { %5266 = vmatpush.bf16.msra.mxu3 %v9924_v57  ;;  %vm4899_vm13 = vweird.f32 %v13375_v58 }
 0x79c   :  { %5324 = vmatpush.bf16.msrb.mxu1 %v9928_v6 }
 0x79e   :  { %5295 = vmatpush.bf16.msrb.mxu0 %v9864_v4  ;;  %5238 = vmatpush.bf16.msra.mxu2 %v9852_v10  ;;  %v4531_v4 = vld [vmem:[#allocation4 + $0x1c] ss:$8 sm:$0x3] }
 0x79f   :  { %v13381_v40 = vpop.eup %11082  ;;  %5267 = vmatpush.bf16.msra.mxu3 %v9916_v34 }
 0x7a0   :  { %v13383_v60 = vpop.eup %11084  ;;  %v4894_v32 = vmul.f32 %v13381_v40, %v13375_v58  ;;  %vm4900_vm10 = vweird.f32 %v13381_v40  ;;  %5325 = vmatpush.bf16.msrb.mxu1 %v9920_v33 }
 0x7a1   :  { %v4904_v52 = vmul.f32 %v13383_v60, %v13377_v11  ;;  %vm4910_vm9 = vweird.f32 %v13383_v60  ;;  %vm4901_vm15 = vmor %vm4899_vm13, %vm4900_vm10 }
 0x7a2   :  { %v4895_v47 = vmul.f32 %v13381_v40, %v4894_v32  ;;  %5296 = vmatpush.bf16.msrb.mxu0 %v9856_v49  ;;  %vm4911_vm12 = vmor %vm4909_vm11, %vm4910_vm9  ;;  %5239 = vmatpush.bf16.msra.mxu2 %v9844_v59 }
 0x7a3   :  { %v4905_v7 = vmul.f32 %v13383_v60, %v4904_v52  ;;  %v9909_v52 = vld [vmem:[#allocation16 + $0x88] sm:$0xf0]  ;;  %5268 = vmatpush.bf16.msra.mxu3 %v9908_v44 }
 0x7a4   :  { %v4896_v55 = vmul.f32 0.5, %v4895_v47  ;;  %v9912_v57 = vor.u32 %v10895_v22, %v9909_v52 }
 0x7a5   :  { %v4906_v21 = vmul.f32 0.5, %v4905_v7 }
 0x7a6   :  { %v4897_v16 = vsub.f32 1.5, %v4896_v55  ;;  %5297 = vmatpush.bf16.msrb.mxu0 %v9848_v45  ;;  %5326 = vmatpush.bf16.msrb.mxu1 %v9912_v57 }
 0x7a7   :  { %v4907_v27 = vsub.f32 1.5, %v4906_v21 }
 0x7a8   :  { %v4898_v32 = vmul.f32 %v13381_v40, %v4897_v16 }
 0x7a9   :  { %v4908_v30 = vmul.f32 %v13383_v60, %v4907_v27 }
 0x7aa   :  { %v4902_v54 = vsel %vm4901_vm15, %v13381_v40, %v4898_v32 }
 0x7ab   :  { %v4912_v11 = vsel %vm4911_vm12, %v13383_v60, %v4908_v30 }
 0x7ac   :  { %v4915_v5 = vrot.slane %v4912_v11, 7 }
 0x7ae   :  { %v4917_v47 = vsel %vm4916_vm14, %v4902_v54, %v4915_v5 }
 0x7af   :  { %v4919_v6 = vmul.f32 %v4917_v47, %v4531_v4 }
 0x7b1   :  { %v4921_v7 = vperm.slane %v4919_v6, 0  ;;  %v4922_v1 = vperm.slane %v4919_v6, 1 }
 0x7b3   :  { %v4926_v58 = vmul.f32 %v4922_v1, %v13369_v38  ;;  %v4933_v60 = vpack.c.bf16 %v4922_v1, %v4921_v7  ;;  %v4925_v8 = vmul.f32 %v4921_v7, %v13367_v51 }
 0x7b5   :  { %v4929_v55 = vrot.slane %v4926_v58, 7  ;;  %v4935_v10 = vunpack.c.l.b16 %v4933_v60  ;;  %v4936_v12 = vunpack.c.h.b16 %v4933_v60 }
 0x7b7   :  { %v4930_v13 = vsel %vm4916_vm14, %v4925_v8, %v4929_v55  ;;  %v4937_v21 = vpack.c.b16 %v4935_v10, %v4935_v10  ;;  %v4938_v34 = vpack.c.b16 %v4936_v12, %v4936_v12 }
 0x7b8   :  { %v4932_v40 = vsub.f32 %v4533_v39, %v4930_v13 }
 0x7b9   :  { %v4940_v15 = vpack.i.b16 %v4937_v21, %v4937_v21  ;;  %v4944_v0 = vpack.i.b16 %v4938_v34, %v4938_v34 }
 0x7ba   :  { %v4974_v16 = vperm.slane %v4932_v40, 0  ;;  %v4975_v49 = vperm.slane %v4932_v40, 1 }
 0x7bb   :  { %v4942_v26 = vperm.slane %v4940_v15, 0  ;;  %v4946_v25 = vperm.slane %v4944_v0, 0 }
 0x7bc   :  { %v4978_v27 = vpack.c.bf16 %v4975_v49, %v4974_v16 }
 0x7bd   :  { %v13407_v38 = vunpack.c.l.bf16 %v4942_v26  ;;  %v13409_v33 = vunpack.c.l.bf16 %v4946_v25 }
 0x7be   :  { %v4980_v51 = vunpack.c.l.b16 %v4978_v27  ;;  %v4981_v31 = vunpack.c.h.b16 %v4978_v27 }
 0x7bf   :  { %v4949_v36 = vmul.f32 %v13407_v38, %v13284_v62  ;;  %v4950_v59 = vmul.f32 %v13409_v33, %v13286_v63  ;;  %v4951_v19 = vmul.f32 %v13407_v38, %v13266_v46  ;;  %v4952_v41 = vmul.f32 %v13409_v33, %v13274_v53 }
 0x7c0   :  { %v4982_v43 = vpack.c.b16 %v4980_v51, %v4980_v51  ;;  %v4983_v32 = vpack.c.b16 %v4981_v31, %v4981_v31  ;;  %v4953_v58 = vmul.f32 %v13407_v38, %v13255_v42  ;;  %v4954_v60 = vmul.f32 %v13409_v33, %v13261_v61 }
 0x7c1   :  { %v4965_v30 = vpack.c.bf16 %v4950_v59, %v4949_v36  ;;  %v4966_v44 = vpack.c.bf16 %v4952_v41, %v4951_v19  ;;  %v4955_v39 = vmul.f32 %v13407_v38, %v13245_v3  ;;  %v4956_v8 = vmul.f32 %v13409_v33, %v13247_v2 }
 0x7c2   :  { %v4985_v45 = vpack.i.b16 %v4982_v43, %v4982_v43  ;;  %v4989_v22 = vpack.i.b16 %v4983_v32, %v4983_v32  ;;  %v4967_v55 = vpack.c.bf16 %v4954_v60, %v4953_v58  ;;  %v4957_v2 = vmul.f32 %v13407_v38, %v13241_v29 }
 0x7c3   :  { %v4992_v11 = vunpack.c.l.bf16 %v4965_v30  ;;  %v4994_v4 = vunpack.c.l.bf16 %v4966_v44  ;;  %v4993_v63 = vunpack.c.h.bf16 %v4965_v30  ;;  %v4995_v54 = vunpack.c.h.bf16 %v4966_v44 }
 0x7c4   :  { %v4987_v52 = vperm.slane %v4985_v45, 0  ;;  %v4991_v57 = vperm.slane %v4989_v22, 0  ;;  %v4968_v10 = vpack.c.bf16 %v4956_v8, %v4955_v39  ;;  %v4996_v12 = vunpack.c.l.bf16 %v4967_v55 }
 0x7c5   :  { %v4997_v21 = vunpack.c.h.bf16 %v4967_v55  ;;  %v4958_v16 = vmul.f32 %v13409_v33, %v13243_v28  ;;  %v4959_v49 = vmul.f32 %v13407_v38, %v13233_v23  ;;  %v4960_v26 = vmul.f32 %v13409_v33, %v13235_v14 }
 0x7c6   :  { %v13419_v62 = vunpack.c.l.bf16 %v4987_v52  ;;  %v13421_v5 = vunpack.c.l.bf16 %v4991_v57  ;;  %v4998_v13 = vunpack.c.l.bf16 %v4968_v10  ;;  %v4999_v34 = vunpack.c.h.bf16 %v4968_v10 }
 0x7c7   :  { %v4969_v25 = vpack.c.bf16 %v4958_v16, %v4957_v2  ;;  %v4970_v27 = vpack.c.bf16 %v4960_v26, %v4959_v49  ;;  %v4961_v14 = vmul.f32 %v13407_v38, %v13225_v17  ;;  %v4962_v32 = vmul.f32 %v13409_v33, %v13227_v20 }
 0x7c8   :  { %v5010_v46 = vadd.f32 %v13419_v62, %v4992_v11  ;;  %v5012_v53 = vadd.f32 %v13419_v62, %v4994_v4  ;;  %v5011_v47 = vadd.f32 %v13421_v5, %v4993_v63  ;;  %v5013_v6 = vadd.f32 %v13421_v5, %v4995_v54 }
 0x7c9   :  { %v5014_v42 = vadd.f32 %v13419_v62, %v4996_v12  ;;  %v5016_v40 = vadd.f32 %v13419_v62, %v4998_v13  ;;  %v5015_v61 = vadd.f32 %v13421_v5, %v4997_v21  ;;  %v5017_v15 = vadd.f32 %v13421_v5, %v4999_v34 }
 0x7ca   :  { %v5026_v7 = vpack.c.bf16 %v5012_v53, %v5010_v46  ;;  %v5027_v1 = vpack.c.bf16 %v5013_v6, %v5011_v47  ;;  %v5000_v51 = vunpack.c.l.bf16 %v4969_v25  ;;  %v5002_v31 = vunpack.c.l.bf16 %v4970_v27 }
 0x7cb   :  { %v5028_v3 = vpack.c.bf16 %v5016_v40, %v5014_v42  ;;  %v5029_v0 = vpack.c.bf16 %v5017_v15, %v5015_v61  ;;  %v5001_v36 = vunpack.c.h.bf16 %v4969_v25  ;;  %v5003_v59 = vunpack.c.h.bf16 %v4970_v27  ;;  %v5067_v40 = vld [vmem:[#allocation4 + $0x1e] ss:$8 sm:$0x3] }
 0x7cc   :  { %5240 = vmatmul.bf16.vlgmr.msra.gmra.mxu2 %v5026_v7  ;;  %5269 = vmatmul.bf16.vlgmr.msra.gmra.mxu3 %v5027_v1  ;;  %v5018_v29 = vadd.f32 %v13419_v62, %v5000_v51  ;;  %v5020_v19 = vadd.f32 %v13419_v62, %v5002_v31  ;;  %v4963_v30 = vmul.f32 %v13407_v38, %v13221_v56  ;;  %v5357_v61 = vperm.slane %v5067_v40, 0 }
 0x7cd   :  { %5298 = vmatmul.bf16.vlgmr.msrb.gmra.mxu0 %v5026_v7  ;;  %5327 = vmatmul.bf16.vlgmr.msrb.gmra.mxu1 %v5027_v1  ;;  %v5019_v28 = vadd.f32 %v13421_v5, %v5001_v36  ;;  %v5021_v41 = vadd.f32 %v13421_v5, %v5003_v59  ;;  %v4964_v44 = vmul.f32 %v13409_v33, %v13223_v50  ;;  %v5358_v15 = vperm.slane %v5067_v40, 1 }
 0x7ce   :  { %v5030_v23 = vpack.c.bf16 %v5020_v19, %v5018_v29  ;;  %v4971_v45 = vpack.c.bf16 %v4962_v32, %v4961_v14 }
 0x7cf   :  { %v5031_v43 = vpack.c.bf16 %v5021_v41, %v5019_v28  ;;  %v4972_v22 = vpack.c.bf16 %v4964_v44, %v4963_v30  ;;  %v5361_v2 = vpack.c.bf16 %v5358_v15, %v5357_v61 }
 0x7d0   :  { %v5004_v52 = vunpack.c.l.bf16 %v4971_v45  ;;  %v5005_v11 = vunpack.c.h.bf16 %v4971_v45 }
 0x7d1   :  { %v5006_v57 = vunpack.c.l.bf16 %v4972_v22  ;;  %v5007_v4 = vunpack.c.h.bf16 %v4972_v22  ;;  %v5363_v26 = vunpack.c.l.b16 %v5361_v2  ;;  %v5364_v25 = vunpack.c.h.b16 %v5361_v2 }
 0x7d2   :  { %v5022_v17 = vadd.f32 %v13419_v62, %v5004_v52  ;;  %v5023_v20 = vadd.f32 %v13421_v5, %v5005_v11 }
 0x7d3   :  { %v5024_v63 = vadd.f32 %v13419_v62, %v5006_v57  ;;  %v5025_v54 = vadd.f32 %v13421_v5, %v5007_v4  ;;  %v5365_v31 = vpack.c.b16 %v5363_v26, %v5363_v26  ;;  %v5366_v36 = vpack.c.b16 %v5364_v25, %v5364_v25 }
 0x7d5   :  { %v5032_v56 = vpack.c.bf16 %v5024_v63, %v5022_v17  ;;  %v5033_v38 = vpack.c.bf16 %v5025_v54, %v5023_v20  ;;  %v5368_v19 = vpack.i.b16 %v5365_v31, %v5365_v31  ;;  %v5372_v28 = vpack.i.b16 %v5366_v36, %v5366_v36 }
 0x7d7   :  { %v5370_v52 = vperm.slane %v5368_v19, 0  ;;  %v5374_v57 = vperm.slane %v5372_v28, 0 }
 0x7dc   :  { %5245 = vmatmul.bf16.gmra.mxu2 %v5028_v3  ;;  %5274 = vmatmul.bf16.gmra.mxu3 %v5029_v0 }
 0x7dd   :  { %5303 = vmatmul.bf16.gmra.mxu0 %v5028_v3  ;;  %5332 = vmatmul.bf16.gmra.mxu1 %v5029_v0 }
 0x7ec   :  { %5250 = vmatmul.bf16.gmra.mxu2 %v5030_v23  ;;  %5279 = vmatmul.bf16.gmra.mxu3 %v5031_v43 }
 0x7ed   :  { %5308 = vmatmul.bf16.gmra.mxu0 %v5030_v23  ;;  %5337 = vmatmul.bf16.gmra.mxu1 %v5031_v43 }
 0x7fc   :  { %5255 = vmatmul.bf16.gmra.mxu2 %v5032_v56  ;;  %5284 = vmatmul.bf16.gmra.mxu3 %v5033_v38 }
 0x7fd   :  { %5313 = vmatmul.bf16.gmra.mxu0 %v5032_v56  ;;  %5342 = vmatmul.bf16.gmra.mxu1 %v5033_v38 }
 0x84a   :  { %v5299_v50 = vpop.f32.mrf.mxu0  ;;  %v5328_v33 = vpop.f32.mrf.mxu1 }
 0x84b   :  { %v5329_v46 = vadd.f32 %v5328_v33, %v5299_v50 }
 0x84f   :  { %v5241_v53 = vpop.f32.mrf.mxu2  ;;  %v5270_v47 = vpop.f32.mrf.mxu3 }
 0x850   :  { %v5271_v6 = vadd.f32 %v5270_v47, %v5241_v53  ;;  %v5391_v47 = vunpack.c.l.bf16 %v5370_v52 }
 0x852   :  { %v13463_v7 = vpack.c.bf16 %v5329_v46, %v5271_v6  ;;  %v5301_v1 = vpop.f32.mrf.mxu0  ;;  %v5330_v62 = vpop.f32.mrf.mxu1  ;;  %v5392_v6 = vunpack.c.l.bf16 %v5374_v57 }
 0x857   :  { %v5243_v58 = vpop.f32.mrf.mxu2  ;;  %v5272_v60 = vpop.f32.mrf.mxu3 }
 0x858   :  { %v5273_v38 = vadd.f32 %v5272_v60, %v5243_v58  ;;  %v5375_v58 = vunpack.c.l.bf16 %v13463_v7 }
 0x85a   :  { %v5304_v39 = vpop.f32.mrf.mxu0  ;;  %v5333_v5 = vpop.f32.mrf.mxu1 }
 0x85b   :  { %v5334_v50 = vadd.f32 %v5333_v5, %v5304_v39 }
 0x85f   :  { %v5246_v8 = vpop.f32.mrf.mxu2  ;;  %v5275_v55 = vpop.f32.mrf.mxu3 }
 0x860   :  { %v5276_v17 = vadd.f32 %v5275_v55, %v5246_v8 }
 0x862   :  { %v5306_v10 = vpop.f32.mrf.mxu0  ;;  %v5335_v12 = vpop.f32.mrf.mxu1 }
 0x863   :  { %v5336_v63 = vadd.f32 %v5335_v12, %v5306_v10 }
 0x867   :  { %v5248_v13 = vpop.f32.mrf.mxu2  ;;  %v5277_v21 = vpop.f32.mrf.mxu3 }
 0x868   :  { %v5278_v45 = vadd.f32 %v5277_v21, %v5248_v13  ;;  %v5331_v13 = vadd.f32 %v5330_v62, %v5301_v1  ;;  %v5350_v21 = vpack.c.bf16 %v5334_v50, %v5276_v17 }
 0x86a   :  { %v5309_v34 = vpop.f32.mrf.mxu0  ;;  %v5338_v42 = vpop.f32.mrf.mxu1  ;;  %v5351_v33 = vpack.c.bf16 %v5336_v63, %v5278_v45  ;;  %v5349_v60 = vpack.c.bf16 %v5331_v13, %v5273_v38  ;;  %v5379_v1 = vunpack.c.l.bf16 %v5350_v21  ;;  %v5380_v62 = vunpack.c.h.bf16 %v5350_v21 }
 0x86b   :  { %v5339_v22 = vadd.f32 %v5338_v42, %v5309_v34  ;;  %v5393_v63 = vadd.f32 %v5391_v47, %v5375_v58 }
 0x86c   :  { %v5381_v39 = vunpack.c.l.bf16 %v5351_v33  ;;  %v5382_v5 = vunpack.c.h.bf16 %v5351_v33 }
 0x86e   :  { %v5399_v19 = vadd.f32 %v5391_v47, %v5381_v39  ;;  %v5400_v28 = vadd.f32 %v5392_v6, %v5382_v5 }
 0x86f   :  { %v5251_v3 = vpop.f32.mrf.mxu2  ;;  %v5280_v0 = vpop.f32.mrf.mxu3 }
 0x870   :  { %v5281_v23 = vadd.f32 %v5280_v0, %v5251_v3  ;;  %v5376_v0 = vunpack.c.h.bf16 %v13463_v7  ;;  %v5397_v7 = vadd.f32 %v5391_v47, %v5379_v1  ;;  %v5440_v17 = vmax.f32 %v5400_v28, 0.0 }
 0x872   :  { %v5311_v16 = vpop.f32.mrf.mxu0  ;;  %v5340_v49 = vpop.f32.mrf.mxu1  ;;  %v5352_v20 = vpack.c.bf16 %v5339_v22, %v5281_v23  ;;  %v5437_v38 = vmax.f32 %v5397_v7, 0.0 }
 0x873   :  { %v5341_v32 = vadd.f32 %v5340_v49, %v5311_v16 }
 0x874   :  { %v5383_v34 = vunpack.c.l.bf16 %v5352_v20  ;;  %v5384_v42 = vunpack.c.h.bf16 %v5352_v20 }
 0x876   :  { %v5401_v26 = vadd.f32 %v5391_v47, %v5383_v34  ;;  %v5402_v25 = vadd.f32 %v5392_v6, %v5384_v42 }
 0x877   :  { %v5253_v27 = vpop.f32.mrf.mxu2  ;;  %v5282_v51 = vpop.f32.mrf.mxu3 }
 0x878   :  { %v5283_v41 = vadd.f32 %v5282_v51, %v5253_v27 }
 0x87a   :  { %v5314_v59 = vpop.f32.mrf.mxu0  ;;  %v5343_v29 = vpop.f32.mrf.mxu1  ;;  %v5353_v11 = vpack.c.bf16 %v5341_v32, %v5283_v41  ;;  %v5398_v32 = vadd.f32 %v5392_v6, %v5380_v62 }
 0x87b   :  { %v5344_v30 = vadd.f32 %v5343_v29, %v5314_v59  ;;  %v5377_v59 = vunpack.c.l.bf16 %v5349_v60  ;;  %v5378_v29 = vunpack.c.h.bf16 %v5349_v60 }
 0x87c   :  { %v5385_v40 = vunpack.c.l.bf16 %v5353_v11  ;;  %v5386_v61 = vunpack.c.h.bf16 %v5353_v11  ;;  %v5438_v50 = vmax.f32 %v5398_v32, 0.0 }
 0x87d   :  { %v5395_v57 = vadd.f32 %v5391_v47, %v5377_v59  ;;  %v5396_v11 = vadd.f32 %v5392_v6, %v5378_v29 }
 0x87e   :  { %v5403_v2 = vadd.f32 %v5391_v47, %v5385_v40  ;;  %v5404_v16 = vadd.f32 %v5392_v6, %v5386_v61 }
 0x87f   :  { %v5256_v43 = vpop.f32.mrf.mxu2  ;;  %v5285_v14 = vpop.f32.mrf.mxu3  ;;  %v5435_v13 = vmax.f32 %v5395_v57, 0.0  ;;  %v5436_v21 = vmax.f32 %v5396_v11, 0.0 }
 0x880   :  { %v5286_v44 = vadd.f32 %v5285_v14, %v5256_v43  ;;  %v5443_v41 = vmax.f32 %v5403_v2, 0.0  ;;  %v5444_v23 = vmax.f32 %v5404_v16, 0.0 }
 0x881   :  { %v5450_v58 = vpack.c.bf16 %v5436_v21, %v5435_v13 }
 0x882   :  { %v5354_v4 = vpack.c.bf16 %v5344_v30, %v5286_v44  ;;  %v5316_v46 = vpop.f32.mrf.mxu0  ;;  %v5345_v53 = vpop.f32.mrf.mxu1  ;;  %v5441_v30 = vmax.f32 %v5401_v26, 0.0  ;;  %v5442_v44 = vmax.f32 %v5402_v25, 0.0  ;;  %v5454_v20 = vpack.c.bf16 %v5444_v23, %v5443_v41 }
 0x883   :  { %v5346_v10 = vadd.f32 %v5345_v53, %v5316_v46 }
 0x884   :  { %v5387_v54 = vunpack.c.l.bf16 %v5354_v4  ;;  %v5388_v56 = vunpack.c.h.bf16 %v5354_v4  ;;  %v5439_v4 = vmax.f32 %v5399_v19, 0.0  ;;  %v5453_v33 = vpack.c.bf16 %v5442_v44, %v5441_v30 }
 0x885   :  { %v13479_v19 = vunpack.c.l.bf16 %v5454_v20  ;;  %v13481_v28 = vunpack.c.h.bf16 %v5454_v20 }
 0x886   :  { %v5405_v8 = vadd.f32 %v5391_v47, %v5387_v54  ;;  %v5406_v55 = vadd.f32 %v5392_v6, %v5388_v56  ;;  %v5394_v56 = vadd.f32 %v5392_v6, %v5376_v0  ;;  %v5452_v34 = vpack.c.bf16 %v5440_v17, %v5439_v4 }
 0x887   :  { %v5258_v15 = vpop.f32.mrf.mxu2  ;;  %v5287_v3 = vpop.f32.mrf.mxu3  ;;  %v13487_v7 = vunpack.c.l.bf16 %v5453_v33  ;;  %v13489_v32 = vunpack.c.h.bf16 %v5453_v33  ;;  %v5549_v11 = vmul.f32 %v13479_v19, %v13479_v19  ;;  %v5550_v4 = vmul.f32 %v13481_v28, %v13481_v28 }
 0x888   :  { %v5288_v12 = vadd.f32 %v5287_v3, %v5258_v15  ;;  %v5445_v27 = vmax.f32 %v5405_v8, 0.0  ;;  %v5446_v51 = vmax.f32 %v5406_v55, 0.0  ;;  %v5475_v3 = vunpack.c.l.b16 %v5454_v20 }
 0x889   :  { %v5476_v8 = vunpack.c.h.b16 %v5454_v20  ;;  %v5433_v55 = vmax.f32 %v5393_v63, 0.0  ;;  %v5471_v5 = vunpack.c.l.b16 %v5452_v34  ;;  %v5472_v0 = vunpack.c.h.b16 %v5452_v34 }
 0x88a   :  { %v5355_v49 = vpack.c.bf16 %v5346_v10, %v5288_v12  ;;  %v5455_v45 = vpack.c.bf16 %v5446_v51, %v5445_v27  ;;  %v5434_v10 = vmax.f32 %v5394_v56, 0.0  ;;  %v5474_v12 = vunpack.c.h.b16 %v5453_v33 }
 0x88b   :  { %v5547_v17 = vmul.f32 %v13487_v7, %v13487_v7  ;;  %v5548_v63 = vmul.f32 %v13489_v32, %v13489_v32 }
 0x88c   :  { %v5389_v31 = vunpack.c.l.bf16 %v5355_v49  ;;  %v5390_v36 = vunpack.c.h.bf16 %v5355_v49  ;;  %v5477_v46 = vunpack.c.l.b16 %v5455_v45  ;;  %v5478_v40 = vunpack.c.h.b16 %v5455_v45 }
 0x88d   :  { %v5486_v39 = vpack.c.b16 %v5476_v8, %v5474_v12  ;;  %v5449_v49 = vpack.c.bf16 %v5434_v10, %v5433_v55  ;;  %v13471_v26 = vunpack.c.l.bf16 %v5455_v45  ;;  %v13473_v25 = vunpack.c.h.bf16 %v5455_v45 }
 0x88e   :  { %v5407_v43 = vadd.f32 %v5391_v47, %v5389_v31  ;;  %v5408_v14 = vadd.f32 %v5392_v6, %v5390_v36  ;;  %v5451_v47 = vpack.c.bf16 %v5438_v50, %v5437_v38  ;;  %v5473_v6 = vunpack.c.l.b16 %v5453_v33 }
 0x88f   :  { %v5467_v31 = vunpack.c.l.b16 %v5450_v58  ;;  %v5468_v36 = vunpack.c.h.b16 %v5450_v58  ;;  %v5465_v41 = vunpack.c.l.b16 %v5449_v49  ;;  %v5466_v23 = vunpack.c.h.b16 %v5449_v49 }
 0x890   :  { %v5447_v22 = vmax.f32 %v5407_v43, 0.0  ;;  %v5448_v52 = vmax.f32 %v5408_v14, 0.0  ;;  %v5485_v60 = vpack.c.b16 %v5475_v3, %v5473_v6  ;;  %v5469_v1 = vunpack.c.l.b16 %v5451_v47 }
 0x891   :  { %v5470_v62 = vunpack.c.h.b16 %v5451_v47  ;;  %v5551_v43 = vmul.f32 %v13471_v26, %v13471_v26  ;;  %v5552_v14 = vmul.f32 %v13473_v25, %v13473_v25  ;;  %v5481_v30 = vpack.c.b16 %v5467_v31, %v5465_v41 }
 0x892   :  { %v5456_v54 = vpack.c.bf16 %v5448_v52, %v5447_v22  ;;  %v5483_v27 = vpack.c.b16 %v5471_v5, %v5469_v1  ;;  %v5482_v44 = vpack.c.b16 %v5468_v36, %v5466_v23  ;;  %v13491_v45 = vunpack.c.l.bf16 %v5452_v34 }
 0x893   :  { %v5484_v51 = vpack.c.b16 %v5472_v0, %v5470_v62  ;;  %v13493_v22 = vunpack.c.h.bf16 %v5452_v34  ;;  %v13503_v20 = vunpack.c.l.bf16 %v5451_v47  ;;  %v13509_v38 = vunpack.c.l.bf16 %v5450_v58 }
 0x894   :  { %v5479_v53 = vunpack.c.l.b16 %v5456_v54  ;;  %v5480_v61 = vunpack.c.h.b16 %v5456_v54  ;;  %v13467_v2 = vunpack.c.l.bf16 %v5456_v54  ;;  %v13469_v16 = vunpack.c.h.bf16 %v5456_v54 }
 0x895   :  { %v13505_v54 = vunpack.c.h.bf16 %v5451_v47  ;;  %v5545_v56 = vmul.f32 %v13491_v45, %v13491_v45  ;;  %v5559_v50 = vpack.c.bf16 %v5549_v11, %v5547_v17  ;;  %v5560_v33 = vpack.c.bf16 %v5550_v4, %v5548_v63  ;;  %v10925_v4 = vld [vmem:[#allocation18 + $0x74] sm:$0xf]  ;;  %v10033_v17 = vld [vmem:[#allocation18 + $0x78] sm:$0xf0] }
 0x896   :  { %v5487_v42 = vpack.c.b16 %v5479_v53, %v5477_v46  ;;  %v5488_v15 = vpack.c.b16 %v5480_v61, %v5478_v40  ;;  %v5553_v59 = vmul.f32 %v13467_v2, %v13467_v2  ;;  %v5554_v29 = vmul.f32 %v13469_v16, %v13469_v16  ;;  %v10941_v63 = vld [vmem:[#allocation18 + $0xf4] sm:$0xf] }
 0x897   :  { %v5546_v46 = vmul.f32 %v13493_v22, %v13493_v22  ;;  %v13517_v53 = vunpack.c.h.bf16 %v5450_v58  ;;  %v5543_v40 = vmul.f32 %v13503_v20, %v13503_v20  ;;  %v5544_v61 = vmul.f32 %v13505_v54, %v13505_v54 }
 0x898   :  { %5501 = vmatpush.bf16.msrb.mxu2 %v5487_v42  ;;  %5514 = vmatpush.bf16.msrb.mxu3 %v5488_v15  ;;  %v5561_v52 = vpack.c.bf16 %v5553_v59, %v5551_v43  ;;  %v5562_v57 = vpack.c.bf16 %v5554_v29, %v5552_v14  ;;  %v13523_v13 = vunpack.c.l.bf16 %v5449_v49  ;;  %v13525_v21 = vunpack.c.h.bf16 %v5449_v49  ;;  %v10031_v43 = vld [vmem:[#allocation18 + $0x70] sm:$0xf] }
 0x899   :  { %v5557_v34 = vpack.c.bf16 %v5545_v56, %v5543_v40  ;;  %v5558_v42 = vpack.c.bf16 %v5546_v46, %v5544_v61  ;;  %v5541_v15 = vmul.f32 %v13509_v38, %v13509_v38  ;;  %v5542_v3 = vmul.f32 %v13517_v53, %v13517_v53  ;;  %v10023_v40 = vld [vmem:[#allocation18 + $0x60] sm:$0xf]  ;;  %v10924_v61 = vld [vmem:[#allocation18 + $0x64] sm:$0xf0] }
 0x89a   :  { %v5539_v8 = vmul.f32 %v13523_v13, %v13523_v13  ;;  %v5540_v55 = vmul.f32 %v13525_v21, %v13525_v21 }
 0x89c   :  { %5502 = vmatpush.bf16.msrb.mxu2 %v5485_v60  ;;  %5515 = vmatpush.bf16.msrb.mxu3 %v5486_v39  ;;  %v5555_v10 = vpack.c.bf16 %v5541_v15, %v5539_v8  ;;  %v5556_v47 = vpack.c.bf16 %v5542_v3, %v5540_v55  ;;  %v10940_v15 = vld [vmem:[#allocation18 + $0xe4] sm:$0xf0]  ;;  %v10923_v3 = vld [vmem:[#allocation18 + $0x64] sm:$0xf]  ;;  %v10025_v8 = vld [vmem:[#allocation18 + $0x68] sm:$0xf0] }
 0x8a0   :  { %5503 = vmatpush.bf16.msrb.mxu2 %v5483_v27  ;;  %5516 = vmatpush.bf16.msrb.mxu3 %v5484_v51 }
 0x8a4   :  { %5504 = vmatpush.bf16.msrb.mxu2 %v5481_v30  ;;  %5517 = vmatpush.bf16.msrb.mxu3 %v5482_v44  ;;  %v10926_v44 = vld [vmem:[#allocation18 + $0x74] sm:$0xf0] }
 0x8a5   :  { %v10032_v11 = vor.u32 %v10926_v44, %v10031_v43 }
 0x8a7   :  { %9969 = vmatmul.msk.bf16.vlgmr.msrb.gmra.mxu2 %vm4785_vm6, %v11544_v48  ;;  %9970 = vmatmul.msk.bf16.vlgmr.msrb.gmra.mxu3 %vm4785_vm6, %v11544_v48 }
 0x8a8   :  { %5567 = vmatpush.bf16.msra.mxu2 %v5561_v52  ;;  %5580 = vmatpush.bf16.msra.mxu3 %v5562_v57  ;;  %v10095_v52 = vld [vmem:[#allocation18 + $0xf0] sm:$0xf]  ;;  %v10942_v57 = vld [vmem:[#allocation18 + $0xf4] sm:$0xf0] }
 0x8a9   :  { %v10096_v56 = vor.u32 %v10942_v57, %v10095_v52  ;;  %5939 = vmatpush.bf16.msra.mxu0 %v10032_v11  ;;  %v10007_v11 = vld [vmem:[#allocation18 + $0x40] sm:$0xf] }
 0x8ab   :  { %5968 = vmatpush.bf16.msra.mxu1 %v10096_v56 }
 0x8ac   :  { %5568 = vmatpush.bf16.msra.mxu2 %v5559_v50  ;;  %5581 = vmatpush.bf16.msra.mxu3 %v5560_v33  ;;  %v10036_v50 = vor.u32 %v10925_v4, %v10033_v17  ;;  %v10097_v33 = vld [vmem:[#allocation18 + $0xf8] sm:$0xf0]  ;;  %v10920_v4 = vld [vmem:[#allocation18 + $0x44] sm:$0xf0]  ;;  %v10071_v17 = vld [vmem:[#allocation18 + $0xc0] sm:$0xf] }
 0x8ad   :  { %v10100_v46 = vor.u32 %v10941_v63, %v10097_v33  ;;  %v10008_v56 = vor.u32 %v10920_v4, %v10007_v11  ;;  %v10919_v33 = vld [vmem:[#allocation18 + $0x44] sm:$0xf] }
 0x8ae   :  { %v10915_v4 = vld [vmem:[#allocation18 + $0x24] sm:$0xf] }
 0x8b0   :  { %5569 = vmatpush.bf16.msra.mxu2 %v5557_v34  ;;  %5582 = vmatpush.bf16.msra.mxu3 %v5558_v42  ;;  %v10087_v34 = vld [vmem:[#allocation18 + $0xe0] sm:$0xf]  ;;  %v10024_v42 = vor.u32 %v10924_v61, %v10023_v40  ;;  %v10009_v61 = vld [vmem:[#allocation18 + $0x48] sm:$0xf0] }
 0x8b1   :  { %v10088_v55 = vor.u32 %v10940_v15, %v10087_v34  ;;  %v10935_v34 = vld [vmem:[#allocation18 + $0xc4] sm:$0xf]  ;;  %v10012_v15 = vor.u32 %v10919_v33, %v10009_v61 }
 0x8b2   :  { %5940 = vmatpush.bf16.msra.mxu0 %v10024_v42 }
 0x8b3   :  { %5969 = vmatpush.bf16.msra.mxu1 %v10088_v55 }
 0x8b4   :  { %5570 = vmatpush.bf16.msra.mxu2 %v5555_v10  ;;  %5583 = vmatpush.bf16.msra.mxu3 %v5556_v47  ;;  %v10028_v10 = vor.u32 %v10923_v3, %v10025_v8  ;;  %v10939_v47 = vld [vmem:[#allocation18 + $0xe4] sm:$0xf]  ;;  %v10073_v3 = vld [vmem:[#allocation18 + $0xc8] sm:$0xf0]  ;;  %v9999_v8 = vld [vmem:[#allocation18 + $0x30] sm:$0xf] }
 0x8b7   :  { %9971 = vmatmul.msk.bf16.vlgmr.msra.gmra.mxu2 %vm4785_vm6, %v11544_v48  ;;  %9972 = vmatmul.msk.bf16.vlgmr.msra.gmra.mxu3 %vm4785_vm6, %v11544_v48 }
 0x8b8   :  { %5997 = vmatpush.bf16.msrb.mxu2 %v10036_v50  ;;  %6026 = vmatpush.bf16.msrb.mxu3 %v10100_v46  ;;  %v10936_v50 = vld [vmem:[#allocation18 + $0xc4] sm:$0xf0] }
 0x8b9   :  { %v10072_v40 = vor.u32 %v10936_v50, %v10071_v17  ;;  %v9993_v17 = vld [vmem:[#allocation18 + $0x28] sm:$0xf0] }
 0x8ba   :  { %v9996_v33 = vor.u32 %v10915_v4, %v9993_v17 }
 0x8bc   :  { %5998 = vmatpush.bf16.msrb.mxu2 %v10028_v10 }
 0x92a   :  { %v5506_v6 = vpop.f32.mrf.mxu2  ;;  %v5519_v12 = vpop.f32.mrf.mxu3 }
 0x92b   :  { %v13539_v39 = vmul.f32 0.015625, %v5506_v6  ;;  %v13541_v5 = vmul.f32 0.015625, %v5519_v12  ;;  %v10089_v6 = vld [vmem:[#allocation18 + $0xe8] sm:$0xf0] }
 0x92c   :  { %v10092_v12 = vor.u32 %v10939_v47, %v10089_v6  ;;  %v10076_v47 = vor.u32 %v10935_v34, %v10073_v3  ;;  %v10918_v6 = vld [vmem:[#allocation18 + $0x34] sm:$0xf0]  ;;  %v10047_v34 = vld [vmem:[#allocation18 + $0x90] sm:$0xf]  ;;  %v10913_v3 = vld [vmem:[#allocation18 + $0x14] sm:$0xf] }
 0x92d   :  { %v5593_v1 = vmul.f32 %v13539_v39, %v13539_v39  ;;  %v5594_v62 = vmul.f32 %v13541_v5, %v13541_v5 }
 0x92e   :  { %6027 = vmatpush.bf16.msrb.mxu3 %v10092_v12  ;;  %v10063_v12 = vld [vmem:[#allocation18 + $0xb0] sm:$0xf] }
 0x932   :  { %v5508_v58 = vpop.f32.mrf.mxu2  ;;  %v5521_v60 = vpop.f32.mrf.mxu3 }
 0x933   :  { %v10015_v60 = vld [vmem:[#allocation18 + $0x50] sm:$0xf] }
 0x93a   :  { %v5572_v0 = vpop.f32.mrf.mxu2  ;;  %v5585_v49 = vpop.f32.mrf.mxu3 }
 0x93b   :  { %v5591_v27 = vmul.f32 0.015625, %v5572_v0  ;;  %v5592_v51 = vmul.f32 0.015625, %v5585_v49  ;;  %v10922_v0 = vld [vmem:[#allocation18 + $0x54] sm:$0xf0]  ;;  %v10079_v49 = vld [vmem:[#allocation18 + $0xd0] sm:$0xf] }
 0x93d   :  { %v5595_v31 = vsub.f32 %v5591_v27, %v5593_v1  ;;  %v5596_v36 = vsub.f32 %v5592_v51, %v5594_v62  ;;  %v10016_v27 = vor.u32 %v10922_v0, %v10015_v60  ;;  %v10938_v51 = vld [vmem:[#allocation18 + $0xd4] sm:$0xf0]  ;;  %v10000_v60 = vor.u32 %v10918_v6, %v9999_v8  ;;  %v10917_v0 = vld [vmem:[#allocation18 + $0x34] sm:$0xf]  ;;  %v9985_v8 = vld [vmem:[#allocation18 + $0x18] sm:$0xf0] }
 0x93e   :  { %v10049_v6 = vld [vmem:[#allocation18 + $0x98] sm:$0xf0] }
 0x93f   :  { %v5597_v59 = vmax.f32 %v5595_v31, 0.0  ;;  %v5598_v29 = vmax.f32 %v5596_v36, 0.0  ;;  %v10921_v31 = vld [vmem:[#allocation18 + $0x54] sm:$0xf]  ;;  %v10017_v36 = vld [vmem:[#allocation18 + $0x58] sm:$0xf0]  ;;  %5941 = vmatpush.bf16.msra.mxu0 %v10016_v27 }
 0x940   :  { %v10020_v43 = vor.u32 %v10921_v31, %v10017_v36  ;;  %v10933_v36 = vld [vmem:[#allocation18 + $0xb4] sm:$0xf] }
 0x941   :  { %v13547_v41 = vadd.f32 1e-05, %v5597_v59  ;;  %v13549_v23 = vadd.f32 1e-05, %v5598_v29  ;;  %v10080_v29 = vor.u32 %v10938_v51, %v10079_v49  ;;  %v10001_v49 = vld [vmem:[#allocation18 + $0x38] sm:$0xf0] }
 0x942   :  { %v5574_v14 = vpop.f32.mrf.mxu2  ;;  %v5587_v30 = vpop.f32.mrf.mxu3  ;;  %5999 = vmatpush.bf16.msrb.mxu2 %v10020_v43  ;;  %v10004_v31 = vor.u32 %v10917_v0, %v10001_v49  ;;  %v5069_v43 = vld [vmem:[#allocation4 + $0x1f] ss:$8 sm:$0x3]  ;;  %v10039_v0 = vld [vmem:[#allocation18 + $0x80] sm:$0xf] }
 0x943   :  { %11086 = vrsqrt.f32 %v13547_v41  ;;  %v10937_v14 = vld [vmem:[#allocation18 + $0xd4] sm:$0xf]  ;;  %v10081_v30 = vld [vmem:[#allocation18 + $0xd8] sm:$0xf0]  ;;  %5970 = vmatpush.bf16.msra.mxu1 %v10080_v29  ;;  %vm5617_vm1 = vweird.f32 %v13549_v23  ;;  %5942 = vmatpush.bf16.msra.mxu0 %v10008_v56  ;;  %v9991_v29 = vld [vmem:[#allocation18 + $0x20] sm:$0xf]  ;;  %vm5607_vm4 = vweird.f32 %v13547_v41 }
 0x944   :  { %11088 = vrsqrt.f32 %v13549_v23  ;;  %v10084_v52 = vor.u32 %v10937_v14, %v10081_v30  ;;  %v10916_v30 = vld [vmem:[#allocation18 + $0x24] sm:$0xf0] }
 0x945   :  { %v9992_v11 = vor.u32 %v10916_v30, %v9991_v29  ;;  %v10928_v49 = vld [vmem:[#allocation18 + $0x84] sm:$0xf0]  ;;  %v10041_v29 = vld [vmem:[#allocation18 + $0x88] sm:$0xf0] }
 0x946   :  { %6028 = vmatpush.bf16.msrb.mxu3 %v10084_v52  ;;  %6000 = vmatpush.bf16.msrb.mxu2 %v10012_v15  ;;  %v10932_v52 = vld [vmem:[#allocation18 + $0xa4] sm:$0xf0] }
 0x947   :  { %5971 = vmatpush.bf16.msra.mxu1 %v10072_v40  ;;  %5943 = vmatpush.bf16.msra.mxu0 %v10000_v60  ;;  %v9983_v40 = vld [vmem:[#allocation18 + $0x10] sm:$0xf] }
 0x949   :  { %v13553_v58 = vpop.eup %11086 }
 0x94a   :  { %v13555_v1 = vpop.eup %11088  ;;  %v5602_v62 = vmul.f32 %v13553_v58, %v13547_v41  ;;  %vm5608_vm3 = vweird.f32 %v13553_v58  ;;  %6029 = vmatpush.bf16.msrb.mxu3 %v10076_v47  ;;  %6001 = vmatpush.bf16.msrb.mxu2 %v10004_v31  ;;  %v10911_v31 = vld [vmem:[#allocation18 + $0x4] sm:$0xf] }
 0x94b   :  { %v5612_v59 = vmul.f32 %v13555_v1, %v13549_v23  ;;  %vm5618_vm0 = vweird.f32 %v13555_v1  ;;  %v10934_v23 = vld [vmem:[#allocation18 + $0xb4] sm:$0xf0]  ;;  %vm5609_vm7 = vmor %vm5607_vm4, %vm5608_vm3  ;;  %5944 = vmatpush.bf16.msra.mxu0 %v9992_v11  ;;  %v5071_v11 = vld [vmem:[#allocation4 + $0x30] ss:$8 sm:$0x3] }
 0x94c   :  { %v5603_v44 = vmul.f32 %v13553_v58, %v5602_v62  ;;  %vm13567_vm2 = vmor %vm5617_vm1, %vm5618_vm0  ;;  %v10064_v51 = vor.u32 %v10934_v23, %v10063_v12  ;;  %v9975_v12 = vld [vmem:[#allocation18] sm:$0xf]  ;;  %v9988_v23 = vor.u32 %v10913_v3, %v9985_v8 }
 0x94d   :  { %v5613_v57 = vmul.f32 %v13555_v1, %v5612_v59  ;;  %v10065_v59 = vld [vmem:[#allocation18 + $0xb8] sm:$0xf0] }
 0x94e   :  { %v5604_v63 = vmul.f32 0.5, %v5603_v44  ;;  %v10068_v14 = vor.u32 %v10933_v36, %v10065_v59  ;;  %v10055_v44 = vld [vmem:[#allocation18 + $0xa0] sm:$0xf]  ;;  %5972 = vmatpush.bf16.msra.mxu1 %v10064_v51  ;;  %6002 = vmatpush.bf16.msrb.mxu2 %v9996_v33  ;;  %v9977_v36 = vld [vmem:[#allocation18 + $0x8] sm:$0xf0] }
 0x94f   :  { %v5614_v46 = vmul.f32 0.5, %v5613_v57  ;;  %v10056_v50 = vor.u32 %v10932_v52, %v10055_v44  ;;  %v10927_v59 = vld [vmem:[#allocation18 + $0x84] sm:$0xf]  ;;  %v10040_v52 = vor.u32 %v10928_v49, %v10039_v0 }
 0x950   :  { %v5605_v42 = vsub.f32 1.5, %v5604_v63  ;;  %v10931_v63 = vld [vmem:[#allocation18 + $0xa4] sm:$0xf]  ;;  %6030 = vmatpush.bf16.msrb.mxu3 %v10068_v14 }
 0x951   :  { %v5615_v55 = vsub.f32 1.5, %v5614_v46  ;;  %v10057_v46 = vld [vmem:[#allocation18 + $0xa8] sm:$0xf0] }
 0x952   :  { %v5606_v62 = vmul.f32 %v13553_v58, %v5605_v42  ;;  %v10060_v61 = vor.u32 %v10931_v63, %v10057_v46  ;;  %v10930_v42 = vld [vmem:[#allocation18 + $0x94] sm:$0xf0]  ;;  %5973 = vmatpush.bf16.msra.mxu1 %v10056_v50  ;;  %6003 = vmatpush.bf16.msrb.mxu2 %v9988_v23 }
 0x953   :  { %v5616_v27 = vmul.f32 %v13555_v1, %v5615_v55  ;;  %v10929_v55 = vld [vmem:[#allocation18 + $0x94] sm:$0xf]  ;;  %v10048_v60 = vor.u32 %v10930_v42, %v10047_v34 }
 0x954   :  { %v5610_v41 = vsel %vm5609_vm7, %v13553_v58, %v5606_v62  ;;  %v10912_v58 = vld [vmem:[#allocation18 + $0x4] sm:$0xf0]  ;;  %6031 = vmatpush.bf16.msrb.mxu3 %v10060_v61  ;;  %v10052_v51 = vor.u32 %v10929_v55, %v10049_v6 }
 0x955   :  { %v5620_v57 = vsel %vm13567_vm2, %v13555_v1, %v5616_v27  ;;  %v10914_v1 = vld [vmem:[#allocation18 + $0x14] sm:$0xf0]  ;;  %v9976_v30 = vor.u32 %v10912_v58, %v9975_v12 }
 0x956   :  { %v5623_v56 = vrot.slane %v5620_v57, 7  ;;  %v9984_v47 = vor.u32 %v10914_v1, %v9983_v40  ;;  %5974 = vmatpush.bf16.msra.mxu1 %v10048_v60  ;;  %v9980_v57 = vor.u32 %v10911_v31, %v9977_v36 }
 0x958   :  { %v5624_v15 = vsel %vm4916_vm14, %v5610_v41, %v5623_v56  ;;  %5945 = vmatpush.bf16.msra.mxu0 %v9984_v47  ;;  %6032 = vmatpush.bf16.msrb.mxu3 %v10052_v51  ;;  %v10044_v56 = vor.u32 %v10927_v59, %v10041_v29 }
 0x959   :  { %v5626_v10 = vmul.f32 %v5624_v15, %v5069_v43  ;;  %6004 = vmatpush.bf16.msrb.mxu2 %v9980_v57 }
 0x95a   :  { %5975 = vmatpush.bf16.msra.mxu1 %v10040_v52 }
 0x95b   :  { %v5628_v62 = vperm.slane %v5626_v10, 0  ;;  %v5629_v27 = vperm.slane %v5626_v10, 1 }
 0x95c   :  { %5946 = vmatpush.bf16.msra.mxu0 %v9976_v30  ;;  %6033 = vmatpush.bf16.msrb.mxu3 %v10044_v56 }
 0x95d   :  { %v5633_v43 = vmul.f32 %v5629_v27, %v13541_v5  ;;  %v5640_v14 = vpack.c.bf16 %v5629_v27, %v5628_v62  ;;  %v5632_v44 = vmul.f32 %v5628_v62, %v13539_v39 }
 0x95f   :  { %v5636_v4 = vrot.slane %v5633_v43, 7  ;;  %v5642_v17 = vunpack.c.l.b16 %v5640_v14  ;;  %v5643_v63 = vunpack.c.h.b16 %v5640_v14 }
 0x961   :  { %v5637_v50 = vsel %vm4916_vm14, %v5632_v44, %v5636_v4  ;;  %v5644_v33 = vpack.c.b16 %v5642_v17, %v5642_v17  ;;  %v5645_v46 = vpack.c.b16 %v5643_v63, %v5643_v63 }
 0x962   :  { %v5639_v5 = vsub.f32 %v5071_v11, %v5637_v50 }
 0x963   :  { %v5647_v40 = vpack.i.b16 %v5644_v33, %v5644_v33  ;;  %v5651_v39 = vpack.i.b16 %v5645_v46, %v5645_v46 }
 0x964   :  { %v5681_v41 = vperm.slane %v5639_v5, 0  ;;  %v5682_v61 = vperm.slane %v5639_v5, 1 }
 0x965   :  { %v5649_v1 = vperm.slane %v5647_v40, 0  ;;  %v5653_v34 = vperm.slane %v5651_v39, 0 }
 0x966   :  { %v5685_v42 = vpack.c.bf16 %v5682_v61, %v5681_v41 }
 0x967   :  { %v13585_v15 = vunpack.c.l.bf16 %v5649_v1  ;;  %v13587_v3 = vunpack.c.l.bf16 %v5653_v34 }
 0x968   :  { %v5687_v8 = vunpack.c.l.b16 %v5685_v42  ;;  %v5688_v55 = vunpack.c.h.b16 %v5685_v42 }
 0x969   :  { %v5656_v10 = vmul.f32 %v13585_v15, %v13523_v13  ;;  %v5657_v47 = vmul.f32 %v13587_v3, %v13525_v21  ;;  %v5658_v6 = vmul.f32 %v13585_v15, %v13509_v38  ;;  %v5659_v12 = vmul.f32 %v13587_v3, %v13517_v53 }
 0x96a   :  { %v5689_v60 = vpack.c.b16 %v5687_v8, %v5687_v8  ;;  %v5690_v23 = vpack.c.b16 %v5688_v55, %v5688_v55  ;;  %v5660_v52 = vmul.f32 %v13585_v15, %v13503_v20  ;;  %v5661_v57 = vmul.f32 %v13587_v3, %v13505_v54 }
 0x96b   :  { %v5672_v58 = vpack.c.bf16 %v5657_v47, %v5656_v10  ;;  %v5673_v0 = vpack.c.bf16 %v5659_v12, %v5658_v6  ;;  %v5662_v11 = vmul.f32 %v13585_v15, %v13491_v45  ;;  %v5663_v4 = vmul.f32 %v13587_v3, %v13493_v22 }
 0x96c   :  { %v5692_v49 = vpack.i.b16 %v5689_v60, %v5689_v60  ;;  %v5696_v62 = vpack.i.b16 %v5690_v23, %v5690_v23  ;;  %v5674_v17 = vpack.c.bf16 %v5661_v57, %v5660_v52  ;;  %v5664_v22 = vmul.f32 %v13585_v15, %v13487_v7 }
 0x96d   :  { %v5699_v31 = vunpack.c.l.bf16 %v5672_v58  ;;  %v5701_v36 = vunpack.c.l.bf16 %v5673_v0  ;;  %v5700_v21 = vunpack.c.h.bf16 %v5672_v58  ;;  %v5702_v29 = vunpack.c.h.bf16 %v5673_v0 }
 0x96e   :  { %v5694_v27 = vperm.slane %v5692_v49, 0  ;;  %v5698_v51 = vperm.slane %v5696_v62, 0  ;;  %v5675_v63 = vpack.c.bf16 %v5663_v4, %v5662_v11  ;;  %v5703_v56 = vunpack.c.l.bf16 %v5674_v17 }
 0x96f   :  { %v5704_v33 = vunpack.c.h.bf16 %v5674_v17  ;;  %v5665_v41 = vmul.f32 %v13587_v3, %v13489_v32  ;;  %v5666_v61 = vmul.f32 %v13585_v15, %v13479_v19  ;;  %v5667_v1 = vmul.f32 %v13587_v3, %v13481_v28 }
 0x970   :  { %v13597_v13 = vunpack.c.l.bf16 %v5694_v27  ;;  %v13599_v59 = vunpack.c.l.bf16 %v5698_v51  ;;  %v5705_v50 = vunpack.c.l.bf16 %v5675_v63  ;;  %v5706_v46 = vunpack.c.h.bf16 %v5675_v63 }
 0x971   :  { %v5676_v34 = vpack.c.bf16 %v5665_v41, %v5664_v22  ;;  %v5677_v42 = vpack.c.bf16 %v5667_v1, %v5666_v61  ;;  %v5668_v28 = vmul.f32 %v13585_v15, %v13471_v26  ;;  %v5669_v23 = vmul.f32 %v13587_v3, %v13473_v25 }
 0x972   :  { %v5717_v38 = vadd.f32 %v13597_v13, %v5699_v31  ;;  %v5719_v53 = vadd.f32 %v13597_v13, %v5701_v36  ;;  %v5718_v43 = vadd.f32 %v13599_v59, %v5700_v21  ;;  %v5720_v14 = vadd.f32 %v13599_v59, %v5702_v29 }
 0x973   :  { %v5721_v20 = vadd.f32 %v13597_v13, %v5703_v56  ;;  %v5723_v5 = vadd.f32 %v13597_v13, %v5705_v50  ;;  %v5722_v54 = vadd.f32 %v13599_v59, %v5704_v33  ;;  %v5724_v40 = vadd.f32 %v13599_v59, %v5706_v46 }
 0x974   :  { %v5733_v30 = vpack.c.bf16 %v5719_v53, %v5717_v38  ;;  %v5734_v44 = vpack.c.bf16 %v5720_v14, %v5718_v43  ;;  %v5707_v8 = vunpack.c.l.bf16 %v5676_v34  ;;  %v5709_v55 = vunpack.c.l.bf16 %v5677_v42 }
 0x975   :  { %v5735_v45 = vpack.c.bf16 %v5723_v5, %v5721_v20  ;;  %v5736_v39 = vpack.c.bf16 %v5724_v40, %v5722_v54  ;;  %v5708_v10 = vunpack.c.h.bf16 %v5676_v34  ;;  %v5710_v47 = vunpack.c.h.bf16 %v5677_v42  ;;  %v5774_v5 = vld [vmem:[#allocation4 + $0x31] ss:$8 sm:$0x3] }
 0x976   :  { %5947 = vmatmul.bf16.vlgmr.msra.gmra.mxu0 %v5733_v30  ;;  %5976 = vmatmul.bf16.vlgmr.msra.gmra.mxu1 %v5734_v44  ;;  %v5725_v7 = vadd.f32 %v13597_v13, %v5707_v8  ;;  %v5727_v6 = vadd.f32 %v13597_v13, %v5709_v55  ;;  %v5670_v58 = vmul.f32 %v13585_v15, %v13467_v2  ;;  %v6064_v54 = vperm.slane %v5774_v5, 0 }
 0x977   :  { %6005 = vmatmul.bf16.vlgmr.msrb.gmra.mxu2 %v5733_v30  ;;  %6034 = vmatmul.bf16.vlgmr.msrb.gmra.mxu3 %v5734_v44  ;;  %v5726_v32 = vadd.f32 %v13599_v59, %v5708_v10  ;;  %v5728_v12 = vadd.f32 %v13599_v59, %v5710_v47  ;;  %v5671_v0 = vmul.f32 %v13587_v3, %v13469_v16  ;;  %v6065_v40 = vperm.slane %v5774_v5, 1 }
 0x978   :  { %v5737_v19 = vpack.c.bf16 %v5727_v6, %v5725_v7  ;;  %v5678_v49 = vpack.c.bf16 %v5669_v23, %v5668_v28 }
 0x979   :  { %v5738_v60 = vpack.c.bf16 %v5728_v12, %v5726_v32  ;;  %v5679_v62 = vpack.c.bf16 %v5671_v0, %v5670_v58  ;;  %v6068_v61 = vpack.c.bf16 %v6065_v40, %v6064_v54 }
 0x97a   :  { %v5711_v27 = vunpack.c.l.bf16 %v5678_v49  ;;  %v5712_v31 = vunpack.c.h.bf16 %v5678_v49 }
 0x97b   :  { %v5713_v51 = vunpack.c.l.bf16 %v5679_v62  ;;  %v5714_v36 = vunpack.c.h.bf16 %v5679_v62  ;;  %v6070_v1 = vunpack.c.l.b16 %v6068_v61  ;;  %v6071_v34 = vunpack.c.h.b16 %v6068_v61 }
 0x97c   :  { %v5729_v26 = vadd.f32 %v13597_v13, %v5711_v27  ;;  %v5730_v25 = vadd.f32 %v13599_v59, %v5712_v31 }
 0x97d   :  { %v5731_v21 = vadd.f32 %v13597_v13, %v5713_v51  ;;  %v5732_v29 = vadd.f32 %v13599_v59, %v5714_v36  ;;  %v6072_v55 = vpack.c.b16 %v6070_v1, %v6070_v1  ;;  %v6073_v10 = vpack.c.b16 %v6071_v34, %v6071_v34 }
 0x97f   :  { %v5739_v2 = vpack.c.bf16 %v5731_v21, %v5729_v26  ;;  %v5740_v15 = vpack.c.bf16 %v5732_v29, %v5730_v25  ;;  %v6075_v6 = vpack.i.b16 %v6072_v55, %v6072_v55  ;;  %v6079_v32 = vpack.i.b16 %v6073_v10, %v6073_v10 }
 0x981   :  { %v6077_v27 = vperm.slane %v6075_v6, 0  ;;  %v6081_v51 = vperm.slane %v6079_v32, 0 }
 0x986   :  { %5952 = vmatmul.bf16.gmra.mxu0 %v5735_v45  ;;  %5981 = vmatmul.bf16.gmra.mxu1 %v5736_v39 }
 0x987   :  { %6010 = vmatmul.bf16.gmra.mxu2 %v5735_v45  ;;  %6039 = vmatmul.bf16.gmra.mxu3 %v5736_v39 }
 0x996   :  { %5957 = vmatmul.bf16.gmra.mxu0 %v5737_v19  ;;  %5986 = vmatmul.bf16.gmra.mxu1 %v5738_v60 }
 0x997   :  { %6015 = vmatmul.bf16.gmra.mxu2 %v5737_v19  ;;  %6044 = vmatmul.bf16.gmra.mxu3 %v5738_v60 }
 0x9a6   :  { %5962 = vmatmul.bf16.gmra.mxu0 %v5739_v2  ;;  %5991 = vmatmul.bf16.gmra.mxu1 %v5740_v15 }
 0x9a7   :  { %6020 = vmatmul.bf16.gmra.mxu2 %v5739_v2  ;;  %6049 = vmatmul.bf16.gmra.mxu3 %v5740_v15 }
 0x9f3   :  { %v5948_v16 = vpop.f32.mrf.mxu0  ;;  %v5977_v3 = vpop.f32.mrf.mxu1 }
 0x9f4   :  { %v5978_v38 = vadd.f32 %v5977_v3, %v5948_v16 }
 0x9fa   :  { %v6006_v53 = vpop.f32.mrf.mxu2  ;;  %v6035_v43 = vpop.f32.mrf.mxu3 }
 0x9fb   :  { %v6036_v14 = vadd.f32 %v6035_v43, %v6006_v53  ;;  %v5950_v30 = vpop.f32.mrf.mxu0  ;;  %v5979_v44 = vpop.f32.mrf.mxu1  ;;  %v6098_v43 = vunpack.c.l.bf16 %v6077_v27 }
 0x9fd   :  { %v13641_v52 = vpack.c.bf16 %v6036_v14, %v5978_v38  ;;  %v6099_v14 = vunpack.c.l.bf16 %v6081_v51 }
 0xa02   :  { %v6008_v13 = vpop.f32.mrf.mxu2  ;;  %v6037_v57 = vpop.f32.mrf.mxu3 }
 0xa03   :  { %v5953_v11 = vpop.f32.mrf.mxu0  ;;  %v5982_v59 = vpop.f32.mrf.mxu1  ;;  %v6038_v15 = vadd.f32 %v6037_v57, %v6008_v13  ;;  %v6082_v13 = vunpack.c.l.bf16 %v13641_v52 }
 0xa04   :  { %v5983_v16 = vadd.f32 %v5982_v59, %v5953_v11 }
 0xa0a   :  { %v6011_v4 = vpop.f32.mrf.mxu2  ;;  %v6040_v17 = vpop.f32.mrf.mxu3 }
 0xa0b   :  { %v5955_v63 = vpop.f32.mrf.mxu0  ;;  %v5984_v56 = vpop.f32.mrf.mxu1  ;;  %v6041_v26 = vadd.f32 %v6040_v17, %v6011_v4 }
 0xa0c   :  { %v5985_v21 = vadd.f32 %v5984_v56, %v5955_v63 }
 0xa12   :  { %v6013_v50 = vpop.f32.mrf.mxu2  ;;  %v6042_v33 = vpop.f32.mrf.mxu3 }
 0xa13   :  { %v5958_v46 = vpop.f32.mrf.mxu0  ;;  %v5987_v20 = vpop.f32.mrf.mxu1  ;;  %v6043_v49 = vadd.f32 %v6042_v33, %v6013_v50  ;;  %v5980_v50 = vadd.f32 %v5979_v44, %v5950_v30  ;;  %v6057_v33 = vpack.c.bf16 %v6041_v26, %v5983_v16 }
 0xa14   :  { %v5988_v62 = vadd.f32 %v5987_v20, %v5958_v46 }
 0xa15   :  { %v6058_v3 = vpack.c.bf16 %v6043_v49, %v5985_v21  ;;  %v6056_v57 = vpack.c.bf16 %v6038_v15, %v5980_v50  ;;  %v6086_v30 = vunpack.c.l.bf16 %v6057_v33  ;;  %v6087_v44 = vunpack.c.h.bf16 %v6057_v33 }
 0xa16   :  { %v6100_v21 = vadd.f32 %v6098_v43, %v6082_v13 }
 0xa17   :  { %v6088_v11 = vunpack.c.l.bf16 %v6058_v3  ;;  %v6089_v59 = vunpack.c.h.bf16 %v6058_v3 }
 0xa19   :  { %v6106_v6 = vadd.f32 %v6098_v43, %v6088_v11  ;;  %v6107_v32 = vadd.f32 %v6099_v14, %v6089_v59 }
 0xa1a   :  { %v6016_v45 = vpop.f32.mrf.mxu2  ;;  %v6045_v39 = vpop.f32.mrf.mxu3 }
 0xa1b   :  { %v5960_v22 = vpop.f32.mrf.mxu0  ;;  %v5989_v41 = vpop.f32.mrf.mxu1  ;;  %v6046_v19 = vadd.f32 %v6045_v39, %v6016_v45  ;;  %v6083_v39 = vunpack.c.h.bf16 %v13641_v52  ;;  %v6104_v52 = vadd.f32 %v6098_v43, %v6086_v30  ;;  %v6147_v26 = vmax.f32 %v6107_v32, 0.0 }
 0xa1c   :  { %v5990_v23 = vadd.f32 %v5989_v41, %v5960_v22 }
 0xa1d   :  { %v6059_v25 = vpack.c.bf16 %v6046_v19, %v5988_v62  ;;  %v6144_v15 = vmax.f32 %v6104_v52, 0.0 }
 0xa1f   :  { %v6090_v46 = vunpack.c.l.bf16 %v6059_v25  ;;  %v6091_v20 = vunpack.c.h.bf16 %v6059_v25 }
 0xa21   :  { %v6108_v1 = vadd.f32 %v6098_v43, %v6090_v46  ;;  %v6109_v34 = vadd.f32 %v6099_v14, %v6091_v20 }
 0xa22   :  { %v6018_v42 = vpop.f32.mrf.mxu2  ;;  %v6047_v8 = vpop.f32.mrf.mxu3 }
 0xa23   :  { %v5963_v47 = vpop.f32.mrf.mxu0  ;;  %v5992_v7 = vpop.f32.mrf.mxu1  ;;  %v6048_v12 = vadd.f32 %v6047_v8, %v6018_v42 }
 0xa24   :  { %v5993_v58 = vadd.f32 %v5992_v7, %v5963_v47  ;;  %v6084_v47 = vunpack.c.l.bf16 %v6056_v57  ;;  %v6085_v7 = vunpack.c.h.bf16 %v6056_v57 }
 0xa25   :  { %v6060_v31 = vpack.c.bf16 %v6048_v12, %v5990_v23  ;;  %v6105_v23 = vadd.f32 %v6099_v14, %v6087_v44 }
 0xa26   :  { %v6102_v51 = vadd.f32 %v6098_v43, %v6084_v47 }
 0xa27   :  { %v6092_v5 = vunpack.c.l.bf16 %v6060_v31  ;;  %v6093_v54 = vunpack.c.h.bf16 %v6060_v31  ;;  %v6103_v31 = vadd.f32 %v6099_v14, %v6085_v7  ;;  %v6145_v16 = vmax.f32 %v6105_v23, 0.0 }
 0xa28   :  { %v6142_v50 = vmax.f32 %v6102_v51, 0.0 }
 0xa29   :  { %v6110_v22 = vadd.f32 %v6098_v43, %v6092_v5  ;;  %v6111_v41 = vadd.f32 %v6099_v14, %v6093_v54  ;;  %v6143_v33 = vmax.f32 %v6103_v31, 0.0 }
 0xa2a   :  { %v6021_v60 = vpop.f32.mrf.mxu2  ;;  %v6050_v28 = vpop.f32.mrf.mxu3 }
 0xa2b   :  { %v6051_v0 = vadd.f32 %v6050_v28, %v6021_v60  ;;  %v5965_v38 = vpop.f32.mrf.mxu0  ;;  %v5994_v53 = vpop.f32.mrf.mxu1  ;;  %v6150_v12 = vmax.f32 %v6110_v22, 0.0  ;;  %v6151_v19 = vmax.f32 %v6111_v41, 0.0  ;;  %v6157_v13 = vpack.c.bf16 %v6143_v33, %v6142_v50 }
 0xa2c   :  { %v5995_v63 = vadd.f32 %v5994_v53, %v5965_v38 }
 0xa2d   :  { %v6061_v36 = vpack.c.bf16 %v6051_v0, %v5993_v58  ;;  %v6148_v58 = vmax.f32 %v6108_v1, 0.0  ;;  %v6149_v0 = vmax.f32 %v6109_v34, 0.0  ;;  %v6161_v25 = vpack.c.bf16 %v6151_v19, %v6150_v12 }
 0xa2f   :  { %v6094_v29 = vunpack.c.l.bf16 %v6061_v36  ;;  %v6095_v2 = vunpack.c.h.bf16 %v6061_v36  ;;  %v6146_v36 = vmax.f32 %v6106_v6, 0.0  ;;  %v6160_v3 = vpack.c.bf16 %v6149_v0, %v6148_v58 }
 0xa30   :  { %v13657_v6 = vunpack.c.l.bf16 %v6161_v25  ;;  %v13659_v32 = vunpack.c.h.bf16 %v6161_v25 }
 0xa31   :  { %v6112_v4 = vadd.f32 %v6098_v43, %v6094_v29  ;;  %v6113_v17 = vadd.f32 %v6099_v14, %v6095_v2  ;;  %v6101_v2 = vadd.f32 %v6099_v14, %v6083_v39  ;;  %v6159_v46 = vpack.c.bf16 %v6147_v26, %v6146_v36 }
 0xa32   :  { %v6023_v40 = vpop.f32.mrf.mxu2  ;;  %v6052_v45 = vpop.f32.mrf.mxu3  ;;  %v13665_v52 = vunpack.c.l.bf16 %v6160_v3  ;;  %v13667_v23 = vunpack.c.h.bf16 %v6160_v3  ;;  %v6256_v31 = vmul.f32 %v13657_v6, %v13657_v6  ;;  %v6257_v36 = vmul.f32 %v13659_v32, %v13659_v32 }
 0xa33   :  { %v6053_v56 = vadd.f32 %v6052_v45, %v6023_v40  ;;  %v6152_v42 = vmax.f32 %v6112_v4, 0.0  ;;  %v6153_v8 = vmax.f32 %v6113_v17, 0.0  ;;  %v6182_v45 = vunpack.c.l.b16 %v6161_v25 }
 0xa34   :  { %v6183_v4 = vunpack.c.h.b16 %v6161_v25  ;;  %v6140_v17 = vmax.f32 %v6100_v21, 0.0  ;;  %v6178_v59 = vunpack.c.l.b16 %v6159_v46  ;;  %v6179_v39 = vunpack.c.h.b16 %v6159_v46 }
 0xa35   :  { %v6062_v61 = vpack.c.bf16 %v6053_v56, %v5995_v63  ;;  %v6162_v49 = vpack.c.bf16 %v6153_v8, %v6152_v42  ;;  %v6141_v63 = vmax.f32 %v6101_v2, 0.0  ;;  %v6181_v56 = vunpack.c.h.b16 %v6160_v3 }
 0xa36   :  { %v6254_v26 = vmul.f32 %v13665_v52, %v13665_v52  ;;  %v6255_v21 = vmul.f32 %v13667_v23, %v13667_v23 }
 0xa37   :  { %v6096_v55 = vunpack.c.l.bf16 %v6062_v61  ;;  %v6097_v10 = vunpack.c.h.bf16 %v6062_v61  ;;  %v6184_v38 = vunpack.c.l.b16 %v6162_v49  ;;  %v6185_v5 = vunpack.c.h.b16 %v6162_v49 }
 0xa38   :  { %v6193_v11 = vpack.c.b16 %v6183_v4, %v6181_v56  ;;  %v6156_v61 = vpack.c.bf16 %v6141_v63, %v6140_v17  ;;  %v13649_v1 = vunpack.c.l.bf16 %v6162_v49  ;;  %v13651_v34 = vunpack.c.h.bf16 %v6162_v49 }
 0xa39   :  { %v6114_v60 = vadd.f32 %v6098_v43, %v6096_v55  ;;  %v6115_v28 = vadd.f32 %v6099_v14, %v6097_v10  ;;  %v6158_v43 = vpack.c.bf16 %v6145_v16, %v6144_v15  ;;  %v6180_v14 = vunpack.c.l.b16 %v6160_v3 }
 0xa3a   :  { %v6174_v55 = vunpack.c.l.b16 %v6157_v13  ;;  %v6175_v10 = vunpack.c.h.b16 %v6157_v13  ;;  %v6172_v12 = vunpack.c.l.b16 %v6156_v61  ;;  %v6173_v19 = vunpack.c.h.b16 %v6156_v61 }
 0xa3b   :  { %v6154_v62 = vmax.f32 %v6114_v60, 0.0  ;;  %v6155_v27 = vmax.f32 %v6115_v28, 0.0  ;;  %v6192_v57 = vpack.c.b16 %v6182_v45, %v6180_v14  ;;  %v6176_v30 = vunpack.c.l.b16 %v6158_v43 }
 0xa3c   :  { %v6177_v44 = vunpack.c.h.b16 %v6158_v43  ;;  %v6258_v60 = vmul.f32 %v13649_v1, %v13649_v1  ;;  %v6259_v28 = vmul.f32 %v13651_v34, %v13651_v34  ;;  %v6188_v58 = vpack.c.b16 %v6174_v55, %v6172_v12  ;;  %v10163_v12 = vld [vmem:[#allocation19 + $0x70] sm:$0xf] }
 0xa3d   :  { %v6163_v29 = vpack.c.bf16 %v6155_v27, %v6154_v62  ;;  %v6190_v42 = vpack.c.b16 %v6178_v59, %v6176_v30  ;;  %v6189_v0 = vpack.c.b16 %v6175_v10, %v6173_v19  ;;  %v13669_v49 = vunpack.c.l.bf16 %v6159_v46  ;;  %v10958_v19 = vld [vmem:[#allocation19 + $0x74] sm:$0xf0] }
 0xa3e   :  { %v6191_v8 = vpack.c.b16 %v6179_v39, %v6177_v44  ;;  %v13671_v62 = vunpack.c.h.bf16 %v6159_v46  ;;  %v13681_v25 = vunpack.c.l.bf16 %v6158_v43  ;;  %v13687_v15 = vunpack.c.l.bf16 %v6157_v13 }
 0xa3f   :  { %v6186_v53 = vunpack.c.l.b16 %v6163_v29  ;;  %v6187_v54 = vunpack.c.h.b16 %v6163_v29  ;;  %v13645_v22 = vunpack.c.l.bf16 %v6163_v29  ;;  %v13647_v41 = vunpack.c.h.bf16 %v6163_v29 }
 0xa40   :  { %v13683_v29 = vunpack.c.h.bf16 %v6158_v43  ;;  %v6252_v2 = vmul.f32 %v13669_v49, %v13669_v49  ;;  %v6266_v16 = vpack.c.bf16 %v6256_v31, %v6254_v26  ;;  %v6267_v3 = vpack.c.bf16 %v6257_v36, %v6255_v21  ;;  %v10957_v26 = vld [vmem:[#allocation19 + $0x74] sm:$0xf]  ;;  %v10165_v21 = vld [vmem:[#allocation19 + $0x78] sm:$0xf0] }
 0xa41   :  { %v6194_v20 = vpack.c.b16 %v6186_v53, %v6184_v38  ;;  %v6195_v40 = vpack.c.b16 %v6187_v54, %v6185_v5  ;;  %v6260_v47 = vmul.f32 %v13645_v22, %v13645_v22  ;;  %v6261_v7 = vmul.f32 %v13647_v41, %v13647_v41 }
 0xa42   :  { %v6253_v38 = vmul.f32 %v13671_v62, %v13671_v62  ;;  %v13695_v53 = vunpack.c.h.bf16 %v6157_v13  ;;  %v6250_v5 = vmul.f32 %v13681_v25, %v13681_v25  ;;  %v6251_v54 = vmul.f32 %v13683_v29, %v13683_v29 }
 0xa43   :  { %6208 = vmatpush.bf16.msrb.mxu0 %v6194_v20  ;;  %6221 = vmatpush.bf16.msrb.mxu1 %v6195_v40  ;;  %v6268_v27 = vpack.c.bf16 %v6260_v47, %v6258_v60  ;;  %v6269_v51 = vpack.c.bf16 %v6261_v7, %v6259_v28  ;;  %v13701_v50 = vunpack.c.l.bf16 %v6156_v61  ;;  %v13703_v33 = vunpack.c.h.bf16 %v6156_v61  ;;  %v10227_v60 = vld [vmem:[#allocation19 + $0xf0] sm:$0xf] }
 0xa44   :  { %v6264_v46 = vpack.c.bf16 %v6252_v2, %v6250_v5  ;;  %v6265_v20 = vpack.c.bf16 %v6253_v38, %v6251_v54  ;;  %v6248_v40 = vmul.f32 %v13687_v15, %v13687_v15  ;;  %v6249_v45 = vmul.f32 %v13695_v53, %v13695_v53  ;;  %v10973_v2 = vld [vmem:[#allocation19 + $0xf4] sm:$0xf]  ;;  %v10155_v5 = vld [vmem:[#allocation19 + $0x60] sm:$0xf]  ;;  %v10956_v54 = vld [vmem:[#allocation19 + $0x64] sm:$0xf0] }
 0xa45   :  { %v6246_v4 = vmul.f32 %v13701_v50, %v13701_v50  ;;  %v6247_v17 = vmul.f32 %v13703_v33, %v13703_v33 }
 0xa47   :  { %6209 = vmatpush.bf16.msrb.mxu0 %v6192_v57  ;;  %6222 = vmatpush.bf16.msrb.mxu1 %v6193_v11  ;;  %v6262_v63 = vpack.c.bf16 %v6248_v40, %v6246_v4  ;;  %v6263_v43 = vpack.c.bf16 %v6249_v45, %v6247_v17  ;;  %v10972_v40 = vld [vmem:[#allocation19 + $0xe4] sm:$0xf0]  ;;  %v10955_v45 = vld [vmem:[#allocation19 + $0x64] sm:$0xf]  ;;  %v10157_v4 = vld [vmem:[#allocation19 + $0x68] sm:$0xf0] }
 0xa4b   :  { %6210 = vmatpush.bf16.msrb.mxu0 %v6190_v42  ;;  %6223 = vmatpush.bf16.msrb.mxu1 %v6191_v8 }
 0xa4f   :  { %6211 = vmatpush.bf16.msrb.mxu0 %v6188_v58  ;;  %6224 = vmatpush.bf16.msrb.mxu1 %v6189_v0  ;;  %v10164_v0 = vor.u32 %v10958_v19, %v10163_v12  ;;  %v10969_v12 = vld [vmem:[#allocation19 + $0xd4] sm:$0xf]  ;;  %v10213_v19 = vld [vmem:[#allocation19 + $0xd8] sm:$0xf0] }
 0xa51   :  { %6646 = vmatpush.bf16.msra.mxu2 %v10164_v0  ;;  %v10216_v0 = vor.u32 %v10969_v12, %v10213_v19  ;;  %v10948_v12 = vld [vmem:[#allocation19 + $0x24] sm:$0xf0] }
 0xa52   :  { %10101 = vmatmul.msk.bf16.vlgmr.msrb.gmra.mxu0 %vm4785_vm6, %v11544_v48  ;;  %10102 = vmatmul.msk.bf16.vlgmr.msrb.gmra.mxu1 %vm4785_vm6, %v11544_v48  ;;  %v5776_v19 = vld [vmem:[#allocation4 + $0x32] ss:$8 sm:$0x3] }
 0xa53   :  { %6274 = vmatpush.bf16.msra.mxu0 %v6268_v27  ;;  %6287 = vmatpush.bf16.msra.mxu1 %v6269_v51  ;;  %v10974_v27 = vld [vmem:[#allocation19 + $0xf4] sm:$0xf0] }
 0xa54   :  { %v10228_v36 = vor.u32 %v10974_v27, %v10227_v60 }
 0xa56   :  { %6675 = vmatpush.bf16.msra.mxu3 %v10228_v36 }
 0xa57   :  { %6275 = vmatpush.bf16.msra.mxu0 %v6266_v16  ;;  %6288 = vmatpush.bf16.msra.mxu1 %v6267_v3  ;;  %v10168_v16 = vor.u32 %v10957_v26, %v10165_v21  ;;  %v10229_v3 = vld [vmem:[#allocation19 + $0xf8] sm:$0xf0]  ;;  %v10203_v21 = vld [vmem:[#allocation19 + $0xc0] sm:$0xf] }
 0xa58   :  { %v10232_v38 = vor.u32 %v10973_v2, %v10229_v3  ;;  %v10968_v2 = vld [vmem:[#allocation19 + $0xc4] sm:$0xf0] }
 0xa5b   :  { %6276 = vmatpush.bf16.msra.mxu0 %v6264_v46  ;;  %6289 = vmatpush.bf16.msra.mxu1 %v6265_v20  ;;  %v10219_v46 = vld [vmem:[#allocation19 + $0xe0] sm:$0xf]  ;;  %v10156_v20 = vor.u32 %v10956_v54, %v10155_v5  ;;  %v10141_v5 = vld [vmem:[#allocation19 + $0x48] sm:$0xf0]  ;;  %v10967_v54 = vld [vmem:[#allocation19 + $0xc4] sm:$0xf] }
 0xa5c   :  { %v10220_v17 = vor.u32 %v10972_v40, %v10219_v46  ;;  %v10205_v40 = vld [vmem:[#allocation19 + $0xc8] sm:$0xf0] }
 0xa5d   :  { %6647 = vmatpush.bf16.msra.mxu2 %v10156_v20 }
 0xa5e   :  { %6676 = vmatpush.bf16.msra.mxu3 %v10220_v17  ;;  %v10131_v17 = vld [vmem:[#allocation19 + $0x30] sm:$0xf] }
 0xa5f   :  { %6277 = vmatpush.bf16.msra.mxu0 %v6262_v63  ;;  %6290 = vmatpush.bf16.msra.mxu1 %v6263_v43  ;;  %v10160_v63 = vor.u32 %v10955_v45, %v10157_v4  ;;  %v10971_v43 = vld [vmem:[#allocation19 + $0xe4] sm:$0xf]  ;;  %v10208_v4 = vor.u32 %v10967_v54, %v10205_v40  ;;  %v10115_v54 = vld [vmem:[#allocation19 + $0x10] sm:$0xf] }
 0xa60   :  { %v10179_v40 = vld [vmem:[#allocation19 + $0x90] sm:$0xf] }
 0xa62   :  { %10103 = vmatmul.msk.bf16.vlgmr.msra.gmra.mxu0 %vm4785_vm6, %v11544_v48  ;;  %10104 = vmatmul.msk.bf16.vlgmr.msra.gmra.mxu1 %vm4785_vm6, %v11544_v48 }
 0xa63   :  { %6704 = vmatpush.bf16.msrb.mxu0 %v10168_v16  ;;  %6733 = vmatpush.bf16.msrb.mxu1 %v10232_v38  ;;  %v10951_v16 = vld [vmem:[#allocation19 + $0x44] sm:$0xf]  ;;  %v10204_v38 = vor.u32 %v10968_v2, %v10203_v21  ;;  %v10125_v21 = vld [vmem:[#allocation19 + $0x28] sm:$0xf0] }
 0xa64   :  { %v10144_v20 = vor.u32 %v10951_v16, %v10141_v5  ;;  %v10963_v2 = vld [vmem:[#allocation19 + $0xa4] sm:$0xf]  ;;  %v10189_v16 = vld [vmem:[#allocation19 + $0xa8] sm:$0xf0] }
 0xa65   :  { %v10192_v5 = vor.u32 %v10963_v2, %v10189_v16 }
 0xa67   :  { %6705 = vmatpush.bf16.msrb.mxu0 %v10160_v63  ;;  %v10950_v63 = vld [vmem:[#allocation19 + $0x34] sm:$0xf0] }
 0xacf   :  { %v6213_v14 = vpop.f32.mrf.mxu0  ;;  %v6226_v56 = vpop.f32.mrf.mxu1 }
 0xad0   :  { %v13717_v11 = vmul.f32 0.015625, %v6213_v14  ;;  %v13719_v59 = vmul.f32 0.015625, %v6226_v56  ;;  %v10221_v14 = vld [vmem:[#allocation19 + $0xe8] sm:$0xf0] }
 0xad1   :  { %v10224_v56 = vor.u32 %v10971_v43, %v10221_v14  ;;  %v10181_v14 = vld [vmem:[#allocation19 + $0x98] sm:$0xf0] }
 0xad2   :  { %v6300_v30 = vmul.f32 %v13717_v11, %v13717_v11  ;;  %v6301_v44 = vmul.f32 %v13719_v59, %v13719_v59 }
 0xad3   :  { %6734 = vmatpush.bf16.msrb.mxu1 %v10224_v56  ;;  %v10132_v56 = vor.u32 %v10950_v63, %v10131_v17  ;;  %v10117_v63 = vld [vmem:[#allocation19 + $0x18] sm:$0xf0] }
 0xad7   :  { %v6215_v13 = vpop.f32.mrf.mxu0  ;;  %v6228_v57 = vpop.f32.mrf.mxu1  ;;  %6735 = vmatpush.bf16.msrb.mxu1 %v10216_v0 }
 0xad8   :  { %v10147_v13 = vld [vmem:[#allocation19 + $0x50] sm:$0xf]  ;;  %v10954_v57 = vld [vmem:[#allocation19 + $0x54] sm:$0xf0] }
 0xadb   :  { %6736 = vmatpush.bf16.msrb.mxu1 %v10208_v4 }
 0xadf   :  { %v6279_v39 = vpop.f32.mrf.mxu0  ;;  %v6292_v61 = vpop.f32.mrf.mxu1 }
 0xae0   :  { %v6298_v42 = vmul.f32 0.015625, %v6279_v39  ;;  %v6299_v8 = vmul.f32 0.015625, %v6292_v61  ;;  %v10211_v39 = vld [vmem:[#allocation19 + $0xd0] sm:$0xf] }
 0xae2   :  { %v6302_v55 = vsub.f32 %v6298_v42, %v6300_v30  ;;  %v6303_v10 = vsub.f32 %v6299_v8, %v6301_v44  ;;  %v10148_v30 = vor.u32 %v10954_v57, %v10147_v13  ;;  %v10970_v44 = vld [vmem:[#allocation19 + $0xd4] sm:$0xf0]  ;;  %v10953_v42 = vld [vmem:[#allocation19 + $0x54] sm:$0xf]  ;;  %v10149_v8 = vld [vmem:[#allocation19 + $0x58] sm:$0xf0] }
 0xae3   :  { %v10195_v13 = vld [vmem:[#allocation19 + $0xb0] sm:$0xf]  ;;  %v10966_v57 = vld [vmem:[#allocation19 + $0xb4] sm:$0xf0] }
 0xae4   :  { %v6304_v47 = vmax.f32 %v6302_v55, 0.0  ;;  %v6305_v7 = vmax.f32 %v6303_v10, 0.0  ;;  %6648 = vmatpush.bf16.msra.mxu2 %v10148_v30  ;;  %v10949_v30 = vld [vmem:[#allocation19 + $0x34] sm:$0xf] }
 0xae6   :  { %v13725_v28 = vadd.f32 1e-05, %v6304_v47  ;;  %v13727_v58 = vadd.f32 1e-05, %v6305_v7  ;;  %v10212_v47 = vor.u32 %v10970_v44, %v10211_v39  ;;  %v10152_v7 = vor.u32 %v10953_v42, %v10149_v8  ;;  %v10133_v44 = vld [vmem:[#allocation19 + $0x38] sm:$0xf0] }
 0xae7   :  { %v6281_v51 = vpop.f32.mrf.mxu0  ;;  %v6294_v31 = vpop.f32.mrf.mxu1  ;;  %v10196_v39 = vor.u32 %v10966_v57, %v10195_v13  ;;  %v10107_v57 = vld [vmem:[#allocation19] sm:$0xf] }
 0xae8   :  { %11090 = vrsqrt.f32 %v13725_v28  ;;  %6677 = vmatpush.bf16.msra.mxu3 %v10212_v47  ;;  %v10139_v51 = vld [vmem:[#allocation19 + $0x40] sm:$0xf]  ;;  %v10952_v31 = vld [vmem:[#allocation19 + $0x44] sm:$0xf0]  ;;  %6706 = vmatpush.bf16.msrb.mxu0 %v10152_v7  ;;  %vm6324_vm9 = vweird.f32 %v13727_v58  ;;  %v10197_v47 = vld [vmem:[#allocation19 + $0xb8] sm:$0xf0]  ;;  %vm6314_vm12 = vweird.f32 %v13725_v28 }
 0xae9   :  { %11092 = vrsqrt.f32 %v13727_v58  ;;  %v10140_v26 = vor.u32 %v10952_v31, %v10139_v51  ;;  %v10123_v7 = vld [vmem:[#allocation19 + $0x20] sm:$0xf]  ;;  %v10964_v51 = vld [vmem:[#allocation19 + $0xa4] sm:$0xf0]  ;;  %v10947_v31 = vld [vmem:[#allocation19 + $0x24] sm:$0xf] }
 0xaea   :  { %v10124_v0 = vor.u32 %v10948_v12, %v10123_v7  ;;  %v10959_v7 = vld [vmem:[#allocation19 + $0x84] sm:$0xf]  ;;  %v10173_v12 = vld [vmem:[#allocation19 + $0x88] sm:$0xf0] }
 0xaeb   :  { %6649 = vmatpush.bf16.msra.mxu2 %v10140_v26 }
 0xaec   :  { %6678 = vmatpush.bf16.msra.mxu3 %v10204_v38  ;;  %6707 = vmatpush.bf16.msrb.mxu0 %v10144_v20  ;;  %v10128_v38 = vor.u32 %v10947_v31, %v10125_v21  ;;  %v5778_v31 = vld [vmem:[#allocation4 + $0x33] ss:$8 sm:$0x3] }
 0xaee   :  { %v13731_v61 = vpop.eup %11090 }
 0xaef   :  { %v13733_v55 = vpop.eup %11092  ;;  %v6309_v10 = vmul.f32 %v13731_v61, %v13725_v28  ;;  %vm6315_vm11 = vweird.f32 %v13731_v61  ;;  %6650 = vmatpush.bf16.msra.mxu2 %v10132_v56 }
 0xaf0   :  { %v6319_v60 = vmul.f32 %v13733_v55, %v13727_v58  ;;  %vm6325_vm8 = vweird.f32 %v13733_v55  ;;  %v10965_v58 = vld [vmem:[#allocation19 + $0xb4] sm:$0xf]  ;;  %6679 = vmatpush.bf16.msra.mxu3 %v10196_v39  ;;  %vm6316_vm13 = vmor %vm6314_vm12, %vm6315_vm11  ;;  %v10944_v39 = vld [vmem:[#allocation19 + $0x4] sm:$0xf0] }
 0xaf1   :  { %v6310_v27 = vmul.f32 %v13731_v61, %v6309_v10  ;;  %vm13745_vm10 = vmor %vm6324_vm9, %vm6325_vm8  ;;  %v10136_v10 = vor.u32 %v10949_v30, %v10133_v44  ;;  %v10171_v30 = vld [vmem:[#allocation19 + $0x80] sm:$0xf]  ;;  %v10960_v44 = vld [vmem:[#allocation19 + $0x84] sm:$0xf0] }
 0xaf2   :  { %v6320_v36 = vmul.f32 %v13733_v55, %v6319_v60  ;;  %v10200_v60 = vor.u32 %v10965_v58, %v10197_v47  ;;  %v10943_v58 = vld [vmem:[#allocation19 + $0x4] sm:$0xf]  ;;  %v10108_v47 = vor.u32 %v10944_v39, %v10107_v57 }
 0xaf3   :  { %v6311_v3 = vmul.f32 0.5, %v6310_v27  ;;  %v10187_v27 = vld [vmem:[#allocation19 + $0xa0] sm:$0xf]  ;;  %6708 = vmatpush.bf16.msrb.mxu0 %v10136_v10  ;;  %6651 = vmatpush.bf16.msra.mxu2 %v10124_v0 }
 0xaf4   :  { %v6321_v46 = vmul.f32 0.5, %v6320_v36  ;;  %v10188_v26 = vor.u32 %v10964_v51, %v10187_v27  ;;  %6737 = vmatpush.bf16.msrb.mxu1 %v10200_v60  ;;  %v10172_v60 = vor.u32 %v10960_v44, %v10171_v30  ;;  %v10176_v51 = vor.u32 %v10959_v7, %v10173_v12 }
 0xaf5   :  { %v6312_v45 = vsub.f32 1.5, %v6311_v3 }
 0xaf6   :  { %v6322_v43 = vsub.f32 1.5, %v6321_v46  ;;  %v10946_v46 = vld [vmem:[#allocation19 + $0x14] sm:$0xf0]  ;;  %6680 = vmatpush.bf16.msra.mxu3 %v10188_v26 }
 0xaf7   :  { %v6313_v42 = vmul.f32 %v13731_v61, %v6312_v45  ;;  %v10116_v20 = vor.u32 %v10946_v46, %v10115_v54  ;;  %v10945_v45 = vld [vmem:[#allocation19 + $0x14] sm:$0xf]  ;;  %6709 = vmatpush.bf16.msrb.mxu0 %v10128_v38 }
 0xaf8   :  { %v6323_v8 = vmul.f32 %v13733_v55, %v6322_v43  ;;  %v10961_v43 = vld [vmem:[#allocation19 + $0x94] sm:$0xf]  ;;  %v10120_v13 = vor.u32 %v10945_v45, %v10117_v63  ;;  %6738 = vmatpush.bf16.msrb.mxu1 %v10192_v5 }
 0xaf9   :  { %v6317_v28 = vsel %vm6316_vm13, %v13731_v61, %v6313_v42  ;;  %v10184_v61 = vor.u32 %v10961_v43, %v10181_v14  ;;  %v10109_v42 = vld [vmem:[#allocation19 + $0x8] sm:$0xf0]  ;;  %6652 = vmatpush.bf16.msra.mxu2 %v10116_v20 }
 0xafa   :  { %v6327_v36 = vsel %vm13745_vm10, %v13733_v55, %v6323_v8  ;;  %v10962_v55 = vld [vmem:[#allocation19 + $0x94] sm:$0xf0]  ;;  %v10112_v27 = vor.u32 %v10943_v58, %v10109_v42 }
 0xafb   :  { %v6330_v3 = vrot.slane %v6327_v36, 7  ;;  %v10180_v17 = vor.u32 %v10962_v55, %v10179_v40  ;;  %6710 = vmatpush.bf16.msrb.mxu0 %v10120_v13 }
 0xafc   :  { %6739 = vmatpush.bf16.msrb.mxu1 %v10184_v61 }
 0xafd   :  { %v6331_v4 = vsel %vm4916_vm14, %v6317_v28, %v6330_v3  ;;  %6681 = vmatpush.bf16.msra.mxu3 %v10180_v17  ;;  %6653 = vmatpush.bf16.msra.mxu2 %v10108_v47 }
 0xafe   :  { %v6333_v56 = vmul.f32 %v6331_v4, %v5776_v19 }
 0xaff   :  { %6711 = vmatpush.bf16.msrb.mxu0 %v10112_v27 }
 0xb00   :  { %v6335_v8 = vperm.slane %v6333_v56, 0  ;;  %v6336_v10 = vperm.slane %v6333_v56, 1  ;;  %6740 = vmatpush.bf16.msrb.mxu1 %v10176_v51 }
 0xb01   :  { %6682 = vmatpush.bf16.msra.mxu3 %v10172_v60 }
 0xb02   :  { %v6340_v19 = vmul.f32 %v6336_v10, %v13719_v59  ;;  %v6347_v0 = vpack.c.bf16 %v6336_v10, %v6335_v8  ;;  %v6339_v36 = vmul.f32 %v6335_v8, %v13717_v11 }
 0xb04   :  { %v6343_v26 = vrot.slane %v6340_v19, 7  ;;  %v6349_v21 = vunpack.c.l.b16 %v6347_v0  ;;  %v6350_v2 = vunpack.c.h.b16 %v6347_v0 }
 0xb06   :  { %v6344_v16 = vsel %vm4916_vm14, %v6339_v36, %v6343_v26  ;;  %v6351_v3 = vpack.c.b16 %v6349_v21, %v6349_v21  ;;  %v6352_v38 = vpack.c.b16 %v6350_v2, %v6350_v2 }
 0xb07   :  { %v6346_v5 = vsub.f32 %v5778_v31, %v6344_v16 }
 0xb08   :  { %v6354_v59 = vpack.i.b16 %v6351_v3, %v6351_v3  ;;  %v6358_v54 = vpack.i.b16 %v6352_v38, %v6352_v38 }
 0xb09   :  { %v6388_v46 = vperm.slane %v6346_v5, 0  ;;  %v6389_v28 = vperm.slane %v6346_v5, 1 }
 0xb0a   :  { %v6356_v20 = vperm.slane %v6354_v59, 0  ;;  %v6360_v40 = vperm.slane %v6358_v54, 0 }
 0xb0b   :  { %v6392_v55 = vpack.c.bf16 %v6389_v28, %v6388_v46 }
 0xb0c   :  { %v13763_v11 = vunpack.c.l.bf16 %v6356_v20  ;;  %v13765_v45 = vunpack.c.l.bf16 %v6360_v40 }
 0xb0d   :  { %v6394_v4 = vunpack.c.l.b16 %v6392_v55  ;;  %v6395_v17 = vunpack.c.h.b16 %v6392_v55 }
 0xb0e   :  { %v6363_v63 = vmul.f32 %v13763_v11, %v13701_v50  ;;  %v6364_v43 = vmul.f32 %v13765_v45, %v13703_v33  ;;  %v6365_v14 = vmul.f32 %v13763_v11, %v13687_v15  ;;  %v6366_v56 = vmul.f32 %v13765_v45, %v13695_v53 }
 0xb0f   :  { %v6396_v13 = vpack.c.b16 %v6394_v4, %v6394_v4  ;;  %v6397_v57 = vpack.c.b16 %v6395_v17, %v6395_v17  ;;  %v6367_v27 = vmul.f32 %v13763_v11, %v13681_v25  ;;  %v6368_v51 = vmul.f32 %v13765_v45, %v13683_v29 }
 0xb10   :  { %v6379_v39 = vpack.c.bf16 %v6364_v43, %v6363_v63  ;;  %v6380_v30 = vpack.c.bf16 %v6366_v56, %v6365_v14  ;;  %v6369_v31 = vmul.f32 %v13763_v11, %v13669_v49  ;;  %v6370_v36 = vmul.f32 %v13765_v45, %v13671_v62 }
 0xb11   :  { %v6399_v61 = vpack.i.b16 %v6396_v13, %v6396_v13  ;;  %v6403_v44 = vpack.i.b16 %v6397_v57, %v6397_v57  ;;  %v6381_v26 = vpack.c.bf16 %v6368_v51, %v6367_v27  ;;  %v6371_v62 = vmul.f32 %v13763_v11, %v13665_v52 }
 0xb12   :  { %v6406_v8 = vunpack.c.l.bf16 %v6379_v39  ;;  %v6408_v10 = vunpack.c.l.bf16 %v6380_v30  ;;  %v6407_v33 = vunpack.c.h.bf16 %v6379_v39  ;;  %v6409_v7 = vunpack.c.h.bf16 %v6380_v30 }
 0xb13   :  { %v6401_v58 = vperm.slane %v6399_v61, 0  ;;  %v6405_v42 = vperm.slane %v6403_v44, 0  ;;  %v6382_v21 = vpack.c.bf16 %v6370_v36, %v6369_v31  ;;  %v6410_v2 = vunpack.c.l.bf16 %v6381_v26 }
 0xb14   :  { %v6411_v3 = vunpack.c.h.bf16 %v6381_v26  ;;  %v6372_v46 = vmul.f32 %v13765_v45, %v13667_v23  ;;  %v6373_v28 = vmul.f32 %v13763_v11, %v13657_v6  ;;  %v6374_v20 = vmul.f32 %v13765_v45, %v13659_v32 }
 0xb15   :  { %v13775_v50 = vunpack.c.l.bf16 %v6401_v58  ;;  %v13777_v47 = vunpack.c.l.bf16 %v6405_v42  ;;  %v6412_v16 = vunpack.c.l.bf16 %v6382_v21  ;;  %v6413_v38 = vunpack.c.h.bf16 %v6382_v21 }
 0xb16   :  { %v6383_v40 = vpack.c.bf16 %v6372_v46, %v6371_v62  ;;  %v6384_v55 = vpack.c.bf16 %v6374_v20, %v6373_v28  ;;  %v6375_v32 = vmul.f32 %v13763_v11, %v13649_v1  ;;  %v6376_v57 = vmul.f32 %v13765_v45, %v13651_v34 }
 0xb17   :  { %v6424_v15 = vadd.f32 %v13775_v50, %v6406_v8  ;;  %v6426_v53 = vadd.f32 %v13775_v50, %v6408_v10  ;;  %v6425_v12 = vadd.f32 %v13777_v47, %v6407_v33  ;;  %v6427_v60 = vadd.f32 %v13777_v47, %v6409_v7 }
 0xb18   :  { %v6428_v25 = vadd.f32 %v13775_v50, %v6410_v2  ;;  %v6430_v5 = vadd.f32 %v13775_v50, %v6412_v16  ;;  %v6429_v29 = vadd.f32 %v13777_v47, %v6411_v3  ;;  %v6431_v59 = vadd.f32 %v13777_v47, %v6413_v38 }
 0xb19   :  { %v6440_v19 = vpack.c.bf16 %v6426_v53, %v6424_v15  ;;  %v6441_v0 = vpack.c.bf16 %v6427_v60, %v6425_v12  ;;  %v6414_v4 = vunpack.c.l.bf16 %v6383_v40  ;;  %v6416_v17 = vunpack.c.l.bf16 %v6384_v55 }
 0xb1a   :  { %v6442_v49 = vpack.c.bf16 %v6430_v5, %v6428_v25  ;;  %v6443_v54 = vpack.c.bf16 %v6431_v59, %v6429_v29  ;;  %v6415_v63 = vunpack.c.h.bf16 %v6383_v40  ;;  %v6417_v43 = vunpack.c.h.bf16 %v6384_v55  ;;  %v6481_v5 = vld [vmem:[#allocation4 + $0x34] ss:$8 sm:$0x3] }
 0xb1b   :  { %6654 = vmatmul.bf16.vlgmr.msra.gmra.mxu2 %v6440_v19  ;;  %6683 = vmatmul.bf16.vlgmr.msra.gmra.mxu3 %v6441_v0  ;;  %v6432_v52 = vadd.f32 %v13775_v50, %v6414_v4  ;;  %v6434_v14 = vadd.f32 %v13775_v50, %v6416_v17  ;;  %v6377_v39 = vmul.f32 %v13763_v11, %v13645_v22  ;;  %v6771_v29 = vperm.slane %v6481_v5, 0 }
 0xb1c   :  { %6712 = vmatmul.bf16.vlgmr.msrb.gmra.mxu0 %v6440_v19  ;;  %6741 = vmatmul.bf16.vlgmr.msrb.gmra.mxu1 %v6441_v0  ;;  %v6433_v23 = vadd.f32 %v13777_v47, %v6415_v63  ;;  %v6435_v56 = vadd.f32 %v13777_v47, %v6417_v43  ;;  %v6378_v30 = vmul.f32 %v13765_v45, %v13647_v41  ;;  %v6772_v59 = vperm.slane %v6481_v5, 1 }
 0xb1d   :  { %v6444_v6 = vpack.c.bf16 %v6434_v14, %v6432_v52  ;;  %v6385_v61 = vpack.c.bf16 %v6376_v57, %v6375_v32 }
 0xb1e   :  { %v6445_v13 = vpack.c.bf16 %v6435_v56, %v6433_v23  ;;  %v6386_v44 = vpack.c.bf16 %v6378_v30, %v6377_v39  ;;  %v6775_v62 = vpack.c.bf16 %v6772_v59, %v6771_v29 }
 0xb1f   :  { %v6418_v58 = vunpack.c.l.bf16 %v6385_v61  ;;  %v6419_v8 = vunpack.c.h.bf16 %v6385_v61 }
 0xb20   :  { %v6420_v42 = vunpack.c.l.bf16 %v6386_v44  ;;  %v6421_v10 = vunpack.c.h.bf16 %v6386_v44  ;;  %v6777_v20 = vunpack.c.l.b16 %v6775_v62  ;;  %v6778_v40 = vunpack.c.h.b16 %v6775_v62 }
 0xb21   :  { %v6436_v1 = vadd.f32 %v13775_v50, %v6418_v58  ;;  %v6437_v34 = vadd.f32 %v13777_v47, %v6419_v8 }
 0xb22   :  { %v6438_v33 = vadd.f32 %v13775_v50, %v6420_v42  ;;  %v6439_v7 = vadd.f32 %v13777_v47, %v6421_v10  ;;  %v6779_v17 = vpack.c.b16 %v6777_v20, %v6777_v20  ;;  %v6780_v63 = vpack.c.b16 %v6778_v40, %v6778_v40 }
 0xb24   :  { %v6446_v22 = vpack.c.bf16 %v6438_v33, %v6436_v1  ;;  %v6447_v11 = vpack.c.bf16 %v6439_v7, %v6437_v34  ;;  %v6782_v14 = vpack.i.b16 %v6779_v17, %v6779_v17  ;;  %v6786_v23 = vpack.i.b16 %v6780_v63, %v6780_v63 }
 0xb26   :  { %v6784_v58 = vperm.slane %v6782_v14, 0  ;;  %v6788_v42 = vperm.slane %v6786_v23, 0 }
 0xb2b   :  { %6659 = vmatmul.bf16.gmra.mxu2 %v6442_v49  ;;  %6688 = vmatmul.bf16.gmra.mxu3 %v6443_v54 }
 0xb2c   :  { %6717 = vmatmul.bf16.gmra.mxu0 %v6442_v49  ;;  %6746 = vmatmul.bf16.gmra.mxu1 %v6443_v54 }
 0xb3b   :  { %6664 = vmatmul.bf16.gmra.mxu2 %v6444_v6  ;;  %6693 = vmatmul.bf16.gmra.mxu3 %v6445_v13 }
 0xb3c   :  { %6722 = vmatmul.bf16.gmra.mxu0 %v6444_v6  ;;  %6751 = vmatmul.bf16.gmra.mxu1 %v6445_v13 }
 0xb4b   :  { %6669 = vmatmul.bf16.gmra.mxu2 %v6446_v22  ;;  %6698 = vmatmul.bf16.gmra.mxu3 %v6447_v11 }
 0xb4c   :  { %6727 = vmatmul.bf16.gmra.mxu0 %v6446_v22  ;;  %6756 = vmatmul.bf16.gmra.mxu1 %v6447_v11 }
 0xb99   :  { %v6713_v41 = vpop.f32.mrf.mxu0  ;;  %v6742_v45 = vpop.f32.mrf.mxu1 }
 0xb9a   :  { %v6743_v15 = vadd.f32 %v6742_v45, %v6713_v41 }
 0xb9e   :  { %v6655_v53 = vpop.f32.mrf.mxu2  ;;  %v6684_v12 = vpop.f32.mrf.mxu3 }
 0xb9f   :  { %v6685_v60 = vadd.f32 %v6684_v12, %v6655_v53  ;;  %v6805_v12 = vunpack.c.l.bf16 %v6784_v58 }
 0xba1   :  { %v13819_v19 = vpack.c.bf16 %v6743_v15, %v6685_v60  ;;  %v6715_v0 = vpop.f32.mrf.mxu0  ;;  %v6744_v50 = vpop.f32.mrf.mxu1  ;;  %v6806_v60 = vunpack.c.l.bf16 %v6788_v42 }
 0xba6   :  { %v6657_v27 = vpop.f32.mrf.mxu2  ;;  %v6686_v51 = vpop.f32.mrf.mxu3 }
 0xba7   :  { %v6687_v11 = vadd.f32 %v6686_v51, %v6657_v27  ;;  %v6789_v27 = vunpack.c.l.bf16 %v13819_v19 }
 0xba9   :  { %v6718_v31 = vpop.f32.mrf.mxu0  ;;  %v6747_v47 = vpop.f32.mrf.mxu1 }
 0xbaa   :  { %v6748_v41 = vadd.f32 %v6747_v47, %v6718_v31 }
 0xbae   :  { %v6660_v36 = vpop.f32.mrf.mxu2  ;;  %v6689_v26 = vpop.f32.mrf.mxu3 }
 0xbaf   :  { %v6690_v1 = vadd.f32 %v6689_v26, %v6660_v36 }
 0xbb1   :  { %v6720_v21 = vpop.f32.mrf.mxu0  ;;  %v6749_v2 = vpop.f32.mrf.mxu1 }
 0xbb2   :  { %v6750_v33 = vadd.f32 %v6749_v2, %v6720_v21 }
 0xbb6   :  { %v6662_v16 = vpop.f32.mrf.mxu2  ;;  %v6691_v3 = vpop.f32.mrf.mxu3 }
 0xbb7   :  { %v6692_v61 = vadd.f32 %v6691_v3, %v6662_v16  ;;  %v6745_v16 = vadd.f32 %v6744_v50, %v6715_v0  ;;  %v6764_v3 = vpack.c.bf16 %v6748_v41, %v6690_v1 }
 0xbb9   :  { %v6723_v38 = vpop.f32.mrf.mxu0  ;;  %v6752_v25 = vpop.f32.mrf.mxu1  ;;  %v6765_v45 = vpack.c.bf16 %v6750_v33, %v6692_v61  ;;  %v6763_v51 = vpack.c.bf16 %v6745_v16, %v6687_v11  ;;  %v6793_v0 = vunpack.c.l.bf16 %v6764_v3  ;;  %v6794_v50 = vunpack.c.h.bf16 %v6764_v3 }
 0xbba   :  { %v6753_v44 = vadd.f32 %v6752_v25, %v6723_v38  ;;  %v6807_v33 = vadd.f32 %v6805_v12, %v6789_v27 }
 0xbbb   :  { %v6795_v31 = vunpack.c.l.bf16 %v6765_v45  ;;  %v6796_v47 = vunpack.c.h.bf16 %v6765_v45 }
 0xbbd   :  { %v6813_v14 = vadd.f32 %v6805_v12, %v6795_v31  ;;  %v6814_v23 = vadd.f32 %v6806_v60, %v6796_v47 }
 0xbbe   :  { %v6665_v49 = vpop.f32.mrf.mxu2  ;;  %v6694_v54 = vpop.f32.mrf.mxu3 }
 0xbbf   :  { %v6695_v6 = vadd.f32 %v6694_v54, %v6665_v49  ;;  %v6790_v54 = vunpack.c.h.bf16 %v13819_v19  ;;  %v6811_v19 = vadd.f32 %v6805_v12, %v6793_v0  ;;  %v6854_v1 = vmax.f32 %v6814_v23, 0.0 }
 0xbc1   :  { %v6725_v46 = vpop.f32.mrf.mxu0  ;;  %v6754_v28 = vpop.f32.mrf.mxu1  ;;  %v6766_v34 = vpack.c.bf16 %v6753_v44, %v6695_v6  ;;  %v6851_v11 = vmax.f32 %v6811_v19, 0.0 }
 0xbc2   :  { %v6755_v57 = vadd.f32 %v6754_v28, %v6725_v46 }
 0xbc3   :  { %v6797_v38 = vunpack.c.l.bf16 %v6766_v34  ;;  %v6798_v25 = vunpack.c.h.bf16 %v6766_v34 }
 0xbc5   :  { %v6815_v20 = vadd.f32 %v6805_v12, %v6797_v38  ;;  %v6816_v40 = vadd.f32 %v6806_v60, %v6798_v25 }
 0xbc6   :  { %v6667_v55 = vpop.f32.mrf.mxu2  ;;  %v6696_v4 = vpop.f32.mrf.mxu3 }
 0xbc7   :  { %v6697_v56 = vadd.f32 %v6696_v4, %v6667_v55 }
 0xbc9   :  { %v6728_v43 = vpop.f32.mrf.mxu0  ;;  %v6757_v52 = vpop.f32.mrf.mxu1  ;;  %v6767_v8 = vpack.c.bf16 %v6755_v57, %v6697_v56  ;;  %v6812_v57 = vadd.f32 %v6806_v60, %v6794_v50 }
 0xbca   :  { %v6758_v39 = vadd.f32 %v6757_v52, %v6728_v43  ;;  %v6791_v43 = vunpack.c.l.bf16 %v6763_v51  ;;  %v6792_v52 = vunpack.c.h.bf16 %v6763_v51 }
 0xbcb   :  { %v6799_v5 = vunpack.c.l.bf16 %v6767_v8  ;;  %v6800_v29 = vunpack.c.h.bf16 %v6767_v8  ;;  %v6852_v41 = vmax.f32 %v6812_v57, 0.0 }
 0xbcc   :  { %v6809_v42 = vadd.f32 %v6805_v12, %v6791_v43  ;;  %v6810_v8 = vadd.f32 %v6806_v60, %v6792_v52 }
 0xbcd   :  { %v6817_v62 = vadd.f32 %v6805_v12, %v6799_v5  ;;  %v6818_v46 = vadd.f32 %v6806_v60, %v6800_v29 }
 0xbce   :  { %v6670_v13 = vpop.f32.mrf.mxu2  ;;  %v6699_v32 = vpop.f32.mrf.mxu3  ;;  %v6849_v16 = vmax.f32 %v6809_v42, 0.0  ;;  %v6850_v3 = vmax.f32 %v6810_v8, 0.0 }
 0xbcf   :  { %v6700_v30 = vadd.f32 %v6699_v32, %v6670_v13  ;;  %v6857_v56 = vmax.f32 %v6817_v62, 0.0  ;;  %v6858_v6 = vmax.f32 %v6818_v46, 0.0 }
 0xbd0   :  { %v6864_v27 = vpack.c.bf16 %v6850_v3, %v6849_v16 }
 0xbd1   :  { %v6768_v10 = vpack.c.bf16 %v6758_v39, %v6700_v30  ;;  %v6730_v15 = vpop.f32.mrf.mxu0  ;;  %v6759_v53 = vpop.f32.mrf.mxu1  ;;  %v6855_v39 = vmax.f32 %v6815_v20, 0.0  ;;  %v6856_v30 = vmax.f32 %v6816_v40, 0.0  ;;  %v6868_v34 = vpack.c.bf16 %v6858_v6, %v6857_v56 }
 0xbd2   :  { %v6760_v21 = vadd.f32 %v6759_v53, %v6730_v15 }
 0xbd3   :  { %v6801_v7 = vunpack.c.l.bf16 %v6768_v10  ;;  %v6802_v22 = vunpack.c.h.bf16 %v6768_v10  ;;  %v6853_v10 = vmax.f32 %v6813_v14, 0.0  ;;  %v6867_v45 = vpack.c.bf16 %v6856_v30, %v6855_v39 }
 0xbd4   :  { %v13835_v14 = vunpack.c.l.bf16 %v6868_v34  ;;  %v13837_v23 = vunpack.c.h.bf16 %v6868_v34 }
 0xbd5   :  { %v6819_v36 = vadd.f32 %v6805_v12, %v6801_v7  ;;  %v6820_v26 = vadd.f32 %v6806_v60, %v6802_v22  ;;  %v6808_v22 = vadd.f32 %v6806_v60, %v6790_v54  ;;  %v6866_v38 = vpack.c.bf16 %v6854_v1, %v6853_v10 }
 0xbd6   :  { %v6672_v59 = vpop.f32.mrf.mxu2  ;;  %v6701_v49 = vpop.f32.mrf.mxu3  ;;  %v13843_v19 = vunpack.c.l.bf16 %v6867_v45  ;;  %v13845_v57 = vunpack.c.h.bf16 %v6867_v45  ;;  %v6963_v8 = vmul.f32 %v13835_v14, %v13835_v14  ;;  %v6964_v10 = vmul.f32 %v13837_v23, %v13837_v23 }
 0xbd7   :  { %v6702_v2 = vadd.f32 %v6701_v49, %v6672_v59  ;;  %v6859_v55 = vmax.f32 %v6819_v36, 0.0  ;;  %v6860_v4 = vmax.f32 %v6820_v26, 0.0  ;;  %v6889_v49 = vunpack.c.l.b16 %v6868_v34 }
 0xbd8   :  { %v6890_v36 = vunpack.c.h.b16 %v6868_v34  ;;  %v6847_v26 = vmax.f32 %v6807_v33, 0.0  ;;  %v6885_v47 = vunpack.c.l.b16 %v6866_v38  ;;  %v6886_v54 = vunpack.c.h.b16 %v6866_v38 }
 0xbd9   :  { %v6769_v28 = vpack.c.bf16 %v6760_v21, %v6702_v2  ;;  %v6869_v61 = vpack.c.bf16 %v6860_v4, %v6859_v55  ;;  %v6848_v21 = vmax.f32 %v6808_v22, 0.0  ;;  %v6888_v2 = vunpack.c.h.b16 %v6867_v45 }
 0xbda   :  { %v6961_v1 = vmul.f32 %v13843_v19, %v13843_v19  ;;  %v6962_v33 = vmul.f32 %v13845_v57, %v13845_v57 }
 0xbdb   :  { %v6803_v17 = vunpack.c.l.bf16 %v6769_v28  ;;  %v6804_v63 = vunpack.c.h.bf16 %v6769_v28  ;;  %v6891_v15 = vunpack.c.l.b16 %v6869_v61  ;;  %v6892_v5 = vunpack.c.h.b16 %v6869_v61 }
 0xbdc   :  { %v6900_v31 = vpack.c.b16 %v6890_v36, %v6888_v2  ;;  %v6863_v28 = vpack.c.bf16 %v6848_v21, %v6847_v26  ;;  %v13827_v20 = vunpack.c.l.bf16 %v6869_v61  ;;  %v13829_v40 = vunpack.c.h.bf16 %v6869_v61 }
 0xbdd   :  { %v6821_v13 = vadd.f32 %v6805_v12, %v6803_v17  ;;  %v6822_v32 = vadd.f32 %v6806_v60, %v6804_v63  ;;  %v6865_v12 = vpack.c.bf16 %v6852_v41, %v6851_v11  ;;  %v6887_v60 = vunpack.c.l.b16 %v6867_v45 }
 0xbde   :  { %v6881_v17 = vunpack.c.l.b16 %v6864_v27  ;;  %v6882_v63 = vunpack.c.h.b16 %v6864_v27  ;;  %v6879_v56 = vunpack.c.l.b16 %v6863_v28  ;;  %v6880_v6 = vunpack.c.h.b16 %v6863_v28 }
 0xbdf   :  { %v6861_v44 = vmax.f32 %v6821_v13, 0.0  ;;  %v6862_v58 = vmax.f32 %v6822_v32, 0.0  ;;  %v6899_v51 = vpack.c.b16 %v6889_v49, %v6887_v60  ;;  %v6883_v0 = vunpack.c.l.b16 %v6865_v12 }
 0xbe0   :  { %v6884_v50 = vunpack.c.h.b16 %v6865_v12  ;;  %v6965_v13 = vmul.f32 %v13827_v20, %v13827_v20  ;;  %v6966_v32 = vmul.f32 %v13829_v40, %v13829_v40  ;;  %v6895_v39 = vpack.c.b16 %v6881_v17, %v6879_v56 }
 0xbe1   :  { %v6870_v7 = vpack.c.bf16 %v6862_v58, %v6861_v44  ;;  %v6897_v55 = vpack.c.b16 %v6885_v47, %v6883_v0  ;;  %v6896_v30 = vpack.c.b16 %v6882_v63, %v6880_v6  ;;  %v13847_v61 = vunpack.c.l.bf16 %v6866_v38  ;;  %v10323_v6 = vld [vmem:[%s14575_s19 + $0xa8] sm:$0xf] }
 0xbe2   :  { %v6898_v4 = vpack.c.b16 %v6886_v54, %v6884_v50  ;;  %v13849_v44 = vunpack.c.h.bf16 %v6866_v38  ;;  %v13859_v34 = vunpack.c.l.bf16 %v6865_v12  ;;  %v13865_v11 = vunpack.c.l.bf16 %v6864_v27 }
 0xbe3   :  { %v6893_v53 = vunpack.c.l.b16 %v6870_v7  ;;  %v6894_v29 = vunpack.c.h.b16 %v6870_v7  ;;  %v13823_v62 = vunpack.c.l.bf16 %v6870_v7  ;;  %v13825_v46 = vunpack.c.h.bf16 %v6870_v7 }
 0xbe4   :  { %v13861_v7 = vunpack.c.h.bf16 %v6865_v12  ;;  %v6959_v22 = vmul.f32 %v13847_v61, %v13847_v61  ;;  %v6973_v41 = vpack.c.bf16 %v6963_v8, %v6961_v1  ;;  %v6974_v45 = vpack.c.bf16 %v6964_v10, %v6962_v33  ;;  %v10996_v8 = vld [vmem:[%s14575_s19 + $0xac] sm:$0xf]  ;;  %v10325_v10 = vld [vmem:[%s14575_s19 + $0xb4] sm:$0xf0] }
 0xbe5   :  { %v6901_v25 = vpack.c.b16 %v6893_v53, %v6891_v15  ;;  %v6902_v59 = vpack.c.b16 %v6894_v29, %v6892_v5  ;;  %v6967_v43 = vmul.f32 %v13823_v62, %v13823_v62  ;;  %v6968_v52 = vmul.f32 %v13825_v46, %v13825_v46  ;;  %v11020_v1 = vld [vmem:[%s14575_s19 + $0x16c] sm:$0xf] }
 0xbe6   :  { %v6960_v15 = vmul.f32 %v13849_v44, %v13849_v44  ;;  %v13873_v53 = vunpack.c.h.bf16 %v6864_v27  ;;  %v6957_v5 = vmul.f32 %v13859_v34, %v13859_v34  ;;  %v6958_v29 = vmul.f32 %v13861_v7, %v13861_v7 }
 0xbe7   :  { %6915 = vmatpush.bf16.msrb.mxu2 %v6901_v25  ;;  %6928 = vmatpush.bf16.msrb.mxu3 %v6902_v59  ;;  %v6975_v58 = vpack.c.bf16 %v6967_v43, %v6965_v13  ;;  %v6976_v42 = vpack.c.bf16 %v6968_v52, %v6966_v32  ;;  %v13879_v16 = vunpack.c.l.bf16 %v6863_v28  ;;  %v13881_v3 = vunpack.c.h.bf16 %v6863_v28  ;;  %v10997_v13 = vld [vmem:[%s14575_s19 + $0xb0] sm:$0xf0]  ;;  %v10419_v32 = vld [vmem:[%s14575_s19 + $0x168] sm:$0xf] }
 0xbe8   :  { %v6971_v38 = vpack.c.bf16 %v6959_v22, %v6957_v5  ;;  %v6972_v25 = vpack.c.bf16 %v6960_v15, %v6958_v29  ;;  %v6955_v59 = vmul.f32 %v13865_v11, %v13865_v11  ;;  %v6956_v49 = vmul.f32 %v13873_v53, %v13873_v53  ;;  %v10311_v15 = vld [vmem:[%s14575_s19 + $0x90] sm:$0xf]  ;;  %v10994_v5 = vld [vmem:[%s14575_s19 + $0x98] sm:$0xf0] }
 0xbe9   :  { %v6953_v36 = vmul.f32 %v13879_v16, %v13879_v16  ;;  %v6954_v26 = vmul.f32 %v13881_v3, %v13881_v3  ;;  %v10328_v22 = vor.u32 %v10996_v8, %v10325_v10  ;;  %v10407_v29 = vld [vmem:[%s14575_s19 + $0x150] sm:$0xf]  ;;  %v10383_v8 = vld [vmem:[%s14575_s19 + $0x120] sm:$0xf] }
 0xbeb   :  { %6916 = vmatpush.bf16.msrb.mxu2 %v6899_v51  ;;  %6929 = vmatpush.bf16.msrb.mxu3 %v6900_v31  ;;  %v6969_v21 = vpack.c.bf16 %v6955_v59, %v6953_v36  ;;  %v6970_v12 = vpack.c.bf16 %v6956_v49, %v6954_v26  ;;  %v10993_v59 = vld [vmem:[%s14575_s19 + $0x94] sm:$0xf]  ;;  %v10313_v49 = vld [vmem:[%s14575_s19 + $0x9c] sm:$0xf0] }
 0xbec   :  { %v10316_v26 = vor.u32 %v10993_v59, %v10313_v49  ;;  %v10275_v59 = vld [vmem:[%s14575_s19 + $0x48] sm:$0xf] }
 0xbef   :  { %6917 = vmatpush.bf16.msrb.mxu2 %v6897_v55  ;;  %6930 = vmatpush.bf16.msrb.mxu3 %v6898_v4 }
 0xbf3   :  { %6918 = vmatpush.bf16.msrb.mxu2 %v6895_v39  ;;  %6931 = vmatpush.bf16.msrb.mxu3 %v6896_v30  ;;  %v11021_v39 = vld [vmem:[%s14575_s19 + $0x170] sm:$0xf0] }
 0xbf4   :  { %v10420_v33 = vor.u32 %v11021_v39, %v10419_v32 }
 0xbf6   :  { %10234 = vmatmul.msk.bf16.vlgmr.msrb.gmra.mxu3 %vm4785_vm6, %v11544_v48  ;;  %10233 = vmatmul.msk.bf16.vlgmr.msrb.gmra.mxu2 %vm4785_vm6, %v11544_v48 }
 0xbf7   :  { %6981 = vmatpush.bf16.msra.mxu2 %v6975_v58  ;;  %6994 = vmatpush.bf16.msra.mxu3 %v6976_v42  ;;  %v10324_v42 = vor.u32 %v10997_v13, %v10323_v6  ;;  %v11014_v6 = vld [vmem:[%s14575_s19 + $0x13c] sm:$0xf]  ;;  %v10397_v13 = vld [vmem:[%s14575_s19 + $0x144] sm:$0xf0] }
 0xbf8   :  { %7513 = vmatpush.bf16.msra.mxu1 %v10420_v33  ;;  %v10400_v39 = vor.u32 %v11014_v6, %v10397_v13  ;;  %v11012_v33 = vld [vmem:[%s14575_s19 + $0x128] sm:$0xf0]  ;;  %v10982_v13 = vld [vmem:[%s14575_s19 + $0x38] sm:$0xf0] }
 0xbf9   :  { %7484 = vmatpush.bf16.msra.mxu0 %v10324_v42  ;;  %v10988_v42 = vld [vmem:[%s14575_s19 + $0x68] sm:$0xf0] }
 0xbfb   :  { %6982 = vmatpush.bf16.msra.mxu2 %v6973_v41  ;;  %6995 = vmatpush.bf16.msra.mxu3 %v6974_v45  ;;  %v10421_v41 = vld [vmem:[%s14575_s19 + $0x174] sm:$0xf0] }
 0xbfc   :  { %v10424_v45 = vor.u32 %v11020_v1, %v10421_v41 }
 0xbff   :  { %6983 = vmatpush.bf16.msra.mxu2 %v6971_v38  ;;  %6996 = vmatpush.bf16.msra.mxu3 %v6972_v25  ;;  %v10312_v38 = vor.u32 %v10994_v5, %v10311_v15  ;;  %v11018_v25 = vld [vmem:[%s14575_s19 + $0x158] sm:$0xf0]  ;;  %v10289_v15 = vld [vmem:[%s14575_s19 + $0x6c] sm:$0xf0]  ;;  %v11011_v5 = vld [vmem:[%s14575_s19 + $0x124] sm:$0xf] }
 0xc00   :  { %v10408_v36 = vor.u32 %v11018_v25, %v10407_v29  ;;  %v10385_v25 = vld [vmem:[%s14575_s19 + $0x12c] sm:$0xf0] }
 0xc01   :  { %7485 = vmatpush.bf16.msra.mxu0 %v10312_v38 }
 0xc02   :  { %7514 = vmatpush.bf16.msra.mxu1 %v10408_v36 }
 0xc03   :  { %6984 = vmatpush.bf16.msra.mxu2 %v6969_v21  ;;  %6997 = vmatpush.bf16.msra.mxu3 %v6970_v12  ;;  %v11017_v21 = vld [vmem:[%s14575_s19 + $0x154] sm:$0xf]  ;;  %v10409_v12 = vld [vmem:[%s14575_s19 + $0x15c] sm:$0xf0] }
 0xc06   :  { %10236 = vmatmul.msk.bf16.vlgmr.msra.gmra.mxu3 %vm4785_vm6, %v11544_v48  ;;  %10235 = vmatmul.msk.bf16.vlgmr.msra.gmra.mxu2 %vm4785_vm6, %v11544_v48 }
 0xc07   :  { %7542 = vmatpush.bf16.msrb.mxu2 %v10328_v22  ;;  %7571 = vmatpush.bf16.msrb.mxu3 %v10424_v45  ;;  %v10987_v22 = vld [vmem:[%s14575_s19 + $0x64] sm:$0xf]  ;;  %v10384_v45 = vor.u32 %v11012_v33, %v10383_v8  ;;  %v10361_v33 = vld [vmem:[%s14575_s19 + $0xfc] sm:$0xf0] }
 0xc08   :  { %v10292_v38 = vor.u32 %v10987_v22, %v10289_v15  ;;  %v10251_v22 = vld [vmem:[%s14575_s19 + $0x18] sm:$0xf] }
 0xc09   :  { %v10347_v15 = vld [vmem:[%s14575_s19 + $0xd8] sm:$0xf] }
 0xc0b   :  { %7543 = vmatpush.bf16.msrb.mxu2 %v10316_v26  ;;  %v10388_v26 = vor.u32 %v11011_v5, %v10385_v25  ;;  %v11003_v5 = vld [vmem:[%s14575_s19 + $0xe0] sm:$0xf0]  ;;  %v10253_v25 = vld [vmem:[%s14575_s19 + $0x24] sm:$0xf0] }
 0xc79   :  { %v6933_v60 = vpop.f32.mrf.mxu3  ;;  %v6920_v2 = vpop.f32.mrf.mxu2 }
 0xc7a   :  { %v13895_v31 = vmul.f32 0.015625, %v6933_v60  ;;  %v13897_v47 = vmul.f32 0.015625, %v6920_v2  ;;  %v10412_v60 = vor.u32 %v11017_v21, %v10409_v12  ;;  %v10371_v21 = vld [vmem:[%s14575_s19 + $0x108] sm:$0xf] }
 0xc7c   :  { %v7008_v0 = vmul.f32 %v13895_v31, %v13895_v31  ;;  %v7007_v50 = vmul.f32 %v13897_v47, %v13897_v47  ;;  %7572 = vmatpush.bf16.msrb.mxu3 %v10412_v60 }
 0xc80   :  { %7573 = vmatpush.bf16.msrb.mxu3 %v10400_v39  ;;  %v11006_v39 = vld [vmem:[%s14575_s19 + $0xf8] sm:$0xf0] }
 0xc81   :  { %v6935_v27 = vpop.f32.mrf.mxu3  ;;  %v6922_v51 = vpop.f32.mrf.mxu2 }
 0xc82   :  { %v10299_v27 = vld [vmem:[%s14575_s19 + $0x78] sm:$0xf]  ;;  %v10991_v51 = vld [vmem:[%s14575_s19 + $0x80] sm:$0xf0] }
 0xc84   :  { %7574 = vmatpush.bf16.msrb.mxu3 %v10388_v26  ;;  %v10239_v26 = vld [vmem:[%s14575_s19] sm:$0xf] }
 0xc89   :  { %v6999_v54 = vpop.f32.mrf.mxu3  ;;  %v6986_v28 = vpop.f32.mrf.mxu2 }
 0xc8a   :  { %v7006_v55 = vmul.f32 0.015625, %v6999_v54  ;;  %v7005_v4 = vmul.f32 0.015625, %v6986_v28  ;;  %v10395_v54 = vld [vmem:[%s14575_s19 + $0x138] sm:$0xf] }
 0xc8c   :  { %v7010_v17 = vsub.f32 %v7006_v55, %v7008_v0  ;;  %v7009_v48 = vsub.f32 %v7005_v4, %v7007_v50  ;;  %v10300_v50 = vor.u32 %v10991_v51, %v10299_v27  ;;  %v11015_v55 = vld [vmem:[%s14575_s19 + $0x140] sm:$0xf0]  ;;  %v10990_v4 = vld [vmem:[%s14575_s19 + $0x7c] sm:$0xf]  ;;  %v11009_v27 = vld [vmem:[%s14575_s19 + $0x110] sm:$0xf0] }
 0xc8d   :  { %v10984_v51 = vld [vmem:[%s14575_s19 + $0x4c] sm:$0xf] }
 0xc8e   :  { %v7012_v63 = vmax.f32 %v7010_v17, 0.0  ;;  %v7011_v43 = vmax.f32 %v7009_v48, 0.0  ;;  %v10301_v17 = vld [vmem:[%s14575_s19 + $0x84] sm:$0xf0]  ;;  %7486 = vmatpush.bf16.msra.mxu0 %v10300_v50 }
 0xc90   :  { %v13903_v52 = vadd.f32 1e-05, %v7012_v63  ;;  %v13905_v56 = vadd.f32 1e-05, %v7011_v43  ;;  %v10396_v63 = vor.u32 %v11015_v55, %v10395_v54  ;;  %v10304_v43 = vor.u32 %v10990_v4, %v10301_v17  ;;  %v10277_v54 = vld [vmem:[%s14575_s19 + $0x54] sm:$0xf0] }
 0xc91   :  { %v7001_v30 = vpop.f32.mrf.mxu3  ;;  %v6988_v58 = vpop.f32.mrf.mxu2  ;;  %v10372_v55 = vor.u32 %v11009_v27, %v10371_v21  ;;  %v10280_v4 = vor.u32 %v10984_v51, %v10277_v54  ;;  %v11008_v17 = vld [vmem:[%s14575_s19 + $0x10c] sm:$0xf]  ;;  %v10335_v51 = vld [vmem:[%s14575_s19 + $0xc0] sm:$0xf] }
 0xc92   :  { %11094 = vrsqrt.f32 %v13903_v52  ;;  %v10287_v58 = vld [vmem:[%s14575_s19 + $0x60] sm:$0xf]  ;;  %7515 = vmatpush.bf16.msra.mxu1 %v10396_v63  ;;  %7544 = vmatpush.bf16.msrb.mxu2 %v10304_v43  ;;  %vm7031_vm15 = vweird.f32 %v13903_v52  ;;  %v10263_v63 = vld [vmem:[%s14575_s19 + $0x30] sm:$0xf]  ;;  %vm7021_vm2 = vweird.f32 %v13905_v56  ;;  %v11000_v54 = vld [vmem:[%s14575_s19 + $0xc8] sm:$0xf0] }
 0xc93   :  { %11096 = vrsqrt.f32 %v13905_v56  ;;  %v10288_v1 = vor.u32 %v10988_v42, %v10287_v58  ;;  %v10265_v58 = vld [vmem:[%s14575_s19 + $0x3c] sm:$0xf0] }
 0xc95   :  { %7487 = vmatpush.bf16.msra.mxu0 %v10288_v1  ;;  %v11005_v1 = vld [vmem:[%s14575_s19 + $0xf4] sm:$0xf] }
 0xc96   :  { %7516 = vmatpush.bf16.msra.mxu1 %v10384_v45  ;;  %7545 = vmatpush.bf16.msrb.mxu2 %v10292_v38  ;;  %v10979_v45 = vld [vmem:[%s14575_s19 + $0x20] sm:$0xf0]  ;;  %v10978_v38 = vld [vmem:[%s14575_s19 + $0x1c] sm:$0xf] }
 0xc97   :  { %v10252_v49 = vor.u32 %v10979_v45, %v10251_v22  ;;  %v10256_v27 = vor.u32 %v10978_v38, %v10253_v25 }
 0xc98   :  { %v13957_v2 = vpop.eup %11094 }
 0xc99   :  { %v13968_v28 = vpop.eup %11096  ;;  %v7026_v0 = vmul.f32 %v13957_v2, %v13903_v52  ;;  %vm7032_vm6 = vweird.f32 %v13957_v2  ;;  %v10985_v52 = vld [vmem:[%s14575_s19 + $0x50] sm:$0xf0] }
 0xc9a   :  { %v7016_v48 = vmul.f32 %v13968_v28, %v13905_v56  ;;  %vm14022_vm0 = vmor %vm7031_vm15, %vm7032_vm6  ;;  %vm7022_vm1 = vweird.f32 %v13968_v28  ;;  %v10276_v60 = vor.u32 %v10985_v52, %v10275_v59  ;;  %v10981_v56 = vld [vmem:[%s14575_s19 + $0x34] sm:$0xf]  ;;  %7517 = vmatpush.bf16.msra.mxu1 %v10372_v55  ;;  %7546 = vmatpush.bf16.msrb.mxu2 %v10280_v4  ;;  %v11002_v59 = vld [vmem:[%s14575_s19 + $0xdc] sm:$0xf] }
 0xc9b   :  { %v7027_v32 = vmul.f32 %v13957_v2, %v7026_v0  ;;  %v6483_v0 = vld [vmem:[#allocation4 + $0x35] ss:$8 sm:$0x3]  ;;  %vm7023_vm3 = vmor %vm7021_vm2, %vm7022_vm1  ;;  %v10976_v52 = vld [vmem:[%s14575_s19 + $0x8] sm:$0xf0] }
 0xc9c   :  { %v7017_v30 = vmul.f32 %v13968_v28, %v7016_v48  ;;  %v10373_v48 = vld [vmem:[%s14575_s19 + $0x114] sm:$0xf0]  ;;  %7488 = vmatpush.bf16.msra.mxu0 %v10276_v60  ;;  %v10348_v60 = vor.u32 %v11003_v5, %v10347_v15  ;;  %v10241_v55 = vld [vmem:[%s14575_s19 + $0xc] sm:$0xf0] }
 0xc9d   :  { %v7028_v10 = vmul.f32 0.5, %v7027_v32  ;;  %v10376_v6 = vor.u32 %v11008_v17, %v10373_v48  ;;  %v10359_v32 = vld [vmem:[%s14575_s19 + $0xf0] sm:$0xf]  ;;  %v10999_v48 = vld [vmem:[%s14575_s19 + $0xc4] sm:$0xf] }
 0xc9e   :  { %v7018_v41 = vmul.f32 0.5, %v7017_v30  ;;  %v10360_v8 = vor.u32 %v11006_v39, %v10359_v32  ;;  %v6485_v32 = vld [vmem:[#allocation4 + $0x36] ss:$8 sm:$0x3] }
 0xc9f   :  { %v7029_v29 = vsub.f32 1.5, %v7028_v10  ;;  %v10268_v10 = vor.u32 %v10981_v56, %v10265_v58  ;;  %7575 = vmatpush.bf16.msrb.mxu3 %v10376_v6  ;;  %v10240_v6 = vor.u32 %v10976_v52, %v10239_v26 }
 0xca0   :  { %v7019_v36 = vsub.f32 1.5, %v7018_v41  ;;  %7518 = vmatpush.bf16.msra.mxu1 %v10360_v8 }
 0xca1   :  { %v7030_v12 = vmul.f32 %v13957_v2, %v7029_v29  ;;  %7547 = vmatpush.bf16.msrb.mxu2 %v10268_v10 }
 0xca2   :  { %v7020_v50 = vmul.f32 %v13968_v28, %v7019_v36  ;;  %v10349_v36 = vld [vmem:[%s14575_s19 + $0xe4] sm:$0xf0] }
 0xca3   :  { %v7034_v43 = vsel %vm14022_vm0, %v13957_v2, %v7030_v12  ;;  %v10264_v2 = vor.u32 %v10982_v13, %v10263_v63  ;;  %v10337_v63 = vld [vmem:[%s14575_s19 + $0xcc] sm:$0xf0]  ;;  %v10336_v13 = vor.u32 %v11000_v54, %v10335_v51 }
 0xca4   :  { %v7037_v30 = vrot.slane %v7034_v43, 7  ;;  %v7024_v42 = vsel %vm7023_vm3, %v13968_v28, %v7020_v50  ;;  %v10364_v28 = vor.u32 %v11005_v1, %v10361_v33  ;;  %v10975_v50 = vld [vmem:[%s14575_s19 + $0x4] sm:$0xf]  ;;  %7519 = vmatpush.bf16.msra.mxu1 %v10348_v60  ;;  %v10340_v56 = vor.u32 %v10999_v48, %v10337_v63 }
 0xca5   :  { %7489 = vmatpush.bf16.msra.mxu0 %v10264_v2  ;;  %7548 = vmatpush.bf16.msrb.mxu2 %v10256_v27 }
 0xca6   :  { %v7038_v41 = vsel %vm4916_vm14, %v7024_v42, %v7037_v30  ;;  %7576 = vmatpush.bf16.msrb.mxu3 %v10364_v28 }
 0xca7   :  { %v7040_v29 = vmul.f32 %v7038_v41, %v6483_v0  ;;  %v10352_v0 = vor.u32 %v11002_v59, %v10349_v36 }
 0xca8   :  { %7520 = vmatpush.bf16.msra.mxu1 %v10336_v13 }
 0xca9   :  { %v7042_v21 = vperm.slane %v7040_v29, 0  ;;  %v7043_v12 = vperm.slane %v7040_v29, 1  ;;  %7490 = vmatpush.bf16.msra.mxu0 %v10252_v49 }
 0xcaa   :  { %7577 = vmatpush.bf16.msrb.mxu3 %v10352_v0 }
 0xcab   :  { %v7047_v4 = vmul.f32 %v7043_v12, %v13895_v31  ;;  %v7054_v17 = vpack.c.bf16 %v7043_v12, %v7042_v21  ;;  %v7046_v43 = vmul.f32 %v7042_v21, %v13897_v47  ;;  %v10244_v31 = vor.u32 %v10975_v50, %v10241_v55 }
 0xcad   :  { %v7050_v39 = vrot.slane %v7047_v4, 7  ;;  %v7056_v30 = vunpack.c.l.b16 %v7054_v17  ;;  %v7057_v2 = vunpack.c.h.b16 %v7054_v17  ;;  %7491 = vmatpush.bf16.msra.mxu0 %v10240_v6  ;;  %7549 = vmatpush.bf16.msrb.mxu2 %v10244_v31  ;;  %v10995_v31 = vld [vmem:[%s14575_s19 + $0xa0] sm:$0xf0] }
 0xcae   :  { %7578 = vmatpush.bf16.msrb.mxu3 %v10340_v56 }
 0xcaf   :  { %v7051_v58 = vsel %vm4916_vm14, %v7046_v43, %v7050_v39  ;;  %v7058_v42 = vpack.c.b16 %v7056_v30, %v7056_v30  ;;  %v7059_v8 = vpack.c.b16 %v7057_v2, %v7057_v2  ;;  %v10427_v30 = vld [vmem:[%s14575_s19 + $0x170] sm:$0xf]  ;;  %v10319_v2 = vld [vmem:[%s14575_s19 + $0x98] sm:$0xf] }
 0xcb0   :  { %v7053_v10 = vsub.f32 %v6485_v32, %v7051_v58 }
 0xcb1   :  { %v7061_v1 = vpack.i.b16 %v7058_v42, %v7058_v42  ;;  %v7065_v47 = vpack.i.b16 %v7059_v8, %v7059_v8  ;;  %v10415_v42 = vld [vmem:[%s14575_s19 + $0x158] sm:$0xf]  ;;  %v11019_v8 = vld [vmem:[%s14575_s19 + $0x160] sm:$0xf0] }
 0xcb2   :  { %v7095_v33 = vperm.slane %v7053_v10, 0  ;;  %v7096_v22 = vperm.slane %v7053_v10, 1 }
 0xcb3   :  { %v7063_v41 = vperm.slane %v7061_v1, 0  ;;  %v7067_v28 = vperm.slane %v7065_v47, 0  ;;  %v10320_v1 = vor.u32 %v10995_v31, %v10319_v2  ;;  %v10416_v47 = vor.u32 %v11019_v8, %v10415_v42 }
 0xcb4   :  { %v7099_v45 = vpack.c.bf16 %v7096_v22, %v7095_v33  ;;  %v10307_v33 = vld [vmem:[%s14575_s19 + $0x80] sm:$0xf]  ;;  %v10992_v22 = vld [vmem:[%s14575_s19 + $0x88] sm:$0xf0] }
 0xcb5   :  { %v14133_v15 = vunpack.c.l.bf16 %v7063_v41  ;;  %v14135_v5 = vunpack.c.l.bf16 %v7067_v28  ;;  %v10403_v41 = vld [vmem:[%s14575_s19 + $0x140] sm:$0xf]  ;;  %v11016_v28 = vld [vmem:[%s14575_s19 + $0x148] sm:$0xf0] }
 0xcb6   :  { %v7101_v29 = vunpack.c.l.b16 %v7099_v45  ;;  %v7102_v38 = vunpack.c.h.b16 %v7099_v45 }
 0xcb7   :  { %v7070_v25 = vmul.f32 %v14133_v15, %v13879_v16  ;;  %v7071_v59 = vmul.f32 %v14135_v5, %v13881_v3  ;;  %v7072_v49 = vmul.f32 %v14133_v15, %v13865_v11  ;;  %v7073_v36 = vmul.f32 %v14135_v5, %v13873_v53 }
 0xcb8   :  { %v7103_v26 = vpack.c.b16 %v7101_v29, %v7101_v29  ;;  %v7104_v52 = vpack.c.b16 %v7102_v38, %v7102_v38  ;;  %v7074_v6 = vmul.f32 %v14133_v15, %v13859_v34  ;;  %v7075_v13 = vmul.f32 %v14135_v5, %v13861_v7  ;;  %v10331_v34 = vld [vmem:[%s14575_s19 + $0xb0] sm:$0xf]  ;;  %v10998_v7 = vld [vmem:[%s14575_s19 + $0xb8] sm:$0xf0] }
 0xcb9   :  { %v7086_v21 = vpack.c.bf16 %v7071_v59, %v7070_v25  ;;  %v7087_v12 = vpack.c.bf16 %v7073_v36, %v7072_v49  ;;  %v7076_v32 = vmul.f32 %v14133_v15, %v13847_v61  ;;  %v7077_v39 = vmul.f32 %v14135_v5, %v13849_v44  ;;  %v11022_v44 = vld [vmem:[%s14575_s19 + $0x178] sm:$0xf0] }
 0xcba   :  { %v7106_v60 = vpack.i.b16 %v7103_v26, %v7103_v26  ;;  %v7110_v27 = vpack.i.b16 %v7104_v52, %v7104_v52  ;;  %v10332_v61 = vor.u32 %v10998_v7, %v10331_v34  ;;  %v7088_v56 = vpack.c.bf16 %v7075_v13, %v7074_v6  ;;  %v10271_v6 = vld [vmem:[%s14575_s19 + $0x38] sm:$0xf]  ;;  %v10983_v34 = vld [vmem:[%s14575_s19 + $0x40] sm:$0xf0] }
 0xcbb   :  { %v7113_v0 = vunpack.c.l.bf16 %v7086_v21  ;;  %v7115_v50 = vunpack.c.l.bf16 %v7087_v12  ;;  %v7114_v3 = vunpack.c.h.bf16 %v7086_v21  ;;  %v7116_v4 = vunpack.c.h.bf16 %v7087_v12  ;;  %v10295_v12 = vld [vmem:[%s14575_s19 + $0x68] sm:$0xf]  ;;  %v10367_v7 = vld [vmem:[%s14575_s19 + $0xf8] sm:$0xf] }
 0xcbc   :  { %v7108_v51 = vperm.slane %v7106_v60, 0  ;;  %v7112_v54 = vperm.slane %v7110_v27, 0  ;;  %v10428_v58 = vor.u32 %v11022_v44, %v10427_v30  ;;  %v7089_v10 = vpack.c.bf16 %v7077_v39, %v7076_v32  ;;  %7600 = vmatpush.bf16.msrb.mxu0 %v10332_v61  ;;  %v10989_v60 = vld [vmem:[%s14575_s19 + $0x70] sm:$0xf0]  ;;  %v10391_v27 = vld [vmem:[%s14575_s19 + $0x128] sm:$0xf] }
 0xcbd   :  { %v7117_v45 = vunpack.c.l.bf16 %v7088_v56  ;;  %v7118_v38 = vunpack.c.h.bf16 %v7088_v56  ;;  %v10308_v59 = vor.u32 %v10992_v22, %v10307_v33  ;;  %v10404_v49 = vor.u32 %v11016_v28, %v10403_v41  ;;  %v11007_v30 = vld [vmem:[%s14575_s19 + $0x100] sm:$0xf0]  ;;  %v10443_v61 = vld [vmem:[#allocation22 + $0x8] sm:$0xf]  ;;  %v11040_v44 = vld [vmem:[#allocation22 + $0x8] sm:$0x30] }
 0xcbe   :  { %v14145_v16 = vunpack.c.l.bf16 %v7108_v51  ;;  %v14147_v55 = vunpack.c.l.bf16 %v7112_v54  ;;  %7629 = vmatpush.bf16.msrb.mxu1 %v10428_v58  ;;  %v7119_v29 = vunpack.c.l.bf16 %v7089_v10  ;;  %v7120_v25 = vunpack.c.h.bf16 %v7089_v10  ;;  %v11013_v51 = vld [vmem:[%s14575_s19 + $0x130] sm:$0xf0]  ;;  %v10259_v56 = vld [vmem:[%s14575_s19 + $0x20] sm:$0xf]  ;;  %v11004_v33 = vld [vmem:[%s14575_s19 + $0xe8] sm:$0xf0] }
 0xcbf   :  { %v10272_v2 = vor.u32 %v10983_v34, %v10271_v6  ;;  %v10368_v31 = vor.u32 %v11007_v30, %v10367_v7  ;;  %v10444_v58 = vor.u32 %v11040_v44, %v10443_v61  ;;  %v11036_v6 = vld [vmem:[#allocation21 + $0x68] sm:$0xff] }
 0xcc0   :  { %v7131_v11 = vadd.f32 %v14145_v16, %v7113_v0  ;;  %v7133_v53 = vadd.f32 %v14145_v16, %v7115_v50  ;;  %v7132_v17 = vadd.f32 %v14147_v55, %v7114_v3  ;;  %v7134_v48 = vadd.f32 %v14147_v55, %v7116_v4  ;;  %7601 = vmatpush.bf16.msrb.mxu0 %v10320_v1  ;;  %v10980_v1 = vld [vmem:[%s14575_s19 + $0x28] sm:$0xf0]  ;;  %v11032_v34 = vld [vmem:[#allocation21 + $0x48] sm:$0xff] }
 0xcc1   :  { %v7135_v36 = vadd.f32 %v14145_v16, %v7117_v45  ;;  %v7137_v26 = vadd.f32 %v14145_v16, %v7119_v29  ;;  %v7136_v52 = vadd.f32 %v14147_v55, %v7118_v38  ;;  %v7138_v21 = vadd.f32 %v14147_v55, %v7120_v25  ;;  %v14314_v7 = vld [vmem:[#allocation4 + $0x37] ss:$8 sm:$0x7] }
 0xcc2   :  { %v14153_v63 = vpack.c.bf16 %v7133_v53, %v7131_v11  ;;  %v14155_v43 = vpack.c.bf16 %v7134_v48, %v7132_v17  ;;  %7630 = vmatpush.bf16.msrb.mxu1 %v10416_v47  ;;  %v10296_v50 = vor.u32 %v10989_v60, %v10295_v12  ;;  %v10392_v3 = vor.u32 %v11013_v51, %v10391_v27  ;;  %v11010_v48 = vld [vmem:[%s14575_s19 + $0x118] sm:$0xf0]  ;;  %v10355_v47 = vld [vmem:[%s14575_s19 + $0xe0] sm:$0xf] }
 0xcc3   :  { %v14221_v54 = vpack.c.bf16 %v7137_v26, %v7135_v36  ;;  %v14223_v0 = vpack.c.bf16 %v7138_v21, %v7136_v52  ;;  %v7078_v4 = vmul.f32 %v14133_v15, %v13843_v19  ;;  %v7079_v11 = vmul.f32 %v14135_v5, %v13845_v57  ;;  %v10283_v19 = vld [vmem:[%s14575_s19 + $0x50] sm:$0xf]  ;;  %v10986_v57 = vld [vmem:[%s14575_s19 + $0x58] sm:$0xf0]  ;;  %v10343_v36 = vld [vmem:[%s14575_s19 + $0xc8] sm:$0xf] }
 0xcc4   :  { %7492 = vmatmul.bf16.vlgmr.msra.gmra.mxu0 %v14153_v63  ;;  %7521 = vmatmul.bf16.vlgmr.msra.gmra.mxu1 %v14155_v43  ;;  %v7080_v53 = vmul.f32 %v14133_v15, %v13835_v14  ;;  %v7081_v17 = vmul.f32 %v14135_v5, %v13837_v23  ;;  %v10379_v14 = vld [vmem:[%s14575_s19 + $0x110] sm:$0xf]  ;;  %v10284_v23 = vor.u32 %v10986_v57, %v10283_v19  ;;  %v11001_v26 = vld [vmem:[%s14575_s19 + $0xd0] sm:$0xf0]  ;;  %v14317_v44 = vperm.slane %v14314_v7, 0 }
 0xcc5   :  { %7550 = vmatmul.bf16.vlgmr.msrb.gmra.mxu2 %v14153_v63  ;;  %7579 = vmatmul.bf16.vlgmr.msrb.gmra.mxu3 %v14155_v43  ;;  %v7090_v13 = vpack.c.bf16 %v7079_v11, %v7078_v4  ;;  %v10380_v39 = vor.u32 %v11010_v48, %v10379_v14  ;;  %v7866_v41 = vand.u32 %v10444_v58, %v13082_v18  ;;  %v10977_v18 = vld [vmem:[%s14575_s19 + $0x10] sm:$0xf0]  ;;  %v11028_v48 = vld [vmem:[#allocation21 + $0x28] sm:$0xff] }
 0xcc6   :  { %7602 = vmatpush.bf16.msrb.mxu0 %v10308_v59  ;;  %7631 = vmatpush.bf16.msrb.mxu1 %v10404_v49  ;;  %v7091_v32 = vpack.c.bf16 %v7081_v17, %v7080_v53  ;;  %v10260_v25 = vor.u32 %v10980_v1, %v10259_v56  ;;  %v10356_v59 = vor.u32 %v11004_v33, %v10355_v47  ;;  %v10247_v49 = vld [vmem:[%s14575_s19 + $0x8] sm:$0xf]  ;;  %v11039_v52 = vld [vmem:[#allocation22] sm:$0xff]  ;;  %s11545_s19 = smov 5  }
 0xcc7   :  { %v7121_v42 = vunpack.c.l.bf16 %v7090_v13  ;;  %v7122_v10 = vunpack.c.h.bf16 %v7090_v13  ;;  %7874 = vmatpush.bf16.msra.mxu2 %v7866_v41  ;;  %v10248_v60 = vor.u32 %v10977_v18, %v10247_v49  ;;  %v10344_v27 = vor.u32 %v11001_v26, %v10343_v36  ;;  %v11024_v13 = vld [vmem:[#allocation21 + $0x8] sm:$0xff] }
 0xcc8   :  { %v7123_v8 = vunpack.c.l.bf16 %v7091_v32  ;;  %v7124_v22 = vunpack.c.h.bf16 %v7091_v32  ;;  %v7082_v51 = vmul.f32 %v14133_v15, %v13827_v20  ;;  %v7085_v4 = vmul.f32 %v14135_v5, %v13825_v46  ;;  %v11033_v32 = vld [vmem:[#allocation21 + $0x50] sm:$0xff] }
 0xcc9   :  { %v7139_v28 = vadd.f32 %v14145_v16, %v7121_v42  ;;  %v7140_v29 = vadd.f32 %v14147_v55, %v7122_v10 }
 0xcca   :  { %7603 = vmatpush.bf16.msrb.mxu0 %v10296_v50  ;;  %7632 = vmatpush.bf16.msrb.mxu1 %v10392_v3  ;;  %v7141_v45 = vadd.f32 %v14145_v16, %v7123_v8  ;;  %v7142_v38 = vadd.f32 %v14147_v55, %v7124_v22  ;;  %v7083_v50 = vmul.f32 %v14135_v5, %v13829_v40  ;;  %v11030_v5 = vld [vmem:[#allocation21 + $0x38] sm:$0xff]  ;;  %v14322_v8 = vperm.slane %v14314_v7, 1 }
 0xccb   :  { %7875 = vmatpush.bf16.msra.mxu2 %v11039_v52  ;;  %v7084_v3 = vmul.f32 %v14133_v15, %v13823_v62  ;;  %7993 = vmatpush.bf16.msra.mxu3 %v11030_v5 }
 0xccc   :  { %v7151_v21 = vpack.c.bf16 %v7141_v45, %v7139_v28  ;;  %v7152_v12 = vpack.c.bf16 %v7142_v38, %v7140_v29  ;;  %v7092_v11 = vpack.c.bf16 %v7083_v50, %v7082_v51 }
 0xccd   :  { %v7093_v53 = vpack.c.bf16 %v7085_v4, %v7084_v3 }
 0xcce   :  { %7604 = vmatpush.bf16.msrb.mxu0 %v10284_v23  ;;  %7633 = vmatpush.bf16.msrb.mxu1 %v10380_v39  ;;  %v7125_v17 = vunpack.c.l.bf16 %v7092_v11  ;;  %v7126_v19 = vunpack.c.h.bf16 %v7092_v11  ;;  %v11023_v39 = vld [vmem:[#allocation21] sm:$0xff] }
 0xccf   :  { %v7127_v20 = vunpack.c.l.bf16 %v7093_v53  ;;  %v7128_v57 = vunpack.c.h.bf16 %v7093_v53 }
 0xcd0   :  { %v7143_v14 = vadd.f32 %v14145_v16, %v7125_v17  ;;  %v7144_v23 = vadd.f32 %v14147_v55, %v7126_v19 }
 0xcd1   :  { %v7145_v40 = vadd.f32 %v14145_v16, %v7127_v20  ;;  %v7146_v62 = vadd.f32 %v14147_v55, %v7128_v57  ;;  %v11029_v16 = vld [vmem:[#allocation21 + $0x30] sm:$0xff]  ;;  %v11038_v55 = vld [vmem:[#allocation21 + $0x78] sm:$0xff] }
 0xcd2   :  { %7605 = vmatpush.bf16.msrb.mxu0 %v10272_v2  ;;  %7634 = vmatpush.bf16.msrb.mxu1 %v10368_v31 }
 0xcd3   :  { %v7153_v15 = vpack.c.bf16 %v7145_v40, %v7143_v14  ;;  %v7154_v46 = vpack.c.bf16 %v7146_v62, %v7144_v23  ;;  %7994 = vmatpush.bf16.msra.mxu3 %v11029_v16 }
 0xcd4   :  { %7497 = vmatmul.bf16.gmra.mxu0 %v14221_v54  ;;  %7526 = vmatmul.bf16.gmra.mxu1 %v14223_v0 }
 0xcd5   :  { %7555 = vmatmul.bf16.gmra.mxu2 %v14221_v54  ;;  %7584 = vmatmul.bf16.gmra.mxu3 %v14223_v0 }
 0xcd6   :  { %7606 = vmatpush.bf16.msrb.mxu0 %v10260_v25  ;;  %7635 = vmatpush.bf16.msrb.mxu1 %v10356_v59 }
 0xcd7   :  { %7995 = vmatpush.bf16.msra.mxu3 %v11028_v48 }
 0xcda   :  { %7607 = vmatpush.bf16.msrb.mxu0 %v10248_v60  ;;  %7636 = vmatpush.bf16.msrb.mxu1 %v10344_v27 }
 0xcde   :  { %8022 = vmatpush.bf16.msra.mxu0 %v11038_v55 }
 0xce4   :  { %7502 = vmatmul.bf16.gmra.mxu0 %v7151_v21  ;;  %7531 = vmatmul.bf16.gmra.mxu1 %v7152_v12 }
 0xce5   :  { %7560 = vmatmul.bf16.gmra.mxu2 %v7151_v21  ;;  %7589 = vmatmul.bf16.gmra.mxu3 %v7152_v12 }
 0xcf4   :  { %7507 = vmatmul.bf16.gmra.mxu0 %v7153_v15  ;;  %7536 = vmatmul.bf16.gmra.mxu1 %v7154_v46 }
 0xcf5   :  { %7565 = vmatmul.bf16.gmra.mxu2 %v7153_v15  ;;  %7594 = vmatmul.bf16.gmra.mxu3 %v7154_v46 }
 0xd04   :  { %7608 = vmatmul.bf16.vlgmr.msrb.gmra.mxu0 %v14153_v63  ;;  %7637 = vmatmul.bf16.vlgmr.msrb.gmra.mxu1 %v14155_v43  ;;  %v11037_v63 = vld [vmem:[#allocation21 + $0x70] sm:$0xff]  ;;  %v11027_v43 = vld [vmem:[#allocation21 + $0x20] sm:$0xff] }
 0xd05   :  { %10445 = vmatmul.msk.bf16.vlgmr.msra.gmra.mxu2 %vm4168_vm5, %v13096_v24  ;;  %8023 = vmatpush.bf16.msra.mxu0 %v11037_v63  ;;  %v11026_v24 = vld [vmem:[#allocation21 + $0x18] sm:$0xff] }
 0xd06   :  { %7996 = vmatpush.bf16.msra.mxu3 %v11027_v43 }
 0xd09   :  { %8024 = vmatpush.bf16.msra.mxu0 %v11036_v6 }
 0xd0a   :  { %7997 = vmatpush.bf16.msra.mxu3 %v11026_v24 }
 0xd14   :  { %7613 = vmatmul.bf16.gmra.mxu0 %v14221_v54  ;;  %7642 = vmatmul.bf16.gmra.mxu1 %v14223_v0  ;;  %v11035_v54 = vld [vmem:[#allocation21 + $0x60] sm:$0xff]  ;;  %v11034_v0 = vld [vmem:[#allocation21 + $0x58] sm:$0xff] }
 0xd15   :  { %10446 = vmatmul.msk.bf16.gmra.mxu2 %vm4168_vm5, %v13118_v37  ;;  %8025 = vmatpush.bf16.msra.mxu0 %v11035_v54  ;;  %v11025_v37 = vld [vmem:[#allocation21 + $0x10] sm:$0xff] }
 0xd16   :  { %7998 = vmatpush.bf16.msra.mxu3 %v11025_v37 }
 0xd19   :  { %8026 = vmatpush.bf16.msra.mxu0 %v11034_v0 }
 0xd1a   :  { %7999 = vmatpush.bf16.msra.mxu3 %v11024_v13 }
 0xd1d   :  { %8027 = vmatpush.bf16.msra.mxu0 %v11033_v32 }
 0xd1e   :  { %8000 = vmatpush.bf16.msra.mxu3 %v11023_v39 }
 0xd21   :  { %8028 = vmatpush.bf16.msra.mxu0 %v11032_v34 }
 0xd24   :  { %7618 = vmatmul.bf16.gmra.mxu0 %v7151_v21  ;;  %7647 = vmatmul.bf16.gmra.mxu1 %v7152_v12 }
 0xd25   :  { %10447 = vmatmul.msk.bf16.gmra.mxu2 %vm4168_vm5, %v13127_v35  ;;  %v11031_v35 = vld [vmem:[#allocation21 + $0x40] sm:$0xff] }
 0xd26   :  { %8029 = vmatpush.bf16.msra.mxu0 %v11031_v35 }
 0xd34   :  { %7623 = vmatmul.bf16.gmra.mxu0 %v7153_v15  ;;  %7652 = vmatmul.bf16.gmra.mxu1 %v7154_v46 }
 0xd35   :  { %10448 = vmatmul.msk.bf16.gmra.mxu2 %vm4168_vm5, %v13138_v9 }
 0xd41   :  { %v7493_v30 = vpop.f32.mrf.mxu0  ;;  %v7522_v61 = vpop.f32.mrf.mxu1 }
 0xd42   :  { %v7494_v2 = vadd.f32 %v7493_v30, %v14317_v44 }
 0xd44   :  { %v7523_v10 = vadd.f32 %v7522_v61, %v7494_v2 }
 0xd48   :  { %v7551_v31 = vpop.f32.mrf.mxu2  ;;  %v7580_v56 = vpop.f32.mrf.mxu3 }
 0xd49   :  { %v7495_v58 = vpop.f32.mrf.mxu0  ;;  %v7524_v42 = vpop.f32.mrf.mxu1  ;;  %v7552_v33 = vadd.f32 %v7551_v31, %v14322_v8 }
 0xd4a   :  { %v7496_v9 = vadd.f32 %v7495_v58, %v14317_v44 }
 0xd4b   :  { %v7581_v38 = vadd.f32 %v7580_v56, %v7552_v33  ;;  %v14337_v56 = vperm.slane %v14314_v7, 2 }
 0xd4c   :  { %v7525_v1 = vadd.f32 %v7524_v42, %v7496_v9 }
 0xd4e   :  { %v7658_v47 = vpack.c.bf16 %v7525_v1, %v7523_v10 }
 0xd50   :  { %v7553_v22 = vpop.f32.mrf.mxu2  ;;  %v7582_v41 = vpop.f32.mrf.mxu3  ;;  %8001 = vmatmul.bf16.vlgmr.msra.gmra.mxu3 %v7658_v47 }
 0xd51   :  { %v7554_v28 = vadd.f32 %v7553_v22, %v14322_v8  ;;  %v7498_v45 = vpop.f32.mrf.mxu0  ;;  %v7527_v29 = vpop.f32.mrf.mxu1 }
 0xd52   :  { %v7499_v49 = vadd.f32 %v7498_v45, %v14317_v44 }
 0xd53   :  { %v7583_v25 = vadd.f32 %v7582_v41, %v7554_v28 }
 0xd54   :  { %v7528_v12 = vadd.f32 %v7527_v29, %v7499_v49 }
 0xd55   :  { %v7659_v59 = vpack.c.bf16 %v7583_v25, %v7581_v38 }
 0xd57   :  { %8030 = vmatmul.bf16.vlgmr.msra.gmra.mxu0 %v7659_v59 }
 0xd58   :  { %v7556_v18 = vpop.f32.mrf.mxu2  ;;  %v7585_v36 = vpop.f32.mrf.mxu3 }
 0xd59   :  { %v7500_v26 = vpop.f32.mrf.mxu0  ;;  %v7529_v52 = vpop.f32.mrf.mxu1  ;;  %v7557_v51 = vadd.f32 %v7556_v18, %v14322_v8 }
 0xd5a   :  { %v7501_v21 = vadd.f32 %v7500_v26, %v14317_v44 }
 0xd5b   :  { %v7586_v17 = vadd.f32 %v7585_v36, %v7557_v51 }
 0xd5c   :  { %v7530_v60 = vadd.f32 %v7529_v52, %v7501_v21 }
 0xd5e   :  { %v7660_v27 = vpack.c.bf16 %v7530_v60, %v7528_v12 }
 0xd60   :  { %v7558_v50 = vpop.f32.mrf.mxu2  ;;  %v7587_v3 = vpop.f32.mrf.mxu3  ;;  %8006 = vmatmul.bf16.gmra.mxu3 %v7660_v27 }
 0xd61   :  { %v7559_v4 = vadd.f32 %v7558_v50, %v14322_v8  ;;  %v7503_v11 = vpop.f32.mrf.mxu0  ;;  %v7532_v53 = vpop.f32.mrf.mxu1 }
 0xd62   :  { %v7504_v57 = vadd.f32 %v7503_v11, %v14317_v44 }
 0xd63   :  { %v7588_v20 = vadd.f32 %v7587_v3, %v7559_v4 }
 0xd64   :  { %v7533_v46 = vadd.f32 %v7532_v53, %v7504_v57 }
 0xd65   :  { %v7661_v19 = vpack.c.bf16 %v7588_v20, %v7586_v17 }
 0xd67   :  { %8035 = vmatmul.bf16.gmra.mxu0 %v7661_v19 }
 0xd68   :  { %v7561_v14 = vpop.f32.mrf.mxu2  ;;  %v7590_v40 = vpop.f32.mrf.mxu3 }
 0xd69   :  { %v7505_v23 = vpop.f32.mrf.mxu0  ;;  %v7534_v62 = vpop.f32.mrf.mxu1  ;;  %v7562_v55 = vadd.f32 %v7561_v14, %v14322_v8 }
 0xd6a   :  { %v7506_v15 = vadd.f32 %v7505_v23, %v14317_v44 }
 0xd6b   :  { %v7591_v54 = vadd.f32 %v7590_v40, %v7562_v55 }
 0xd6c   :  { %v7535_v5 = vadd.f32 %v7534_v62, %v7506_v15 }
 0xd6e   :  { %v7662_v16 = vpack.c.bf16 %v7535_v5, %v7533_v46 }
 0xd70   :  { %v7563_v48 = vpop.f32.mrf.mxu2  ;;  %v7592_v63 = vpop.f32.mrf.mxu3  ;;  %8011 = vmatmul.bf16.gmra.mxu3 %v7662_v16 }
 0xd71   :  { %v7564_v43 = vadd.f32 %v7563_v48, %v14322_v8  ;;  %v7508_v6 = vpop.f32.mrf.mxu0  ;;  %v7537_v24 = vpop.f32.mrf.mxu1 }
 0xd72   :  { %v7509_v13 = vadd.f32 %v7508_v6, %v14317_v44 }
 0xd73   :  { %v7593_v37 = vadd.f32 %v7592_v63, %v7564_v43 }
 0xd74   :  { %v7538_v61 = vadd.f32 %v7537_v24, %v7509_v13 }
 0xd75   :  { %v7663_v0 = vpack.c.bf16 %v7593_v37, %v7591_v54 }
 0xd77   :  { %8040 = vmatmul.bf16.gmra.mxu0 %v7663_v0 }
 0xd78   :  { %v7566_v32 = vpop.f32.mrf.mxu2  ;;  %v7595_v39 = vpop.f32.mrf.mxu3 }
 0xd79   :  { %v7510_v34 = vpop.f32.mrf.mxu0  ;;  %v7539_v35 = vpop.f32.mrf.mxu1  ;;  %v7567_v58 = vadd.f32 %v7566_v32, %v14322_v8 }
 0xd7a   :  { %v7511_v30 = vadd.f32 %v7510_v34, %v14317_v44 }
 0xd7b   :  { %v7596_v22 = vadd.f32 %v7595_v39, %v7567_v58 }
 0xd7c   :  { %v7540_v2 = vadd.f32 %v7539_v35, %v7511_v30 }
 0xd7e   :  { %v7664_v31 = vpack.c.bf16 %v7540_v2, %v7538_v61 }
 0xd80   :  { %v7568_v42 = vpop.f32.mrf.mxu2  ;;  %8016 = vmatmul.bf16.gmra.mxu3 %v7664_v31  ;;  %v7597_v47 = vpop.f32.mrf.mxu3 }
 0xd81   :  { %v7569_v9 = vadd.f32 %v7568_v42, %v14322_v8  ;;  %v7609_v10 = vpop.f32.mrf.mxu0  ;;  %v7638_v1 = vpop.f32.mrf.mxu1  ;;  %v11048_v42 = vld [vmem:[%s14608_s6 + $0x38] sm:$0xff] }
 0xd82   :  { %v7610_v33 = vadd.f32 %v7609_v10, %v14337_v56  ;;  %8171 = vmatpush.bf16.msra.mxu1 %v11048_v42 }
 0xd83   :  { %v7598_v41 = vadd.f32 %v7597_v47, %v7569_v9  ;;  %v11047_v47 = vld [vmem:[%s14608_s6 + $0x30] sm:$0xff] }
 0xd84   :  { %v7639_v44 = vadd.f32 %v7638_v1, %v7610_v33 }
 0xd85   :  { %v7665_v28 = vpack.c.bf16 %v7598_v41, %v7596_v22 }
 0xd86   :  { %v10429_v45 = vmul.f32 -1.442695, %v7639_v44  ;;  %8172 = vmatpush.bf16.msra.mxu1 %v11047_v47 }
 0xd87   :  { %8045 = vmatmul.bf16.gmra.mxu0 %v7665_v28 }
 0xd88   :  { %11098 = vpow2.f32 %v10429_v45 }
 0xd89   :  { %v7611_v7 = vpop.f32.mrf.mxu0  ;;  %v7640_v29 = vpop.f32.mrf.mxu1 }
 0xd8a   :  { %v7612_v38 = vadd.f32 %v7611_v7, %v14337_v56 }
 0xd8c   :  { %v7641_v25 = vadd.f32 %v7640_v29, %v7612_v38 }
 0xd8e   :  { %v11099_v59 = vpop.eup %11098  ;;  %v10430_v49 = vmul.f32 -1.442695, %v7641_v25 }
 0xd8f   :  { %v7690_v8 = vadd.f32 1.0, %v11099_v59 }
 0xd90   :  { %11100 = vpow2.f32 %v10430_v49 }
 0xd91   :  { %11102 = vrcp.f32 %v7690_v8  ;;  %v7614_v18 = vpop.f32.mrf.mxu0  ;;  %v7643_v36 = vpop.f32.mrf.mxu1  ;;  %v7709_v53 = vand.u32 2147483648, %v7690_v8  ;;  %v7707_v19 = vand.u32 2147483647, %v7690_v8  ;;  %vm7703_vm14 = vweird.f32 %v7690_v8 }
 0xd92   :  { %v7615_v26 = vadd.f32 %v7614_v18, %v14337_v56 }
 0xd93   :  { %v7710_v15 = vor.u32 1.1754944e-38, %v7709_v53  ;;  %vm7708_vm7 = vcmp.eq.f32.partialorder %v7707_v19, 8.507059e+37 }
 0xd94   :  { %v7644_v52 = vadd.f32 %v7643_v36, %v7615_v26 }
 0xd96   :  { %v11101_v21 = vpop.eup %11100  ;;  %v10431_v12 = vmul.f32 -1.442695, %v7644_v52 }
 0xd97   :  { %v11103_v60 = vpop.eup %11102  ;;  %v7691_v27 = vadd.f32 1.0, %v11101_v21 }
 0xd98   :  { %11104 = vpow2.f32 %v10431_v12  ;;  %v7699_v51 = vmul.f32 %v11103_v60, %v7690_v8  ;;  %vm7704_vm5 = vweird.f32 %v11103_v60 }
 0xd99   :  { %11106 = vrcp.f32 %v7691_v27  ;;  %v7616_v50 = vpop.f32.mrf.mxu0  ;;  %v7645_v3 = vpop.f32.mrf.mxu1  ;;  %vm7705_vm4 = vmor %vm7703_vm14, %vm7704_vm5  ;;  %v7724_v6 = vand.u32 2147483648, %v7691_v27  ;;  %v7722_v37 = vand.u32 2147483647, %v7691_v27  ;;  %vm7718_vm9 = vweird.f32 %v7691_v27 }
 0xd9a   :  { %v7617_v4 = vadd.f32 %v7616_v50, %v14337_v56  ;;  %v7700_v11 = vsub.f32 1.0, %v7699_v51 }
 0xd9b   :  { %v7725_v35 = vor.u32 1.1754944e-38, %v7724_v6  ;;  %vm7723_vm11 = vcmp.eq.f32.partialorder %v7722_v37, 8.507059e+37  ;;  %v11041_v6 = vld [vmem:[%s14608_s6] sm:$0xff] }
 0xd9c   :  { %v7646_v17 = vadd.f32 %v7645_v3, %v7617_v4  ;;  %v7701_v20 = vmul.f32 %v11103_v60, %v7700_v11 }
 0xd9e   :  { %v11105_v57 = vpop.eup %11104  ;;  %v10432_v14 = vmul.f32 -1.442695, %v7646_v17  ;;  %v7702_v40 = vadd.f32 %v11103_v60, %v7701_v20 }
 0xd9f   :  { %v11107_v23 = vpop.eup %11106  ;;  %v7692_v62 = vadd.f32 1.0, %v11105_v57 }
 0xda0   :  { %11108 = vpow2.f32 %v10432_v14  ;;  %v7706_v46 = vsel %vm7705_vm4, %v11103_v60, %v7702_v40  ;;  %v7714_v5 = vmul.f32 %v11107_v23, %v7691_v27  ;;  %vm7719_vm8 = vweird.f32 %v11107_v23 }
 0xda1   :  { %11110 = vrcp.f32 %v7692_v62  ;;  %v7619_v16 = vpop.f32.mrf.mxu0  ;;  %v7648_v55 = vpop.f32.mrf.mxu1  ;;  %v7711_v48 = vsel %vm7708_vm7, %v7710_v15, %v7706_v46  ;;  %vm7720_vm10 = vmor %vm7718_vm9, %vm7719_vm8  ;;  %v7739_v1 = vand.u32 2147483648, %v7692_v62  ;;  %v7737_v41 = vand.u32 2147483647, %v7692_v62 }
 0xda2   :  { %v7620_v63 = vadd.f32 %v7619_v16, %v14337_v56  ;;  %8451 = vrot.lane.b32.xlu2 %v7711_v48, %s11545_s19  ;;  %v7715_v43 = vsub.f32 1.0, %v7714_v5  ;;  %vm7733_vm13 = vweird.f32 %v7692_v62  ;;  %v7877_v16 = vpop.f32.mrf.mxu2  ;;  %v11043_v48 = vld [vmem:[%s14608_s6 + $0x10] sm:$0xff] }
 0xda3   :  { %v7740_v29 = vor.u32 1.1754944e-38, %v7739_v1  ;;  %vm7738_vm15 = vcmp.eq.f32.partialorder %v7737_v41, 8.507059e+37 }
 0xda4   :  { %v7649_v24 = vadd.f32 %v7648_v55, %v7620_v63  ;;  %v7716_v54 = vmul.f32 %v11107_v23, %v7715_v43  ;;  %v11044_v55 = vld [vmem:[%s14608_s6 + $0x18] sm:$0xff]  ;;  %v11042_v63 = vld [vmem:[%s14608_s6 + $0x8] sm:$0xff] }
 0xda6   :  { %v11109_v0 = vpop.eup %11108  ;;  %v10433_v13 = vmul.f32 -1.442695, %v7649_v24  ;;  %v7717_v32 = vadd.f32 %v11107_v23, %v7716_v54 }
 0xda7   :  { %v11111_v39 = vpop.eup %11110  ;;  %v7693_v34 = vadd.f32 1.0, %v11109_v0 }
 0xda8   :  { %11112 = vpow2.f32 %v10433_v13  ;;  %v7721_v30 = vsel %vm7720_vm10, %v11107_v23, %v7717_v32  ;;  %v7729_v61 = vmul.f32 %v11111_v39, %v7692_v62  ;;  %vm7734_vm12 = vweird.f32 %v11111_v39  ;;  %v11046_v62 = vld [vmem:[%s14608_s6 + $0x28] sm:$0xff] }
 0xda9   :  { %11114 = vrcp.f32 %v7693_v34  ;;  %v7621_v2 = vpop.f32.mrf.mxu0  ;;  %v7650_v31 = vpop.f32.mrf.mxu1  ;;  %v7726_v58 = vsel %vm7723_vm11, %v7725_v35, %v7721_v30  ;;  %vm7735_vm6 = vmor %vm7733_vm13, %vm7734_vm12  ;;  %v7754_v26 = vand.u32 2147483648, %v7693_v34  ;;  %v7752_v12 = vand.u32 2147483647, %v7693_v34  ;;  %8173 = vmatpush.bf16.msra.mxu1 %v11046_v62  ;;  %v8051_v13 = vld [vmem:[#allocation4 + $0x48] ss:$0 sm:$0xff] }
 0xdaa   :  { %v7622_v9 = vadd.f32 %v7621_v2, %v14337_v56  ;;  %8453 = vrot.lane.b32.xlu0 %v7726_v58, %s11545_s19  ;;  %v7730_v10 = vsub.f32 1.0, %v7729_v61  ;;  %vm7748_vm1 = vweird.f32 %v7693_v34  ;;  %v7879_v43 = vpop.f32.mrf.mxu2 }
 0xdab   :  { %v7755_v51 = vor.u32 1.1754944e-38, %v7754_v26  ;;  %vm7753_vm3 = vcmp.eq.f32.partialorder %v7752_v12, 8.507059e+37 }
 0xdac   :  { %v14355_v33 = vadd.f32 %v7650_v31, %v7622_v9  ;;  %v7731_v22 = vmul.f32 %v11111_v39, %v7730_v10 }
 0xdae   :  { %v11113_v44 = vpop.eup %11112  ;;  %v7732_v28 = vadd.f32 %v11111_v39, %v7731_v22 }
 0xdaf   :  { %v11115_v45 = vpop.eup %11114  ;;  %v7694_v7 = vadd.f32 1.0, %v11113_v44 }
 0xdb0   :  { %v7736_v38 = vsel %vm7735_vm6, %v11111_v39, %v7732_v28  ;;  %v7744_v25 = vmul.f32 %v11115_v45, %v7693_v34  ;;  %vm7749_vm0 = vweird.f32 %v11115_v45  ;;  %v8060_v34 = vpack.c.bf16 %v8051_v13, %v8051_v13 }
 0xdb1   :  { %11116 = vrcp.f32 %v7694_v7  ;;  %v7624_v59 = vpop.f32.mrf.mxu0  ;;  %v7653_v49 = vpop.f32.mrf.mxu1  ;;  %v7741_v8 = vsel %vm7738_vm15, %v7740_v29, %v7736_v38  ;;  %vm7750_vm2 = vmor %vm7748_vm1, %vm7749_vm0  ;;  %v7769_v19 = vand.u32 2147483648, %v7694_v7  ;;  %v7767_v40 = vand.u32 2147483647, %v7694_v7 }
 0xdb2   :  { %v7625_v18 = vadd.f32 %v7624_v59, %v14337_v56  ;;  %8455 = vrot.lane.b32.xlu1 %v7741_v8, %s11545_s19  ;;  %v7745_v36 = vsub.f32 1.0, %v7744_v25  ;;  %vm7763_vm14 = vweird.f32 %v7694_v7  ;;  %v7882_v32 = vpop.f32.mrf.mxu2  ;;  %v14384_v31 = vunpack.c.l.bf16 %v8060_v34 }
 0xdb3   :  { %v7770_v15 = vor.u32 1.1754944e-38, %v7769_v19  ;;  %vm7768_vm7 = vcmp.eq.f32.partialorder %v7767_v40, 8.507059e+37 }
 0xdb4   :  { %v14359_v52 = vadd.f32 %v7653_v49, %v7625_v18  ;;  %v7746_v21 = vmul.f32 %v11115_v45, %v7745_v36 }
 0xdb6   :  { %v7747_v60 = vadd.f32 %v11115_v45, %v7746_v21 }
 0xdb7   :  { %v11117_v27 = vpop.eup %11116 }
 0xdb8   :  { %v7751_v50 = vsel %vm7750_vm2, %v11115_v45, %v7747_v60  ;;  %v7759_v3 = vmul.f32 %v11117_v27, %v7694_v7  ;;  %vm7764_vm5 = vweird.f32 %v11117_v27 }
 0xdb9   :  { %v7626_v4 = vpop.f32.mrf.mxu0  ;;  %v7756_v11 = vsel %vm7753_vm3, %v7755_v51, %v7751_v50  ;;  %v7655_v20 = vpop.f32.mrf.mxu1  ;;  %vm7765_vm4 = vmor %vm7763_vm14, %vm7764_vm5 }
 0xdba   :  { %v7627_v53 = vadd.f32 %v7626_v4, %v14337_v56  ;;  %8457 = vrot.lane.b32.xlu2 %v7756_v11, %s11545_s19  ;;  %v7760_v17 = vsub.f32 1.0, %v7759_v3  ;;  %v11045_v56 = vld [vmem:[%s14608_s6 + $0x20] sm:$0xff]  ;;  %v7884_v1 = vpop.f32.mrf.mxu2 }
 0xdbb   :  { %8174 = vmatpush.bf16.msra.mxu1 %v11045_v56 }
 0xdbc   :  { %v14363_v57 = vadd.f32 %v7655_v20, %v7627_v53  ;;  %v7761_v14 = vmul.f32 %v11117_v27, %v7760_v17 }
 0xdbe   :  { %v7762_v23 = vadd.f32 %v11117_v27, %v7761_v14 }
 0xdbf   :  { %8175 = vmatpush.bf16.msra.mxu1 %v11044_v55 }
 0xdc0   :  { %v7766_v46 = vsel %vm7765_vm4, %v11117_v27, %v7762_v23 }
 0xdc1   :  { %v7771_v5 = vsel %vm7768_vm7, %v7770_v15, %v7766_v46 }
 0xdc2   :  { %8459 = vrot.lane.b32.xlu0 %v7771_v5, %s11545_s19  ;;  %v7887_v8 = vpop.f32.mrf.mxu2 }
 0xdc3   :  { %8176 = vmatpush.bf16.msra.mxu1 %v11043_v48 }
 0xdc7   :  { %8177 = vmatpush.bf16.msra.mxu1 %v11042_v63 }
 0xdca   :  { %v7889_v53 = vpop.f32.mrf.mxu2 }
 0xdcb   :  { %8178 = vmatpush.bf16.msra.mxu1 %v11041_v6 }
 0xdd2   :  { %v7892_v46 = vpop.f32.mrf.mxu2 }
 0xdd3   :  { %v8002_v24 = vpop.f32.mrf.mxu3 }
 0xdd4   :  { %v8003_v54 = vadd.f32 %v8002_v24, %v7877_v16  ;;  %v8031_v37 = vpop.f32.mrf.mxu0 }
 0xdd6   :  { %v8032_v0 = vadd.f32 %v8031_v37, %v8003_v54 }
 0xdd8   :  { %v8052_v39 = vpack.c.bf16 %v8032_v0, %v8032_v0 }
 0xdda   :  { %v8061_v2 = vunpack.c.l.bf16 %v8052_v39  ;;  %v7894_v0 = vpop.f32.mrf.mxu2 }
 0xddb   :  { %v8004_v35 = vpop.f32.mrf.mxu3 }
 0xddc   :  { %v8005_v30 = vadd.f32 %v8004_v35, %v7879_v43  ;;  %v8033_v61 = vpop.f32.mrf.mxu0  ;;  %v8070_v9 = vadd.f32 %v14384_v31, %v8061_v2 }
 0xdde   :  { %v8034_v58 = vadd.f32 %v8033_v61, %v8005_v30  ;;  %v8094_v28 = vmax.f32 %v8070_v9, 0.0 }
 0xde0   :  { %v8053_v42 = vpack.c.bf16 %v8034_v58, %v8034_v58 }
 0xde2   :  { %v8062_v10 = vunpack.c.l.bf16 %v8053_v42 }
 0xde3   :  { %v8007_v47 = vpop.f32.mrf.mxu3 }
 0xde4   :  { %v8071_v22 = vadd.f32 %v14384_v31, %v8062_v10  ;;  %v8008_v41 = vadd.f32 %v8007_v47, %v7882_v32  ;;  %v8036_v44 = vpop.f32.mrf.mxu0 }
 0xde6   :  { %v8095_v45 = vmax.f32 %v8071_v22, 0.0  ;;  %v8037_v7 = vadd.f32 %v8036_v44, %v8008_v41 }
 0xde8   :  { %v8102_v29 = vpack.c.bf16 %v8095_v45, %v8094_v28  ;;  %v8054_v38 = vpack.c.bf16 %v8037_v7, %v8037_v7 }
 0xdea   :  { %8179 = vmatmul.bf16.vlgmr.msra.gmra.mxu1 %v8102_v29  ;;  %v8063_v18 = vunpack.c.l.bf16 %v8054_v38 }
 0xdeb   :  { %v8009_v25 = vpop.f32.mrf.mxu3 }
 0xdec   :  { %v8010_v59 = vadd.f32 %v8009_v25, %v7884_v1  ;;  %v8038_v49 = vpop.f32.mrf.mxu0  ;;  %v8072_v21 = vadd.f32 %v14384_v31, %v8063_v18  ;;  %v14394_v1 = vld [vmem:[#allocation4 + $0x49] ss:$0 sm:$0xff] }
 0xdee   :  { %v8039_v36 = vadd.f32 %v8038_v49, %v8010_v59  ;;  %v8096_v3 = vmax.f32 %v8072_v21, 0.0 }
 0xdf0   :  { %v8055_v26 = vpack.c.bf16 %v8039_v36, %v8039_v36 }
 0xdf2   :  { %v8064_v12 = vunpack.c.l.bf16 %v8055_v26 }
 0xdf3   :  { %v8012_v60 = vpop.f32.mrf.mxu3 }
 0xdf4   :  { %v8073_v27 = vadd.f32 %v14384_v31, %v8064_v12  ;;  %v8013_v51 = vadd.f32 %v8012_v60, %v7887_v8  ;;  %v8041_v50 = vpop.f32.mrf.mxu0 }
 0xdf6   :  { %v8097_v4 = vmax.f32 %v8073_v27, 0.0  ;;  %v8042_v11 = vadd.f32 %v8041_v50, %v8013_v51 }
 0xdf8   :  { %v8103_v17 = vpack.c.bf16 %v8097_v4, %v8096_v3  ;;  %v8056_v20 = vpack.c.bf16 %v8042_v11, %v8042_v11 }
 0xdfa   :  { %8184 = vmatmul.bf16.gmra.mxu1 %v8103_v17  ;;  %v8065_v23 = vunpack.c.l.bf16 %v8056_v20 }
 0xdfb   :  { %v8014_v19 = vpop.f32.mrf.mxu3 }
 0xdfc   :  { %v8015_v14 = vadd.f32 %v8014_v19, %v7889_v53  ;;  %v8043_v40 = vpop.f32.mrf.mxu0  ;;  %v8074_v56 = vadd.f32 %v14384_v31, %v8065_v23 }
 0xdfe   :  { %v8044_v62 = vadd.f32 %v8043_v40, %v8015_v14  ;;  %v8098_v43 = vmax.f32 %v8074_v56, 0.0  ;;  %v10435_v40 = vmul.f32 -1.442695, %v14359_v52 }
 0xe00   :  { %v8057_v15 = vpack.c.bf16 %v8044_v62, %v8044_v62 }
 0xe02   :  { %v8066_v5 = vunpack.c.l.bf16 %v8057_v15 }
 0xe03   :  { %v8017_v16 = vpop.f32.mrf.mxu3 }
 0xe04   :  { %v8075_v55 = vadd.f32 %v14384_v31, %v8066_v5  ;;  %v8018_v48 = vadd.f32 %v8017_v16, %v7892_v46  ;;  %v8046_v63 = vpop.f32.mrf.mxu0 }
 0xe06   :  { %v8099_v6 = vmax.f32 %v8075_v55, 0.0  ;;  %v8047_v24 = vadd.f32 %v8046_v63, %v8018_v48 }
 0xe08   :  { %v8104_v54 = vpack.c.bf16 %v8099_v6, %v8098_v43  ;;  %v8058_v37 = vpack.c.bf16 %v8047_v24, %v8047_v24 }
 0xe0a   :  { %8189 = vmatmul.bf16.gmra.mxu1 %v8104_v54  ;;  %v8067_v34 = vunpack.c.l.bf16 %v8058_v37  ;;  %v10436_v37 = vmul.f32 -1.442695, %v14363_v57 }
 0xe0b   :  { %v8019_v13 = vpop.f32.mrf.mxu3 }
 0xe0c   :  { %v8020_v32 = vadd.f32 %v8019_v13, %v7894_v0  ;;  %v8048_v39 = vpop.f32.mrf.mxu0  ;;  %v8076_v61 = vadd.f32 %v14384_v31, %v8067_v34 }
 0xe0e   :  { %v8049_v35 = vadd.f32 %v8048_v39, %v8020_v32  ;;  %v8100_v42 = vmax.f32 %v8076_v61, 0.0 }
 0xe10   :  { %v8059_v30 = vpack.c.bf16 %v8049_v35, %v8049_v35 }
 0xe12   :  { %v8068_v2 = vunpack.c.l.bf16 %v8059_v30 }
 0xe14   :  { %v8077_v58 = vadd.f32 %v14384_v31, %v8068_v2 }
 0xe16   :  { %v8101_v9 = vmax.f32 %v8077_v58, 0.0 }
 0xe18   :  { %v8105_v10 = vpack.c.bf16 %v8101_v9, %v8100_v42 }
 0xe1a   :  { %8194 = vmatmul.bf16.gmra.mxu1 %v8105_v10 }
 0xe67   :  { %v8180_v47 = vpop.f32.mrf.mxu1 }
 0xe68   :  { %v8181_v22 = vadd.f32 %v8180_v47, %v14394_v1 }
 0xe6a   :  { %v10545_v41 = vmul.f32 -1.442695, %v8181_v22 }
 0xe6c   :  { %11118 = vpow2.f32 %v10545_v41  ;;  %v10434_v41 = vmul.f32 -1.442695, %v14355_v33 }
 0xe6f   :  { %v8182_v44 = vpop.f32.mrf.mxu1 }
 0xe70   :  { %v8183_v28 = vadd.f32 %v8182_v44, %v14394_v1 }
 0xe72   :  { %v11119_v45 = vpop.eup %11118  ;;  %v10546_v7 = vmul.f32 -1.442695, %v8183_v28 }
 0xe73   :  { %v8224_v29 = vadd.f32 1.0, %v11119_v45 }
 0xe74   :  { %11120 = vpow2.f32 %v10546_v7 }
 0xe75   :  { %11122 = vrcp.f32 %v8224_v29  ;;  %v8243_v21 = vand.u32 2147483648, %v8224_v29  ;;  %v8241_v27 = vand.u32 2147483647, %v8224_v29  ;;  %vm8237_vm9 = vweird.f32 %v8224_v29 }
 0xe77   :  { %v8185_v31 = vpop.f32.mrf.mxu1  ;;  %v8244_v53 = vor.u32 1.1754944e-38, %v8243_v21  ;;  %vm8242_vm11 = vcmp.eq.f32.partialorder %v8241_v27, 8.507059e+37 }
 0xe78   :  { %v8186_v38 = vadd.f32 %v8185_v31, %v14394_v1 }
 0xe7a   :  { %v11121_v25 = vpop.eup %11120  ;;  %v10547_v59 = vmul.f32 -1.442695, %v8186_v38 }
 0xe7b   :  { %v11123_v49 = vpop.eup %11122  ;;  %v8225_v8 = vadd.f32 1.0, %v11121_v25 }
 0xe7c   :  { %11124 = vpow2.f32 %v10547_v59  ;;  %v8233_v18 = vmul.f32 %v11123_v49, %v8224_v29  ;;  %vm8238_vm8 = vweird.f32 %v11123_v49 }
 0xe7d   :  { %11126 = vrcp.f32 %v8225_v8  ;;  %vm8239_vm10 = vmor %vm8237_vm9, %vm8238_vm8  ;;  %v8258_v62 = vand.u32 2147483648, %v8225_v8  ;;  %v8256_v56 = vand.u32 2147483647, %v8225_v8  ;;  %vm8252_vm13 = vweird.f32 %v8225_v8 }
 0xe7e   :  { %v8234_v36 = vsub.f32 1.0, %v8233_v18 }
 0xe7f   :  { %v8187_v26 = vpop.f32.mrf.mxu1  ;;  %v8259_v43 = vor.u32 1.1754944e-38, %v8258_v62  ;;  %vm8257_vm15 = vcmp.eq.f32.partialorder %v8256_v56, 8.507059e+37 }
 0xe80   :  { %v8188_v12 = vadd.f32 %v8187_v26, %v14394_v1  ;;  %v8235_v60 = vmul.f32 %v11123_v49, %v8234_v36 }
 0xe82   :  { %v11125_v51 = vpop.eup %11124  ;;  %v10548_v50 = vmul.f32 -1.442695, %v8188_v12  ;;  %v8236_v3 = vadd.f32 %v11123_v49, %v8235_v60 }
 0xe83   :  { %v11127_v4 = vpop.eup %11126  ;;  %v8226_v11 = vadd.f32 1.0, %v11125_v51 }
 0xe84   :  { %11128 = vpow2.f32 %v10548_v50  ;;  %v8240_v17 = vsel %vm8239_vm10, %v11123_v49, %v8236_v3  ;;  %v8248_v20 = vmul.f32 %v11127_v4, %v8225_v8  ;;  %vm8253_vm12 = vweird.f32 %v11127_v4 }
 0xe85   :  { %11130 = vrcp.f32 %v8226_v11  ;;  %v8245_v19 = vsel %vm8242_vm11, %v8244_v53, %v8240_v17  ;;  %vm8254_vm6 = vmor %vm8252_vm13, %vm8253_vm12  ;;  %v8273_v13 = vand.u32 2147483648, %v8226_v11  ;;  %v8271_v34 = vand.u32 2147483647, %v8226_v11 }
 0xe86   :  { %8410 = vrot.lane.b32.xlu0 %v8245_v19, %s11531_s29  ;;  %v8249_v14 = vsub.f32 1.0, %v8248_v20  ;;  %11132 = vpow2.f32 %v10435_v40  ;;  %vm8267_vm1 = vweird.f32 %v8226_v11 }
 0xe87   :  { %v8190_v23 = vpop.f32.mrf.mxu1  ;;  %v8274_v9 = vor.u32 1.1754944e-38, %v8273_v13  ;;  %vm8272_vm3 = vcmp.eq.f32.partialorder %v8271_v34, 8.507059e+37 }
 0xe88   :  { %v8191_v15 = vadd.f32 %v8190_v23, %v14394_v1  ;;  %v8250_v46 = vmul.f32 %v11127_v4, %v8249_v14 }
 0xe8a   :  { %v11129_v5 = vpop.eup %11128  ;;  %v10549_v16 = vmul.f32 -1.442695, %v8191_v15  ;;  %v8251_v55 = vadd.f32 %v11127_v4, %v8250_v46 }
 0xe8b   :  { %v11131_v48 = vpop.eup %11130  ;;  %v8227_v63 = vadd.f32 1.0, %v11129_v5 }
 0xe8c   :  { %11134 = vpow2.f32 %v10549_v16  ;;  %v8255_v6 = vsel %vm8254_vm6, %v11127_v4, %v8251_v55  ;;  %v8263_v52 = vmul.f32 %v11131_v48, %v8226_v11  ;;  %vm8268_vm0 = vweird.f32 %v11131_v48  ;;  %v11133_v35 = vpop.eup %11132 }
 0xe8d   :  { %11136 = vrcp.f32 %v8227_v63  ;;  %v8260_v24 = vsel %vm8257_vm15, %v8259_v43, %v8255_v6  ;;  %vm8269_vm2 = vmor %vm8267_vm1, %vm8268_vm0  ;;  %v14406_v47 = vadd.f32 1.0, %v11133_v35  ;;  %v8288_v45 = vand.u32 2147483648, %v8227_v63 }
 0xe8e   :  { %8412 = vrot.lane.b32.xlu1 %v8260_v24, %s11531_s29  ;;  %v8264_v54 = vsub.f32 1.0, %v8263_v52  ;;  %11138 = vpow2.f32 %v10436_v37  ;;  %v8286_v31 = vand.u32 2147483647, %v8227_v63  ;;  %vm8282_vm14 = vweird.f32 %v8227_v63 }
 0xe8f   :  { %v8192_v0 = vpop.f32.mrf.mxu1  ;;  %v8289_v18 = vor.u32 1.1754944e-38, %v8288_v45  ;;  %vm7793_vm1 = vweird.f32 %v14406_v47 }
 0xe90   :  { %v8193_v32 = vadd.f32 %v8192_v0, %v14394_v1  ;;  %v8265_v39 = vmul.f32 %v11131_v48, %v8264_v54  ;;  %vm8287_vm7 = vcmp.eq.f32.partialorder %v8286_v31, 8.507059e+37 }
 0xe92   :  { %v11135_v30 = vpop.eup %11134  ;;  %v10550_v61 = vmul.f32 -1.442695, %v8193_v32  ;;  %v8266_v2 = vadd.f32 %v11131_v48, %v8265_v39 }
 0xe93   :  { %v11137_v58 = vpop.eup %11136  ;;  %v8228_v42 = vadd.f32 1.0, %v11135_v30 }
 0xe94   :  { %11140 = vpow2.f32 %v10550_v61  ;;  %v8270_v10 = vsel %vm8269_vm2, %v11131_v48, %v8266_v2  ;;  %v8278_v57 = vmul.f32 %v11137_v58, %v8227_v63  ;;  %vm8283_vm5 = vweird.f32 %v11137_v58  ;;  %v11139_v38 = vpop.eup %11138 }
 0xe95   :  { %11142 = vrcp.f32 %v8228_v42  ;;  %v8275_v22 = vsel %vm8272_vm3, %v8274_v9, %v8270_v10  ;;  %vm8284_vm4 = vmor %vm8282_vm14, %vm8283_vm5  ;;  %v14412_v21 = vadd.f32 1.0, %v11139_v38  ;;  %v8303_v50 = vand.u32 2147483648, %v8228_v42 }
 0xe96   :  { %8414 = vrot.lane.b32.xlu2 %v8275_v22, %s11531_s29  ;;  %v8279_v44 = vsub.f32 1.0, %v8278_v57  ;;  %11144 = vrcp.f32 %v14406_v47  ;;  %v8301_v53 = vand.u32 2147483647, %v8228_v42  ;;  %vm8297_vm9 = vweird.f32 %v8228_v42 }
 0xe97   :  { %v8195_v28 = vpop.f32.mrf.mxu1  ;;  %11146 = vpow2.f32 %v10434_v41  ;;  %v8304_v15 = vor.u32 1.1754944e-38, %v8303_v50  ;;  %v7797_v9 = vand.u32 2147483647, %v14406_v47 }
 0xe98   :  { %v8196_v7 = vadd.f32 %v8195_v28, %v14394_v1  ;;  %v8280_v29 = vmul.f32 %v11137_v58, %v8279_v44  ;;  %vm8302_vm11 = vcmp.eq.f32.partialorder %v8301_v53, 8.507059e+37 }
 0xe9a   :  { %v11141_v25 = vpop.eup %11140  ;;  %v10551_v59 = vmul.f32 -1.442695, %v8196_v7  ;;  %v8281_v49 = vadd.f32 %v11137_v58, %v8280_v29 }
 0xe9b   :  { %v11143_v8 = vpop.eup %11142  ;;  %v8229_v33 = vadd.f32 1.0, %v11141_v25 }
 0xe9c   :  { %11148 = vpow2.f32 %v10551_v59  ;;  %v8285_v36 = vsel %vm8284_vm4, %v11137_v58, %v8281_v49  ;;  %v8293_v26 = vmul.f32 %v11143_v8, %v8228_v42  ;;  %v14415_v27 = vpop.eup %11144  ;;  %vm8298_vm8 = vweird.f32 %v11143_v8 }
 0xe9d   :  { %11150 = vrcp.f32 %v8229_v33  ;;  %v8290_v12 = vsel %vm8287_vm7, %v8289_v18, %v8285_v36  ;;  %v11147_v3 = vpop.eup %11146  ;;  %v7789_v14 = vmul.f32 %v14415_v27, %v14406_v47  ;;  %vm8299_vm10 = vmor %vm8297_vm9, %vm8298_vm8  ;;  %v8318_v48 = vand.u32 2147483648, %v8229_v33 }
 0xe9e   :  { %8416 = vrot.lane.b32.xlu0 %v8290_v12, %s11531_s29  ;;  %v8294_v60 = vsub.f32 1.0, %v8293_v26  ;;  %11152 = vrcp.f32 %v14412_v21  ;;  %v14421_v23 = vadd.f32 1.0, %v11147_v3  ;;  %v8316_v43 = vand.u32 2147483647, %v8229_v33 }
 0xe9f   :  { %v8197_v51 = vpop.f32.mrf.mxu1  ;;  %v7790_v16 = vsub.f32 1.0, %v7789_v14  ;;  %vm8312_vm13 = vweird.f32 %v8229_v33  ;;  %v8319_v13 = vor.u32 1.1754944e-38, %v8318_v48  ;;  %vm7794_vm0 = vweird.f32 %v14415_v27 }
 0xea0   :  { %v8198_v4 = vadd.f32 %v8197_v51, %v14394_v1  ;;  %v8295_v11 = vmul.f32 %v11143_v8, %v8294_v60  ;;  %vm8317_vm15 = vcmp.eq.f32.partialorder %v8316_v43, 8.507059e+37  ;;  %v7799_v58 = vand.u32 2147483648, %v14406_v47  ;;  %vm7795_vm3 = vmor %vm7793_vm1, %vm7794_vm0 }
 0xea1   :  { %v7791_v24 = vmul.f32 %v14415_v27, %v7790_v16  ;;  %vm7798_vm4 = vcmp.eq.f32.partialorder %v7797_v9, 8.507059e+37  ;;  %vm7808_vm9 = vweird.f32 %v14412_v21  ;;  %v7814_v18 = vand.u32 2147483648, %v14412_v21 }
 0xea2   :  { %v11149_v17 = vpop.eup %11148  ;;  %v10552_v20 = vmul.f32 -1.442695, %v8198_v4  ;;  %v8296_v19 = vadd.f32 %v11143_v8, %v8295_v11  ;;  %v7800_v7 = vor.u32 1.1754944e-38, %v7799_v58  ;;  %v7812_v12 = vand.u32 2147483647, %v14412_v21 }
 0xea3   :  { %v11151_v40 = vpop.eup %11150  ;;  %v8230_v62 = vadd.f32 1.0, %v11149_v17  ;;  %v7792_v30 = vadd.f32 %v14415_v27, %v7791_v24  ;;  %v7815_v3 = vor.u32 1.1754944e-38, %v7814_v18  ;;  %v7784_v17 = vand.u32 2147483648, %v14421_v23 }
 0xea4   :  { %11154 = vpow2.f32 %v10552_v20  ;;  %v8300_v1 = vsel %vm8299_vm10, %v11143_v8, %v8296_v19  ;;  %v8308_v46 = vmul.f32 %v11151_v40, %v8229_v33  ;;  %v14424_v55 = vpop.eup %11152  ;;  %vm8313_vm12 = vweird.f32 %v11151_v40 }
 0xea5   :  { %11156 = vrcp.f32 %v8230_v62  ;;  %v8305_v56 = vsel %vm8302_vm11, %v8304_v15, %v8300_v1  ;;  %v7804_v54 = vmul.f32 %v14424_v55, %v14412_v21  ;;  %vm8314_vm6 = vmor %vm8312_vm13, %vm8313_vm12  ;;  %v8333_v42 = vand.u32 2147483648, %v8230_v62  ;;  %v8454_v1 = vpop.permute.xlu0 %8453 }
 0xea6   :  { %8418 = vrot.lane.b32.xlu1 %v8305_v56, %s11531_s29  ;;  %v8309_v5 = vsub.f32 1.0, %v8308_v46  ;;  %11158 = vrcp.f32 %v14421_v23  ;;  %v8331_v57 = vand.u32 2147483647, %v8230_v62  ;;  %v7796_v41 = vsel %vm7795_vm3, %v14415_v27, %v7792_v30 }
 0xea7   :  { %v7805_v2 = vsub.f32 1.0, %v7804_v54  ;;  %vm8327_vm5 = vweird.f32 %v8230_v62  ;;  %v8334_v29 = vor.u32 1.1754944e-38, %v8333_v42  ;;  %v7801_v38 = vsel %vm7798_vm4, %v7800_v7, %v7796_v41 }
 0xea8   :  { %v8310_v63 = vmul.f32 %v11151_v40, %v8309_v5  ;;  %vm8332_vm7 = vcmp.eq.f32.partialorder %v8331_v57, 8.507059e+37  ;;  %vm7809_vm8 = vweird.f32 %v14424_v55  ;;  %vm7778_vm1 = vweird.f32 %v14421_v23  ;;  %v8456_v5 = vpop.permute.xlu1 %8455 }
 0xea9   :  { %v7806_v28 = vmul.f32 %v14424_v55, %v7805_v2  ;;  %vm7810_vm11 = vmor %vm7808_vm9, %vm7809_vm8  ;;  %v7782_v20 = vand.u32 2147483647, %v14421_v23  ;;  %v7785_v14 = vor.u32 1.1754944e-38, %v7784_v17  ;;  %vm8484_vm4 = vcmask 64560  }
 0xeaa   :  { %v11155_v6 = vpop.eup %11154  ;;  %v8311_v52 = vadd.f32 %v11151_v40, %v8310_v63 }
 0xeab   :  { %v11157_v37 = vpop.eup %11156  ;;  %v8231_v0 = vadd.f32 1.0, %v11155_v6  ;;  %v7807_v49 = vadd.f32 %v14424_v55, %v7806_v28  ;;  %vm7783_vm3 = vcmp.eq.f32.partialorder %v7782_v20, 8.507059e+37 }
 0xeac   :  { %v8315_v32 = vsel %vm8314_vm6, %v11151_v40, %v8311_v52  ;;  %v8323_v39 = vmul.f32 %v11157_v37, %v8230_v62  ;;  %v14430_v35 = vpop.eup %11158  ;;  %vm8328_vm2 = vweird.f32 %v11157_v37  ;;  %v8452_v62 = vpop.permute.xlu2 %8451 }
 0xead   :  { %11160 = vrcp.f32 %v8231_v0  ;;  %v8320_v34 = vsel %vm8317_vm15, %v8319_v13, %v8315_v32  ;;  %v7774_v22 = vmul.f32 %v14430_v35, %v14421_v23  ;;  %vm8329_vm14 = vmor %vm8327_vm5, %vm8328_vm2  ;;  %v8348_v33 = vand.u32 2147483648, %v8231_v0  ;;  %v8460_v46 = vpop.permute.xlu0 %8459 }
 0xeae   :  { %8420 = vrot.lane.b32.xlu2 %v8320_v34, %s11531_s29  ;;  %v8324_v61 = vsub.f32 1.0, %v8323_v39  ;;  %v8346_v26 = vand.u32 2147483647, %v8231_v0  ;;  %vm8342_vm12 = vweird.f32 %v8231_v0  ;;  %v7811_v27 = vsel %vm7810_vm11, %v14424_v55, %v7807_v49 }
 0xeaf   :  { %v7775_v8 = vsub.f32 1.0, %v7774_v22  ;;  %v8349_v50 = vor.u32 1.1754944e-38, %v8348_v33  ;;  %vm7813_vm15 = vcmp.eq.f32.partialorder %v7812_v12, 8.507059e+37  ;;  %vm7779_vm0 = vweird.f32 %v14430_v35 }
 0xeb0   :  { %v8325_v10 = vmul.f32 %v11157_v37, %v8324_v61  ;;  %vm8347_vm6 = vcmp.eq.f32.partialorder %v8346_v26, 8.507059e+37  ;;  %v7816_v53 = vsel %vm7813_vm15, %v7815_v3, %v7811_v27  ;;  %vm7780_vm2 = vmor %vm7778_vm1, %vm7779_vm0  ;;  %vm8434_vm5 = vcmask 39968  }
 0xeb1   :  { %v7776_v51 = vmul.f32 %v14430_v35, %v7775_v8  ;;  %v11546_v23 = vmov 0.0  }
 0xeb2   :  { %v8326_v44 = vadd.f32 %v11157_v37, %v8325_v10 }
 0xeb3   :  { %v11161_v45 = vpop.eup %11160  ;;  %v7777_v21 = vadd.f32 %v14430_v35, %v7776_v51 }
 0xeb4   :  { %v8330_v31 = vsel %vm8329_vm14, %v11157_v37, %v8326_v44  ;;  %v8338_v47 = vmul.f32 %v11161_v45, %v8231_v0  ;;  %vm8343_vm10 = vweird.f32 %v11161_v45  ;;  %v8458_v15 = vpop.permute.xlu2 %8457  ;;  %vm8475_vm14 = vcmask 48168  }
 0xeb5   :  { %v8335_v25 = vsel %vm8332_vm7, %v8334_v29, %v8330_v31  ;;  %vm8344_vm13 = vmor %vm8342_vm12, %vm8343_vm10  ;;  %v7781_v19 = vsel %vm7780_vm2, %v14430_v35, %v7777_v21 }
 0xeb6   :  { %8463 = vrot.lane.b32.xlu2 %v7801_v38, %s11545_s19  ;;  %8422 = vrot.lane.b32.xlu0 %v8335_v25, %s11531_s29  ;;  %v8339_v59 = vsub.f32 1.0, %v8338_v47  ;;  %v7786_v40 = vsel %vm7783_vm3, %v7785_v14, %v7781_v19 }
 0xeb8   :  { %v8340_v36 = vmul.f32 %v11161_v45, %v8339_v59 }
 0xeba   :  { %v8341_v60 = vadd.f32 %v11161_v45, %v8340_v36 }
 0xebc   :  { %v8345_v4 = vsel %vm8344_vm13, %v11161_v45, %v8341_v60 }
 0xebd   :  { %v8350_v11 = vsel %vm8347_vm6, %v8349_v50, %v8345_v4 }
 0xebe   :  { %8424 = vrot.lane.b32.xlu1 %v8350_v11, %s11531_s29  ;;  %8465 = vrot.lane.b32.xlu0 %v7816_v53, %s11545_s19 }
 0xec6   :  { %8461 = vrot.lane.b32.xlu1 %v7786_v40, %s11545_s19 }
 0xef0   :  { %v8415_v56 = vpop.permute.xlu2 %8414 }
 0xef1   :  { %8437 = vst.msk [vmem:[%s14579_s23 + $0x10] sm:$0xff] %vm8434_vm5, %v8415_v56 }
 0xef2   :  { %8478 = vst.msk [vmem:[%s14579_s23 + $0x10] sm:$0xff] %vm8475_vm14, %v8456_v5 }
 0xef3   :  { %8487 = vst.msk [vmem:[%s14579_s23 + $0x10] sm:$0xff] %vm8484_vm4, %v11546_v23 }
 0xef8   :  { %v8411_v16 = vpop.permute.xlu0 %8410 }
 0xef9   :  { %8435 = vst.msk [vmem:[%s14579_s23] sm:$0xff] %vm8434_vm5, %v8411_v16 }
 0xefa   :  { %8476 = vst.msk [vmem:[%s14579_s23] sm:$0xff] %vm8475_vm14, %v8452_v62 }
 0xefb   :  { %8485 = vst.msk [vmem:[%s14579_s23] sm:$0xff] %vm8484_vm4, %v11546_v23 }
 0xf00   :  { %v8413_v55 = vpop.permute.xlu1 %8412 }
 0xf01   :  { %8436 = vst.msk [vmem:[%s14579_s23 + $0x8] sm:$0xff] %vm8434_vm5, %v8413_v55 }
 0xf02   :  { %8477 = vst.msk [vmem:[%s14579_s23 + $0x8] sm:$0xff] %vm8475_vm14, %v8454_v1 }
 0xf03   :  { %8486 = vst.msk [vmem:[%s14579_s23 + $0x8] sm:$0xff] %vm8484_vm4, %v11546_v23 }
 0xf08   :  { %v8421_v48 = vpop.permute.xlu2 %8420 }
 0xf09   :  { %8440 = vst.msk [vmem:[%s14579_s23 + $0x28] sm:$0xff] %vm8434_vm5, %v8421_v48 }
 0xf10   :  { %v8417_v63 = vpop.permute.xlu0 %8416  ;;  %v8464_v52 = vpop.permute.xlu2 %8463 }
 0xf11   :  { %8438 = vst.msk [vmem:[%s14579_s23 + $0x18] sm:$0xff] %vm8434_vm5, %v8417_v63 }
 0xf12   :  { %8479 = vst.msk [vmem:[%s14579_s23 + $0x18] sm:$0xff] %vm8475_vm14, %v8458_v15 }
 0xf13   :  { %8488 = vst.msk [vmem:[%s14579_s23 + $0x18] sm:$0xff] %vm8484_vm4, %v11546_v23 }
 0xf18   :  { %v8419_v43 = vpop.permute.xlu1 %8418 }
 0xf19   :  { %8439 = vst.msk [vmem:[%s14579_s23 + $0x20] sm:$0xff] %vm8434_vm5, %v8419_v43 }
 0xf1a   :  { %8480 = vst.msk [vmem:[%s14579_s23 + $0x20] sm:$0xff] %vm8475_vm14, %v8460_v46 }
 0xf1b   :  { %8489 = vst.msk [vmem:[%s14579_s23 + $0x20] sm:$0xff] %vm8484_vm4, %v11546_v23 }
 0xf28   :  { %v8423_v6 = vpop.permute.xlu0 %8422 }
 0xf29   :  { %8441 = vst.msk [vmem:[%s14579_s23 + $0x30] sm:$0xff] %vm8434_vm5, %v8423_v6 }
 0xf2a   :  { %8482 = vst.msk [vmem:[%s14579_s23 + $0x30] sm:$0xff] %vm8475_vm14, %v8464_v52 }
 0xf2b   :  { %8491 = vst.msk [vmem:[%s14579_s23 + $0x30] sm:$0xff] %vm8484_vm4, %v11546_v23 }
 0xf30   :  { %v8425_v24 = vpop.permute.xlu1 %8424  ;;  %v8466_v54 = vpop.permute.xlu0 %8465 }
 0xf31   :  { %8442 = vst.msk [vmem:[%s14579_s23 + $0x38] sm:$0xff] %vm8434_vm5, %v8425_v24 }
 0xf32   :  { %8483 = vst.msk [vmem:[%s14579_s23 + $0x38] sm:$0xff] %vm8475_vm14, %v8466_v54 }
 0xf33   :  { %8492 = vst.msk [vmem:[%s14579_s23 + $0x38] sm:$0xff] %vm8484_vm4, %v11546_v23 }
 0xf38   :  { %v8462_v37 = vpop.permute.xlu1 %8461 }
 0xf39   :  { %8481 = vst.msk [vmem:[%s14579_s23 + $0x28] sm:$0xff] %vm8475_vm14, %v8462_v37 }
 0xf3a   :  { %8490 = vst.msk [vmem:[%s14579_s23 + $0x28] sm:$0xff] %vm8484_vm4, %v11546_v23 }
 0xf3b   :  { %8497 = vsyncpa [#allocation3], 1 }
 0xf3c   :  { %8498 = vsyncpa [#allocation5], 1 }
 0xf3d   :  { %8499 = vsyncpa [#allocation8], 1 }
 0xf3e   :  { %8500 = vsyncpa [#allocation11], 1 }
 0xf3f   :  { %8501 = vsyncpa [#allocation14], 1 }
 0xf40   :  { %8502 = vsyncpa [#allocation17], 1 }
 0xf41   :  { %8503 = vsyncpa [#allocation20], 1 }
 0xf42   :  { %8504 = vsyncpa [#allocation23], 1 }

</bundles_post_ra>
